<compile_context>
chip_gen: v7x
topology: tpu7x:2x2x1
jax: 0.10.0
libtpu: 0.0.40
codegen_flags: <defaults>
</compile_context>

<pallas_src>
import jax
import jax.numpy as jnp
from jax import lax
from jax.experimental import pallas as pl
from jax.experimental.pallas import tpu as pltpu


# --------------------------------------------------------------------------------------
# Kernel A: transposed conv (parity decomposition, fused taps) + per-channel stat epilogue
# --------------------------------------------------------------------------------------
def _convt_kernel(x_ref, w_ref, pt_ref, pb_ref, b_ref, y_ref, st_ref):
    # x_ref : (1, 1, Cin, TH+1, W+1) input tile + 1-pixel bottom/right zero halo
    # w_ref : (4*Cout, 4*Cin)        fused parity/tap weights (p = dy*2+dx row blocks,
    #                                r = ry*2+rx column blocks)
    # pt/pb : (W, 2*W)               0/1 matrices placing even / odd output columns
    # b_ref : (Cout, 1)              ConvTranspose2d bias
    # y_ref : (1, Cout, TH, 4*W)     pre-BN conv output; memory-identical to NCHW rows
    #                                [2a, 2a+1] of the (N, Cout, 2H, 2W) tensor
    # st_ref: (1, 1, Cout, 2)        per-tile [sum, sum_of_squares] per output channel
    _, _, _, _, wp1 = x_ref.shape
    _, cout, th, _ = y_ref.shape
    w = wp1 - 1
    w2 = 2 * w

    wmat = w_ref[...]
    pt = pt_ref[...]
    pb = pb_ref[...]
    bias = jnp.broadcast_to(b_ref[...], (cout, w2))      # hoisted out of the row loop

    acc1 = jnp.zeros((cout, w2), jnp.float32)
    acc2 = jnp.zeros((cout, w2), jnp.float32)

    for a in range(th):                                  # static unroll over tile rows
        # im2col for the 4 tap offsets -> one fused MXU matmul (K = 4*Cin)
        g = jnp.concatenate(
            [
                x_ref[0, 0, :, a, 0:w],
                x_ref[0, 0, :, a, 1:w + 1],
                x_ref[0, 0, :, a + 1, 0:w],
                x_ref[0, 0, :, a + 1, 1:w + 1],
            ],
            axis=0,
        )                                                # (4*Cin, W)
        ys = jnp.dot(wmat, g, preferred_element_type=jnp.float32)   # (4*Cout, W)

        # column interleave on the MXU: full-width output rows 2a (row0) and 2a+1 (row1)
        row0 = (jnp.dot(ys[0 * cout:1 * cout], pt, preferred_element_type=jnp.float32)
                + jnp.dot(ys[1 * cout:2 * cout], pb, preferred_element_type=jnp.float32)
                + bias)                                  # (Cout, 2W)
        row1 = (jnp.dot(ys[2 * cout:3 * cout], pt, preferred_element_type=jnp.float32)
                + jnp.dot(ys[3 * cout:4 * cout], pb, preferred_element_type=jnp.float32)
                + bias)                                  # (Cout, 2W)

        # row interleave is free: last dim 4W holds [row 2a | row 2a+1] contiguously (NCHW)
        y_ref[0, :, a, 0:w2] = row0
        y_ref[0, :, a, w2:2 * w2] = row1

        acc1 = acc1 + row0 + row1
        acc2 = acc2 + row0 * row0 + row1 * row1

    st_ref[0, 0] = jnp.concatenate(
        [jnp.sum(acc1, axis=1, keepdims=True),
         jnp.sum(acc2, axis=1, keepdims=True)],
        axis=1,
    )


# --------------------------------------------------------------------------------------
# Kernel B: train-mode BatchNorm affine (precomputed scale/shift) + Swish, lane-dense NCHW
# --------------------------------------------------------------------------------------
def _bn_swish_kernel(y_ref, sc_ref, sh_ref, o_ref):
    # y_ref/o_ref: (1, Cout, L) flattened NCHW slab; sc/sh: (Cout, 1) per-channel affine
    z = y_ref[...] * sc_ref[...] + sh_ref[...]
    o_ref[...] = z * jax.nn.sigmoid(z)


# --------------------------------------------------------------------------------------
# Wrapper glue
# --------------------------------------------------------------------------------------
def _pick_tile_rows(h, w):
    """Largest TH <= 32 with H % TH == 0, TH % 8 == 0 and 128-lane-aligned flat blocks."""
    for th in range(min(h // 2, 32), 0, -1):
        if h % th == 0 and th % 8 == 0 and (4 * th * w) % 128 == 0:
            return th
    return h


def _tap_kernel_index(parity, offset):
    # ConvTranspose2d(k=3, s=2, p=1): output row 2a+dy reads input row a+ry via kernel row
    # ky satisfying 2*(a+ry) - 1 + ky == 2a + dy  =>  ky = dy + 1 - 2*ry (None if not in 0..2)
    ky = parity + 1 - 2 * offset
    return ky if 0 <= ky <= 2 else None


def _build_fused_weight(w_t):
    """(Cin, Cout, 3, 3) ConvTranspose2d weight -> (4*Cout, 4*Cin) parity/tap matrix."""
    cin, cout = w_t.shape[0], w_t.shape[1]
    rows = []
    for dy in (0, 1):
        for dx in (0, 1):
            cols = []
            for ry in (0, 1):
                for rx in (0, 1):
                    ky, kx = _tap_kernel_index(dy, ry), _tap_kernel_index(dx, rx)
                    if ky is None or kx is None:
                        cols.append(jnp.zeros((cout, cin), jnp.float32))
                    else:
                        cols.append(w_t[:, :, ky, kx].T.astype(jnp.float32))
            rows.append(jnp.concatenate(cols, axis=1))
    return jnp.concatenate(rows, axis=0)


def _interleave_mats(w):
    eye = jnp.eye(w, dtype=jnp.float32)
    pt = jnp.zeros((w, 2 * w), jnp.float32).at[:, 0::2].set(eye)
    pb = jnp.zeros((w, 2 * w), jnp.float32).at[:, 1::2].set(eye)
    return pt, pb


def upsample_block(x, w_t, bias, gamma, beta, *, eps=1e-5):
    """ConvTranspose2d(3, s=2, p=1, op=1) -> BatchNorm2d(batch stats) -> Swish, NCHW in/out."""
    n, cin, h, w = x.shape
    cout = w_t.shape[1]
    ho, wo = 2 * h, 2 * w
    th = _pick_tile_rows(h, w)
    t = h // th

    # 1-pixel bottom/right zero halo; pack non-overlapping per-tile slabs (TH + 1 halo rows).
    x_pad = jnp.pad(x.astype(jnp.float32), ((0, 0), (0, 0), (0, 1), (0, 1)))
    x_tiles = jnp.stack([x_pad[:, :, i * th:i * th + th + 1, :] for i in range(t)], axis=1)

    w_big = _build_fused_weight(w_t)
    pt, pb = _interleave_mats(w)
    b2 = bias.reshape(cout, 1).astype(jnp.float32)

    cparams = pltpu.CompilerParams(
        dimension_semantics=("parallel", "parallel"),
        vmem_limit_bytes=32 * 1024 * 1024,
    )

    y, stats = pl.pallas_call(
        _convt_kernel,
        out_shape=(
            jax.ShapeDtypeStruct((n, cout, h, 4 * w), jnp.float32),   # == NCHW (n,cout,2h,2w)
            jax.ShapeDtypeStruct((n, t, cout, 2), jnp.float32),
        ),
        grid=(n, t),
        in_specs=[
            pl.BlockSpec((1, 1, cin, th + 1, w + 1), lambda i, j: (i, j, 0, 0, 0)),
            pl.BlockSpec((4 * cout, 4 * cin), lambda i, j: (0, 0)),
            pl.BlockSpec((w, 2 * w), lambda i, j: (0, 0)),
            pl.BlockSpec((w, 2 * w), lambda i, j: (0, 0)),
            pl.BlockSpec((cout, 1), lambda i, j: (0, 0)),
        ],
        out_specs=(
            pl.BlockSpec((1, cout, th, 4 * w), lambda i, j: (i, 0, j, 0)),
            pl.BlockSpec((1, 1, cout, 2), lambda i, j: (i, j, 0, 0)),
        ),
        compiler_params=cparams,
    )(x_tiles, w_big, pt, pb, b2)

    # Fold per-tile partial sums into train-mode BatchNorm scale/shift (O(Cout) scalar work).
    s = jnp.sum(stats, axis=(0, 1))                     # (Cout, 2)
    cnt = jnp.float32(n * ho * wo)
    mean = s[:, 0] / cnt
    var = jnp.maximum(s[:, 1] / cnt - mean * mean, 0.0)  # biased (train-mode) variance
    scale = gamma.astype(jnp.float32) * lax.rsqrt(var + eps)
    shift = beta.astype(jnp.float32) - mean * scale

    lane = (ho * wo) // t                               # multiple of 128 (or full extent)
    out = pl.pallas_call(
        _bn_swish_kernel,
        out_shape=jax.ShapeDtypeStruct((n, cout, ho * wo), jnp.float32),
        grid=(n, t),
        in_specs=[
            pl.BlockSpec((1, cout, lane), lambda i, j: (i, 0, j)),
            pl.BlockSpec((cout, 1), lambda i, j: (0, 0)),
            pl.BlockSpec((cout, 1), lambda i, j: (0, 0)),
        ],
        out_specs=pl.BlockSpec((1, cout, lane), lambda i, j: (i, 0, j)),
        input_output_aliases={0: 0},                    # normalize in place over y
        compiler_params=cparams,
    )(y.reshape(n, cout, ho * wo), scale.reshape(cout, 1), shift.reshape(cout, 1))

    return out.reshape(n, cout, ho, wo)


def decoder_block(x, params):
    """PyTorch DecoderBlock.forward: sequentially apply each UpsampleBlock."""
    for (w_t, bias, gamma, beta) in params:
        x = upsample_block(x, w_t, bias, gamma, beta)
    return x


# --------------------------------------------------------------------------------------
# Pure-JAX reference
# --------------------------------------------------------------------------------------
def _reference(x, params, eps=1e-5):
    for (w_t, bias, gamma, beta) in params:
        cout = w_t.shape[1]
        w_conv = jnp.transpose(jnp.flip(w_t, axis=(2, 3)), (1, 0, 2, 3))  # (Cout, Cin, 3, 3)
        y = lax.conv_general_dilated(
            x, w_conv, window_strides=(1, 1), padding=((1, 2), (1, 2)),
            lhs_dilation=(2, 2), dimension_numbers=("NCHW", "OIHW", "NCHW"),
        ) + bias.reshape(1, cout, 1, 1)
        mean = jnp.mean(y, axis=(0, 2, 3), keepdims=True)
        var = jnp.mean((y - mean) ** 2, axis=(0, 2, 3), keepdims=True)
        z = (y - mean) * lax.rsqrt(var + eps) * gamma.reshape(1, cout, 1, 1) \
            + beta.reshape(1, cout, 1, 1)
        x = z * jax.nn.sigmoid(z)
    return x


if __name__ == "__main__":
    channels = (4, 8, 3)                 # DecoderBlock([4, 8, 3]) -> two UpsampleBlocks
    N, H, W = 2, 16, 16

    key = jax.random.PRNGKey(0)
    key, kx = jax.random.split(key)
    x = jax.random.normal(kx, (N, channels[0], H, W), jnp.float32)

    params = []
    for i in range(len(channels) - 1):
        key, k1, k2, k3, k4 = jax.random.split(key, 5)
        cin, cout = channels[i], channels[i + 1]
        params.append((
            jax.random.normal(k1, (cin, cout, 3, 3), jnp.float32) * 0.2,   # ConvT weight
            jax.random.normal(k2, (cout,), jnp.float32) * 0.1,             # ConvT bias
            1.0 + 0.1 * jax.random.normal(k3, (cout,), jnp.float32),       # BN gamma
            0.1 * jax.random.normal(k4, (cout,), jnp.float32),             # BN beta
        ))

    out = jax.jit(decoder_block)(x, params)
    out = jax.block_until_ready(out)

    up = 2 ** (len(channels) - 1)
    assert out.shape == (N, channels[-1], H * up, W * up), out.shape

    ref = _reference(x, params)
    err = float(jnp.max(jnp.abs(out - ref)))
    assert jnp.allclose(out, ref, atol=1e-3, rtol=1e-3), f"max abs err {err}"

    print("KERNEL_OK")
</pallas_src>

<mosaic_0001>
module attributes {stable_mosaic.version = 11 : i64} {
  func.func @_bn_swish_kernel(%arg0: i32, %arg1: i32, %arg2: memref<1x8x512xf32, #tpu.memory_space<vmem>>, %arg3: memref<8x1xf32, #tpu.memory_space<vmem>>, %arg4: memref<8x1xf32, #tpu.memory_space<vmem>>, %arg5: memref<1x8x512xf32, #tpu.memory_space<vmem>>) attributes {dimension_semantics = [#tpu.dimension_semantics<parallel>, #tpu.dimension_semantics<parallel>], iteration_bounds = array<i64: 2, 2>, scalar_prefetch = 0 : i64, scratch_operands = 0 : i64, tpu.core_type = #tpu.core_type<tc>, window_params = [{transform_indices = @transform_0, window_bounds = array<i64: 1, 8, 512>}, {pipeline_mode = #tpu.pipeline_mode<synchronous>, transform_indices = @transform_1, window_bounds = array<i64: 8, 1>}, {pipeline_mode = #tpu.pipeline_mode<synchronous>, transform_indices = @transform_2, window_bounds = array<i64: 8, 1>}, {transform_indices = @transform_3, window_bounds = array<i64: 1, 8, 512>}]} {
    %c0 = arith.constant 0 : index
    %c0_0 = arith.constant 0 : index
    %c0_1 = arith.constant 0 : index
    %0 = vector.load %arg2[%c0, %c0_0, %c0_1] : memref<1x8x512xf32, #tpu.memory_space<vmem>>, vector<1x8x512xf32>
    %c0_2 = arith.constant 0 : index
    %c0_3 = arith.constant 0 : index
    %1 = vector.load %arg3[%c0_2, %c0_3] : memref<8x1xf32, #tpu.memory_space<vmem>>, vector<8x1xf32>
    %2 = vector.shape_cast %1 : vector<8x1xf32> to vector<1x8x1xf32>
    %3 = vector.broadcast %2 : vector<1x8x1xf32> to vector<1x8x512xf32>
    %4 = arith.mulf %0, %3 : vector<1x8x512xf32>
    %c0_4 = arith.constant 0 : index
    %c0_5 = arith.constant 0 : index
    %5 = vector.load %arg4[%c0_4, %c0_5] : memref<8x1xf32, #tpu.memory_space<vmem>>, vector<8x1xf32>
    %6 = vector.shape_cast %5 : vector<8x1xf32> to vector<1x8x1xf32>
    %7 = vector.broadcast %6 : vector<1x8x1xf32> to vector<1x8x512xf32>
    %8 = arith.addf %4, %7 : vector<1x8x512xf32>
    %9 = arith.negf %8 : vector<1x8x512xf32>
    %10 = math.exp %9 : vector<1x8x512xf32>
    %cst = arith.constant 1.000000e+00 : f32
    %11 = vector.broadcast %cst : f32 to vector<1x8x512xf32>
    %12 = arith.addf %11, %10 : vector<1x8x512xf32>
    %13 = arith.divf %11, %12 : vector<1x8x512xf32>
    %14 = arith.mulf %8, %13 : vector<1x8x512xf32>
    %c0_6 = arith.constant 0 : index
    %c0_7 = arith.constant 0 : index
    %c0_8 = arith.constant 0 : index
    %15 = vector.load %arg5[%c0_6, %c0_7, %c0_8] : memref<1x8x512xf32, #tpu.memory_space<vmem>>, vector<1x8x512xf32>
    tpu.vector_store %arg5[%c0_6, %c0_7, %c0_8], %14 {strides = array<i32>} : memref<1x8x512xf32, #tpu.memory_space<vmem>>, vector<1x8x512xf32>,
    return
  }
  func.func @transform_0(%arg0: i32, %arg1: i32) -> (i32, i32, i32) {
    %c0_i32 = arith.constant 0 : i32
    %c0_i32_0 = arith.constant 0 : i32
    return %arg0, %c0_i32, %arg1 : i32, i32, i32
  }
  func.func @transform_1(%arg0: i32, %arg1: i32) -> (i32, i32) {
    %c0_i32 = arith.constant 0 : i32
    %c0_i32_0 = arith.constant 0 : i32
    %c0_i32_1 = arith.constant 0 : i32
    return %c0_i32, %c0_i32_0 : i32, i32
  }
  func.func @transform_2(%arg0: i32, %arg1: i32) -> (i32, i32) {
    %c0_i32 = arith.constant 0 : i32
    %c0_i32_0 = arith.constant 0 : i32
    %c0_i32_1 = arith.constant 0 : i32
    return %c0_i32, %c0_i32_0 : i32, i32
  }
  func.func @transform_3(%arg0: i32, %arg1: i32) -> (i32, i32, i32) {
    %c0_i32 = arith.constant 0 : i32
    %c0_i32_0 = arith.constant 0 : i32
    return %arg0, %c0_i32, %arg1 : i32, i32, i32
  }
}

module attributes {stable_mosaic.version = 11 : i64} {
  func.func @_convt_kernel(%arg0: i32, %arg1: i32, %arg2: memref<1x1x4x9x17xf32, #tpu.memory_space<vmem>>, %arg3: memref<32x16xf32, #tpu.memory_space<vmem>>, %arg4: memref<16x32xf32, #tpu.memory_space<vmem>>, %arg5: memref<16x32xf32, #tpu.memory_space<vmem>>, %arg6: memref<8x1xf32, #tpu.memory_space<vmem>>, %arg7: memref<1x8x8x64xf32, #tpu.memory_space<vmem>>, %arg8: memref<1x1x8x2xf32, #tpu.memory_space<vmem>>) attributes {dimension_semantics = [#tpu.dimension_semantics<parallel>, #tpu.dimension_semantics<parallel>], iteration_bounds = array<i64: 2, 2>, scalar_prefetch = 0 : i64, scratch_operands = 0 : i64, tpu.core_type = #tpu.core_type<tc>, window_params = [{transform_indices = @transform_0, window_bounds = array<i64: 1, 1, 4, 9, 17>}, {pipeline_mode = #tpu.pipeline_mode<synchronous>, transform_indices = @transform_1, window_bounds = array<i64: 32, 16>}, {pipeline_mode = #tpu.pipeline_mode<synchronous>, transform_indices = @transform_2, window_bounds = array<i64: 16, 32>}, {pipeline_mode = #tpu.pipeline_mode<synchronous>, transform_indices = @transform_3, window_bounds = array<i64: 16, 32>}, {pipeline_mode = #tpu.pipeline_mode<synchronous>, transform_indices = @transform_4, window_bounds = array<i64: 8, 1>}, {transform_indices = @transform_5, window_bounds = array<i64: 1, 8, 8, 64>}, {transform_indices = @transform_6, window_bounds = array<i64: 1, 1, 8, 2>}]} {
    %c0 = arith.constant 0 : index
    %c0_0 = arith.constant 0 : index
    %0 = vector.load %arg3[%c0, %c0_0] : memref<32x16xf32, #tpu.memory_space<vmem>>, vector<32x16xf32>
    %c0_1 = arith.constant 0 : index
    %c0_2 = arith.constant 0 : index
    %1 = vector.load %arg4[%c0_1, %c0_2] : memref<16x32xf32, #tpu.memory_space<vmem>>, vector<16x32xf32>
    %c0_3 = arith.constant 0 : index
    %c0_4 = arith.constant 0 : index
    %2 = vector.load %arg5[%c0_3, %c0_4] : memref<16x32xf32, #tpu.memory_space<vmem>>, vector<16x32xf32>
    %c0_5 = arith.constant 0 : index
    %c0_6 = arith.constant 0 : index
    %3 = vector.load %arg6[%c0_5, %c0_6] : memref<8x1xf32, #tpu.memory_space<vmem>>, vector<8x1xf32>
    %4 = vector.shape_cast %3 : vector<8x1xf32> to vector<8x1xf32>
    %5 = vector.broadcast %4 : vector<8x1xf32> to vector<8x32xf32>
    %cst = arith.constant 0.000000e+00 : f32
    %6 = vector.broadcast %cst : f32 to vector<8x32xf32>
    %cst_7 = arith.constant 0.000000e+00 : f32
    %7 = vector.broadcast %cst_7 : f32 to vector<8x32xf32>
    %c0_8 = arith.constant 0 : index
    %c0_9 = arith.constant 0 : index
    %c0_10 = arith.constant 0 : index
    %c0_11 = arith.constant 0 : index
    %c0_12 = arith.constant 0 : index
    %8 = vector.load %arg2[%c0_8, %c0_9, %c0_10, %c0_11, %c0_12] : memref<1x1x4x9x17xf32, #tpu.memory_space<vmem>>, vector<1x1x4x1x16xf32>
    %9 = vector.shape_cast %8 : vector<1x1x4x1x16xf32> to vector<4x16xf32>
    %c0_13 = arith.constant 0 : index
    %c0_14 = arith.constant 0 : index
    %c0_15 = arith.constant 0 : index
    %c0_16 = arith.constant 0 : index
    %c1 = arith.constant 1 : index
    %10 = vector.load %arg2[%c0_13, %c0_14, %c0_15, %c0_16, %c1] : memref<1x1x4x9x17xf32, #tpu.memory_space<vmem>>, vector<1x1x4x1x16xf32>
    %11 = vector.shape_cast %10 : vector<1x1x4x1x16xf32> to vector<4x16xf32>
    %c0_17 = arith.constant 0 : index
    %c0_18 = arith.constant 0 : index
    %c0_19 = arith.constant 0 : index
    %c1_20 = arith.constant 1 : index
    %c0_21 = arith.constant 0 : index
    %12 = vector.load %arg2[%c0_17, %c0_18, %c0_19, %c1_20, %c0_21] : memref<1x1x4x9x17xf32, #tpu.memory_space<vmem>>, vector<1x1x4x1x16xf32>
    %13 = vector.shape_cast %12 : vector<1x1x4x1x16xf32> to vector<4x16xf32>
    %c0_22 = arith.constant 0 : index
    %c0_23 = arith.constant 0 : index
    %c0_24 = arith.constant 0 : index
    %c1_25 = arith.constant 1 : index
    %c1_26 = arith.constant 1 : index
    %14 = vector.load %arg2[%c0_22, %c0_23, %c0_24, %c1_25, %c1_26] : memref<1x1x4x9x17xf32, #tpu.memory_space<vmem>>, vector<1x1x4x1x16xf32>
    %15 = vector.shape_cast %14 : vector<1x1x4x1x16xf32> to vector<4x16xf32>
    %16 = tpu.concatenate %9, %11, %13, %15 in 0 : vector<4x16xf32>, vector<4x16xf32>, vector<4x16xf32>, vector<4x16xf32> -> vector<16x16xf32>
    %cst_27 = arith.constant dense<0.000000e+00> : vector<32x16xf32>
    %17 = tpu.matmul %0, %16, %cst_27 {dimension_numbers = #tpu.dot_dimension_numbers<[1], [0], [0], [1], [0, 0, 1, 1], [], []>} : vector<32x16xf32>, vector<16x16xf32>, vector<32x16xf32> -> vector<32x16xf32>
    %18 = vector.extract_strided_slice %17 {offsets = [0, 0], sizes = [8, 16], strides = [1, 1]} : vector<32x16xf32> to vector<8x16xf32>
    %cst_28 = arith.constant dense<0.000000e+00> : vector<8x32xf32>
    %19 = tpu.matmul %18, %1, %cst_28 {dimension_numbers = #tpu.dot_dimension_numbers<[1], [0], [0], [1], [0, 0, 1, 1], [], []>} : vector<8x16xf32>, vector<16x32xf32>, vector<8x32xf32> -> vector<8x32xf32>
    %20 = vector.extract_strided_slice %17 {offsets = [8, 0], sizes = [8, 16], strides = [1, 1]} : vector<32x16xf32> to vector<8x16xf32>
    %cst_29 = arith.constant dense<0.000000e+00> : vector<8x32xf32>
    %21 = tpu.matmul %20, %2, %cst_29 {dimension_numbers = #tpu.dot_dimension_numbers<[1], [0], [0], [1], [0, 0, 1, 1], [], []>} : vector<8x16xf32>, vector<16x32xf32>, vector<8x32xf32> -> vector<8x32xf32>
    %22 = arith.addf %19, %21 : vector<8x32xf32>
    %23 = arith.addf %22, %5 : vector<8x32xf32>
    %24 = vector.extract_strided_slice %17 {offsets = [16, 0], sizes = [8, 16], strides = [1, 1]} : vector<32x16xf32> to vector<8x16xf32>
    %cst_30 = arith.constant dense<0.000000e+00> : vector<8x32xf32>
    %25 = tpu.matmul %24, %1, %cst_30 {dimension_numbers = #tpu.dot_dimension_numbers<[1], [0], [0], [1], [0, 0, 1, 1], [], []>} : vector<8x16xf32>, vector<16x32xf32>, vector<8x32xf32> -> vector<8x32xf32>
    %26 = vector.extract_strided_slice %17 {offsets = [24, 0], sizes = [8, 16], strides = [1, 1]} : vector<32x16xf32> to vector<8x16xf32>
    %cst_31 = arith.constant dense<0.000000e+00> : vector<8x32xf32>
    %27 = tpu.matmul %26, %2, %cst_31 {dimension_numbers = #tpu.dot_dimension_numbers<[1], [0], [0], [1], [0, 0, 1, 1], [], []>} : vector<8x16xf32>, vector<16x32xf32>, vector<8x32xf32> -> vector<8x32xf32>
    %28 = arith.addf %25, %27 : vector<8x32xf32>
    %29 = arith.addf %28, %5 : vector<8x32xf32>
    %c0_32 = arith.constant 0 : index
    %c0_33 = arith.constant 0 : index
    %c0_34 = arith.constant 0 : index
    %c0_35 = arith.constant 0 : index
    %30 = vector.load %arg7[%c0_32, %c0_33, %c0_34, %c0_35] : memref<1x8x8x64xf32, #tpu.memory_space<vmem>>, vector<1x8x1x32xf32>
    %31 = vector.shape_cast %30 : vector<1x8x1x32xf32> to vector<8x32xf32>
    %32 = vector.shape_cast %23 : vector<8x32xf32> to vector<1x8x1x32xf32>
    tpu.vector_store %arg7[%c0_32, %c0_33, %c0_34, %c0_35], %32 {strides = array<i32>} : memref<1x8x8x64xf32, #tpu.memory_space<vmem>>, vector<1x8x1x32xf32>,
    %c0_36 = arith.constant 0 : index
    %c0_37 = arith.constant 0 : index
    %c0_38 = arith.constant 0 : index
    %c32 = arith.constant 32 : index
    %33 = vector.load %arg7[%c0_36, %c0_37, %c0_38, %c32] : memref<1x8x8x64xf32, #tpu.memory_space<vmem>>, vector<1x8x1x32xf32>
    %34 = vector.shape_cast %33 : vector<1x8x1x32xf32> to vector<8x32xf32>
    %35 = vector.shape_cast %29 : vector<8x32xf32> to vector<1x8x1x32xf32>
    tpu.vector_store %arg7[%c0_36, %c0_37, %c0_38, %c32], %35 {strides = array<i32>} : memref<1x8x8x64xf32, #tpu.memory_space<vmem>>, vector<1x8x1x32xf32>,
    %36 = arith.addf %6, %23 : vector<8x32xf32>
    %37 = arith.addf %36, %29 : vector<8x32xf32>
    %38 = arith.mulf %23, %23 : vector<8x32xf32>
    %39 = arith.addf %7, %38 : vector<8x32xf32>
    %40 = arith.mulf %29, %29 : vector<8x32xf32>
    %41 = arith.addf %39, %40 : vector<8x32xf32>
    %c0_39 = arith.constant 0 : index
    %c0_40 = arith.constant 0 : index
    %c0_41 = arith.constant 0 : index
    %c1_42 = arith.constant 1 : index
    %c0_43 = arith.constant 0 : index
    %42 = vector.load %arg2[%c0_39, %c0_40, %c0_41, %c1_42, %c0_43] : memref<1x1x4x9x17xf32, #tpu.memory_space<vmem>>, vector<1x1x4x1x16xf32>
    %43 = vector.shape_cast %42 : vector<1x1x4x1x16xf32> to vector<4x16xf32>
    %c0_44 = arith.constant 0 : index
    %c0_45 = arith.constant 0 : index
    %c0_46 = arith.constant 0 : index
    %c1_47 = arith.constant 1 : index
    %c1_48 = arith.constant 1 : index
    %44 = vector.load %arg2[%c0_44, %c0_45, %c0_46, %c1_47, %c1_48] : memref<1x1x4x9x17xf32, #tpu.memory_space<vmem>>, vector<1x1x4x1x16xf32>
    %45 = vector.shape_cast %44 : vector<1x1x4x1x16xf32> to vector<4x16xf32>
    %c0_49 = arith.constant 0 : index
    %c0_50 = arith.constant 0 : index
    %c0_51 = arith.constant 0 : index
    %c2 = arith.constant 2 : index
    %c0_52 = arith.constant 0 : index
    %46 = vector.load %arg2[%c0_49, %c0_50, %c0_51, %c2, %c0_52] : memref<1x1x4x9x17xf32, #tpu.memory_space<vmem>>, vector<1x1x4x1x16xf32>
    %47 = vector.shape_cast %46 : vector<1x1x4x1x16xf32> to vector<4x16xf32>
    %c0_53 = arith.constant 0 : index
    %c0_54 = arith.constant 0 : index
    %c0_55 = arith.constant 0 : index
    %c2_56 = arith.constant 2 : index
    %c1_57 = arith.constant 1 : index
    %48 = vector.load %arg2[%c0_53, %c0_54, %c0_55, %c2_56, %c1_57] : memref<1x1x4x9x17xf32, #tpu.memory_space<vmem>>, vector<1x1x4x1x16xf32>
    %49 = vector.shape_cast %48 : vector<1x1x4x1x16xf32> to vector<4x16xf32>
    %50 = tpu.concatenate %43, %45, %47, %49 in 0 : vector<4x16xf32>, vector<4x16xf32>, vector<4x16xf32>, vector<4x16xf32> -> vector<16x16xf32>
    %cst_58 = arith.constant dense<0.000000e+00> : vector<32x16xf32>
    %51 = tpu.matmul %0, %50, %cst_58 {dimension_numbers = #tpu.dot_dimension_numbers<[1], [0], [0], [1], [0, 0, 1, 1], [], []>} : vector<32x16xf32>, vector<16x16xf32>, vector<32x16xf32> -> vector<32x16xf32>
    %52 = vector.extract_strided_slice %51 {offsets = [0, 0], sizes = [8, 16], strides = [1, 1]} : vector<32x16xf32> to vector<8x16xf32>
    %cst_59 = arith.constant dense<0.000000e+00> : vector<8x32xf32>
    %53 = tpu.matmul %52, %1, %cst_59 {dimension_numbers = #tpu.dot_dimension_numbers<[1], [0], [0], [1], [0, 0, 1, 1], [], []>} : vector<8x16xf32>, vector<16x32xf32>, vector<8x32xf32> -> vector<8x32xf32>
    %54 = vector.extract_strided_slice %51 {offsets = [8, 0], sizes = [8, 16], strides = [1, 1]} : vector<32x16xf32> to vector<8x16xf32>
    %cst_60 = arith.constant dense<0.000000e+00> : vector<8x32xf32>
    %55 = tpu.matmul %54, %2, %cst_60 {dimension_numbers = #tpu.dot_dimension_numbers<[1], [0], [0], [1], [0, 0, 1, 1], [], []>} : vector<8x16xf32>, vector<16x32xf32>, vector<8x32xf32> -> vector<8x32xf32>
    %56 = arith.addf %53, %55 : vector<8x32xf32>
    %57 = arith.addf %56, %5 : vector<8x32xf32>
    %58 = vector.extract_strided_slice %51 {offsets = [16, 0], sizes = [8, 16], strides = [1, 1]} : vector<32x16xf32> to vector<8x16xf32>
    %cst_61 = arith.constant dense<0.000000e+00> : vector<8x32xf32>
    %59 = tpu.matmul %58, %1, %cst_61 {dimension_numbers = #tpu.dot_dimension_numbers<[1], [0], [0], [1], [0, 0, 1, 1], [], []>} : vector<8x16xf32>, vector<16x32xf32>, vector<8x32xf32> -> vector<8x32xf32>
    %60 = vector.extract_strided_slice %51 {offsets = [24, 0], sizes = [8, 16], strides = [1, 1]} : vector<32x16xf32> to vector<8x16xf32>
    %cst_62 = arith.constant dense<0.000000e+00> : vector<8x32xf32>
    %61 = tpu.matmul %60, %2, %cst_62 {dimension_numbers = #tpu.dot_dimension_numbers<[1], [0], [0], [1], [0, 0, 1, 1], [], []>} : vector<8x16xf32>, vector<16x32xf32>, vector<8x32xf32> -> vector<8x32xf32>
    %62 = arith.addf %59, %61 : vector<8x32xf32>
    %63 = arith.addf %62, %5 : vector<8x32xf32>
    %c0_63 = arith.constant 0 : index
    %c0_64 = arith.constant 0 : index
    %c1_65 = arith.constant 1 : index
    %c0_66 = arith.constant 0 : index
    %64 = vector.load %arg7[%c0_63, %c0_64, %c1_65, %c0_66] : memref<1x8x8x64xf32, #tpu.memory_space<vmem>>, vector<1x8x1x32xf32>
    %65 = vector.shape_cast %64 : vector<1x8x1x32xf32> to vector<8x32xf32>
    %66 = vector.shape_cast %57 : vector<8x32xf32> to vector<1x8x1x32xf32>
    tpu.vector_store %arg7[%c0_63, %c0_64, %c1_65, %c0_66], %66 {strides = array<i32>} : memref<1x8x8x64xf32, #tpu.memory_space<vmem>>, vector<1x8x1x32xf32>,
    %c0_67 = arith.constant 0 : index
    %c0_68 = arith.constant 0 : index
    %c1_69 = arith.constant 1 : index
    %c32_70 = arith.constant 32 : index
    %67 = vector.load %arg7[%c0_67, %c0_68, %c1_69, %c32_70] : memref<1x8x8x64xf32, #tpu.memory_space<vmem>>, vector<1x8x1x32xf32>
    %68 = vector.shape_cast %67 : vector<1x8x1x32xf32> to vector<8x32xf32>
    %69 = vector.shape_cast %63 : vector<8x32xf32> to vector<1x8x1x32xf32>
    tpu.vector_store %arg7[%c0_67, %c0_68, %c1_69, %c32_70], %69 {strides = array<i32>} : memref<1x8x8x64xf32, #tpu.memory_space<vmem>>, vector<1x8x1x32xf32>,
    %70 = arith.addf %37, %57 : vector<8x32xf32>
    %71 = arith.addf %70, %63 : vector<8x32xf32>
    %72 = arith.mulf %57, %57 : vector<8x32xf32>
    %73 = arith.addf %41, %72 : vector<8x32xf32>
    %74 = arith.mulf %63, %63 : vector<8x32xf32>
    %75 = arith.addf %73, %74 : vector<8x32xf32>
    %c0_71 = arith.constant 0 : index
    %c0_72 = arith.constant 0 : index
    %c0_73 = arith.constant 0 : index
    %c2_74 = arith.constant 2 : index
    %c0_75 = arith.constant 0 : index
    %76 = vector.load %arg2[%c0_71, %c0_72, %c0_73, %c2_74, %c0_75] : memref<1x1x4x9x17xf32, #tpu.memory_space<vmem>>, vector<1x1x4x1x16xf32>
    %77 = vector.shape_cast %76 : vector<1x1x4x1x16xf32> to vector<4x16xf32>
    %c0_76 = arith.constant 0 : index
    %c0_77 = arith.constant 0 : index
    %c0_78 = arith.constant 0 : index
    %c2_79 = arith.constant 2 : index
    %c1_80 = arith.constant 1 : index
    %78 = vector.load %arg2[%c0_76, %c0_77, %c0_78, %c2_79, %c1_80] : memref<1x1x4x9x17xf32, #tpu.memory_space<vmem>>, vector<1x1x4x1x16xf32>
    %79 = vector.shape_cast %78 : vector<1x1x4x1x16xf32> to vector<4x16xf32>
    %c0_81 = arith.constant 0 : index
    %c0_82 = arith.constant 0 : index
    %c0_83 = arith.constant 0 : index
    %c3 = arith.constant 3 : index
    %c0_84 = arith.constant 0 : index
    %80 = vector.load %arg2[%c0_81, %c0_82, %c0_83, %c3, %c0_84] : memref<1x1x4x9x17xf32, #tpu.memory_space<vmem>>, vector<1x1x4x1x16xf32>
    %81 = vector.shape_cast %80 : vector<1x1x4x1x16xf32> to vector<4x16xf32>
    %c0_85 = arith.constant 0 : index
    %c0_86 = arith.constant 0 : index
    %c0_87 = arith.constant 0 : index
    %c3_88 = arith.constant 3 : index
    %c1_89 = arith.constant 1 : index
    %82 = vector.load %arg2[%c0_85, %c0_86, %c0_87, %c3_88, %c1_89] : memref<1x1x4x9x17xf32, #tpu.memory_space<vmem>>, vector<1x1x4x1x16xf32>
    %83 = vector.shape_cast %82 : vector<1x1x4x1x16xf32> to vector<4x16xf32>
    %84 = tpu.concatenate %77, %79, %81, %83 in 0 : vector<4x16xf32>, vector<4x16xf32>, vector<4x16xf32>, vector<4x16xf32> -> vector<16x16xf32>
    %cst_90 = arith.constant dense<0.000000e+00> : vector<32x16xf32>
    %85 = tpu.matmul %0, %84, %cst_90 {dimension_numbers = #tpu.dot_dimension_numbers<[1], [0], [0], [1], [0, 0, 1, 1], [], []>} : vector<32x16xf32>, vector<16x16xf32>, vector<32x16xf32> -> vector<32x16xf32>
    %86 = vector.extract_strided_slice %85 {offsets = [0, 0], sizes = [8, 16], strides = [1, 1]} : vector<32x16xf32> to vector<8x16xf32>
    %cst_91 = arith.constant dense<0.000000e+00> : vector<8x32xf32>
    %87 = tpu.matmul %86, %1, %cst_91 {dimension_numbers = #tpu.dot_dimension_numbers<[1], [0], [0], [1], [0, 0, 1, 1], [], []>} : vector<8x16xf32>, vector<16x32xf32>, vector<8x32xf32> -> vector<8x32xf32>
    %88 = vector.extract_strided_slice %85 {offsets = [8, 0], sizes = [8, 16], strides = [1, 1]} : vector<32x16xf32> to vector<8x16xf32>
    %cst_92 = arith.constant dense<0.000000e+00> : vector<8x32xf32>
    %89 = tpu.matmul %88, %2, %cst_92 {dimension_numbers = #tpu.dot_dimension_numbers<[1], [0], [0], [1], [0, 0, 1, 1], [], []>} : vector<8x16xf32>, vector<16x32xf32>, vector<8x32xf32> -> vector<8x32xf32>
    %90 = arith.addf %87, %89 : vector<8x32xf32>
    %91 = arith.addf %90, %5 : vector<8x32xf32>
    %92 = vector.extract_strided_slice %85 {offsets = [16, 0], sizes = [8, 16], strides = [1, 1]} : vector<32x16xf32> to vector<8x16xf32>
    %cst_93 = arith.constant dense<0.000000e+00> : vector<8x32xf32>
    %93 = tpu.matmul %92, %1, %cst_93 {dimension_numbers = #tpu.dot_dimension_numbers<[1], [0], [0], [1], [0, 0, 1, 1], [], []>} : vector<8x16xf32>, vector<16x32xf32>, vector<8x32xf32> -> vector<8x32xf32>
    %94 = vector.extract_strided_slice %85 {offsets = [24, 0], sizes = [8, 16], strides = [1, 1]} : vector<32x16xf32> to vector<8x16xf32>
    %cst_94 = arith.constant dense<0.000000e+00> : vector<8x32xf32>
    %95 = tpu.matmul %94, %2, %cst_94 {dimension_numbers = #tpu.dot_dimension_numbers<[1], [0], [0], [1], [0, 0, 1, 1], [], []>} : vector<8x16xf32>, vector<16x32xf32>, vector<8x32xf32> -> vector<8x32xf32>
    %96 = arith.addf %93, %95 : vector<8x32xf32>
    %97 = arith.addf %96, %5 : vector<8x32xf32>
    %c0_95 = arith.constant 0 : index
    %c0_96 = arith.constant 0 : index
    %c2_97 = arith.constant 2 : index
    %c0_98 = arith.constant 0 : index
    %98 = vector.load %arg7[%c0_95, %c0_96, %c2_97, %c0_98] : memref<1x8x8x64xf32, #tpu.memory_space<vmem>>, vector<1x8x1x32xf32>
    %99 = vector.shape_cast %98 : vector<1x8x1x32xf32> to vector<8x32xf32>
    %100 = vector.shape_cast %91 : vector<8x32xf32> to vector<1x8x1x32xf32>
    tpu.vector_store %arg7[%c0_95, %c0_96, %c2_97, %c0_98], %100 {strides = array<i32>} : memref<1x8x8x64xf32, #tpu.memory_space<vmem>>, vector<1x8x1x32xf32>,
    %c0_99 = arith.constant 0 : index
    %c0_100 = arith.constant 0 : index
    %c2_101 = arith.constant 2 : index
    %c32_102 = arith.constant 32 : index
    %101 = vector.load %arg7[%c0_99, %c0_100, %c2_101, %c32_102] : memref<1x8x8x64xf32, #tpu.memory_space<vmem>>, vector<1x8x1x32xf32>
    %102 = vector.shape_cast %101 : vector<1x8x1x32xf32> to vector<8x32xf32>
    %103 = vector.shape_cast %97 : vector<8x32xf32> to vector<1x8x1x32xf32>
    tpu.vector_store %arg7[%c0_99, %c0_100, %c2_101, %c32_102], %103 {strides = array<i32>} : memref<1x8x8x64xf32, #tpu.memory_space<vmem>>, vector<1x8x1x32xf32>,
    %104 = arith.addf %71, %91 : vector<8x32xf32>
    %105 = arith.addf %104, %97 : vector<8x32xf32>
    %106 = arith.mulf %91, %91 : vector<8x32xf32>
    %107 = arith.addf %75, %106 : vector<8x32xf32>
    %108 = arith.mulf %97, %97 : vector<8x32xf32>
    %109 = arith.addf %107, %108 : vector<8x32xf32>
    %c0_103 = arith.constant 0 : index
    %c0_104 = arith.constant 0 : index
    %c0_105 = arith.constant 0 : index
    %c3_106 = arith.constant 3 : index
    %c0_107 = arith.constant 0 : index
    %110 = vector.load %arg2[%c0_103, %c0_104, %c0_105, %c3_106, %c0_107] : memref<1x1x4x9x17xf32, #tpu.memory_space<vmem>>, vector<1x1x4x1x16xf32>
    %111 = vector.shape_cast %110 : vector<1x1x4x1x16xf32> to vector<4x16xf32>
    %c0_108 = arith.constant 0 : index
    %c0_109 = arith.constant 0 : index
    %c0_110 = arith.constant 0 : index
    %c3_111 = arith.constant 3 : index
    %c1_112 = arith.constant 1 : index
    %112 = vector.load %arg2[%c0_108, %c0_109, %c0_110, %c3_111, %c1_112] : memref<1x1x4x9x17xf32, #tpu.memory_space<vmem>>, vector<1x1x4x1x16xf32>
    %113 = vector.shape_cast %112 : vector<1x1x4x1x16xf32> to vector<4x16xf32>
    %c0_113 = arith.constant 0 : index
    %c0_114 = arith.constant 0 : index
    %c0_115 = arith.constant 0 : index
    %c4 = arith.constant 4 : index
    %c0_116 = arith.constant 0 : index
    %114 = vector.load %arg2[%c0_113, %c0_114, %c0_115, %c4, %c0_116] : memref<1x1x4x9x17xf32, #tpu.memory_space<vmem>>, vector<1x1x4x1x16xf32>
    %115 = vector.shape_cast %114 : vector<1x1x4x1x16xf32> to vector<4x16xf32>
    %c0_117 = arith.constant 0 : index
    %c0_118 = arith.constant 0 : index
    %c0_119 = arith.constant 0 : index
    %c4_120 = arith.constant 4 : index
    %c1_121 = arith.constant 1 : index
    %116 = vector.load %arg2[%c0_117, %c0_118, %c0_119, %c4_120, %c1_121] : memref<1x1x4x9x17xf32, #tpu.memory_space<vmem>>, vector<1x1x4x1x16xf32>
    %117 = vector.shape_cast %116 : vector<1x1x4x1x16xf32> to vector<4x16xf32>
    %118 = tpu.concatenate %111, %113, %115, %117 in 0 : vector<4x16xf32>, vector<4x16xf32>, vector<4x16xf32>, vector<4x16xf32> -> vector<16x16xf32>
    %cst_122 = arith.constant dense<0.000000e+00> : vector<32x16xf32>
    %119 = tpu.matmul %0, %118, %cst_122 {dimension_numbers = #tpu.dot_dimension_numbers<[1], [0], [0], [1], [0, 0, 1, 1], [], []>} : vector<32x16xf32>, vector<16x16xf32>, vector<32x16xf32> -> vector<32x16xf32>
    %120 = vector.extract_strided_slice %119 {offsets = [0, 0], sizes = [8, 16], strides = [1, 1]} : vector<32x16xf32> to vector<8x16xf32>
    %cst_123 = arith.constant dense<0.000000e+00> : vector<8x32xf32>
    %121 = tpu.matmul %120, %1, %cst_123 {dimension_numbers = #tpu.dot_dimension_numbers<[1], [0], [0], [1], [0, 0, 1, 1], [], []>} : vector<8x16xf32>, vector<16x32xf32>, vector<8x32xf32> -> vector<8x32xf32>
    %122 = vector.extract_strided_slice %119 {offsets = [8, 0], sizes = [8, 16], strides = [1, 1]} : vector<32x16xf32> to vector<8x16xf32>
    %cst_124 = arith.constant dense<0.000000e+00> : vector<8x32xf32>
    %123 = tpu.matmul %122, %2, %cst_124 {dimension_numbers = #tpu.dot_dimension_numbers<[1], [0], [0], [1], [0, 0, 1, 1], [], []>} : vector<8x16xf32>, vector<16x32xf32>, vector<8x32xf32> -> vector<8x32xf32>
    %124 = arith.addf %121, %123 : vector<8x32xf32>
    %125 = arith.addf %124, %5 : vector<8x32xf32>
    %126 = vector.extract_strided_slice %119 {offsets = [16, 0], sizes = [8, 16], strides = [1, 1]} : vector<32x16xf32> to vector<8x16xf32>
    %cst_125 = arith.constant dense<0.000000e+00> : vector<8x32xf32>
    %127 = tpu.matmul %126, %1, %cst_125 {dimension_numbers = #tpu.dot_dimension_numbers<[1], [0], [0], [1], [0, 0, 1, 1], [], []>} : vector<8x16xf32>, vector<16x32xf32>, vector<8x32xf32> -> vector<8x32xf32>
    %128 = vector.extract_strided_slice %119 {offsets = [24, 0], sizes = [8, 16], strides = [1, 1]} : vector<32x16xf32> to vector<8x16xf32>
    %cst_126 = arith.constant dense<0.000000e+00> : vector<8x32xf32>
    %129 = tpu.matmul %128, %2, %cst_126 {dimension_numbers = #tpu.dot_dimension_numbers<[1], [0], [0], [1], [0, 0, 1, 1], [], []>} : vector<8x16xf32>, vector<16x32xf32>, vector<8x32xf32> -> vector<8x32xf32>
    %130 = arith.addf %127, %129 : vector<8x32xf32>
    %131 = arith.addf %130, %5 : vector<8x32xf32>
    %c0_127 = arith.constant 0 : index
    %c0_128 = arith.constant 0 : index
    %c3_129 = arith.constant 3 : index
    %c0_130 = arith.constant 0 : index
    %132 = vector.load %arg7[%c0_127, %c0_128, %c3_129, %c0_130] : memref<1x8x8x64xf32, #tpu.memory_space<vmem>>, vector<1x8x1x32xf32>
    %133 = vector.shape_cast %132 : vector<1x8x1x32xf32> to vector<8x32xf32>
    %134 = vector.shape_cast %125 : vector<8x32xf32> to vector<1x8x1x32xf32>
    tpu.vector_store %arg7[%c0_127, %c0_128, %c3_129, %c0_130], %134 {strides = array<i32>} : memref<1x8x8x64xf32, #tpu.memory_space<vmem>>, vector<1x8x1x32xf32>,
    %c0_131 = arith.constant 0 : index
    %c0_132 = arith.constant 0 : index
    %c3_133 = arith.constant 3 : index
    %c32_134 = arith.constant 32 : index
    %135 = vector.load %arg7[%c0_131, %c0_132, %c3_133, %c32_134] : memref<1x8x8x64xf32, #tpu.memory_space<vmem>>, vector<1x8x1x32xf32>
    %136 = vector.shape_cast %135 : vector<1x8x1x32xf32> to vector<8x32xf32>
    %137 = vector.shape_cast %131 : vector<8x32xf32> to vector<1x8x1x32xf32>
    tpu.vector_store %arg7[%c0_131, %c0_132, %c3_133, %c32_134], %137 {strides = array<i32>} : memref<1x8x8x64xf32, #tpu.memory_space<vmem>>, vector<1x8x1x32xf32>,
    %138 = arith.addf %105, %125 : vector<8x32xf32>
    %139 = arith.addf %138, %131 : vector<8x32xf32>
    %140 = arith.mulf %125, %125 : vector<8x32xf32>
    %141 = arith.addf %109, %140 : vector<8x32xf32>
    %142 = arith.mulf %131, %131 : vector<8x32xf32>
    %143 = arith.addf %141, %142 : vector<8x32xf32>
    %c0_135 = arith.constant 0 : index
    %c0_136 = arith.constant 0 : index
    %c0_137 = arith.constant 0 : index
    %c4_138 = arith.constant 4 : index
    %c0_139 = arith.constant 0 : index
    %144 = vector.load %arg2[%c0_135, %c0_136, %c0_137, %c4_138, %c0_139] : memref<1x1x4x9x17xf32, #tpu.memory_space<vmem>>, vector<1x1x4x1x16xf32>
    %145 = vector.shape_cast %144 : vector<1x1x4x1x16xf32> to vector<4x16xf32>
    %c0_140 = arith.constant 0 : index
    %c0_141 = arith.constant 0 : index
    %c0_142 = arith.constant 0 : index
    %c4_143 = arith.constant 4 : index
    %c1_144 = arith.constant 1 : index
    %146 = vector.load %arg2[%c0_140, %c0_141, %c0_142, %c4_143, %c1_144] : memref<1x1x4x9x17xf32, #tpu.memory_space<vmem>>, vector<1x1x4x1x16xf32>
    %147 = vector.shape_cast %146 : vector<1x1x4x1x16xf32> to vector<4x16xf32>
    %c0_145 = arith.constant 0 : index
    %c0_146 = arith.constant 0 : index
    %c0_147 = arith.constant 0 : index
    %c5 = arith.constant 5 : index
    %c0_148 = arith.constant 0 : index
    %148 = vector.load %arg2[%c0_145, %c0_146, %c0_147, %c5, %c0_148] : memref<1x1x4x9x17xf32, #tpu.memory_space<vmem>>, vector<1x1x4x1x16xf32>
    %149 = vector.shape_cast %148 : vector<1x1x4x1x16xf32> to vector<4x16xf32>
    %c0_149 = arith.constant 0 : index
    %c0_150 = arith.constant 0 : index
    %c0_151 = arith.constant 0 : index
    %c5_152 = arith.constant 5 : index
    %c1_153 = arith.constant 1 : index
    %150 = vector.load %arg2[%c0_149, %c0_150, %c0_151, %c5_152, %c1_153] : memref<1x1x4x9x17xf32, #tpu.memory_space<vmem>>, vector<1x1x4x1x16xf32>
    %151 = vector.shape_cast %150 : vector<1x1x4x1x16xf32> to vector<4x16xf32>
    %152 = tpu.concatenate %145, %147, %149, %151 in 0 : vector<4x16xf32>, vector<4x16xf32>, vector<4x16xf32>, vector<4x16xf32> -> vector<16x16xf32>
    %cst_154 = arith.constant dense<0.000000e+00> : vector<32x16xf32>
    %153 = tpu.matmul %0, %152, %cst_154 {dimension_numbers = #tpu.dot_dimension_numbers<[1], [0], [0], [1], [0, 0, 1, 1], [], []>} : vector<32x16xf32>, vector<16x16xf32>, vector<32x16xf32> -> vector<32x16xf32>
    %154 = vector.extract_strided_slice %153 {offsets = [0, 0], sizes = [8, 16], strides = [1, 1]} : vector<32x16xf32> to vector<8x16xf32>
    %cst_155 = arith.constant dense<0.000000e+00> : vector<8x32xf32>
    %155 = tpu.matmul %154, %1, %cst_155 {dimension_numbers = #tpu.dot_dimension_numbers<[1], [0], [0], [1], [0, 0, 1, 1], [], []>} : vector<8x16xf32>, vector<16x32xf32>, vector<8x32xf32> -> vector<8x32xf32>
    %156 = vector.extract_strided_slice %153 {offsets = [8, 0], sizes = [8, 16], strides = [1, 1]} : vector<32x16xf32> to vector<8x16xf32>
    %cst_156 = arith.constant dense<0.000000e+00> : vector<8x32xf32>
    %157 = tpu.matmul %156, %2, %cst_156 {dimension_numbers = #tpu.dot_dimension_numbers<[1], [0], [0], [1], [0, 0, 1, 1], [], []>} : vector<8x16xf32>, vector<16x32xf32>, vector<8x32xf32> -> vector<8x32xf32>
    %158 = arith.addf %155, %157 : vector<8x32xf32>
    %159 = arith.addf %158, %5 : vector<8x32xf32>
    %160 = vector.extract_strided_slice %153 {offsets = [16, 0], sizes = [8, 16], strides = [1, 1]} : vector<32x16xf32> to vector<8x16xf32>
    %cst_157 = arith.constant dense<0.000000e+00> : vector<8x32xf32>
    %161 = tpu.matmul %160, %1, %cst_157 {dimension_numbers = #tpu.dot_dimension_numbers<[1], [0], [0], [1], [0, 0, 1, 1], [], []>} : vector<8x16xf32>, vector<16x32xf32>, vector<8x32xf32> -> vector<8x32xf32>
    %162 = vector.extract_strided_slice %153 {offsets = [24, 0], sizes = [8, 16], strides = [1, 1]} : vector<32x16xf32> to vector<8x16xf32>
    %cst_158 = arith.constant dense<0.000000e+00> : vector<8x32xf32>
    %163 = tpu.matmul %162, %2, %cst_158 {dimension_numbers = #tpu.dot_dimension_numbers<[1], [0], [0], [1], [0, 0, 1, 1], [], []>} : vector<8x16xf32>, vector<16x32xf32>, vector<8x32xf32> -> vector<8x32xf32>
    %164 = arith.addf %161, %163 : vector<8x32xf32>
    %165 = arith.addf %164, %5 : vector<8x32xf32>
    %c0_159 = arith.constant 0 : index
    %c0_160 = arith.constant 0 : index
    %c4_161 = arith.constant 4 : index
    %c0_162 = arith.constant 0 : index
    %166 = vector.load %arg7[%c0_159, %c0_160, %c4_161, %c0_162] : memref<1x8x8x64xf32, #tpu.memory_space<vmem>>, vector<1x8x1x32xf32>
    %167 = vector.shape_cast %166 : vector<1x8x1x32xf32> to vector<8x32xf32>
    %168 = vector.shape_cast %159 : vector<8x32xf32> to vector<1x8x1x32xf32>
    tpu.vector_store %arg7[%c0_159, %c0_160, %c4_161, %c0_162], %168 {strides = array<i32>} : memref<1x8x8x64xf32, #tpu.memory_space<vmem>>, vector<1x8x1x32xf32>,
    %c0_163 = arith.constant 0 : index
    %c0_164 = arith.constant 0 : index
    %c4_165 = arith.constant 4 : index
    %c32_166 = arith.constant 32 : index
    %169 = vector.load %arg7[%c0_163, %c0_164, %c4_165, %c32_166] : memref<1x8x8x64xf32, #tpu.memory_space<vmem>>, vector<1x8x1x32xf32>
    %170 = vector.shape_cast %169 : vector<1x8x1x32xf32> to vector<8x32xf32>
    %171 = vector.shape_cast %165 : vector<8x32xf32> to vector<1x8x1x32xf32>
    tpu.vector_store %arg7[%c0_163, %c0_164, %c4_165, %c32_166], %171 {strides = array<i32>} : memref<1x8x8x64xf32, #tpu.memory_space<vmem>>, vector<1x8x1x32xf32>,
    %172 = arith.addf %139, %159 : vector<8x32xf32>
    %173 = arith.addf %172, %165 : vector<8x32xf32>
    %174 = arith.mulf %159, %159 : vector<8x32xf32>
    %175 = arith.addf %143, %174 : vector<8x32xf32>
    %176 = arith.mulf %165, %165 : vector<8x32xf32>
    %177 = arith.addf %175, %176 : vector<8x32xf32>
    %c0_167 = arith.constant 0 : index
    %c0_168 = arith.constant 0 : index
    %c0_169 = arith.constant 0 : index
    %c5_170 = arith.constant 5 : index
    %c0_171 = arith.constant 0 : index
    %178 = vector.load %arg2[%c0_167, %c0_168, %c0_169, %c5_170, %c0_171] : memref<1x1x4x9x17xf32, #tpu.memory_space<vmem>>, vector<1x1x4x1x16xf32>
    %179 = vector.shape_cast %178 : vector<1x1x4x1x16xf32> to vector<4x16xf32>
    %c0_172 = arith.constant 0 : index
    %c0_173 = arith.constant 0 : index
    %c0_174 = arith.constant 0 : index
    %c5_175 = arith.constant 5 : index
    %c1_176 = arith.constant 1 : index
    %180 = vector.load %arg2[%c0_172, %c0_173, %c0_174, %c5_175, %c1_176] : memref<1x1x4x9x17xf32, #tpu.memory_space<vmem>>, vector<1x1x4x1x16xf32>
    %181 = vector.shape_cast %180 : vector<1x1x4x1x16xf32> to vector<4x16xf32>
    %c0_177 = arith.constant 0 : index
    %c0_178 = arith.constant 0 : index
    %c0_179 = arith.constant 0 : index
    %c6 = arith.constant 6 : index
    %c0_180 = arith.constant 0 : index
    %182 = vector.load %arg2[%c0_177, %c0_178, %c0_179, %c6, %c0_180] : memref<1x1x4x9x17xf32, #tpu.memory_space<vmem>>, vector<1x1x4x1x16xf32>
    %183 = vector.shape_cast %182 : vector<1x1x4x1x16xf32> to vector<4x16xf32>
    %c0_181 = arith.constant 0 : index
    %c0_182 = arith.constant 0 : index
    %c0_183 = arith.constant 0 : index
    %c6_184 = arith.constant 6 : index
    %c1_185 = arith.constant 1 : index
    %184 = vector.load %arg2[%c0_181, %c0_182, %c0_183, %c6_184, %c1_185] : memref<1x1x4x9x17xf32, #tpu.memory_space<vmem>>, vector<1x1x4x1x16xf32>
    %185 = vector.shape_cast %184 : vector<1x1x4x1x16xf32> to vector<4x16xf32>
    %186 = tpu.concatenate %179, %181, %183, %185 in 0 : vector<4x16xf32>, vector<4x16xf32>, vector<4x16xf32>, vector<4x16xf32> -> vector<16x16xf32>
    %cst_186 = arith.constant dense<0.000000e+00> : vector<32x16xf32>
    %187 = tpu.matmul %0, %186, %cst_186 {dimension_numbers = #tpu.dot_dimension_numbers<[1], [0], [0], [1], [0, 0, 1, 1], [], []>} : vector<32x16xf32>, vector<16x16xf32>, vector<32x16xf32> -> vector<32x16xf32>
    %188 = vector.extract_strided_slice %187 {offsets = [0, 0], sizes = [8, 16], strides = [1, 1]} : vector<32x16xf32> to vector<8x16xf32>
    %cst_187 = arith.constant dense<0.000000e+00> : vector<8x32xf32>
    %189 = tpu.matmul %188, %1, %cst_187 {dimension_numbers = #tpu.dot_dimension_numbers<[1], [0], [0], [1], [0, 0, 1, 1], [], []>} : vector<8x16xf32>, vector<16x32xf32>, vector<8x32xf32> -> vector<8x32xf32>
    %190 = vector.extract_strided_slice %187 {offsets = [8, 0], sizes = [8, 16], strides = [1, 1]} : vector<32x16xf32> to vector<8x16xf32>
    %cst_188 = arith.constant dense<0.000000e+00> : vector<8x32xf32>
    %191 = tpu.matmul %190, %2, %cst_188 {dimension_numbers = #tpu.dot_dimension_numbers<[1], [0], [0], [1], [0, 0, 1, 1], [], []>} : vector<8x16xf32>, vector<16x32xf32>, vector<8x32xf32> -> vector<8x32xf32>
    %192 = arith.addf %189, %191 : vector<8x32xf32>
    %193 = arith.addf %192, %5 : vector<8x32xf32>
    %194 = vector.extract_strided_slice %187 {offsets = [16, 0], sizes = [8, 16], strides = [1, 1]} : vector<32x16xf32> to vector<8x16xf32>
    %cst_189 = arith.constant dense<0.000000e+00> : vector<8x32xf32>
    %195 = tpu.matmul %194, %1, %cst_189 {dimension_numbers = #tpu.dot_dimension_numbers<[1], [0], [0], [1], [0, 0, 1, 1], [], []>} : vector<8x16xf32>, vector<16x32xf32>, vector<8x32xf32> -> vector<8x32xf32>
    %196 = vector.extract_strided_slice %187 {offsets = [24, 0], sizes = [8, 16], strides = [1, 1]} : vector<32x16xf32> to vector<8x16xf32>
    %cst_190 = arith.constant dense<0.000000e+00> : vector<8x32xf32>
    %197 = tpu.matmul %196, %2, %cst_190 {dimension_numbers = #tpu.dot_dimension_numbers<[1], [0], [0], [1], [0, 0, 1, 1], [], []>} : vector<8x16xf32>, vector<16x32xf32>, vector<8x32xf32> -> vector<8x32xf32>
    %198 = arith.addf %195, %197 : vector<8x32xf32>
    %199 = arith.addf %198, %5 : vector<8x32xf32>
    %c0_191 = arith.constant 0 : index
    %c0_192 = arith.constant 0 : index
    %c5_193 = arith.constant 5 : index
    %c0_194 = arith.constant 0 : index
    %200 = vector.load %arg7[%c0_191, %c0_192, %c5_193, %c0_194] : memref<1x8x8x64xf32, #tpu.memory_space<vmem>>, vector<1x8x1x32xf32>
    %201 = vector.shape_cast %200 : vector<1x8x1x32xf32> to vector<8x32xf32>
    %202 = vector.shape_cast %193 : vector<8x32xf32> to vector<1x8x1x32xf32>
    tpu.vector_store %arg7[%c0_191, %c0_192, %c5_193, %c0_194], %202 {strides = array<i32>} : memref<1x8x8x64xf32, #tpu.memory_space<vmem>>, vector<1x8x1x32xf32>,
    %c0_195 = arith.constant 0 : index
    %c0_196 = arith.constant 0 : index
    %c5_197 = arith.constant 5 : index
    %c32_198 = arith.constant 32 : index
    %203 = vector.load %arg7[%c0_195, %c0_196, %c5_197, %c32_198] : memref<1x8x8x64xf32, #tpu.memory_space<vmem>>, vector<1x8x1x32xf32>
    %204 = vector.shape_cast %203 : vector<1x8x1x32xf32> to vector<8x32xf32>
    %205 = vector.shape_cast %199 : vector<8x32xf32> to vector<1x8x1x32xf32>
    tpu.vector_store %arg7[%c0_195, %c0_196, %c5_197, %c32_198], %205 {strides = array<i32>} : memref<1x8x8x64xf32, #tpu.memory_space<vmem>>, vector<1x8x1x32xf32>,
    %206 = arith.addf %173, %193 : vector<8x32xf32>
    %207 = arith.addf %206, %199 : vector<8x32xf32>
    %208 = arith.mulf %193, %193 : vector<8x32xf32>
    %209 = arith.addf %177, %208 : vector<8x32xf32>
    %210 = arith.mulf %199, %199 : vector<8x32xf32>
    %211 = arith.addf %209, %210 : vector<8x32xf32>
    %c0_199 = arith.constant 0 : index
    %c0_200 = arith.constant 0 : index
    %c0_201 = arith.constant 0 : index
    %c6_202 = arith.constant 6 : index
    %c0_203 = arith.constant 0 : index
    %212 = vector.load %arg2[%c0_199, %c0_200, %c0_201, %c6_202, %c0_203] : memref<1x1x4x9x17xf32, #tpu.memory_space<vmem>>, vector<1x1x4x1x16xf32>
    %213 = vector.shape_cast %212 : vector<1x1x4x1x16xf32> to vector<4x16xf32>
    %c0_204 = arith.constant 0 : index
    %c0_205 = arith.constant 0 : index
    %c0_206 = arith.constant 0 : index
    %c6_207 = arith.constant 6 : index
    %c1_208 = arith.constant 1 : index
    %214 = vector.load %arg2[%c0_204, %c0_205, %c0_206, %c6_207, %c1_208] : memref<1x1x4x9x17xf32, #tpu.memory_space<vmem>>, vector<1x1x4x1x16xf32>
    %215 = vector.shape_cast %214 : vector<1x1x4x1x16xf32> to vector<4x16xf32>
    %c0_209 = arith.constant 0 : index
    %c0_210 = arith.constant 0 : index
    %c0_211 = arith.constant 0 : index
    %c7 = arith.constant 7 : index
    %c0_212 = arith.constant 0 : index
    %216 = vector.load %arg2[%c0_209, %c0_210, %c0_211, %c7, %c0_212] : memref<1x1x4x9x17xf32, #tpu.memory_space<vmem>>, vector<1x1x4x1x16xf32>
    %217 = vector.shape_cast %216 : vector<1x1x4x1x16xf32> to vector<4x16xf32>
    %c0_213 = arith.constant 0 : index
    %c0_214 = arith.constant 0 : index
    %c0_215 = arith.constant 0 : index
    %c7_216 = arith.constant 7 : index
    %c1_217 = arith.constant 1 : index
    %218 = vector.load %arg2[%c0_213, %c0_214, %c0_215, %c7_216, %c1_217] : memref<1x1x4x9x17xf32, #tpu.memory_space<vmem>>, vector<1x1x4x1x16xf32>
    %219 = vector.shape_cast %218 : vector<1x1x4x1x16xf32> to vector<4x16xf32>
    %220 = tpu.concatenate %213, %215, %217, %219 in 0 : vector<4x16xf32>, vector<4x16xf32>, vector<4x16xf32>, vector<4x16xf32> -> vector<16x16xf32>
    %cst_218 = arith.constant dense<0.000000e+00> : vector<32x16xf32>
    %221 = tpu.matmul %0, %220, %cst_218 {dimension_numbers = #tpu.dot_dimension_numbers<[1], [0], [0], [1], [0, 0, 1, 1], [], []>} : vector<32x16xf32>, vector<16x16xf32>, vector<32x16xf32> -> vector<32x16xf32>
    %222 = vector.extract_strided_slice %221 {offsets = [0, 0], sizes = [8, 16], strides = [1, 1]} : vector<32x16xf32> to vector<8x16xf32>
    %cst_219 = arith.constant dense<0.000000e+00> : vector<8x32xf32>
    %223 = tpu.matmul %222, %1, %cst_219 {dimension_numbers = #tpu.dot_dimension_numbers<[1], [0], [0], [1], [0, 0, 1, 1], [], []>} : vector<8x16xf32>, vector<16x32xf32>, vector<8x32xf32> -> vector<8x32xf32>
    %224 = vector.extract_strided_slice %221 {offsets = [8, 0], sizes = [8, 16], strides = [1, 1]} : vector<32x16xf32> to vector<8x16xf32>
    %cst_220 = arith.constant dense<0.000000e+00> : vector<8x32xf32>
    %225 = tpu.matmul %224, %2, %cst_220 {dimension_numbers = #tpu.dot_dimension_numbers<[1], [0], [0], [1], [0, 0, 1, 1], [], []>} : vector<8x16xf32>, vector<16x32xf32>, vector<8x32xf32> -> vector<8x32xf32>
    %226 = arith.addf %223, %225 : vector<8x32xf32>
    %227 = arith.addf %226, %5 : vector<8x32xf32>
    %228 = vector.extract_strided_slice %221 {offsets = [16, 0], sizes = [8, 16], strides = [1, 1]} : vector<32x16xf32> to vector<8x16xf32>
    %cst_221 = arith.constant dense<0.000000e+00> : vector<8x32xf32>
    %229 = tpu.matmul %228, %1, %cst_221 {dimension_numbers = #tpu.dot_dimension_numbers<[1], [0], [0], [1], [0, 0, 1, 1], [], []>} : vector<8x16xf32>, vector<16x32xf32>, vector<8x32xf32> -> vector<8x32xf32>
    %230 = vector.extract_strided_slice %221 {offsets = [24, 0], sizes = [8, 16], strides = [1, 1]} : vector<32x16xf32> to vector<8x16xf32>
    %cst_222 = arith.constant dense<0.000000e+00> : vector<8x32xf32>
    %231 = tpu.matmul %230, %2, %cst_222 {dimension_numbers = #tpu.dot_dimension_numbers<[1], [0], [0], [1], [0, 0, 1, 1], [], []>} : vector<8x16xf32>, vector<16x32xf32>, vector<8x32xf32> -> vector<8x32xf32>
    %232 = arith.addf %229, %231 : vector<8x32xf32>
    %233 = arith.addf %232, %5 : vector<8x32xf32>
    %c0_223 = arith.constant 0 : index
    %c0_224 = arith.constant 0 : index
    %c6_225 = arith.constant 6 : index
    %c0_226 = arith.constant 0 : index
    %234 = vector.load %arg7[%c0_223, %c0_224, %c6_225, %c0_226] : memref<1x8x8x64xf32, #tpu.memory_space<vmem>>, vector<1x8x1x32xf32>
    %235 = vector.shape_cast %234 : vector<1x8x1x32xf32> to vector<8x32xf32>
    %236 = vector.shape_cast %227 : vector<8x32xf32> to vector<1x8x1x32xf32>
    tpu.vector_store %arg7[%c0_223, %c0_224, %c6_225, %c0_226], %236 {strides = array<i32>} : memref<1x8x8x64xf32, #tpu.memory_space<vmem>>, vector<1x8x1x32xf32>,
    %c0_227 = arith.constant 0 : index
    %c0_228 = arith.constant 0 : index
    %c6_229 = arith.constant 6 : index
    %c32_230 = arith.constant 32 : index
    %237 = vector.load %arg7[%c0_227, %c0_228, %c6_229, %c32_230] : memref<1x8x8x64xf32, #tpu.memory_space<vmem>>, vector<1x8x1x32xf32>
    %238 = vector.shape_cast %237 : vector<1x8x1x32xf32> to vector<8x32xf32>
    %239 = vector.shape_cast %233 : vector<8x32xf32> to vector<1x8x1x32xf32>
    tpu.vector_store %arg7[%c0_227, %c0_228, %c6_229, %c32_230], %239 {strides = array<i32>} : memref<1x8x8x64xf32, #tpu.memory_space<vmem>>, vector<1x8x1x32xf32>,
    %240 = arith.addf %207, %227 : vector<8x32xf32>
    %241 = arith.addf %240, %233 : vector<8x32xf32>
    %242 = arith.mulf %227, %227 : vector<8x32xf32>
    %243 = arith.addf %211, %242 : vector<8x32xf32>
    %244 = arith.mulf %233, %233 : vector<8x32xf32>
    %245 = arith.addf %243, %244 : vector<8x32xf32>
    %c0_231 = arith.constant 0 : index
    %c0_232 = arith.constant 0 : index
    %c0_233 = arith.constant 0 : index
    %c7_234 = arith.constant 7 : index
    %c0_235 = arith.constant 0 : index
    %246 = vector.load %arg2[%c0_231, %c0_232, %c0_233, %c7_234, %c0_235] : memref<1x1x4x9x17xf32, #tpu.memory_space<vmem>>, vector<1x1x4x1x16xf32>
    %247 = vector.shape_cast %246 : vector<1x1x4x1x16xf32> to vector<4x16xf32>
    %c0_236 = arith.constant 0 : index
    %c0_237 = arith.constant 0 : index
    %c0_238 = arith.constant 0 : index
    %c7_239 = arith.constant 7 : index
    %c1_240 = arith.constant 1 : index
    %248 = vector.load %arg2[%c0_236, %c0_237, %c0_238, %c7_239, %c1_240] : memref<1x1x4x9x17xf32, #tpu.memory_space<vmem>>, vector<1x1x4x1x16xf32>
    %249 = vector.shape_cast %248 : vector<1x1x4x1x16xf32> to vector<4x16xf32>
    %c0_241 = arith.constant 0 : index
    %c0_242 = arith.constant 0 : index
    %c0_243 = arith.constant 0 : index
    %c8 = arith.constant 8 : index
    %c0_244 = arith.constant 0 : index
    %250 = vector.load %arg2[%c0_241, %c0_242, %c0_243, %c8, %c0_244] : memref<1x1x4x9x17xf32, #tpu.memory_space<vmem>>, vector<1x1x4x1x16xf32>
    %251 = vector.shape_cast %250 : vector<1x1x4x1x16xf32> to vector<4x16xf32>
    %c0_245 = arith.constant 0 : index
    %c0_246 = arith.constant 0 : index
    %c0_247 = arith.constant 0 : index
    %c8_248 = arith.constant 8 : index
    %c1_249 = arith.constant 1 : index
    %252 = vector.load %arg2[%c0_245, %c0_246, %c0_247, %c8_248, %c1_249] : memref<1x1x4x9x17xf32, #tpu.memory_space<vmem>>, vector<1x1x4x1x16xf32>
    %253 = vector.shape_cast %252 : vector<1x1x4x1x16xf32> to vector<4x16xf32>
    %254 = tpu.concatenate %247, %249, %251, %253 in 0 : vector<4x16xf32>, vector<4x16xf32>, vector<4x16xf32>, vector<4x16xf32> -> vector<16x16xf32>
    %cst_250 = arith.constant dense<0.000000e+00> : vector<32x16xf32>
    %255 = tpu.matmul %0, %254, %cst_250 {dimension_numbers = #tpu.dot_dimension_numbers<[1], [0], [0], [1], [0, 0, 1, 1], [], []>} : vector<32x16xf32>, vector<16x16xf32>, vector<32x16xf32> -> vector<32x16xf32>
    %256 = vector.extract_strided_slice %255 {offsets = [0, 0], sizes = [8, 16], strides = [1, 1]} : vector<32x16xf32> to vector<8x16xf32>
    %cst_251 = arith.constant dense<0.000000e+00> : vector<8x32xf32>
    %257 = tpu.matmul %256, %1, %cst_251 {dimension_numbers = #tpu.dot_dimension_numbers<[1], [0], [0], [1], [0, 0, 1, 1], [], []>} : vector<8x16xf32>, vector<16x32xf32>, vector<8x32xf32> -> vector<8x32xf32>
    %258 = vector.extract_strided_slice %255 {offsets = [8, 0], sizes = [8, 16], strides = [1, 1]} : vector<32x16xf32> to vector<8x16xf32>
    %cst_252 = arith.constant dense<0.000000e+00> : vector<8x32xf32>
    %259 = tpu.matmul %258, %2, %cst_252 {dimension_numbers = #tpu.dot_dimension_numbers<[1], [0], [0], [1], [0, 0, 1, 1], [], []>} : vector<8x16xf32>, vector<16x32xf32>, vector<8x32xf32> -> vector<8x32xf32>
    %260 = arith.addf %257, %259 : vector<8x32xf32>
    %261 = arith.addf %260, %5 : vector<8x32xf32>
    %262 = vector.extract_strided_slice %255 {offsets = [16, 0], sizes = [8, 16], strides = [1, 1]} : vector<32x16xf32> to vector<8x16xf32>
    %cst_253 = arith.constant dense<0.000000e+00> : vector<8x32xf32>
    %263 = tpu.matmul %262, %1, %cst_253 {dimension_numbers = #tpu.dot_dimension_numbers<[1], [0], [0], [1], [0, 0, 1, 1], [], []>} : vector<8x16xf32>, vector<16x32xf32>, vector<8x32xf32> -> vector<8x32xf32>
    %264 = vector.extract_strided_slice %255 {offsets = [24, 0], sizes = [8, 16], strides = [1, 1]} : vector<32x16xf32> to vector<8x16xf32>
    %cst_254 = arith.constant dense<0.000000e+00> : vector<8x32xf32>
    %265 = tpu.matmul %264, %2, %cst_254 {dimension_numbers = #tpu.dot_dimension_numbers<[1], [0], [0], [1], [0, 0, 1, 1], [], []>} : vector<8x16xf32>, vector<16x32xf32>, vector<8x32xf32> -> vector<8x32xf32>
    %266 = arith.addf %263, %265 : vector<8x32xf32>
    %267 = arith.addf %266, %5 : vector<8x32xf32>
    %c0_255 = arith.constant 0 : index
    %c0_256 = arith.constant 0 : index
    %c7_257 = arith.constant 7 : index
    %c0_258 = arith.constant 0 : index
    %268 = vector.load %arg7[%c0_255, %c0_256, %c7_257, %c0_258] : memref<1x8x8x64xf32, #tpu.memory_space<vmem>>, vector<1x8x1x32xf32>
    %269 = vector.shape_cast %268 : vector<1x8x1x32xf32> to vector<8x32xf32>
    %270 = vector.shape_cast %261 : vector<8x32xf32> to vector<1x8x1x32xf32>
    tpu.vector_store %arg7[%c0_255, %c0_256, %c7_257, %c0_258], %270 {strides = array<i32>} : memref<1x8x8x64xf32, #tpu.memory_space<vmem>>, vector<1x8x1x32xf32>,
    %c0_259 = arith.constant 0 : index
    %c0_260 = arith.constant 0 : index
    %c7_261 = arith.constant 7 : index
    %c32_262 = arith.constant 32 : index
    %271 = vector.load %arg7[%c0_259, %c0_260, %c7_261, %c32_262] : memref<1x8x8x64xf32, #tpu.memory_space<vmem>>, vector<1x8x1x32xf32>
    %272 = vector.shape_cast %271 : vector<1x8x1x32xf32> to vector<8x32xf32>
    %273 = vector.shape_cast %267 : vector<8x32xf32> to vector<1x8x1x32xf32>
    tpu.vector_store %arg7[%c0_259, %c0_260, %c7_261, %c32_262], %273 {strides = array<i32>} : memref<1x8x8x64xf32, #tpu.memory_space<vmem>>, vector<1x8x1x32xf32>,
    %274 = arith.addf %241, %261 : vector<8x32xf32>
    %275 = arith.addf %274, %267 : vector<8x32xf32>
    %276 = arith.mulf %261, %261 : vector<8x32xf32>
    %277 = arith.addf %245, %276 : vector<8x32xf32>
    %278 = arith.mulf %267, %267 : vector<8x32xf32>
    %279 = arith.addf %277, %278 : vector<8x32xf32>
    %cst_263 = arith.constant dense<0.000000e+00> : vector<8xf32>
    %280 = vector.multi_reduction <add>, %275, %cst_263 [1] : vector<8x32xf32> to vector<8xf32>
    %281 = vector.shape_cast %280 : vector<8xf32> to vector<8x1xf32>
    %cst_264 = arith.constant dense<0.000000e+00> : vector<8xf32>
    %282 = vector.multi_reduction <add>, %279, %cst_264 [1] : vector<8x32xf32> to vector<8xf32>
    %283 = vector.shape_cast %282 : vector<8xf32> to vector<8x1xf32>
    %284 = tpu.concatenate %281, %283 in 1 : vector<8x1xf32>, vector<8x1xf32> -> vector<8x2xf32>
    %c0_265 = arith.constant 0 : index
    %c0_266 = arith.constant 0 : index
    %c0_267 = arith.constant 0 : index
    %c0_268 = arith.constant 0 : index
    %285 = vector.load %arg8[%c0_265, %c0_266, %c0_267, %c0_268] : memref<1x1x8x2xf32, #tpu.memory_space<vmem>>, vector<1x1x8x2xf32>
    %286 = vector.shape_cast %285 : vector<1x1x8x2xf32> to vector<8x2xf32>
    %287 = vector.shape_cast %284 : vector<8x2xf32> to vector<1x1x8x2xf32>
    tpu.vector_store %arg8[%c0_265, %c0_266, %c0_267, %c0_268], %287 {strides = array<i32>} : memref<1x1x8x2xf32, #tpu.memory_space<vmem>>, vector<1x1x8x2xf32>,
    return
  }
  func.func @transform_0(%arg0: i32, %arg1: i32) -> (i32, i32, i32, i32, i32) {
    %c0_i32 = arith.constant 0 : i32
    %c0_i32_0 = arith.constant 0 : i32
    %c0_i32_1 = arith.constant 0 : i32
    %c0_i32_2 = arith.constant 0 : i32
    return %arg0, %arg1, %c0_i32, %c0_i32_0, %c0_i32_1 : i32, i32, i32, i32, i32
  }
  func.func @transform_1(%arg0: i32, %arg1: i32) -> (i32, i32) {
    %c0_i32 = arith.constant 0 : i32
    %c0_i32_0 = arith.constant 0 : i32
    %c0_i32_1 = arith.constant 0 : i32
    return %c0_i32, %c0_i32_0 : i32, i32
  }
  func.func @transform_2(%arg0: i32, %arg1: i32) -> (i32, i32) {
    %c0_i32 = arith.constant 0 : i32
    %c0_i32_0 = arith.constant 0 : i32
    %c0_i32_1 = arith.constant 0 : i32
    return %c0_i32, %c0_i32_0 : i32, i32
  }
  func.func @transform_3(%arg0: i32, %arg1: i32) -> (i32, i32) {
    %c0_i32 = arith.constant 0 : i32
    %c0_i32_0 = arith.constant 0 : i32
    %c0_i32_1 = arith.constant 0 : i32
    return %c0_i32, %c0_i32_0 : i32, i32
  }
  func.func @transform_4(%arg0: i32, %arg1: i32) -> (i32, i32) {
    %c0_i32 = arith.constant 0 : i32
    %c0_i32_0 = arith.constant 0 : i32
    %c0_i32_1 = arith.constant 0 : i32
    return %c0_i32, %c0_i32_0 : i32, i32
  }
  func.func @transform_5(%arg0: i32, %arg1: i32) -> (i32, i32, i32, i32) {
    %c0_i32 = arith.constant 0 : i32
    %c0_i32_0 = arith.constant 0 : i32
    %c0_i32_1 = arith.constant 0 : i32
    return %arg0, %c0_i32, %arg1, %c0_i32_0 : i32, i32, i32, i32
  }
  func.func @transform_6(%arg0: i32, %arg1: i32) -> (i32, i32, i32, i32) {
    %c0_i32 = arith.constant 0 : i32
    %c0_i32_0 = arith.constant 0 : i32
    %c0_i32_1 = arith.constant 0 : i32
    return %arg0, %arg1, %c0_i32, %c0_i32_0 : i32, i32, i32, i32
  }
}

module attributes {stable_mosaic.version = 11 : i64} {
  func.func @_bn_swish_kernel(%arg0: i32, %arg1: i32, %arg2: memref<1x3x2048xf32, #tpu.memory_space<vmem>>, %arg3: memref<3x1xf32, #tpu.memory_space<vmem>>, %arg4: memref<3x1xf32, #tpu.memory_space<vmem>>, %arg5: memref<1x3x2048xf32, #tpu.memory_space<vmem>>) attributes {dimension_semantics = [#tpu.dimension_semantics<parallel>, #tpu.dimension_semantics<parallel>], iteration_bounds = array<i64: 2, 2>, scalar_prefetch = 0 : i64, scratch_operands = 0 : i64, tpu.core_type = #tpu.core_type<tc>, window_params = [{transform_indices = @transform_0, window_bounds = array<i64: 1, 3, 2048>}, {pipeline_mode = #tpu.pipeline_mode<synchronous>, transform_indices = @transform_1, window_bounds = array<i64: 3, 1>}, {pipeline_mode = #tpu.pipeline_mode<synchronous>, transform_indices = @transform_2, window_bounds = array<i64: 3, 1>}, {transform_indices = @transform_3, window_bounds = array<i64: 1, 3, 2048>}]} {
    %c0 = arith.constant 0 : index
    %c0_0 = arith.constant 0 : index
    %c0_1 = arith.constant 0 : index
    %0 = vector.load %arg2[%c0, %c0_0, %c0_1] : memref<1x3x2048xf32, #tpu.memory_space<vmem>>, vector<1x3x2048xf32>
    %c0_2 = arith.constant 0 : index
    %c0_3 = arith.constant 0 : index
    %1 = vector.load %arg3[%c0_2, %c0_3] : memref<3x1xf32, #tpu.memory_space<vmem>>, vector<3x1xf32>
    %2 = vector.shape_cast %1 : vector<3x1xf32> to vector<1x3x1xf32>
    %3 = vector.broadcast %2 : vector<1x3x1xf32> to vector<1x3x2048xf32>
    %4 = arith.mulf %0, %3 : vector<1x3x2048xf32>
    %c0_4 = arith.constant 0 : index
    %c0_5 = arith.constant 0 : index
    %5 = vector.load %arg4[%c0_4, %c0_5] : memref<3x1xf32, #tpu.memory_space<vmem>>, vector<3x1xf32>
    %6 = vector.shape_cast %5 : vector<3x1xf32> to vector<1x3x1xf32>
    %7 = vector.broadcast %6 : vector<1x3x1xf32> to vector<1x3x2048xf32>
    %8 = arith.addf %4, %7 : vector<1x3x2048xf32>
    %9 = arith.negf %8 : vector<1x3x2048xf32>
    %10 = math.exp %9 : vector<1x3x2048xf32>
    %cst = arith.constant 1.000000e+00 : f32
    %11 = vector.broadcast %cst : f32 to vector<1x3x2048xf32>
    %12 = arith.addf %11, %10 : vector<1x3x2048xf32>
    %13 = arith.divf %11, %12 : vector<1x3x2048xf32>
    %14 = arith.mulf %8, %13 : vector<1x3x2048xf32>
    %c0_6 = arith.constant 0 : index
    %c0_7 = arith.constant 0 : index
    %c0_8 = arith.constant 0 : index
    %15 = vector.load %arg5[%c0_6, %c0_7, %c0_8] : memref<1x3x2048xf32, #tpu.memory_space<vmem>>, vector<1x3x2048xf32>
    tpu.vector_store %arg5[%c0_6, %c0_7, %c0_8], %14 {strides = array<i32>} : memref<1x3x2048xf32, #tpu.memory_space<vmem>>, vector<1x3x2048xf32>,
    return
  }
  func.func @transform_0(%arg0: i32, %arg1: i32) -> (i32, i32, i32) {
    %c0_i32 = arith.constant 0 : i32
    %c0_i32_0 = arith.constant 0 : i32
    return %arg0, %c0_i32, %arg1 : i32, i32, i32
  }
  func.func @transform_1(%arg0: i32, %arg1: i32) -> (i32, i32) {
    %c0_i32 = arith.constant 0 : i32
    %c0_i32_0 = arith.constant 0 : i32
    %c0_i32_1 = arith.constant 0 : i32
    return %c0_i32, %c0_i32_0 : i32, i32
  }
  func.func @transform_2(%arg0: i32, %arg1: i32) -> (i32, i32) {
    %c0_i32 = arith.constant 0 : i32
    %c0_i32_0 = arith.constant 0 : i32
    %c0_i32_1 = arith.constant 0 : i32
    return %c0_i32, %c0_i32_0 : i32, i32
  }
  func.func @transform_3(%arg0: i32, %arg1: i32) -> (i32, i32, i32) {
    %c0_i32 = arith.constant 0 : i32
    %c0_i32_0 = arith.constant 0 : i32
    return %arg0, %c0_i32, %arg1 : i32, i32, i32
  }
}

module attributes {stable_mosaic.version = 11 : i64} {
  func.func @_convt_kernel(%arg0: i32, %arg1: i32, %arg2: memref<1x1x8x17x33xf32, #tpu.memory_space<vmem>>, %arg3: memref<12x32xf32, #tpu.memory_space<vmem>>, %arg4: memref<32x64xf32, #tpu.memory_space<vmem>>, %arg5: memref<32x64xf32, #tpu.memory_space<vmem>>, %arg6: memref<3x1xf32, #tpu.memory_space<vmem>>, %arg7: memref<1x3x16x128xf32, #tpu.memory_space<vmem>>, %arg8: memref<1x1x3x2xf32, #tpu.memory_space<vmem>>) attributes {dimension_semantics = [#tpu.dimension_semantics<parallel>, #tpu.dimension_semantics<parallel>], iteration_bounds = array<i64: 2, 2>, scalar_prefetch = 0 : i64, scratch_operands = 0 : i64, tpu.core_type = #tpu.core_type<tc>, window_params = [{transform_indices = @transform_0, window_bounds = array<i64: 1, 1, 8, 17, 33>}, {pipeline_mode = #tpu.pipeline_mode<synchronous>, transform_indices = @transform_1, window_bounds = array<i64: 12, 32>}, {pipeline_mode = #tpu.pipeline_mode<synchronous>, transform_indices = @transform_2, window_bounds = array<i64: 32, 64>}, {pipeline_mode = #tpu.pipeline_mode<synchronous>, transform_indices = @transform_3, window_bounds = array<i64: 32, 64>}, {pipeline_mode = #tpu.pipeline_mode<synchronous>, transform_indices = @transform_4, window_bounds = array<i64: 3, 1>}, {transform_indices = @transform_5, window_bounds = array<i64: 1, 3, 16, 128>}, {transform_indices = @transform_6, window_bounds = array<i64: 1, 1, 3, 2>}]} {
    %c0 = arith.constant 0 : index
    %c0_0 = arith.constant 0 : index
    %0 = vector.load %arg3[%c0, %c0_0] : memref<12x32xf32, #tpu.memory_space<vmem>>, vector<12x32xf32>
    %c0_1 = arith.constant 0 : index
    %c0_2 = arith.constant 0 : index
    %1 = vector.load %arg4[%c0_1, %c0_2] : memref<32x64xf32, #tpu.memory_space<vmem>>, vector<32x64xf32>
    %c0_3 = arith.constant 0 : index
    %c0_4 = arith.constant 0 : index
    %2 = vector.load %arg5[%c0_3, %c0_4] : memref<32x64xf32, #tpu.memory_space<vmem>>, vector<32x64xf32>
    %c0_5 = arith.constant 0 : index
    %c0_6 = arith.constant 0 : index
    %3 = vector.load %arg6[%c0_5, %c0_6] : memref<3x1xf32, #tpu.memory_space<vmem>>, vector<3x1xf32>
    %4 = vector.shape_cast %3 : vector<3x1xf32> to vector<3x1xf32>
    %5 = vector.broadcast %4 : vector<3x1xf32> to vector<3x64xf32>
    %cst = arith.constant 0.000000e+00 : f32
    %6 = vector.broadcast %cst : f32 to vector<3x64xf32>
    %cst_7 = arith.constant 0.000000e+00 : f32
    %7 = vector.broadcast %cst_7 : f32 to vector<3x64xf32>
    %c0_8 = arith.constant 0 : index
    %c0_9 = arith.constant 0 : index
    %c0_10 = arith.constant 0 : index
    %c0_11 = arith.constant 0 : index
    %c0_12 = arith.constant 0 : index
    %8 = vector.load %arg2[%c0_8, %c0_9, %c0_10, %c0_11, %c0_12] : memref<1x1x8x17x33xf32, #tpu.memory_space<vmem>>, vector<1x1x8x1x32xf32>
    %9 = vector.shape_cast %8 : vector<1x1x8x1x32xf32> to vector<8x32xf32>
    %c0_13 = arith.constant 0 : index
    %c0_14 = arith.constant 0 : index
    %c0_15 = arith.constant 0 : index
    %c0_16 = arith.constant 0 : index
    %c1 = arith.constant 1 : index
    %10 = vector.load %arg2[%c0_13, %c0_14, %c0_15, %c0_16, %c1] : memref<1x1x8x17x33xf32, #tpu.memory_space<vmem>>, vector<1x1x8x1x32xf32>
    %11 = vector.shape_cast %10 : vector<1x1x8x1x32xf32> to vector<8x32xf32>
    %c0_17 = arith.constant 0 : index
    %c0_18 = arith.constant 0 : index
    %c0_19 = arith.constant 0 : index
    %c1_20 = arith.constant 1 : index
    %c0_21 = arith.constant 0 : index
    %12 = vector.load %arg2[%c0_17, %c0_18, %c0_19, %c1_20, %c0_21] : memref<1x1x8x17x33xf32, #tpu.memory_space<vmem>>, vector<1x1x8x1x32xf32>
    %13 = vector.shape_cast %12 : vector<1x1x8x1x32xf32> to vector<8x32xf32>
    %c0_22 = arith.constant 0 : index
    %c0_23 = arith.constant 0 : index
    %c0_24 = arith.constant 0 : index
    %c1_25 = arith.constant 1 : index
    %c1_26 = arith.constant 1 : index
    %14 = vector.load %arg2[%c0_22, %c0_23, %c0_24, %c1_25, %c1_26] : memref<1x1x8x17x33xf32, #tpu.memory_space<vmem>>, vector<1x1x8x1x32xf32>
    %15 = vector.shape_cast %14 : vector<1x1x8x1x32xf32> to vector<8x32xf32>
    %16 = tpu.concatenate %9, %11, %13, %15 in 0 : vector<8x32xf32>, vector<8x32xf32>, vector<8x32xf32>, vector<8x32xf32> -> vector<32x32xf32>
    %cst_27 = arith.constant dense<0.000000e+00> : vector<12x32xf32>
    %17 = tpu.matmul %0, %16, %cst_27 {dimension_numbers = #tpu.dot_dimension_numbers<[1], [0], [0], [1], [0, 0, 1, 1], [], []>} : vector<12x32xf32>, vector<32x32xf32>, vector<12x32xf32> -> vector<12x32xf32>
    %18 = vector.extract_strided_slice %17 {offsets = [0, 0], sizes = [3, 32], strides = [1, 1]} : vector<12x32xf32> to vector<3x32xf32>
    %cst_28 = arith.constant dense<0.000000e+00> : vector<3x64xf32>
    %19 = tpu.matmul %18, %1, %cst_28 {dimension_numbers = #tpu.dot_dimension_numbers<[1], [0], [0], [1], [0, 0, 1, 1], [], []>} : vector<3x32xf32>, vector<32x64xf32>, vector<3x64xf32> -> vector<3x64xf32>
    %20 = vector.extract_strided_slice %17 {offsets = [3, 0], sizes = [3, 32], strides = [1, 1]} : vector<12x32xf32> to vector<3x32xf32>
    %cst_29 = arith.constant dense<0.000000e+00> : vector<3x64xf32>
    %21 = tpu.matmul %20, %2, %cst_29 {dimension_numbers = #tpu.dot_dimension_numbers<[1], [0], [0], [1], [0, 0, 1, 1], [], []>} : vector<3x32xf32>, vector<32x64xf32>, vector<3x64xf32> -> vector<3x64xf32>
    %22 = arith.addf %19, %21 : vector<3x64xf32>
    %23 = arith.addf %22, %5 : vector<3x64xf32>
    %24 = vector.extract_strided_slice %17 {offsets = [6, 0], sizes = [3, 32], strides = [1, 1]} : vector<12x32xf32> to vector<3x32xf32>
    %cst_30 = arith.constant dense<0.000000e+00> : vector<3x64xf32>
    %25 = tpu.matmul %24, %1, %cst_30 {dimension_numbers = #tpu.dot_dimension_numbers<[1], [0], [0], [1], [0, 0, 1, 1], [], []>} : vector<3x32xf32>, vector<32x64xf32>, vector<3x64xf32> -> vector<3x64xf32>
    %26 = vector.extract_strided_slice %17 {offsets = [9, 0], sizes = [3, 32], strides = [1, 1]} : vector<12x32xf32> to vector<3x32xf32>
    %cst_31 = arith.constant dense<0.000000e+00> : vector<3x64xf32>
    %27 = tpu.matmul %26, %2, %cst_31 {dimension_numbers = #tpu.dot_dimension_numbers<[1], [0], [0], [1], [0, 0, 1, 1], [], []>} : vector<3x32xf32>, vector<32x64xf32>, vector<3x64xf32> -> vector<3x64xf32>
    %28 = arith.addf %25, %27 : vector<3x64xf32>
    %29 = arith.addf %28, %5 : vector<3x64xf32>
    %c0_32 = arith.constant 0 : index
    %c0_33 = arith.constant 0 : index
    %c0_34 = arith.constant 0 : index
    %c0_35 = arith.constant 0 : index
    %30 = vector.load %arg7[%c0_32, %c0_33, %c0_34, %c0_35] : memref<1x3x16x128xf32, #tpu.memory_space<vmem>>, vector<1x3x1x64xf32>
    %31 = vector.shape_cast %30 : vector<1x3x1x64xf32> to vector<3x64xf32>
    %32 = vector.shape_cast %23 : vector<3x64xf32> to vector<1x3x1x64xf32>
    tpu.vector_store %arg7[%c0_32, %c0_33, %c0_34, %c0_35], %32 {strides = array<i32>} : memref<1x3x16x128xf32, #tpu.memory_space<vmem>>, vector<1x3x1x64xf32>,
    %c0_36 = arith.constant 0 : index
    %c0_37 = arith.constant 0 : index
    %c0_38 = arith.constant 0 : index
    %c64 = arith.constant 64 : index
    %33 = vector.load %arg7[%c0_36, %c0_37, %c0_38, %c64] : memref<1x3x16x128xf32, #tpu.memory_space<vmem>>, vector<1x3x1x64xf32>
    %34 = vector.shape_cast %33 : vector<1x3x1x64xf32> to vector<3x64xf32>
    %35 = vector.shape_cast %29 : vector<3x64xf32> to vector<1x3x1x64xf32>
    tpu.vector_store %arg7[%c0_36, %c0_37, %c0_38, %c64], %35 {strides = array<i32>} : memref<1x3x16x128xf32, #tpu.memory_space<vmem>>, vector<1x3x1x64xf32>,
    %36 = arith.addf %6, %23 : vector<3x64xf32>
    %37 = arith.addf %36, %29 : vector<3x64xf32>
    %38 = arith.mulf %23, %23 : vector<3x64xf32>
    %39 = arith.addf %7, %38 : vector<3x64xf32>
    %40 = arith.mulf %29, %29 : vector<3x64xf32>
    %41 = arith.addf %39, %40 : vector<3x64xf32>
    %c0_39 = arith.constant 0 : index
    %c0_40 = arith.constant 0 : index
    %c0_41 = arith.constant 0 : index
    %c1_42 = arith.constant 1 : index
    %c0_43 = arith.constant 0 : index
    %42 = vector.load %arg2[%c0_39, %c0_40, %c0_41, %c1_42, %c0_43] : memref<1x1x8x17x33xf32, #tpu.memory_space<vmem>>, vector<1x1x8x1x32xf32>
    %43 = vector.shape_cast %42 : vector<1x1x8x1x32xf32> to vector<8x32xf32>
    %c0_44 = arith.constant 0 : index
    %c0_45 = arith.constant 0 : index
    %c0_46 = arith.constant 0 : index
    %c1_47 = arith.constant 1 : index
    %c1_48 = arith.constant 1 : index
    %44 = vector.load %arg2[%c0_44, %c0_45, %c0_46, %c1_47, %c1_48] : memref<1x1x8x17x33xf32, #tpu.memory_space<vmem>>, vector<1x1x8x1x32xf32>
    %45 = vector.shape_cast %44 : vector<1x1x8x1x32xf32> to vector<8x32xf32>
    %c0_49 = arith.constant 0 : index
    %c0_50 = arith.constant 0 : index
    %c0_51 = arith.constant 0 : index
    %c2 = arith.constant 2 : index
    %c0_52 = arith.constant 0 : index
    %46 = vector.load %arg2[%c0_49, %c0_50, %c0_51, %c2, %c0_52] : memref<1x1x8x17x33xf32, #tpu.memory_space<vmem>>, vector<1x1x8x1x32xf32>
    %47 = vector.shape_cast %46 : vector<1x1x8x1x32xf32> to vector<8x32xf32>
    %c0_53 = arith.constant 0 : index
    %c0_54 = arith.constant 0 : index
    %c0_55 = arith.constant 0 : index
    %c2_56 = arith.constant 2 : index
    %c1_57 = arith.constant 1 : index
    %48 = vector.load %arg2[%c0_53, %c0_54, %c0_55, %c2_56, %c1_57] : memref<1x1x8x17x33xf32, #tpu.memory_space<vmem>>, vector<1x1x8x1x32xf32>
    %49 = vector.shape_cast %48 : vector<1x1x8x1x32xf32> to vector<8x32xf32>
    %50 = tpu.concatenate %43, %45, %47, %49 in 0 : vector<8x32xf32>, vector<8x32xf32>, vector<8x32xf32>, vector<8x32xf32> -> vector<32x32xf32>
    %cst_58 = arith.constant dense<0.000000e+00> : vector<12x32xf32>
    %51 = tpu.matmul %0, %50, %cst_58 {dimension_numbers = #tpu.dot_dimension_numbers<[1], [0], [0], [1], [0, 0, 1, 1], [], []>} : vector<12x32xf32>, vector<32x32xf32>, vector<12x32xf32> -> vector<12x32xf32>
    %52 = vector.extract_strided_slice %51 {offsets = [0, 0], sizes = [3, 32], strides = [1, 1]} : vector<12x32xf32> to vector<3x32xf32>
    %cst_59 = arith.constant dense<0.000000e+00> : vector<3x64xf32>
    %53 = tpu.matmul %52, %1, %cst_59 {dimension_numbers = #tpu.dot_dimension_numbers<[1], [0], [0], [1], [0, 0, 1, 1], [], []>} : vector<3x32xf32>, vector<32x64xf32>, vector<3x64xf32> -> vector<3x64xf32>
    %54 = vector.extract_strided_slice %51 {offsets = [3, 0], sizes = [3, 32], strides = [1, 1]} : vector<12x32xf32> to vector<3x32xf32>
    %cst_60 = arith.constant dense<0.000000e+00> : vector<3x64xf32>
    %55 = tpu.matmul %54, %2, %cst_60 {dimension_numbers = #tpu.dot_dimension_numbers<[1], [0], [0], [1], [0, 0, 1, 1], [], []>} : vector<3x32xf32>, vector<32x64xf32>, vector<3x64xf32> -> vector<3x64xf32>
    %56 = arith.addf %53, %55 : vector<3x64xf32>
    %57 = arith.addf %56, %5 : vector<3x64xf32>
    %58 = vector.extract_strided_slice %51 {offsets = [6, 0], sizes = [3, 32], strides = [1, 1]} : vector<12x32xf32> to vector<3x32xf32>
    %cst_61 = arith.constant dense<0.000000e+00> : vector<3x64xf32>
    %59 = tpu.matmul %58, %1, %cst_61 {dimension_numbers = #tpu.dot_dimension_numbers<[1], [0], [0], [1], [0, 0, 1, 1], [], []>} : vector<3x32xf32>, vector<32x64xf32>, vector<3x64xf32> -> vector<3x64xf32>
    %60 = vector.extract_strided_slice %51 {offsets = [9, 0], sizes = [3, 32], strides = [1, 1]} : vector<12x32xf32> to vector<3x32xf32>
    %cst_62 = arith.constant dense<0.000000e+00> : vector<3x64xf32>
    %61 = tpu.matmul %60, %2, %cst_62 {dimension_numbers = #tpu.dot_dimension_numbers<[1], [0], [0], [1], [0, 0, 1, 1], [], []>} : vector<3x32xf32>, vector<32x64xf32>, vector<3x64xf32> -> vector<3x64xf32>
    %62 = arith.addf %59, %61 : vector<3x64xf32>
    %63 = arith.addf %62, %5 : vector<3x64xf32>
    %c0_63 = arith.constant 0 : index
    %c0_64 = arith.constant 0 : index
    %c1_65 = arith.constant 1 : index
    %c0_66 = arith.constant 0 : index
    %64 = vector.load %arg7[%c0_63, %c0_64, %c1_65, %c0_66] : memref<1x3x16x128xf32, #tpu.memory_space<vmem>>, vector<1x3x1x64xf32>
    %65 = vector.shape_cast %64 : vector<1x3x1x64xf32> to vector<3x64xf32>
    %66 = vector.shape_cast %57 : vector<3x64xf32> to vector<1x3x1x64xf32>
    tpu.vector_store %arg7[%c0_63, %c0_64, %c1_65, %c0_66], %66 {strides = array<i32>} : memref<1x3x16x128xf32, #tpu.memory_space<vmem>>, vector<1x3x1x64xf32>,
    %c0_67 = arith.constant 0 : index
    %c0_68 = arith.constant 0 : index
    %c1_69 = arith.constant 1 : index
    %c64_70 = arith.constant 64 : index
    %67 = vector.load %arg7[%c0_67, %c0_68, %c1_69, %c64_70] : memref<1x3x16x128xf32, #tpu.memory_space<vmem>>, vector<1x3x1x64xf32>
    %68 = vector.shape_cast %67 : vector<1x3x1x64xf32> to vector<3x64xf32>
    %69 = vector.shape_cast %63 : vector<3x64xf32> to vector<1x3x1x64xf32>
    tpu.vector_store %arg7[%c0_67, %c0_68, %c1_69, %c64_70], %69 {strides = array<i32>} : memref<1x3x16x128xf32, #tpu.memory_space<vmem>>, vector<1x3x1x64xf32>,
    %70 = arith.addf %37, %57 : vector<3x64xf32>
    %71 = arith.addf %70, %63 : vector<3x64xf32>
    %72 = arith.mulf %57, %57 : vector<3x64xf32>
    %73 = arith.addf %41, %72 : vector<3x64xf32>
    %74 = arith.mulf %63, %63 : vector<3x64xf32>
    %75 = arith.addf %73, %74 : vector<3x64xf32>
    %c0_71 = arith.constant 0 : index
    %c0_72 = arith.constant 0 : index
    %c0_73 = arith.constant 0 : index
    %c2_74 = arith.constant 2 : index
    %c0_75 = arith.constant 0 : index
    %76 = vector.load %arg2[%c0_71, %c0_72, %c0_73, %c2_74, %c0_75] : memref<1x1x8x17x33xf32, #tpu.memory_space<vmem>>, vector<1x1x8x1x32xf32>
    %77 = vector.shape_cast %76 : vector<1x1x8x1x32xf32> to vector<8x32xf32>
    %c0_76 = arith.constant 0 : index
    %c0_77 = arith.constant 0 : index
    %c0_78 = arith.constant 0 : index
    %c2_79 = arith.constant 2 : index
    %c1_80 = arith.constant 1 : index
    %78 = vector.load %arg2[%c0_76, %c0_77, %c0_78, %c2_79, %c1_80] : memref<1x1x8x17x33xf32, #tpu.memory_space<vmem>>, vector<1x1x8x1x32xf32>
    %79 = vector.shape_cast %78 : vector<1x1x8x1x32xf32> to vector<8x32xf32>
    %c0_81 = arith.constant 0 : index
    %c0_82 = arith.constant 0 : index
    %c0_83 = arith.constant 0 : index
    %c3 = arith.constant 3 : index
    %c0_84 = arith.constant 0 : index
    %80 = vector.load %arg2[%c0_81, %c0_82, %c0_83, %c3, %c0_84] : memref<1x1x8x17x33xf32, #tpu.memory_space<vmem>>, vector<1x1x8x1x32xf32>
    %81 = vector.shape_cast %80 : vector<1x1x8x1x32xf32> to vector<8x32xf32>
    %c0_85 = arith.constant 0 : index
    %c0_86 = arith.constant 0 : index
    %c0_87 = arith.constant 0 : index
    %c3_88 = arith.constant 3 : index
    %c1_89 = arith.constant 1 : index
    %82 = vector.load %arg2[%c0_85, %c0_86, %c0_87, %c3_88, %c1_89] : memref<1x1x8x17x33xf32, #tpu.memory_space<vmem>>, vector<1x1x8x1x32xf32>
    %83 = vector.shape_cast %82 : vector<1x1x8x1x32xf32> to vector<8x32xf32>
    %84 = tpu.concatenate %77, %79, %81, %83 in 0 : vector<8x32xf32>, vector<8x32xf32>, vector<8x32xf32>, vector<8x32xf32> -> vector<32x32xf32>
    %cst_90 = arith.constant dense<0.000000e+00> : vector<12x32xf32>
    %85 = tpu.matmul %0, %84, %cst_90 {dimension_numbers = #tpu.dot_dimension_numbers<[1], [0], [0], [1], [0, 0, 1, 1], [], []>} : vector<12x32xf32>, vector<32x32xf32>, vector<12x32xf32> -> vector<12x32xf32>
    %86 = vector.extract_strided_slice %85 {offsets = [0, 0], sizes = [3, 32], strides = [1, 1]} : vector<12x32xf32> to vector<3x32xf32>
    %cst_91 = arith.constant dense<0.000000e+00> : vector<3x64xf32>
    %87 = tpu.matmul %86, %1, %cst_91 {dimension_numbers = #tpu.dot_dimension_numbers<[1], [0], [0], [1], [0, 0, 1, 1], [], []>} : vector<3x32xf32>, vector<32x64xf32>, vector<3x64xf32> -> vector<3x64xf32>
    %88 = vector.extract_strided_slice %85 {offsets = [3, 0], sizes = [3, 32], strides = [1, 1]} : vector<12x32xf32> to vector<3x32xf32>
    %cst_92 = arith.constant dense<0.000000e+00> : vector<3x64xf32>
    %89 = tpu.matmul %88, %2, %cst_92 {dimension_numbers = #tpu.dot_dimension_numbers<[1], [0], [0], [1], [0, 0, 1, 1], [], []>} : vector<3x32xf32>, vector<32x64xf32>, vector<3x64xf32> -> vector<3x64xf32>
    %90 = arith.addf %87, %89 : vector<3x64xf32>
    %91 = arith.addf %90, %5 : vector<3x64xf32>
    %92 = vector.extract_strided_slice %85 {offsets = [6, 0], sizes = [3, 32], strides = [1, 1]} : vector<12x32xf32> to vector<3x32xf32>
    %cst_93 = arith.constant dense<0.000000e+00> : vector<3x64xf32>
    %93 = tpu.matmul %92, %1, %cst_93 {dimension_numbers = #tpu.dot_dimension_numbers<[1], [0], [0], [1], [0, 0, 1, 1], [], []>} : vector<3x32xf32>, vector<32x64xf32>, vector<3x64xf32> -> vector<3x64xf32>
    %94 = vector.extract_strided_slice %85 {offsets = [9, 0], sizes = [3, 32], strides = [1, 1]} : vector<12x32xf32> to vector<3x32xf32>
    %cst_94 = arith.constant dense<0.000000e+00> : vector<3x64xf32>
    %95 = tpu.matmul %94, %2, %cst_94 {dimension_numbers = #tpu.dot_dimension_numbers<[1], [0], [0], [1], [0, 0, 1, 1], [], []>} : vector<3x32xf32>, vector<32x64xf32>, vector<3x64xf32> -> vector<3x64xf32>
    %96 = arith.addf %93, %95 : vector<3x64xf32>
    %97 = arith.addf %96, %5 : vector<3x64xf32>
    %c0_95 = arith.constant 0 : index
    %c0_96 = arith.constant 0 : index
    %c2_97 = arith.constant 2 : index
    %c0_98 = arith.constant 0 : index
    %98 = vector.load %arg7[%c0_95, %c0_96, %c2_97, %c0_98] : memref<1x3x16x128xf32, #tpu.memory_space<vmem>>, vector<1x3x1x64xf32>
    %99 = vector.shape_cast %98 : vector<1x3x1x64xf32> to vector<3x64xf32>
    %100 = vector.shape_cast %91 : vector<3x64xf32> to vector<1x3x1x64xf32>
    tpu.vector_store %arg7[%c0_95, %c0_96, %c2_97, %c0_98], %100 {strides = array<i32>} : memref<1x3x16x128xf32, #tpu.memory_space<vmem>>, vector<1x3x1x64xf32>,
    %c0_99 = arith.constant 0 : index
    %c0_100 = arith.constant 0 : index
    %c2_101 = arith.constant 2 : index
    %c64_102 = arith.constant 64 : index
    %101 = vector.load %arg7[%c0_99, %c0_100, %c2_101, %c64_102] : memref<1x3x16x128xf32, #tpu.memory_space<vmem>>, vector<1x3x1x64xf32>
    %102 = vector.shape_cast %101 : vector<1x3x1x64xf32> to vector<3x64xf32>
    %103 = vector.shape_cast %97 : vector<3x64xf32> to vector<1x3x1x64xf32>
    tpu.vector_store %arg7[%c0_99, %c0_100, %c2_101, %c64_102], %103 {strides = array<i32>} : memref<1x3x16x128xf32, #tpu.memory_space<vmem>>, vector<1x3x1x64xf32>,
    %104 = arith.addf %71, %91 : vector<3x64xf32>
    %105 = arith.addf %104, %97 : vector<3x64xf32>
    %106 = arith.mulf %91, %91 : vector<3x64xf32>
    %107 = arith.addf %75, %106 : vector<3x64xf32>
    %108 = arith.mulf %97, %97 : vector<3x64xf32>
    %109 = arith.addf %107, %108 : vector<3x64xf32>
    %c0_103 = arith.constant 0 : index
    %c0_104 = arith.constant 0 : index
    %c0_105 = arith.constant 0 : index
    %c3_106 = arith.constant 3 : index
    %c0_107 = arith.constant 0 : index
    %110 = vector.load %arg2[%c0_103, %c0_104, %c0_105, %c3_106, %c0_107] : memref<1x1x8x17x33xf32, #tpu.memory_space<vmem>>, vector<1x1x8x1x32xf32>
    %111 = vector.shape_cast %110 : vector<1x1x8x1x32xf32> to vector<8x32xf32>
    %c0_108 = arith.constant 0 : index
    %c0_109 = arith.constant 0 : index
    %c0_110 = arith.constant 0 : index
    %c3_111 = arith.constant 3 : index
    %c1_112 = arith.constant 1 : index
    %112 = vector.load %arg2[%c0_108, %c0_109, %c0_110, %c3_111, %c1_112] : memref<1x1x8x17x33xf32, #tpu.memory_space<vmem>>, vector<1x1x8x1x32xf32>
    %113 = vector.shape_cast %112 : vector<1x1x8x1x32xf32> to vector<8x32xf32>
    %c0_113 = arith.constant 0 : index
    %c0_114 = arith.constant 0 : index
    %c0_115 = arith.constant 0 : index
    %c4 = arith.constant 4 : index
    %c0_116 = arith.constant 0 : index
    %114 = vector.load %arg2[%c0_113, %c0_114, %c0_115, %c4, %c0_116] : memref<1x1x8x17x33xf32, #tpu.memory_space<vmem>>, vector<1x1x8x1x32xf32>
    %115 = vector.shape_cast %114 : vector<1x1x8x1x32xf32> to vector<8x32xf32>
    %c0_117 = arith.constant 0 : index
    %c0_118 = arith.constant 0 : index
    %c0_119 = arith.constant 0 : index
    %c4_120 = arith.constant 4 : index
    %c1_121 = arith.constant 1 : index
    %116 = vector.load %arg2[%c0_117, %c0_118, %c0_119, %c4_120, %c1_121] : memref<1x1x8x17x33xf32, #tpu.memory_space<vmem>>, vector<1x1x8x1x32xf32>
    %117 = vector.shape_cast %116 : vector<1x1x8x1x32xf32> to vector<8x32xf32>
    %118 = tpu.concatenate %111, %113, %115, %117 in 0 : vector<8x32xf32>, vector<8x32xf32>, vector<8x32xf32>, vector<8x32xf32> -> vector<32x32xf32>
    %cst_122 = arith.constant dense<0.000000e+00> : vector<12x32xf32>
    %119 = tpu.matmul %0, %118, %cst_122 {dimension_numbers = #tpu.dot_dimension_numbers<[1], [0], [0], [1], [0, 0, 1, 1], [], []>} : vector<12x32xf32>, vector<32x32xf32>, vector<12x32xf32> -> vector<12x32xf32>
    %120 = vector.extract_strided_slice %119 {offsets = [0, 0], sizes = [3, 32], strides = [1, 1]} : vector<12x32xf32> to vector<3x32xf32>
    %cst_123 = arith.constant dense<0.000000e+00> : vector<3x64xf32>
    %121 = tpu.matmul %120, %1, %cst_123 {dimension_numbers = #tpu.dot_dimension_numbers<[1], [0], [0], [1], [0, 0, 1, 1], [], []>} : vector<3x32xf32>, vector<32x64xf32>, vector<3x64xf32> -> vector<3x64xf32>
    %122 = vector.extract_strided_slice %119 {offsets = [3, 0], sizes = [3, 32], strides = [1, 1]} : vector<12x32xf32> to vector<3x32xf32>
    %cst_124 = arith.constant dense<0.000000e+00> : vector<3x64xf32>
    %123 = tpu.matmul %122, %2, %cst_124 {dimension_numbers = #tpu.dot_dimension_numbers<[1], [0], [0], [1], [0, 0, 1, 1], [], []>} : vector<3x32xf32>, vector<32x64xf32>, vector<3x64xf32> -> vector<3x64xf32>
    %124 = arith.addf %121, %123 : vector<3x64xf32>
    %125 = arith.addf %124, %5 : vector<3x64xf32>
    %126 = vector.extract_strided_slice %119 {offsets = [6, 0], sizes = [3, 32], strides = [1, 1]} : vector<12x32xf32> to vector<3x32xf32>
    %cst_125 = arith.constant dense<0.000000e+00> : vector<3x64xf32>
    %127 = tpu.matmul %126, %1, %cst_125 {dimension_numbers = #tpu.dot_dimension_numbers<[1], [0], [0], [1], [0, 0, 1, 1], [], []>} : vector<3x32xf32>, vector<32x64xf32>, vector<3x64xf32> -> vector<3x64xf32>
    %128 = vector.extract_strided_slice %119 {offsets = [9, 0], sizes = [3, 32], strides = [1, 1]} : vector<12x32xf32> to vector<3x32xf32>
    %cst_126 = arith.constant dense<0.000000e+00> : vector<3x64xf32>
    %129 = tpu.matmul %128, %2, %cst_126 {dimension_numbers = #tpu.dot_dimension_numbers<[1], [0], [0], [1], [0, 0, 1, 1], [], []>} : vector<3x32xf32>, vector<32x64xf32>, vector<3x64xf32> -> vector<3x64xf32>
    %130 = arith.addf %127, %129 : vector<3x64xf32>
    %131 = arith.addf %130, %5 : vector<3x64xf32>
    %c0_127 = arith.constant 0 : index
    %c0_128 = arith.constant 0 : index
    %c3_129 = arith.constant 3 : index
    %c0_130 = arith.constant 0 : index
    %132 = vector.load %arg7[%c0_127, %c0_128, %c3_129, %c0_130] : memref<1x3x16x128xf32, #tpu.memory_space<vmem>>, vector<1x3x1x64xf32>
    %133 = vector.shape_cast %132 : vector<1x3x1x64xf32> to vector<3x64xf32>
    %134 = vector.shape_cast %125 : vector<3x64xf32> to vector<1x3x1x64xf32>
    tpu.vector_store %arg7[%c0_127, %c0_128, %c3_129, %c0_130], %134 {strides = array<i32>} : memref<1x3x16x128xf32, #tpu.memory_space<vmem>>, vector<1x3x1x64xf32>,
    %c0_131 = arith.constant 0 : index
    %c0_132 = arith.constant 0 : index
    %c3_133 = arith.constant 3 : index
    %c64_134 = arith.constant 64 : index
    %135 = vector.load %arg7[%c0_131, %c0_132, %c3_133, %c64_134] : memref<1x3x16x128xf32, #tpu.memory_space<vmem>>, vector<1x3x1x64xf32>
    %136 = vector.shape_cast %135 : vector<1x3x1x64xf32> to vector<3x64xf32>
    %137 = vector.shape_cast %131 : vector<3x64xf32> to vector<1x3x1x64xf32>
    tpu.vector_store %arg7[%c0_131, %c0_132, %c3_133, %c64_134], %137 {strides = array<i32>} : memref<1x3x16x128xf32, #tpu.memory_space<vmem>>, vector<1x3x1x64xf32>,
    %138 = arith.addf %105, %125 : vector<3x64xf32>
    %139 = arith.addf %138, %131 : vector<3x64xf32>
    %140 = arith.mulf %125, %125 : vector<3x64xf32>
    %141 = arith.addf %109, %140 : vector<3x64xf32>
    %142 = arith.mulf %131, %131 : vector<3x64xf32>
    %143 = arith.addf %141, %142 : vector<3x64xf32>
    %c0_135 = arith.constant 0 : index
    %c0_136 = arith.constant 0 : index
    %c0_137 = arith.constant 0 : index
    %c4_138 = arith.constant 4 : index
    %c0_139 = arith.constant 0 : index
    %144 = vector.load %arg2[%c0_135, %c0_136, %c0_137, %c4_138, %c0_139] : memref<1x1x8x17x33xf32, #tpu.memory_space<vmem>>, vector<1x1x8x1x32xf32>
    %145 = vector.shape_cast %144 : vector<1x1x8x1x32xf32> to vector<8x32xf32>
    %c0_140 = arith.constant 0 : index
    %c0_141 = arith.constant 0 : index
    %c0_142 = arith.constant 0 : index
    %c4_143 = arith.constant 4 : index
    %c1_144 = arith.constant 1 : index
    %146 = vector.load %arg2[%c0_140, %c0_141, %c0_142, %c4_143, %c1_144] : memref<1x1x8x17x33xf32, #tpu.memory_space<vmem>>, vector<1x1x8x1x32xf32>
    %147 = vector.shape_cast %146 : vector<1x1x8x1x32xf32> to vector<8x32xf32>
    %c0_145 = arith.constant 0 : index
    %c0_146 = arith.constant 0 : index
    %c0_147 = arith.constant 0 : index
    %c5 = arith.constant 5 : index
    %c0_148 = arith.constant 0 : index
    %148 = vector.load %arg2[%c0_145, %c0_146, %c0_147, %c5, %c0_148] : memref<1x1x8x17x33xf32, #tpu.memory_space<vmem>>, vector<1x1x8x1x32xf32>
    %149 = vector.shape_cast %148 : vector<1x1x8x1x32xf32> to vector<8x32xf32>
    %c0_149 = arith.constant 0 : index
    %c0_150 = arith.constant 0 : index
    %c0_151 = arith.constant 0 : index
    %c5_152 = arith.constant 5 : index
    %c1_153 = arith.constant 1 : index
    %150 = vector.load %arg2[%c0_149, %c0_150, %c0_151, %c5_152, %c1_153] : memref<1x1x8x17x33xf32, #tpu.memory_space<vmem>>, vector<1x1x8x1x32xf32>
    %151 = vector.shape_cast %150 : vector<1x1x8x1x32xf32> to vector<8x32xf32>
    %152 = tpu.concatenate %145, %147, %149, %151 in 0 : vector<8x32xf32>, vector<8x32xf32>, vector<8x32xf32>, vector<8x32xf32> -> vector<32x32xf32>
    %cst_154 = arith.constant dense<0.000000e+00> : vector<12x32xf32>
    %153 = tpu.matmul %0, %152, %cst_154 {dimension_numbers = #tpu.dot_dimension_numbers<[1], [0], [0], [1], [0, 0, 1, 1], [], []>} : vector<12x32xf32>, vector<32x32xf32>, vector<12x32xf32> -> vector<12x32xf32>
    %154 = vector.extract_strided_slice %153 {offsets = [0, 0], sizes = [3, 32], strides = [1, 1]} : vector<12x32xf32> to vector<3x32xf32>
    %cst_155 = arith.constant dense<0.000000e+00> : vector<3x64xf32>
    %155 = tpu.matmul %154, %1, %cst_155 {dimension_numbers = #tpu.dot_dimension_numbers<[1], [0], [0], [1], [0, 0, 1, 1], [], []>} : vector<3x32xf32>, vector<32x64xf32>, vector<3x64xf32> -> vector<3x64xf32>
    %156 = vector.extract_strided_slice %153 {offsets = [3, 0], sizes = [3, 32], strides = [1, 1]} : vector<12x32xf32> to vector<3x32xf32>
    %cst_156 = arith.constant dense<0.000000e+00> : vector<3x64xf32>
    %157 = tpu.matmul %156, %2, %cst_156 {dimension_numbers = #tpu.dot_dimension_numbers<[1], [0], [0], [1], [0, 0, 1, 1], [], []>} : vector<3x32xf32>, vector<32x64xf32>, vector<3x64xf32> -> vector<3x64xf32>
    %158 = arith.addf %155, %157 : vector<3x64xf32>
    %159 = arith.addf %158, %5 : vector<3x64xf32>
    %160 = vector.extract_strided_slice %153 {offsets = [6, 0], sizes = [3, 32], strides = [1, 1]} : vector<12x32xf32> to vector<3x32xf32>
    %cst_157 = arith.constant dense<0.000000e+00> : vector<3x64xf32>
    %161 = tpu.matmul %160, %1, %cst_157 {dimension_numbers = #tpu.dot_dimension_numbers<[1], [0], [0], [1], [0, 0, 1, 1], [], []>} : vector<3x32xf32>, vector<32x64xf32>, vector<3x64xf32> -> vector<3x64xf32>
    %162 = vector.extract_strided_slice %153 {offsets = [9, 0], sizes = [3, 32], strides = [1, 1]} : vector<12x32xf32> to vector<3x32xf32>
    %cst_158 = arith.constant dense<0.000000e+00> : vector<3x64xf32>
    %163 = tpu.matmul %162, %2, %cst_158 {dimension_numbers = #tpu.dot_dimension_numbers<[1], [0], [0], [1], [0, 0, 1, 1], [], []>} : vector<3x32xf32>, vector<32x64xf32>, vector<3x64xf32> -> vector<3x64xf32>
    %164 = arith.addf %161, %163 : vector<3x64xf32>
    %165 = arith.addf %164, %5 : vector<3x64xf32>
    %c0_159 = arith.constant 0 : index
    %c0_160 = arith.constant 0 : index
    %c4_161 = arith.constant 4 : index
    %c0_162 = arith.constant 0 : index
    %166 = vector.load %arg7[%c0_159, %c0_160, %c4_161, %c0_162] : memref<1x3x16x128xf32, #tpu.memory_space<vmem>>, vector<1x3x1x64xf32>
    %167 = vector.shape_cast %166 : vector<1x3x1x64xf32> to vector<3x64xf32>
    %168 = vector.shape_cast %159 : vector<3x64xf32> to vector<1x3x1x64xf32>
    tpu.vector_store %arg7[%c0_159, %c0_160, %c4_161, %c0_162], %168 {strides = array<i32>} : memref<1x3x16x128xf32, #tpu.memory_space<vmem>>, vector<1x3x1x64xf32>,
    %c0_163 = arith.constant 0 : index
    %c0_164 = arith.constant 0 : index
    %c4_165 = arith.constant 4 : index
    %c64_166 = arith.constant 64 : index
    %169 = vector.load %arg7[%c0_163, %c0_164, %c4_165, %c64_166] : memref<1x3x16x128xf32, #tpu.memory_space<vmem>>, vector<1x3x1x64xf32>
    %170 = vector.shape_cast %169 : vector<1x3x1x64xf32> to vector<3x64xf32>
    %171 = vector.shape_cast %165 : vector<3x64xf32> to vector<1x3x1x64xf32>
    tpu.vector_store %arg7[%c0_163, %c0_164, %c4_165, %c64_166], %171 {strides = array<i32>} : memref<1x3x16x128xf32, #tpu.memory_space<vmem>>, vector<1x3x1x64xf32>,
    %172 = arith.addf %139, %159 : vector<3x64xf32>
    %173 = arith.addf %172, %165 : vector<3x64xf32>
    %174 = arith.mulf %159, %159 : vector<3x64xf32>
    %175 = arith.addf %143, %174 : vector<3x64xf32>
    %176 = arith.mulf %165, %165 : vector<3x64xf32>
    %177 = arith.addf %175, %176 : vector<3x64xf32>
    %c0_167 = arith.constant 0 : index
    %c0_168 = arith.constant 0 : index
    %c0_169 = arith.constant 0 : index
    %c5_170 = arith.constant 5 : index
    %c0_171 = arith.constant 0 : index
    %178 = vector.load %arg2[%c0_167, %c0_168, %c0_169, %c5_170, %c0_171] : memref<1x1x8x17x33xf32, #tpu.memory_space<vmem>>, vector<1x1x8x1x32xf32>
    %179 = vector.shape_cast %178 : vector<1x1x8x1x32xf32> to vector<8x32xf32>
    %c0_172 = arith.constant 0 : index
    %c0_173 = arith.constant 0 : index
    %c0_174 = arith.constant 0 : index
    %c5_175 = arith.constant 5 : index
    %c1_176 = arith.constant 1 : index
    %180 = vector.load %arg2[%c0_172, %c0_173, %c0_174, %c5_175, %c1_176] : memref<1x1x8x17x33xf32, #tpu.memory_space<vmem>>, vector<1x1x8x1x32xf32>
    %181 = vector.shape_cast %180 : vector<1x1x8x1x32xf32> to vector<8x32xf32>
    %c0_177 = arith.constant 0 : index
    %c0_178 = arith.constant 0 : index
    %c0_179 = arith.constant 0 : index
    %c6 = arith.constant 6 : index
    %c0_180 = arith.constant 0 : index
    %182 = vector.load %arg2[%c0_177, %c0_178, %c0_179, %c6, %c0_180] : memref<1x1x8x17x33xf32, #tpu.memory_space<vmem>>, vector<1x1x8x1x32xf32>
    %183 = vector.shape_cast %182 : vector<1x1x8x1x32xf32> to vector<8x32xf32>
    %c0_181 = arith.constant 0 : index
    %c0_182 = arith.constant 0 : index
    %c0_183 = arith.constant 0 : index
    %c6_184 = arith.constant 6 : index
    %c1_185 = arith.constant 1 : index
    %184 = vector.load %arg2[%c0_181, %c0_182, %c0_183, %c6_184, %c1_185] : memref<1x1x8x17x33xf32, #tpu.memory_space<vmem>>, vector<1x1x8x1x32xf32>
    %185 = vector.shape_cast %184 : vector<1x1x8x1x32xf32> to vector<8x32xf32>
    %186 = tpu.concatenate %179, %181, %183, %185 in 0 : vector<8x32xf32>, vector<8x32xf32>, vector<8x32xf32>, vector<8x32xf32> -> vector<32x32xf32>
    %cst_186 = arith.constant dense<0.000000e+00> : vector<12x32xf32>
    %187 = tpu.matmul %0, %186, %cst_186 {dimension_numbers = #tpu.dot_dimension_numbers<[1], [0], [0], [1], [0, 0, 1, 1], [], []>} : vector<12x32xf32>, vector<32x32xf32>, vector<12x32xf32> -> vector<12x32xf32>
    %188 = vector.extract_strided_slice %187 {offsets = [0, 0], sizes = [3, 32], strides = [1, 1]} : vector<12x32xf32> to vector<3x32xf32>
    %cst_187 = arith.constant dense<0.000000e+00> : vector<3x64xf32>
    %189 = tpu.matmul %188, %1, %cst_187 {dimension_numbers = #tpu.dot_dimension_numbers<[1], [0], [0], [1], [0, 0, 1, 1], [], []>} : vector<3x32xf32>, vector<32x64xf32>, vector<3x64xf32> -> vector<3x64xf32>
    %190 = vector.extract_strided_slice %187 {offsets = [3, 0], sizes = [3, 32], strides = [1, 1]} : vector<12x32xf32> to vector<3x32xf32>
    %cst_188 = arith.constant dense<0.000000e+00> : vector<3x64xf32>
    %191 = tpu.matmul %190, %2, %cst_188 {dimension_numbers = #tpu.dot_dimension_numbers<[1], [0], [0], [1], [0, 0, 1, 1], [], []>} : vector<3x32xf32>, vector<32x64xf32>, vector<3x64xf32> -> vector<3x64xf32>
    %192 = arith.addf %189, %191 : vector<3x64xf32>
    %193 = arith.addf %192, %5 : vector<3x64xf32>
    %194 = vector.extract_strided_slice %187 {offsets = [6, 0], sizes = [3, 32], strides = [1, 1]} : vector<12x32xf32> to vector<3x32xf32>
    %cst_189 = arith.constant dense<0.000000e+00> : vector<3x64xf32>
    %195 = tpu.matmul %194, %1, %cst_189 {dimension_numbers = #tpu.dot_dimension_numbers<[1], [0], [0], [1], [0, 0, 1, 1], [], []>} : vector<3x32xf32>, vector<32x64xf32>, vector<3x64xf32> -> vector<3x64xf32>
    %196 = vector.extract_strided_slice %187 {offsets = [9, 0], sizes = [3, 32], strides = [1, 1]} : vector<12x32xf32> to vector<3x32xf32>
    %cst_190 = arith.constant dense<0.000000e+00> : vector<3x64xf32>
    %197 = tpu.matmul %196, %2, %cst_190 {dimension_numbers = #tpu.dot_dimension_numbers<[1], [0], [0], [1], [0, 0, 1, 1], [], []>} : vector<3x32xf32>, vector<32x64xf32>, vector<3x64xf32> -> vector<3x64xf32>
    %198 = arith.addf %195, %197 : vector<3x64xf32>
    %199 = arith.addf %198, %5 : vector<3x64xf32>
    %c0_191 = arith.constant 0 : index
    %c0_192 = arith.constant 0 : index
    %c5_193 = arith.constant 5 : index
    %c0_194 = arith.constant 0 : index
    %200 = vector.load %arg7[%c0_191, %c0_192, %c5_193, %c0_194] : memref<1x3x16x128xf32, #tpu.memory_space<vmem>>, vector<1x3x1x64xf32>
    %201 = vector.shape_cast %200 : vector<1x3x1x64xf32> to vector<3x64xf32>
    %202 = vector.shape_cast %193 : vector<3x64xf32> to vector<1x3x1x64xf32>
    tpu.vector_store %arg7[%c0_191, %c0_192, %c5_193, %c0_194], %202 {strides = array<i32>} : memref<1x3x16x128xf32, #tpu.memory_space<vmem>>, vector<1x3x1x64xf32>,
    %c0_195 = arith.constant 0 : index
    %c0_196 = arith.constant 0 : index
    %c5_197 = arith.constant 5 : index
    %c64_198 = arith.constant 64 : index
    %203 = vector.load %arg7[%c0_195, %c0_196, %c5_197, %c64_198] : memref<1x3x16x128xf32, #tpu.memory_space<vmem>>, vector<1x3x1x64xf32>
    %204 = vector.shape_cast %203 : vector<1x3x1x64xf32> to vector<3x64xf32>
    %205 = vector.shape_cast %199 : vector<3x64xf32> to vector<1x3x1x64xf32>
    tpu.vector_store %arg7[%c0_195, %c0_196, %c5_197, %c64_198], %205 {strides = array<i32>} : memref<1x3x16x128xf32, #tpu.memory_space<vmem>>, vector<1x3x1x64xf32>,
    %206 = arith.addf %173, %193 : vector<3x64xf32>
    %207 = arith.addf %206, %199 : vector<3x64xf32>
    %208 = arith.mulf %193, %193 : vector<3x64xf32>
    %209 = arith.addf %177, %208 : vector<3x64xf32>
    %210 = arith.mulf %199, %199 : vector<3x64xf32>
    %211 = arith.addf %209, %210 : vector<3x64xf32>
    %c0_199 = arith.constant 0 : index
    %c0_200 = arith.constant 0 : index
    %c0_201 = arith.constant 0 : index
    %c6_202 = arith.constant 6 : index
    %c0_203 = arith.constant 0 : index
    %212 = vector.load %arg2[%c0_199, %c0_200, %c0_201, %c6_202, %c0_203] : memref<1x1x8x17x33xf32, #tpu.memory_space<vmem>>, vector<1x1x8x1x32xf32>
    %213 = vector.shape_cast %212 : vector<1x1x8x1x32xf32> to vector<8x32xf32>
    %c0_204 = arith.constant 0 : index
    %c0_205 = arith.constant 0 : index
    %c0_206 = arith.constant 0 : index
    %c6_207 = arith.constant 6 : index
    %c1_208 = arith.constant 1 : index
    %214 = vector.load %arg2[%c0_204, %c0_205, %c0_206, %c6_207, %c1_208] : memref<1x1x8x17x33xf32, #tpu.memory_space<vmem>>, vector<1x1x8x1x32xf32>
    %215 = vector.shape_cast %214 : vector<1x1x8x1x32xf32> to vector<8x32xf32>
    %c0_209 = arith.constant 0 : index
    %c0_210 = arith.constant 0 : index
    %c0_211 = arith.constant 0 : index
    %c7 = arith.constant 7 : index
    %c0_212 = arith.constant 0 : index
    %216 = vector.load %arg2[%c0_209, %c0_210, %c0_211, %c7, %c0_212] : memref<1x1x8x17x33xf32, #tpu.memory_space<vmem>>, vector<1x1x8x1x32xf32>
    %217 = vector.shape_cast %216 : vector<1x1x8x1x32xf32> to vector<8x32xf32>
    %c0_213 = arith.constant 0 : index
    %c0_214 = arith.constant 0 : index
    %c0_215 = arith.constant 0 : index
    %c7_216 = arith.constant 7 : index
    %c1_217 = arith.constant 1 : index
    %218 = vector.load %arg2[%c0_213, %c0_214, %c0_215, %c7_216, %c1_217] : memref<1x1x8x17x33xf32, #tpu.memory_space<vmem>>, vector<1x1x8x1x32xf32>
    %219 = vector.shape_cast %218 : vector<1x1x8x1x32xf32> to vector<8x32xf32>
    %220 = tpu.concatenate %213, %215, %217, %219 in 0 : vector<8x32xf32>, vector<8x32xf32>, vector<8x32xf32>, vector<8x32xf32> -> vector<32x32xf32>
    %cst_218 = arith.constant dense<0.000000e+00> : vector<12x32xf32>
    %221 = tpu.matmul %0, %220, %cst_218 {dimension_numbers = #tpu.dot_dimension_numbers<[1], [0], [0], [1], [0, 0, 1, 1], [], []>} : vector<12x32xf32>, vector<32x32xf32>, vector<12x32xf32> -> vector<12x32xf32>
    %222 = vector.extract_strided_slice %221 {offsets = [0, 0], sizes = [3, 32], strides = [1, 1]} : vector<12x32xf32> to vector<3x32xf32>
    %cst_219 = arith.constant dense<0.000000e+00> : vector<3x64xf32>
    %223 = tpu.matmul %222, %1, %cst_219 {dimension_numbers = #tpu.dot_dimension_numbers<[1], [0], [0], [1], [0, 0, 1, 1], [], []>} : vector<3x32xf32>, vector<32x64xf32>, vector<3x64xf32> -> vector<3x64xf32>
    %224 = vector.extract_strided_slice %221 {offsets = [3, 0], sizes = [3, 32], strides = [1, 1]} : vector<12x32xf32> to vector<3x32xf32>
    %cst_220 = arith.constant dense<0.000000e+00> : vector<3x64xf32>
    %225 = tpu.matmul %224, %2, %cst_220 {dimension_numbers = #tpu.dot_dimension_numbers<[1], [0], [0], [1], [0, 0, 1, 1], [], []>} : vector<3x32xf32>, vector<32x64xf32>, vector<3x64xf32> -> vector<3x64xf32>
    %226 = arith.addf %223, %225 : vector<3x64xf32>
    %227 = arith.addf %226, %5 : vector<3x64xf32>
    %228 = vector.extract_strided_slice %221 {offsets = [6, 0], sizes = [3, 32], strides = [1, 1]} : vector<12x32xf32> to vector<3x32xf32>
    %cst_221 = arith.constant dense<0.000000e+00> : vector<3x64xf32>
    %229 = tpu.matmul %228, %1, %cst_221 {dimension_numbers = #tpu.dot_dimension_numbers<[1], [0], [0], [1], [0, 0, 1, 1], [], []>} : vector<3x32xf32>, vector<32x64xf32>, vector<3x64xf32> -> vector<3x64xf32>
    %230 = vector.extract_strided_slice %221 {offsets = [9, 0], sizes = [3, 32], strides = [1, 1]} : vector<12x32xf32> to vector<3x32xf32>
    %cst_222 = arith.constant dense<0.000000e+00> : vector<3x64xf32>
    %231 = tpu.matmul %230, %2, %cst_222 {dimension_numbers = #tpu.dot_dimension_numbers<[1], [0], [0], [1], [0, 0, 1, 1], [], []>} : vector<3x32xf32>, vector<32x64xf32>, vector<3x64xf32> -> vector<3x64xf32>
    %232 = arith.addf %229, %231 : vector<3x64xf32>
    %233 = arith.addf %232, %5 : vector<3x64xf32>
    %c0_223 = arith.constant 0 : index
    %c0_224 = arith.constant 0 : index
    %c6_225 = arith.constant 6 : index
    %c0_226 = arith.constant 0 : index
    %234 = vector.load %arg7[%c0_223, %c0_224, %c6_225, %c0_226] : memref<1x3x16x128xf32, #tpu.memory_space<vmem>>, vector<1x3x1x64xf32>
    %235 = vector.shape_cast %234 : vector<1x3x1x64xf32> to vector<3x64xf32>
    %236 = vector.shape_cast %227 : vector<3x64xf32> to vector<1x3x1x64xf32>
    tpu.vector_store %arg7[%c0_223, %c0_224, %c6_225, %c0_226], %236 {strides = array<i32>} : memref<1x3x16x128xf32, #tpu.memory_space<vmem>>, vector<1x3x1x64xf32>,
    %c0_227 = arith.constant 0 : index
    %c0_228 = arith.constant 0 : index
    %c6_229 = arith.constant 6 : index
    %c64_230 = arith.constant 64 : index
    %237 = vector.load %arg7[%c0_227, %c0_228, %c6_229, %c64_230] : memref<1x3x16x128xf32, #tpu.memory_space<vmem>>, vector<1x3x1x64xf32>
    %238 = vector.shape_cast %237 : vector<1x3x1x64xf32> to vector<3x64xf32>
    %239 = vector.shape_cast %233 : vector<3x64xf32> to vector<1x3x1x64xf32>
    tpu.vector_store %arg7[%c0_227, %c0_228, %c6_229, %c64_230], %239 {strides = array<i32>} : memref<1x3x16x128xf32, #tpu.memory_space<vmem>>, vector<1x3x1x64xf32>,
    %240 = arith.addf %207, %227 : vector<3x64xf32>
    %241 = arith.addf %240, %233 : vector<3x64xf32>
    %242 = arith.mulf %227, %227 : vector<3x64xf32>
    %243 = arith.addf %211, %242 : vector<3x64xf32>
    %244 = arith.mulf %233, %233 : vector<3x64xf32>
    %245 = arith.addf %243, %244 : vector<3x64xf32>
    %c0_231 = arith.constant 0 : index
    %c0_232 = arith.constant 0 : index
    %c0_233 = arith.constant 0 : index
    %c7_234 = arith.constant 7 : index
    %c0_235 = arith.constant 0 : index
    %246 = vector.load %arg2[%c0_231, %c0_232, %c0_233, %c7_234, %c0_235] : memref<1x1x8x17x33xf32, #tpu.memory_space<vmem>>, vector<1x1x8x1x32xf32>
    %247 = vector.shape_cast %246 : vector<1x1x8x1x32xf32> to vector<8x32xf32>
    %c0_236 = arith.constant 0 : index
    %c0_237 = arith.constant 0 : index
    %c0_238 = arith.constant 0 : index
    %c7_239 = arith.constant 7 : index
    %c1_240 = arith.constant 1 : index
    %248 = vector.load %arg2[%c0_236, %c0_237, %c0_238, %c7_239, %c1_240] : memref<1x1x8x17x33xf32, #tpu.memory_space<vmem>>, vector<1x1x8x1x32xf32>
    %249 = vector.shape_cast %248 : vector<1x1x8x1x32xf32> to vector<8x32xf32>
    %c0_241 = arith.constant 0 : index
    %c0_242 = arith.constant 0 : index
    %c0_243 = arith.constant 0 : index
    %c8 = arith.constant 8 : index
    %c0_244 = arith.constant 0 : index
    %250 = vector.load %arg2[%c0_241, %c0_242, %c0_243, %c8, %c0_244] : memref<1x1x8x17x33xf32, #tpu.memory_space<vmem>>, vector<1x1x8x1x32xf32>
    %251 = vector.shape_cast %250 : vector<1x1x8x1x32xf32> to vector<8x32xf32>
    %c0_245 = arith.constant 0 : index
    %c0_246 = arith.constant 0 : index
    %c0_247 = arith.constant 0 : index
    %c8_248 = arith.constant 8 : index
    %c1_249 = arith.constant 1 : index
    %252 = vector.load %arg2[%c0_245, %c0_246, %c0_247, %c8_248, %c1_249] : memref<1x1x8x17x33xf32, #tpu.memory_space<vmem>>, vector<1x1x8x1x32xf32>
    %253 = vector.shape_cast %252 : vector<1x1x8x1x32xf32> to vector<8x32xf32>
    %254 = tpu.concatenate %247, %249, %251, %253 in 0 : vector<8x32xf32>, vector<8x32xf32>, vector<8x32xf32>, vector<8x32xf32> -> vector<32x32xf32>
    %cst_250 = arith.constant dense<0.000000e+00> : vector<12x32xf32>
    %255 = tpu.matmul %0, %254, %cst_250 {dimension_numbers = #tpu.dot_dimension_numbers<[1], [0], [0], [1], [0, 0, 1, 1], [], []>} : vector<12x32xf32>, vector<32x32xf32>, vector<12x32xf32> -> vector<12x32xf32>
    %256 = vector.extract_strided_slice %255 {offsets = [0, 0], sizes = [3, 32], strides = [1, 1]} : vector<12x32xf32> to vector<3x32xf32>
    %cst_251 = arith.constant dense<0.000000e+00> : vector<3x64xf32>
    %257 = tpu.matmul %256, %1, %cst_251 {dimension_numbers = #tpu.dot_dimension_numbers<[1], [0], [0], [1], [0, 0, 1, 1], [], []>} : vector<3x32xf32>, vector<32x64xf32>, vector<3x64xf32> -> vector<3x64xf32>
    %258 = vector.extract_strided_slice %255 {offsets = [3, 0], sizes = [3, 32], strides = [1, 1]} : vector<12x32xf32> to vector<3x32xf32>
    %cst_252 = arith.constant dense<0.000000e+00> : vector<3x64xf32>
    %259 = tpu.matmul %258, %2, %cst_252 {dimension_numbers = #tpu.dot_dimension_numbers<[1], [0], [0], [1], [0, 0, 1, 1], [], []>} : vector<3x32xf32>, vector<32x64xf32>, vector<3x64xf32> -> vector<3x64xf32>
    %260 = arith.addf %257, %259 : vector<3x64xf32>
    %261 = arith.addf %260, %5 : vector<3x64xf32>
    %262 = vector.extract_strided_slice %255 {offsets = [6, 0], sizes = [3, 32], strides = [1, 1]} : vector<12x32xf32> to vector<3x32xf32>
    %cst_253 = arith.constant dense<0.000000e+00> : vector<3x64xf32>
    %263 = tpu.matmul %262, %1, %cst_253 {dimension_numbers = #tpu.dot_dimension_numbers<[1], [0], [0], [1], [0, 0, 1, 1], [], []>} : vector<3x32xf32>, vector<32x64xf32>, vector<3x64xf32> -> vector<3x64xf32>
    %264 = vector.extract_strided_slice %255 {offsets = [9, 0], sizes = [3, 32], strides = [1, 1]} : vector<12x32xf32> to vector<3x32xf32>
    %cst_254 = arith.constant dense<0.000000e+00> : vector<3x64xf32>
    %265 = tpu.matmul %264, %2, %cst_254 {dimension_numbers = #tpu.dot_dimension_numbers<[1], [0], [0], [1], [0, 0, 1, 1], [], []>} : vector<3x32xf32>, vector<32x64xf32>, vector<3x64xf32> -> vector<3x64xf32>
    %266 = arith.addf %263, %265 : vector<3x64xf32>
    %267 = arith.addf %266, %5 : vector<3x64xf32>
    %c0_255 = arith.constant 0 : index
    %c0_256 = arith.constant 0 : index
    %c7_257 = arith.constant 7 : index
    %c0_258 = arith.constant 0 : index
    %268 = vector.load %arg7[%c0_255, %c0_256, %c7_257, %c0_258] : memref<1x3x16x128xf32, #tpu.memory_space<vmem>>, vector<1x3x1x64xf32>
    %269 = vector.shape_cast %268 : vector<1x3x1x64xf32> to vector<3x64xf32>
    %270 = vector.shape_cast %261 : vector<3x64xf32> to vector<1x3x1x64xf32>
    tpu.vector_store %arg7[%c0_255, %c0_256, %c7_257, %c0_258], %270 {strides = array<i32>} : memref<1x3x16x128xf32, #tpu.memory_space<vmem>>, vector<1x3x1x64xf32>,
    %c0_259 = arith.constant 0 : index
    %c0_260 = arith.constant 0 : index
    %c7_261 = arith.constant 7 : index
    %c64_262 = arith.constant 64 : index
    %271 = vector.load %arg7[%c0_259, %c0_260, %c7_261, %c64_262] : memref<1x3x16x128xf32, #tpu.memory_space<vmem>>, vector<1x3x1x64xf32>
    %272 = vector.shape_cast %271 : vector<1x3x1x64xf32> to vector<3x64xf32>
    %273 = vector.shape_cast %267 : vector<3x64xf32> to vector<1x3x1x64xf32>
    tpu.vector_store %arg7[%c0_259, %c0_260, %c7_261, %c64_262], %273 {strides = array<i32>} : memref<1x3x16x128xf32, #tpu.memory_space<vmem>>, vector<1x3x1x64xf32>,
    %274 = arith.addf %241, %261 : vector<3x64xf32>
    %275 = arith.addf %274, %267 : vector<3x64xf32>
    %276 = arith.mulf %261, %261 : vector<3x64xf32>
    %277 = arith.addf %245, %276 : vector<3x64xf32>
    %278 = arith.mulf %267, %267 : vector<3x64xf32>
    %279 = arith.addf %277, %278 : vector<3x64xf32>
    %c0_263 = arith.constant 0 : index
    %c0_264 = arith.constant 0 : index
    %c0_265 = arith.constant 0 : index
    %c8_266 = arith.constant 8 : index
    %c0_267 = arith.constant 0 : index
    %280 = vector.load %arg2[%c0_263, %c0_264, %c0_265, %c8_266, %c0_267] : memref<1x1x8x17x33xf32, #tpu.memory_space<vmem>>, vector<1x1x8x1x32xf32>
    %281 = vector.shape_cast %280 : vector<1x1x8x1x32xf32> to vector<8x32xf32>
    %c0_268 = arith.constant 0 : index
    %c0_269 = arith.constant 0 : index
    %c0_270 = arith.constant 0 : index
    %c8_271 = arith.constant 8 : index
    %c1_272 = arith.constant 1 : index
    %282 = vector.load %arg2[%c0_268, %c0_269, %c0_270, %c8_271, %c1_272] : memref<1x1x8x17x33xf32, #tpu.memory_space<vmem>>, vector<1x1x8x1x32xf32>
    %283 = vector.shape_cast %282 : vector<1x1x8x1x32xf32> to vector<8x32xf32>
    %c0_273 = arith.constant 0 : index
    %c0_274 = arith.constant 0 : index
    %c0_275 = arith.constant 0 : index
    %c9 = arith.constant 9 : index
    %c0_276 = arith.constant 0 : index
    %284 = vector.load %arg2[%c0_273, %c0_274, %c0_275, %c9, %c0_276] : memref<1x1x8x17x33xf32, #tpu.memory_space<vmem>>, vector<1x1x8x1x32xf32>
    %285 = vector.shape_cast %284 : vector<1x1x8x1x32xf32> to vector<8x32xf32>
    %c0_277 = arith.constant 0 : index
    %c0_278 = arith.constant 0 : index
    %c0_279 = arith.constant 0 : index
    %c9_280 = arith.constant 9 : index
    %c1_281 = arith.constant 1 : index
    %286 = vector.load %arg2[%c0_277, %c0_278, %c0_279, %c9_280, %c1_281] : memref<1x1x8x17x33xf32, #tpu.memory_space<vmem>>, vector<1x1x8x1x32xf32>
    %287 = vector.shape_cast %286 : vector<1x1x8x1x32xf32> to vector<8x32xf32>
    %288 = tpu.concatenate %281, %283, %285, %287 in 0 : vector<8x32xf32>, vector<8x32xf32>, vector<8x32xf32>, vector<8x32xf32> -> vector<32x32xf32>
    %cst_282 = arith.constant dense<0.000000e+00> : vector<12x32xf32>
    %289 = tpu.matmul %0, %288, %cst_282 {dimension_numbers = #tpu.dot_dimension_numbers<[1], [0], [0], [1], [0, 0, 1, 1], [], []>} : vector<12x32xf32>, vector<32x32xf32>, vector<12x32xf32> -> vector<12x32xf32>
    %290 = vector.extract_strided_slice %289 {offsets = [0, 0], sizes = [3, 32], strides = [1, 1]} : vector<12x32xf32> to vector<3x32xf32>
    %cst_283 = arith.constant dense<0.000000e+00> : vector<3x64xf32>
    %291 = tpu.matmul %290, %1, %cst_283 {dimension_numbers = #tpu.dot_dimension_numbers<[1], [0], [0], [1], [0, 0, 1, 1], [], []>} : vector<3x32xf32>, vector<32x64xf32>, vector<3x64xf32> -> vector<3x64xf32>
    %292 = vector.extract_strided_slice %289 {offsets = [3, 0], sizes = [3, 32], strides = [1, 1]} : vector<12x32xf32> to vector<3x32xf32>
    %cst_284 = arith.constant dense<0.000000e+00> : vector<3x64xf32>
    %293 = tpu.matmul %292, %2, %cst_284 {dimension_numbers = #tpu.dot_dimension_numbers<[1], [0], [0], [1], [0, 0, 1, 1], [], []>} : vector<3x32xf32>, vector<32x64xf32>, vector<3x64xf32> -> vector<3x64xf32>
    %294 = arith.addf %291, %293 : vector<3x64xf32>
    %295 = arith.addf %294, %5 : vector<3x64xf32>
    %296 = vector.extract_strided_slice %289 {offsets = [6, 0], sizes = [3, 32], strides = [1, 1]} : vector<12x32xf32> to vector<3x32xf32>
    %cst_285 = arith.constant dense<0.000000e+00> : vector<3x64xf32>
    %297 = tpu.matmul %296, %1, %cst_285 {dimension_numbers = #tpu.dot_dimension_numbers<[1], [0], [0], [1], [0, 0, 1, 1], [], []>} : vector<3x32xf32>, vector<32x64xf32>, vector<3x64xf32> -> vector<3x64xf32>
    %298 = vector.extract_strided_slice %289 {offsets = [9, 0], sizes = [3, 32], strides = [1, 1]} : vector<12x32xf32> to vector<3x32xf32>
    %cst_286 = arith.constant dense<0.000000e+00> : vector<3x64xf32>
    %299 = tpu.matmul %298, %2, %cst_286 {dimension_numbers = #tpu.dot_dimension_numbers<[1], [0], [0], [1], [0, 0, 1, 1], [], []>} : vector<3x32xf32>, vector<32x64xf32>, vector<3x64xf32> -> vector<3x64xf32>
    %300 = arith.addf %297, %299 : vector<3x64xf32>
    %301 = arith.addf %300, %5 : vector<3x64xf32>
    %c0_287 = arith.constant 0 : index
    %c0_288 = arith.constant 0 : index
    %c8_289 = arith.constant 8 : index
    %c0_290 = arith.constant 0 : index
    %302 = vector.load %arg7[%c0_287, %c0_288, %c8_289, %c0_290] : memref<1x3x16x128xf32, #tpu.memory_space<vmem>>, vector<1x3x1x64xf32>
    %303 = vector.shape_cast %302 : vector<1x3x1x64xf32> to vector<3x64xf32>
    %304 = vector.shape_cast %295 : vector<3x64xf32> to vector<1x3x1x64xf32>
    tpu.vector_store %arg7[%c0_287, %c0_288, %c8_289, %c0_290], %304 {strides = array<i32>} : memref<1x3x16x128xf32, #tpu.memory_space<vmem>>, vector<1x3x1x64xf32>,
    %c0_291 = arith.constant 0 : index
    %c0_292 = arith.constant 0 : index
    %c8_293 = arith.constant 8 : index
    %c64_294 = arith.constant 64 : index
    %305 = vector.load %arg7[%c0_291, %c0_292, %c8_293, %c64_294] : memref<1x3x16x128xf32, #tpu.memory_space<vmem>>, vector<1x3x1x64xf32>
    %306 = vector.shape_cast %305 : vector<1x3x1x64xf32> to vector<3x64xf32>
    %307 = vector.shape_cast %301 : vector<3x64xf32> to vector<1x3x1x64xf32>
    tpu.vector_store %arg7[%c0_291, %c0_292, %c8_293, %c64_294], %307 {strides = array<i32>} : memref<1x3x16x128xf32, #tpu.memory_space<vmem>>, vector<1x3x1x64xf32>,
    %308 = arith.addf %275, %295 : vector<3x64xf32>
    %309 = arith.addf %308, %301 : vector<3x64xf32>
    %310 = arith.mulf %295, %295 : vector<3x64xf32>
    %311 = arith.addf %279, %310 : vector<3x64xf32>
    %312 = arith.mulf %301, %301 : vector<3x64xf32>
    %313 = arith.addf %311, %312 : vector<3x64xf32>
    %c0_295 = arith.constant 0 : index
    %c0_296 = arith.constant 0 : index
    %c0_297 = arith.constant 0 : index
    %c9_298 = arith.constant 9 : index
    %c0_299 = arith.constant 0 : index
    %314 = vector.load %arg2[%c0_295, %c0_296, %c0_297, %c9_298, %c0_299] : memref<1x1x8x17x33xf32, #tpu.memory_space<vmem>>, vector<1x1x8x1x32xf32>
    %315 = vector.shape_cast %314 : vector<1x1x8x1x32xf32> to vector<8x32xf32>
    %c0_300 = arith.constant 0 : index
    %c0_301 = arith.constant 0 : index
    %c0_302 = arith.constant 0 : index
    %c9_303 = arith.constant 9 : index
    %c1_304 = arith.constant 1 : index
    %316 = vector.load %arg2[%c0_300, %c0_301, %c0_302, %c9_303, %c1_304] : memref<1x1x8x17x33xf32, #tpu.memory_space<vmem>>, vector<1x1x8x1x32xf32>
    %317 = vector.shape_cast %316 : vector<1x1x8x1x32xf32> to vector<8x32xf32>
    %c0_305 = arith.constant 0 : index
    %c0_306 = arith.constant 0 : index
    %c0_307 = arith.constant 0 : index
    %c10 = arith.constant 10 : index
    %c0_308 = arith.constant 0 : index
    %318 = vector.load %arg2[%c0_305, %c0_306, %c0_307, %c10, %c0_308] : memref<1x1x8x17x33xf32, #tpu.memory_space<vmem>>, vector<1x1x8x1x32xf32>
    %319 = vector.shape_cast %318 : vector<1x1x8x1x32xf32> to vector<8x32xf32>
    %c0_309 = arith.constant 0 : index
    %c0_310 = arith.constant 0 : index
    %c0_311 = arith.constant 0 : index
    %c10_312 = arith.constant 10 : index
    %c1_313 = arith.constant 1 : index
    %320 = vector.load %arg2[%c0_309, %c0_310, %c0_311, %c10_312, %c1_313] : memref<1x1x8x17x33xf32, #tpu.memory_space<vmem>>, vector<1x1x8x1x32xf32>
    %321 = vector.shape_cast %320 : vector<1x1x8x1x32xf32> to vector<8x32xf32>
    %322 = tpu.concatenate %315, %317, %319, %321 in 0 : vector<8x32xf32>, vector<8x32xf32>, vector<8x32xf32>, vector<8x32xf32> -> vector<32x32xf32>
    %cst_314 = arith.constant dense<0.000000e+00> : vector<12x32xf32>
    %323 = tpu.matmul %0, %322, %cst_314 {dimension_numbers = #tpu.dot_dimension_numbers<[1], [0], [0], [1], [0, 0, 1, 1], [], []>} : vector<12x32xf32>, vector<32x32xf32>, vector<12x32xf32> -> vector<12x32xf32>
    %324 = vector.extract_strided_slice %323 {offsets = [0, 0], sizes = [3, 32], strides = [1, 1]} : vector<12x32xf32> to vector<3x32xf32>
    %cst_315 = arith.constant dense<0.000000e+00> : vector<3x64xf32>
    %325 = tpu.matmul %324, %1, %cst_315 {dimension_numbers = #tpu.dot_dimension_numbers<[1], [0], [0], [1], [0, 0, 1, 1], [], []>} : vector<3x32xf32>, vector<32x64xf32>, vector<3x64xf32> -> vector<3x64xf32>
    %326 = vector.extract_strided_slice %323 {offsets = [3, 0], sizes = [3, 32], strides = [1, 1]} : vector<12x32xf32> to vector<3x32xf32>
    %cst_316 = arith.constant dense<0.000000e+00> : vector<3x64xf32>
    %327 = tpu.matmul %326, %2, %cst_316 {dimension_numbers = #tpu.dot_dimension_numbers<[1], [0], [0], [1], [0, 0, 1, 1], [], []>} : vector<3x32xf32>, vector<32x64xf32>, vector<3x64xf32> -> vector<3x64xf32>
    %328 = arith.addf %325, %327 : vector<3x64xf32>
    %329 = arith.addf %328, %5 : vector<3x64xf32>
    %330 = vector.extract_strided_slice %323 {offsets = [6, 0], sizes = [3, 32], strides = [1, 1]} : vector<12x32xf32> to vector<3x32xf32>
    %cst_317 = arith.constant dense<0.000000e+00> : vector<3x64xf32>
    %331 = tpu.matmul %330, %1, %cst_317 {dimension_numbers = #tpu.dot_dimension_numbers<[1], [0], [0], [1], [0, 0, 1, 1], [], []>} : vector<3x32xf32>, vector<32x64xf32>, vector<3x64xf32> -> vector<3x64xf32>
    %332 = vector.extract_strided_slice %323 {offsets = [9, 0], sizes = [3, 32], strides = [1, 1]} : vector<12x32xf32> to vector<3x32xf32>
    %cst_318 = arith.constant dense<0.000000e+00> : vector<3x64xf32>
    %333 = tpu.matmul %332, %2, %cst_318 {dimension_numbers = #tpu.dot_dimension_numbers<[1], [0], [0], [1], [0, 0, 1, 1], [], []>} : vector<3x32xf32>, vector<32x64xf32>, vector<3x64xf32> -> vector<3x64xf32>
    %334 = arith.addf %331, %333 : vector<3x64xf32>
    %335 = arith.addf %334, %5 : vector<3x64xf32>
    %c0_319 = arith.constant 0 : index
    %c0_320 = arith.constant 0 : index
    %c9_321 = arith.constant 9 : index
    %c0_322 = arith.constant 0 : index
    %336 = vector.load %arg7[%c0_319, %c0_320, %c9_321, %c0_322] : memref<1x3x16x128xf32, #tpu.memory_space<vmem>>, vector<1x3x1x64xf32>
    %337 = vector.shape_cast %336 : vector<1x3x1x64xf32> to vector<3x64xf32>
    %338 = vector.shape_cast %329 : vector<3x64xf32> to vector<1x3x1x64xf32>
    tpu.vector_store %arg7[%c0_319, %c0_320, %c9_321, %c0_322], %338 {strides = array<i32>} : memref<1x3x16x128xf32, #tpu.memory_space<vmem>>, vector<1x3x1x64xf32>,
    %c0_323 = arith.constant 0 : index
    %c0_324 = arith.constant 0 : index
    %c9_325 = arith.constant 9 : index
    %c64_326 = arith.constant 64 : index
    %339 = vector.load %arg7[%c0_323, %c0_324, %c9_325, %c64_326] : memref<1x3x16x128xf32, #tpu.memory_space<vmem>>, vector<1x3x1x64xf32>
    %340 = vector.shape_cast %339 : vector<1x3x1x64xf32> to vector<3x64xf32>
    %341 = vector.shape_cast %335 : vector<3x64xf32> to vector<1x3x1x64xf32>
    tpu.vector_store %arg7[%c0_323, %c0_324, %c9_325, %c64_326], %341 {strides = array<i32>} : memref<1x3x16x128xf32, #tpu.memory_space<vmem>>, vector<1x3x1x64xf32>,
    %342 = arith.addf %309, %329 : vector<3x64xf32>
    %343 = arith.addf %342, %335 : vector<3x64xf32>
    %344 = arith.mulf %329, %329 : vector<3x64xf32>
    %345 = arith.addf %313, %344 : vector<3x64xf32>
    %346 = arith.mulf %335, %335 : vector<3x64xf32>
    %347 = arith.addf %345, %346 : vector<3x64xf32>
    %c0_327 = arith.constant 0 : index
    %c0_328 = arith.constant 0 : index
    %c0_329 = arith.constant 0 : index
    %c10_330 = arith.constant 10 : index
    %c0_331 = arith.constant 0 : index
    %348 = vector.load %arg2[%c0_327, %c0_328, %c0_329, %c10_330, %c0_331] : memref<1x1x8x17x33xf32, #tpu.memory_space<vmem>>, vector<1x1x8x1x32xf32>
    %349 = vector.shape_cast %348 : vector<1x1x8x1x32xf32> to vector<8x32xf32>
    %c0_332 = arith.constant 0 : index
    %c0_333 = arith.constant 0 : index
    %c0_334 = arith.constant 0 : index
    %c10_335 = arith.constant 10 : index
    %c1_336 = arith.constant 1 : index
    %350 = vector.load %arg2[%c0_332, %c0_333, %c0_334, %c10_335, %c1_336] : memref<1x1x8x17x33xf32, #tpu.memory_space<vmem>>, vector<1x1x8x1x32xf32>
    %351 = vector.shape_cast %350 : vector<1x1x8x1x32xf32> to vector<8x32xf32>
    %c0_337 = arith.constant 0 : index
    %c0_338 = arith.constant 0 : index
    %c0_339 = arith.constant 0 : index
    %c11 = arith.constant 11 : index
    %c0_340 = arith.constant 0 : index
    %352 = vector.load %arg2[%c0_337, %c0_338, %c0_339, %c11, %c0_340] : memref<1x1x8x17x33xf32, #tpu.memory_space<vmem>>, vector<1x1x8x1x32xf32>
    %353 = vector.shape_cast %352 : vector<1x1x8x1x32xf32> to vector<8x32xf32>
    %c0_341 = arith.constant 0 : index
    %c0_342 = arith.constant 0 : index
    %c0_343 = arith.constant 0 : index
    %c11_344 = arith.constant 11 : index
    %c1_345 = arith.constant 1 : index
    %354 = vector.load %arg2[%c0_341, %c0_342, %c0_343, %c11_344, %c1_345] : memref<1x1x8x17x33xf32, #tpu.memory_space<vmem>>, vector<1x1x8x1x32xf32>
    %355 = vector.shape_cast %354 : vector<1x1x8x1x32xf32> to vector<8x32xf32>
    %356 = tpu.concatenate %349, %351, %353, %355 in 0 : vector<8x32xf32>, vector<8x32xf32>, vector<8x32xf32>, vector<8x32xf32> -> vector<32x32xf32>
    %cst_346 = arith.constant dense<0.000000e+00> : vector<12x32xf32>
    %357 = tpu.matmul %0, %356, %cst_346 {dimension_numbers = #tpu.dot_dimension_numbers<[1], [0], [0], [1], [0, 0, 1, 1], [], []>} : vector<12x32xf32>, vector<32x32xf32>, vector<12x32xf32> -> vector<12x32xf32>
    %358 = vector.extract_strided_slice %357 {offsets = [0, 0], sizes = [3, 32], strides = [1, 1]} : vector<12x32xf32> to vector<3x32xf32>
    %cst_347 = arith.constant dense<0.000000e+00> : vector<3x64xf32>
    %359 = tpu.matmul %358, %1, %cst_347 {dimension_numbers = #tpu.dot_dimension_numbers<[1], [0], [0], [1], [0, 0, 1, 1], [], []>} : vector<3x32xf32>, vector<32x64xf32>, vector<3x64xf32> -> vector<3x64xf32>
    %360 = vector.extract_strided_slice %357 {offsets = [3, 0], sizes = [3, 32], strides = [1, 1]} : vector<12x32xf32> to vector<3x32xf32>
    %cst_348 = arith.constant dense<0.000000e+00> : vector<3x64xf32>
    %361 = tpu.matmul %360, %2, %cst_348 {dimension_numbers = #tpu.dot_dimension_numbers<[1], [0], [0], [1], [0, 0, 1, 1], [], []>} : vector<3x32xf32>, vector<32x64xf32>, vector<3x64xf32> -> vector<3x64xf32>
    %362 = arith.addf %359, %361 : vector<3x64xf32>
    %363 = arith.addf %362, %5 : vector<3x64xf32>
    %364 = vector.extract_strided_slice %357 {offsets = [6, 0], sizes = [3, 32], strides = [1, 1]} : vector<12x32xf32> to vector<3x32xf32>
    %cst_349 = arith.constant dense<0.000000e+00> : vector<3x64xf32>
    %365 = tpu.matmul %364, %1, %cst_349 {dimension_numbers = #tpu.dot_dimension_numbers<[1], [0], [0], [1], [0, 0, 1, 1], [], []>} : vector<3x32xf32>, vector<32x64xf32>, vector<3x64xf32> -> vector<3x64xf32>
    %366 = vector.extract_strided_slice %357 {offsets = [9, 0], sizes = [3, 32], strides = [1, 1]} : vector<12x32xf32> to vector<3x32xf32>
    %cst_350 = arith.constant dense<0.000000e+00> : vector<3x64xf32>
    %367 = tpu.matmul %366, %2, %cst_350 {dimension_numbers = #tpu.dot_dimension_numbers<[1], [0], [0], [1], [0, 0, 1, 1], [], []>} : vector<3x32xf32>, vector<32x64xf32>, vector<3x64xf32> -> vector<3x64xf32>
    %368 = arith.addf %365, %367 : vector<3x64xf32>
    %369 = arith.addf %368, %5 : vector<3x64xf32>
    %c0_351 = arith.constant 0 : index
    %c0_352 = arith.constant 0 : index
    %c10_353 = arith.constant 10 : index
    %c0_354 = arith.constant 0 : index
    %370 = vector.load %arg7[%c0_351, %c0_352, %c10_353, %c0_354] : memref<1x3x16x128xf32, #tpu.memory_space<vmem>>, vector<1x3x1x64xf32>
    %371 = vector.shape_cast %370 : vector<1x3x1x64xf32> to vector<3x64xf32>
    %372 = vector.shape_cast %363 : vector<3x64xf32> to vector<1x3x1x64xf32>
    tpu.vector_store %arg7[%c0_351, %c0_352, %c10_353, %c0_354], %372 {strides = array<i32>} : memref<1x3x16x128xf32, #tpu.memory_space<vmem>>, vector<1x3x1x64xf32>,
    %c0_355 = arith.constant 0 : index
    %c0_356 = arith.constant 0 : index
    %c10_357 = arith.constant 10 : index
    %c64_358 = arith.constant 64 : index
    %373 = vector.load %arg7[%c0_355, %c0_356, %c10_357, %c64_358] : memref<1x3x16x128xf32, #tpu.memory_space<vmem>>, vector<1x3x1x64xf32>
    %374 = vector.shape_cast %373 : vector<1x3x1x64xf32> to vector<3x64xf32>
    %375 = vector.shape_cast %369 : vector<3x64xf32> to vector<1x3x1x64xf32>
    tpu.vector_store %arg7[%c0_355, %c0_356, %c10_357, %c64_358], %375 {strides = array<i32>} : memref<1x3x16x128xf32, #tpu.memory_space<vmem>>, vector<1x3x1x64xf32>,
    %376 = arith.addf %343, %363 : vector<3x64xf32>
    %377 = arith.addf %376, %369 : vector<3x64xf32>
    %378 = arith.mulf %363, %363 : vector<3x64xf32>
    %379 = arith.addf %347, %378 : vector<3x64xf32>
    %380 = arith.mulf %369, %369 : vector<3x64xf32>
    %381 = arith.addf %379, %380 : vector<3x64xf32>
    %c0_359 = arith.constant 0 : index
    %c0_360 = arith.constant 0 : index
    %c0_361 = arith.constant 0 : index
    %c11_362 = arith.constant 11 : index
    %c0_363 = arith.constant 0 : index
    %382 = vector.load %arg2[%c0_359, %c0_360, %c0_361, %c11_362, %c0_363] : memref<1x1x8x17x33xf32, #tpu.memory_space<vmem>>, vector<1x1x8x1x32xf32>
    %383 = vector.shape_cast %382 : vector<1x1x8x1x32xf32> to vector<8x32xf32>
    %c0_364 = arith.constant 0 : index
    %c0_365 = arith.constant 0 : index
    %c0_366 = arith.constant 0 : index
    %c11_367 = arith.constant 11 : index
    %c1_368 = arith.constant 1 : index
    %384 = vector.load %arg2[%c0_364, %c0_365, %c0_366, %c11_367, %c1_368] : memref<1x1x8x17x33xf32, #tpu.memory_space<vmem>>, vector<1x1x8x1x32xf32>
    %385 = vector.shape_cast %384 : vector<1x1x8x1x32xf32> to vector<8x32xf32>
    %c0_369 = arith.constant 0 : index
    %c0_370 = arith.constant 0 : index
    %c0_371 = arith.constant 0 : index
    %c12 = arith.constant 12 : index
    %c0_372 = arith.constant 0 : index
    %386 = vector.load %arg2[%c0_369, %c0_370, %c0_371, %c12, %c0_372] : memref<1x1x8x17x33xf32, #tpu.memory_space<vmem>>, vector<1x1x8x1x32xf32>
    %387 = vector.shape_cast %386 : vector<1x1x8x1x32xf32> to vector<8x32xf32>
    %c0_373 = arith.constant 0 : index
    %c0_374 = arith.constant 0 : index
    %c0_375 = arith.constant 0 : index
    %c12_376 = arith.constant 12 : index
    %c1_377 = arith.constant 1 : index
    %388 = vector.load %arg2[%c0_373, %c0_374, %c0_375, %c12_376, %c1_377] : memref<1x1x8x17x33xf32, #tpu.memory_space<vmem>>, vector<1x1x8x1x32xf32>
    %389 = vector.shape_cast %388 : vector<1x1x8x1x32xf32> to vector<8x32xf32>
    %390 = tpu.concatenate %383, %385, %387, %389 in 0 : vector<8x32xf32>, vector<8x32xf32>, vector<8x32xf32>, vector<8x32xf32> -> vector<32x32xf32>
    %cst_378 = arith.constant dense<0.000000e+00> : vector<12x32xf32>
    %391 = tpu.matmul %0, %390, %cst_378 {dimension_numbers = #tpu.dot_dimension_numbers<[1], [0], [0], [1], [0, 0, 1, 1], [], []>} : vector<12x32xf32>, vector<32x32xf32>, vector<12x32xf32> -> vector<12x32xf32>
    %392 = vector.extract_strided_slice %391 {offsets = [0, 0], sizes = [3, 32], strides = [1, 1]} : vector<12x32xf32> to vector<3x32xf32>
    %cst_379 = arith.constant dense<0.000000e+00> : vector<3x64xf32>
    %393 = tpu.matmul %392, %1, %cst_379 {dimension_numbers = #tpu.dot_dimension_numbers<[1], [0], [0], [1], [0, 0, 1, 1], [], []>} : vector<3x32xf32>, vector<32x64xf32>, vector<3x64xf32> -> vector<3x64xf32>
    %394 = vector.extract_strided_slice %391 {offsets = [3, 0], sizes = [3, 32], strides = [1, 1]} : vector<12x32xf32> to vector<3x32xf32>
    %cst_380 = arith.constant dense<0.000000e+00> : vector<3x64xf32>
    %395 = tpu.matmul %394, %2, %cst_380 {dimension_numbers = #tpu.dot_dimension_numbers<[1], [0], [0], [1], [0, 0, 1, 1], [], []>} : vector<3x32xf32>, vector<32x64xf32>, vector<3x64xf32> -> vector<3x64xf32>
    %396 = arith.addf %393, %395 : vector<3x64xf32>
    %397 = arith.addf %396, %5 : vector<3x64xf32>
    %398 = vector.extract_strided_slice %391 {offsets = [6, 0], sizes = [3, 32], strides = [1, 1]} : vector<12x32xf32> to vector<3x32xf32>
    %cst_381 = arith.constant dense<0.000000e+00> : vector<3x64xf32>
    %399 = tpu.matmul %398, %1, %cst_381 {dimension_numbers = #tpu.dot_dimension_numbers<[1], [0], [0], [1], [0, 0, 1, 1], [], []>} : vector<3x32xf32>, vector<32x64xf32>, vector<3x64xf32> -> vector<3x64xf32>
    %400 = vector.extract_strided_slice %391 {offsets = [9, 0], sizes = [3, 32], strides = [1, 1]} : vector<12x32xf32> to vector<3x32xf32>
    %cst_382 = arith.constant dense<0.000000e+00> : vector<3x64xf32>
    %401 = tpu.matmul %400, %2, %cst_382 {dimension_numbers = #tpu.dot_dimension_numbers<[1], [0], [0], [1], [0, 0, 1, 1], [], []>} : vector<3x32xf32>, vector<32x64xf32>, vector<3x64xf32> -> vector<3x64xf32>
    %402 = arith.addf %399, %401 : vector<3x64xf32>
    %403 = arith.addf %402, %5 : vector<3x64xf32>
    %c0_383 = arith.constant 0 : index
    %c0_384 = arith.constant 0 : index
    %c11_385 = arith.constant 11 : index
    %c0_386 = arith.constant 0 : index
    %404 = vector.load %arg7[%c0_383, %c0_384, %c11_385, %c0_386] : memref<1x3x16x128xf32, #tpu.memory_space<vmem>>, vector<1x3x1x64xf32>
    %405 = vector.shape_cast %404 : vector<1x3x1x64xf32> to vector<3x64xf32>
    %406 = vector.shape_cast %397 : vector<3x64xf32> to vector<1x3x1x64xf32>
    tpu.vector_store %arg7[%c0_383, %c0_384, %c11_385, %c0_386], %406 {strides = array<i32>} : memref<1x3x16x128xf32, #tpu.memory_space<vmem>>, vector<1x3x1x64xf32>,
    %c0_387 = arith.constant 0 : index
    %c0_388 = arith.constant 0 : index
    %c11_389 = arith.constant 11 : index
    %c64_390 = arith.constant 64 : index
    %407 = vector.load %arg7[%c0_387, %c0_388, %c11_389, %c64_390] : memref<1x3x16x128xf32, #tpu.memory_space<vmem>>, vector<1x3x1x64xf32>
    %408 = vector.shape_cast %407 : vector<1x3x1x64xf32> to vector<3x64xf32>
    %409 = vector.shape_cast %403 : vector<3x64xf32> to vector<1x3x1x64xf32>
    tpu.vector_store %arg7[%c0_387, %c0_388, %c11_389, %c64_390], %409 {strides = array<i32>} : memref<1x3x16x128xf32, #tpu.memory_space<vmem>>, vector<1x3x1x64xf32>,
    %410 = arith.addf %377, %397 : vector<3x64xf32>
    %411 = arith.addf %410, %403 : vector<3x64xf32>
    %412 = arith.mulf %397, %397 : vector<3x64xf32>
    %413 = arith.addf %381, %412 : vector<3x64xf32>
    %414 = arith.mulf %403, %403 : vector<3x64xf32>
    %415 = arith.addf %413, %414 : vector<3x64xf32>
    %c0_391 = arith.constant 0 : index
    %c0_392 = arith.constant 0 : index
    %c0_393 = arith.constant 0 : index
    %c12_394 = arith.constant 12 : index
    %c0_395 = arith.constant 0 : index
    %416 = vector.load %arg2[%c0_391, %c0_392, %c0_393, %c12_394, %c0_395] : memref<1x1x8x17x33xf32, #tpu.memory_space<vmem>>, vector<1x1x8x1x32xf32>
    %417 = vector.shape_cast %416 : vector<1x1x8x1x32xf32> to vector<8x32xf32>
    %c0_396 = arith.constant 0 : index
    %c0_397 = arith.constant 0 : index
    %c0_398 = arith.constant 0 : index
    %c12_399 = arith.constant 12 : index
    %c1_400 = arith.constant 1 : index
    %418 = vector.load %arg2[%c0_396, %c0_397, %c0_398, %c12_399, %c1_400] : memref<1x1x8x17x33xf32, #tpu.memory_space<vmem>>, vector<1x1x8x1x32xf32>
    %419 = vector.shape_cast %418 : vector<1x1x8x1x32xf32> to vector<8x32xf32>
    %c0_401 = arith.constant 0 : index
    %c0_402 = arith.constant 0 : index
    %c0_403 = arith.constant 0 : index
    %c13 = arith.constant 13 : index
    %c0_404 = arith.constant 0 : index
    %420 = vector.load %arg2[%c0_401, %c0_402, %c0_403, %c13, %c0_404] : memref<1x1x8x17x33xf32, #tpu.memory_space<vmem>>, vector<1x1x8x1x32xf32>
    %421 = vector.shape_cast %420 : vector<1x1x8x1x32xf32> to vector<8x32xf32>
    %c0_405 = arith.constant 0 : index
    %c0_406 = arith.constant 0 : index
    %c0_407 = arith.constant 0 : index
    %c13_408 = arith.constant 13 : index
    %c1_409 = arith.constant 1 : index
    %422 = vector.load %arg2[%c0_405, %c0_406, %c0_407, %c13_408, %c1_409] : memref<1x1x8x17x33xf32, #tpu.memory_space<vmem>>, vector<1x1x8x1x32xf32>
    %423 = vector.shape_cast %422 : vector<1x1x8x1x32xf32> to vector<8x32xf32>
    %424 = tpu.concatenate %417, %419, %421, %423 in 0 : vector<8x32xf32>, vector<8x32xf32>, vector<8x32xf32>, vector<8x32xf32> -> vector<32x32xf32>
    %cst_410 = arith.constant dense<0.000000e+00> : vector<12x32xf32>
    %425 = tpu.matmul %0, %424, %cst_410 {dimension_numbers = #tpu.dot_dimension_numbers<[1], [0], [0], [1], [0, 0, 1, 1], [], []>} : vector<12x32xf32>, vector<32x32xf32>, vector<12x32xf32> -> vector<12x32xf32>
    %426 = vector.extract_strided_slice %425 {offsets = [0, 0], sizes = [3, 32], strides = [1, 1]} : vector<12x32xf32> to vector<3x32xf32>
    %cst_411 = arith.constant dense<0.000000e+00> : vector<3x64xf32>
    %427 = tpu.matmul %426, %1, %cst_411 {dimension_numbers = #tpu.dot_dimension_numbers<[1], [0], [0], [1], [0, 0, 1, 1], [], []>} : vector<3x32xf32>, vector<32x64xf32>, vector<3x64xf32> -> vector<3x64xf32>
    %428 = vector.extract_strided_slice %425 {offsets = [3, 0], sizes = [3, 32], strides = [1, 1]} : vector<12x32xf32> to vector<3x32xf32>
    %cst_412 = arith.constant dense<0.000000e+00> : vector<3x64xf32>
    %429 = tpu.matmul %428, %2, %cst_412 {dimension_numbers = #tpu.dot_dimension_numbers<[1], [0], [0], [1], [0, 0, 1, 1], [], []>} : vector<3x32xf32>, vector<32x64xf32>, vector<3x64xf32> -> vector<3x64xf32>
    %430 = arith.addf %427, %429 : vector<3x64xf32>
    %431 = arith.addf %430, %5 : vector<3x64xf32>
    %432 = vector.extract_strided_slice %425 {offsets = [6, 0], sizes = [3, 32], strides = [1, 1]} : vector<12x32xf32> to vector<3x32xf32>
    %cst_413 = arith.constant dense<0.000000e+00> : vector<3x64xf32>
    %433 = tpu.matmul %432, %1, %cst_413 {dimension_numbers = #tpu.dot_dimension_numbers<[1], [0], [0], [1], [0, 0, 1, 1], [], []>} : vector<3x32xf32>, vector<32x64xf32>, vector<3x64xf32> -> vector<3x64xf32>
    %434 = vector.extract_strided_slice %425 {offsets = [9, 0], sizes = [3, 32], strides = [1, 1]} : vector<12x32xf32> to vector<3x32xf32>
    %cst_414 = arith.constant dense<0.000000e+00> : vector<3x64xf32>
    %435 = tpu.matmul %434, %2, %cst_414 {dimension_numbers = #tpu.dot_dimension_numbers<[1], [0], [0], [1], [0, 0, 1, 1], [], []>} : vector<3x32xf32>, vector<32x64xf32>, vector<3x64xf32> -> vector<3x64xf32>
    %436 = arith.addf %433, %435 : vector<3x64xf32>
    %437 = arith.addf %436, %5 : vector<3x64xf32>
    %c0_415 = arith.constant 0 : index
    %c0_416 = arith.constant 0 : index
    %c12_417 = arith.constant 12 : index
    %c0_418 = arith.constant 0 : index
    %438 = vector.load %arg7[%c0_415, %c0_416, %c12_417, %c0_418] : memref<1x3x16x128xf32, #tpu.memory_space<vmem>>, vector<1x3x1x64xf32>
    %439 = vector.shape_cast %438 : vector<1x3x1x64xf32> to vector<3x64xf32>
    %440 = vector.shape_cast %431 : vector<3x64xf32> to vector<1x3x1x64xf32>
    tpu.vector_store %arg7[%c0_415, %c0_416, %c12_417, %c0_418], %440 {strides = array<i32>} : memref<1x3x16x128xf32, #tpu.memory_space<vmem>>, vector<1x3x1x64xf32>,
    %c0_419 = arith.constant 0 : index
    %c0_420 = arith.constant 0 : index
    %c12_421 = arith.constant 12 : index
    %c64_422 = arith.constant 64 : index
    %441 = vector.load %arg7[%c0_419, %c0_420, %c12_421, %c64_422] : memref<1x3x16x128xf32, #tpu.memory_space<vmem>>, vector<1x3x1x64xf32>
    %442 = vector.shape_cast %441 : vector<1x3x1x64xf32> to vector<3x64xf32>
    %443 = vector.shape_cast %437 : vector<3x64xf32> to vector<1x3x1x64xf32>
    tpu.vector_store %arg7[%c0_419, %c0_420, %c12_421, %c64_422], %443 {strides = array<i32>} : memref<1x3x16x128xf32, #tpu.memory_space<vmem>>, vector<1x3x1x64xf32>,
    %444 = arith.addf %411, %431 : vector<3x64xf32>
    %445 = arith.addf %444, %437 : vector<3x64xf32>
    %446 = arith.mulf %431, %431 : vector<3x64xf32>
    %447 = arith.addf %415, %446 : vector<3x64xf32>
    %448 = arith.mulf %437, %437 : vector<3x64xf32>
    %449 = arith.addf %447, %448 : vector<3x64xf32>
    %c0_423 = arith.constant 0 : index
    %c0_424 = arith.constant 0 : index
    %c0_425 = arith.constant 0 : index
    %c13_426 = arith.constant 13 : index
    %c0_427 = arith.constant 0 : index
    %450 = vector.load %arg2[%c0_423, %c0_424, %c0_425, %c13_426, %c0_427] : memref<1x1x8x17x33xf32, #tpu.memory_space<vmem>>, vector<1x1x8x1x32xf32>
    %451 = vector.shape_cast %450 : vector<1x1x8x1x32xf32> to vector<8x32xf32>
    %c0_428 = arith.constant 0 : index
    %c0_429 = arith.constant 0 : index
    %c0_430 = arith.constant 0 : index
    %c13_431 = arith.constant 13 : index
    %c1_432 = arith.constant 1 : index
    %452 = vector.load %arg2[%c0_428, %c0_429, %c0_430, %c13_431, %c1_432] : memref<1x1x8x17x33xf32, #tpu.memory_space<vmem>>, vector<1x1x8x1x32xf32>
    %453 = vector.shape_cast %452 : vector<1x1x8x1x32xf32> to vector<8x32xf32>
    %c0_433 = arith.constant 0 : index
    %c0_434 = arith.constant 0 : index
    %c0_435 = arith.constant 0 : index
    %c14 = arith.constant 14 : index
    %c0_436 = arith.constant 0 : index
    %454 = vector.load %arg2[%c0_433, %c0_434, %c0_435, %c14, %c0_436] : memref<1x1x8x17x33xf32, #tpu.memory_space<vmem>>, vector<1x1x8x1x32xf32>
    %455 = vector.shape_cast %454 : vector<1x1x8x1x32xf32> to vector<8x32xf32>
    %c0_437 = arith.constant 0 : index
    %c0_438 = arith.constant 0 : index
    %c0_439 = arith.constant 0 : index
    %c14_440 = arith.constant 14 : index
    %c1_441 = arith.constant 1 : index
    %456 = vector.load %arg2[%c0_437, %c0_438, %c0_439, %c14_440, %c1_441] : memref<1x1x8x17x33xf32, #tpu.memory_space<vmem>>, vector<1x1x8x1x32xf32>
    %457 = vector.shape_cast %456 : vector<1x1x8x1x32xf32> to vector<8x32xf32>
    %458 = tpu.concatenate %451, %453, %455, %457 in 0 : vector<8x32xf32>, vector<8x32xf32>, vector<8x32xf32>, vector<8x32xf32> -> vector<32x32xf32>
    %cst_442 = arith.constant dense<0.000000e+00> : vector<12x32xf32>
    %459 = tpu.matmul %0, %458, %cst_442 {dimension_numbers = #tpu.dot_dimension_numbers<[1], [0], [0], [1], [0, 0, 1, 1], [], []>} : vector<12x32xf32>, vector<32x32xf32>, vector<12x32xf32> -> vector<12x32xf32>
    %460 = vector.extract_strided_slice %459 {offsets = [0, 0], sizes = [3, 32], strides = [1, 1]} : vector<12x32xf32> to vector<3x32xf32>
    %cst_443 = arith.constant dense<0.000000e+00> : vector<3x64xf32>
    %461 = tpu.matmul %460, %1, %cst_443 {dimension_numbers = #tpu.dot_dimension_numbers<[1], [0], [0], [1], [0, 0, 1, 1], [], []>} : vector<3x32xf32>, vector<32x64xf32>, vector<3x64xf32> -> vector<3x64xf32>
    %462 = vector.extract_strided_slice %459 {offsets = [3, 0], sizes = [3, 32], strides = [1, 1]} : vector<12x32xf32> to vector<3x32xf32>
    %cst_444 = arith.constant dense<0.000000e+00> : vector<3x64xf32>
    %463 = tpu.matmul %462, %2, %cst_444 {dimension_numbers = #tpu.dot_dimension_numbers<[1], [0], [0], [1], [0, 0, 1, 1], [], []>} : vector<3x32xf32>, vector<32x64xf32>, vector<3x64xf32> -> vector<3x64xf32>
    %464 = arith.addf %461, %463 : vector<3x64xf32>
    %465 = arith.addf %464, %5 : vector<3x64xf32>
    %466 = vector.extract_strided_slice %459 {offsets = [6, 0], sizes = [3, 32], strides = [1, 1]} : vector<12x32xf32> to vector<3x32xf32>
    %cst_445 = arith.constant dense<0.000000e+00> : vector<3x64xf32>
    %467 = tpu.matmul %466, %1, %cst_445 {dimension_numbers = #tpu.dot_dimension_numbers<[1], [0], [0], [1], [0, 0, 1, 1], [], []>} : vector<3x32xf32>, vector<32x64xf32>, vector<3x64xf32> -> vector<3x64xf32>
    %468 = vector.extract_strided_slice %459 {offsets = [9, 0], sizes = [3, 32], strides = [1, 1]} : vector<12x32xf32> to vector<3x32xf32>
    %cst_446 = arith.constant dense<0.000000e+00> : vector<3x64xf32>
    %469 = tpu.matmul %468, %2, %cst_446 {dimension_numbers = #tpu.dot_dimension_numbers<[1], [0], [0], [1], [0, 0, 1, 1], [], []>} : vector<3x32xf32>, vector<32x64xf32>, vector<3x64xf32> -> vector<3x64xf32>
    %470 = arith.addf %467, %469 : vector<3x64xf32>
    %471 = arith.addf %470, %5 : vector<3x64xf32>
    %c0_447 = arith.constant 0 : index
    %c0_448 = arith.constant 0 : index
    %c13_449 = arith.constant 13 : index
    %c0_450 = arith.constant 0 : index
    %472 = vector.load %arg7[%c0_447, %c0_448, %c13_449, %c0_450] : memref<1x3x16x128xf32, #tpu.memory_space<vmem>>, vector<1x3x1x64xf32>
    %473 = vector.shape_cast %472 : vector<1x3x1x64xf32> to vector<3x64xf32>
    %474 = vector.shape_cast %465 : vector<3x64xf32> to vector<1x3x1x64xf32>
    tpu.vector_store %arg7[%c0_447, %c0_448, %c13_449, %c0_450], %474 {strides = array<i32>} : memref<1x3x16x128xf32, #tpu.memory_space<vmem>>, vector<1x3x1x64xf32>,
    %c0_451 = arith.constant 0 : index
    %c0_452 = arith.constant 0 : index
    %c13_453 = arith.constant 13 : index
    %c64_454 = arith.constant 64 : index
    %475 = vector.load %arg7[%c0_451, %c0_452, %c13_453, %c64_454] : memref<1x3x16x128xf32, #tpu.memory_space<vmem>>, vector<1x3x1x64xf32>
    %476 = vector.shape_cast %475 : vector<1x3x1x64xf32> to vector<3x64xf32>
    %477 = vector.shape_cast %471 : vector<3x64xf32> to vector<1x3x1x64xf32>
    tpu.vector_store %arg7[%c0_451, %c0_452, %c13_453, %c64_454], %477 {strides = array<i32>} : memref<1x3x16x128xf32, #tpu.memory_space<vmem>>, vector<1x3x1x64xf32>,
    %478 = arith.addf %445, %465 : vector<3x64xf32>
    %479 = arith.addf %478, %471 : vector<3x64xf32>
    %480 = arith.mulf %465, %465 : vector<3x64xf32>
    %481 = arith.addf %449, %480 : vector<3x64xf32>
    %482 = arith.mulf %471, %471 : vector<3x64xf32>
    %483 = arith.addf %481, %482 : vector<3x64xf32>
    %c0_455 = arith.constant 0 : index
    %c0_456 = arith.constant 0 : index
    %c0_457 = arith.constant 0 : index
    %c14_458 = arith.constant 14 : index
    %c0_459 = arith.constant 0 : index
    %484 = vector.load %arg2[%c0_455, %c0_456, %c0_457, %c14_458, %c0_459] : memref<1x1x8x17x33xf32, #tpu.memory_space<vmem>>, vector<1x1x8x1x32xf32>
    %485 = vector.shape_cast %484 : vector<1x1x8x1x32xf32> to vector<8x32xf32>
    %c0_460 = arith.constant 0 : index
    %c0_461 = arith.constant 0 : index
    %c0_462 = arith.constant 0 : index
    %c14_463 = arith.constant 14 : index
    %c1_464 = arith.constant 1 : index
    %486 = vector.load %arg2[%c0_460, %c0_461, %c0_462, %c14_463, %c1_464] : memref<1x1x8x17x33xf32, #tpu.memory_space<vmem>>, vector<1x1x8x1x32xf32>
    %487 = vector.shape_cast %486 : vector<1x1x8x1x32xf32> to vector<8x32xf32>
    %c0_465 = arith.constant 0 : index
    %c0_466 = arith.constant 0 : index
    %c0_467 = arith.constant 0 : index
    %c15 = arith.constant 15 : index
    %c0_468 = arith.constant 0 : index
    %488 = vector.load %arg2[%c0_465, %c0_466, %c0_467, %c15, %c0_468] : memref<1x1x8x17x33xf32, #tpu.memory_space<vmem>>, vector<1x1x8x1x32xf32>
    %489 = vector.shape_cast %488 : vector<1x1x8x1x32xf32> to vector<8x32xf32>
    %c0_469 = arith.constant 0 : index
    %c0_470 = arith.constant 0 : index
    %c0_471 = arith.constant 0 : index
    %c15_472 = arith.constant 15 : index
    %c1_473 = arith.constant 1 : index
    %490 = vector.load %arg2[%c0_469, %c0_470, %c0_471, %c15_472, %c1_473] : memref<1x1x8x17x33xf32, #tpu.memory_space<vmem>>, vector<1x1x8x1x32xf32>
    %491 = vector.shape_cast %490 : vector<1x1x8x1x32xf32> to vector<8x32xf32>
    %492 = tpu.concatenate %485, %487, %489, %491 in 0 : vector<8x32xf32>, vector<8x32xf32>, vector<8x32xf32>, vector<8x32xf32> -> vector<32x32xf32>
    %cst_474 = arith.constant dense<0.000000e+00> : vector<12x32xf32>
    %493 = tpu.matmul %0, %492, %cst_474 {dimension_numbers = #tpu.dot_dimension_numbers<[1], [0], [0], [1], [0, 0, 1, 1], [], []>} : vector<12x32xf32>, vector<32x32xf32>, vector<12x32xf32> -> vector<12x32xf32>
    %494 = vector.extract_strided_slice %493 {offsets = [0, 0], sizes = [3, 32], strides = [1, 1]} : vector<12x32xf32> to vector<3x32xf32>
    %cst_475 = arith.constant dense<0.000000e+00> : vector<3x64xf32>
    %495 = tpu.matmul %494, %1, %cst_475 {dimension_numbers = #tpu.dot_dimension_numbers<[1], [0], [0], [1], [0, 0, 1, 1], [], []>} : vector<3x32xf32>, vector<32x64xf32>, vector<3x64xf32> -> vector<3x64xf32>
    %496 = vector.extract_strided_slice %493 {offsets = [3, 0], sizes = [3, 32], strides = [1, 1]} : vector<12x32xf32> to vector<3x32xf32>
    %cst_476 = arith.constant dense<0.000000e+00> : vector<3x64xf32>
    %497 = tpu.matmul %496, %2, %cst_476 {dimension_numbers = #tpu.dot_dimension_numbers<[1], [0], [0], [1], [0, 0, 1, 1], [], []>} : vector<3x32xf32>, vector<32x64xf32>, vector<3x64xf32> -> vector<3x64xf32>
    %498 = arith.addf %495, %497 : vector<3x64xf32>
    %499 = arith.addf %498, %5 : vector<3x64xf32>
    %500 = vector.extract_strided_slice %493 {offsets = [6, 0], sizes = [3, 32], strides = [1, 1]} : vector<12x32xf32> to vector<3x32xf32>
    %cst_477 = arith.constant dense<0.000000e+00> : vector<3x64xf32>
    %501 = tpu.matmul %500, %1, %cst_477 {dimension_numbers = #tpu.dot_dimension_numbers<[1], [0], [0], [1], [0, 0, 1, 1], [], []>} : vector<3x32xf32>, vector<32x64xf32>, vector<3x64xf32> -> vector<3x64xf32>
    %502 = vector.extract_strided_slice %493 {offsets = [9, 0], sizes = [3, 32], strides = [1, 1]} : vector<12x32xf32> to vector<3x32xf32>
    %cst_478 = arith.constant dense<0.000000e+00> : vector<3x64xf32>
    %503 = tpu.matmul %502, %2, %cst_478 {dimension_numbers = #tpu.dot_dimension_numbers<[1], [0], [0], [1], [0, 0, 1, 1], [], []>} : vector<3x32xf32>, vector<32x64xf32>, vector<3x64xf32> -> vector<3x64xf32>
    %504 = arith.addf %501, %503 : vector<3x64xf32>
    %505 = arith.addf %504, %5 : vector<3x64xf32>
    %c0_479 = arith.constant 0 : index
    %c0_480 = arith.constant 0 : index
    %c14_481 = arith.constant 14 : index
    %c0_482 = arith.constant 0 : index
    %506 = vector.load %arg7[%c0_479, %c0_480, %c14_481, %c0_482] : memref<1x3x16x128xf32, #tpu.memory_space<vmem>>, vector<1x3x1x64xf32>
    %507 = vector.shape_cast %506 : vector<1x3x1x64xf32> to vector<3x64xf32>
    %508 = vector.shape_cast %499 : vector<3x64xf32> to vector<1x3x1x64xf32>
    tpu.vector_store %arg7[%c0_479, %c0_480, %c14_481, %c0_482], %508 {strides = array<i32>} : memref<1x3x16x128xf32, #tpu.memory_space<vmem>>, vector<1x3x1x64xf32>,
    %c0_483 = arith.constant 0 : index
    %c0_484 = arith.constant 0 : index
    %c14_485 = arith.constant 14 : index
    %c64_486 = arith.constant 64 : index
    %509 = vector.load %arg7[%c0_483, %c0_484, %c14_485, %c64_486] : memref<1x3x16x128xf32, #tpu.memory_space<vmem>>, vector<1x3x1x64xf32>
    %510 = vector.shape_cast %509 : vector<1x3x1x64xf32> to vector<3x64xf32>
    %511 = vector.shape_cast %505 : vector<3x64xf32> to vector<1x3x1x64xf32>
    tpu.vector_store %arg7[%c0_483, %c0_484, %c14_485, %c64_486], %511 {strides = array<i32>} : memref<1x3x16x128xf32, #tpu.memory_space<vmem>>, vector<1x3x1x64xf32>,
    %512 = arith.addf %479, %499 : vector<3x64xf32>
    %513 = arith.addf %512, %505 : vector<3x64xf32>
    %514 = arith.mulf %499, %499 : vector<3x64xf32>
    %515 = arith.addf %483, %514 : vector<3x64xf32>
    %516 = arith.mulf %505, %505 : vector<3x64xf32>
    %517 = arith.addf %515, %516 : vector<3x64xf32>
    %c0_487 = arith.constant 0 : index
    %c0_488 = arith.constant 0 : index
    %c0_489 = arith.constant 0 : index
    %c15_490 = arith.constant 15 : index
    %c0_491 = arith.constant 0 : index
    %518 = vector.load %arg2[%c0_487, %c0_488, %c0_489, %c15_490, %c0_491] : memref<1x1x8x17x33xf32, #tpu.memory_space<vmem>>, vector<1x1x8x1x32xf32>
    %519 = vector.shape_cast %518 : vector<1x1x8x1x32xf32> to vector<8x32xf32>
    %c0_492 = arith.constant 0 : index
    %c0_493 = arith.constant 0 : index
    %c0_494 = arith.constant 0 : index
    %c15_495 = arith.constant 15 : index
    %c1_496 = arith.constant 1 : index
    %520 = vector.load %arg2[%c0_492, %c0_493, %c0_494, %c15_495, %c1_496] : memref<1x1x8x17x33xf32, #tpu.memory_space<vmem>>, vector<1x1x8x1x32xf32>
    %521 = vector.shape_cast %520 : vector<1x1x8x1x32xf32> to vector<8x32xf32>
    %c0_497 = arith.constant 0 : index
    %c0_498 = arith.constant 0 : index
    %c0_499 = arith.constant 0 : index
    %c16 = arith.constant 16 : index
    %c0_500 = arith.constant 0 : index
    %522 = vector.load %arg2[%c0_497, %c0_498, %c0_499, %c16, %c0_500] : memref<1x1x8x17x33xf32, #tpu.memory_space<vmem>>, vector<1x1x8x1x32xf32>
    %523 = vector.shape_cast %522 : vector<1x1x8x1x32xf32> to vector<8x32xf32>
    %c0_501 = arith.constant 0 : index
    %c0_502 = arith.constant 0 : index
    %c0_503 = arith.constant 0 : index
    %c16_504 = arith.constant 16 : index
    %c1_505 = arith.constant 1 : index
    %524 = vector.load %arg2[%c0_501, %c0_502, %c0_503, %c16_504, %c1_505] : memref<1x1x8x17x33xf32, #tpu.memory_space<vmem>>, vector<1x1x8x1x32xf32>
    %525 = vector.shape_cast %524 : vector<1x1x8x1x32xf32> to vector<8x32xf32>
    %526 = tpu.concatenate %519, %521, %523, %525 in 0 : vector<8x32xf32>, vector<8x32xf32>, vector<8x32xf32>, vector<8x32xf32> -> vector<32x32xf32>
    %cst_506 = arith.constant dense<0.000000e+00> : vector<12x32xf32>
    %527 = tpu.matmul %0, %526, %cst_506 {dimension_numbers = #tpu.dot_dimension_numbers<[1], [0], [0], [1], [0, 0, 1, 1], [], []>} : vector<12x32xf32>, vector<32x32xf32>, vector<12x32xf32> -> vector<12x32xf32>
    %528 = vector.extract_strided_slice %527 {offsets = [0, 0], sizes = [3, 32], strides = [1, 1]} : vector<12x32xf32> to vector<3x32xf32>
    %cst_507 = arith.constant dense<0.000000e+00> : vector<3x64xf32>
    %529 = tpu.matmul %528, %1, %cst_507 {dimension_numbers = #tpu.dot_dimension_numbers<[1], [0], [0], [1], [0, 0, 1, 1], [], []>} : vector<3x32xf32>, vector<32x64xf32>, vector<3x64xf32> -> vector<3x64xf32>
    %530 = vector.extract_strided_slice %527 {offsets = [3, 0], sizes = [3, 32], strides = [1, 1]} : vector<12x32xf32> to vector<3x32xf32>
    %cst_508 = arith.constant dense<0.000000e+00> : vector<3x64xf32>
    %531 = tpu.matmul %530, %2, %cst_508 {dimension_numbers = #tpu.dot_dimension_numbers<[1], [0], [0], [1], [0, 0, 1, 1], [], []>} : vector<3x32xf32>, vector<32x64xf32>, vector<3x64xf32> -> vector<3x64xf32>
    %532 = arith.addf %529, %531 : vector<3x64xf32>
    %533 = arith.addf %532, %5 : vector<3x64xf32>
    %534 = vector.extract_strided_slice %527 {offsets = [6, 0], sizes = [3, 32], strides = [1, 1]} : vector<12x32xf32> to vector<3x32xf32>
    %cst_509 = arith.constant dense<0.000000e+00> : vector<3x64xf32>
    %535 = tpu.matmul %534, %1, %cst_509 {dimension_numbers = #tpu.dot_dimension_numbers<[1], [0], [0], [1], [0, 0, 1, 1], [], []>} : vector<3x32xf32>, vector<32x64xf32>, vector<3x64xf32> -> vector<3x64xf32>
    %536 = vector.extract_strided_slice %527 {offsets = [9, 0], sizes = [3, 32], strides = [1, 1]} : vector<12x32xf32> to vector<3x32xf32>
    %cst_510 = arith.constant dense<0.000000e+00> : vector<3x64xf32>
    %537 = tpu.matmul %536, %2, %cst_510 {dimension_numbers = #tpu.dot_dimension_numbers<[1], [0], [0], [1], [0, 0, 1, 1], [], []>} : vector<3x32xf32>, vector<32x64xf32>, vector<3x64xf32> -> vector<3x64xf32>
    %538 = arith.addf %535, %537 : vector<3x64xf32>
    %539 = arith.addf %538, %5 : vector<3x64xf32>
    %c0_511 = arith.constant 0 : index
    %c0_512 = arith.constant 0 : index
    %c15_513 = arith.constant 15 : index
    %c0_514 = arith.constant 0 : index
    %540 = vector.load %arg7[%c0_511, %c0_512, %c15_513, %c0_514] : memref<1x3x16x128xf32, #tpu.memory_space<vmem>>, vector<1x3x1x64xf32>
    %541 = vector.shape_cast %540 : vector<1x3x1x64xf32> to vector<3x64xf32>
    %542 = vector.shape_cast %533 : vector<3x64xf32> to vector<1x3x1x64xf32>
    tpu.vector_store %arg7[%c0_511, %c0_512, %c15_513, %c0_514], %542 {strides = array<i32>} : memref<1x3x16x128xf32, #tpu.memory_space<vmem>>, vector<1x3x1x64xf32>,
    %c0_515 = arith.constant 0 : index
    %c0_516 = arith.constant 0 : index
    %c15_517 = arith.constant 15 : index
    %c64_518 = arith.constant 64 : index
    %543 = vector.load %arg7[%c0_515, %c0_516, %c15_517, %c64_518] : memref<1x3x16x128xf32, #tpu.memory_space<vmem>>, vector<1x3x1x64xf32>
    %544 = vector.shape_cast %543 : vector<1x3x1x64xf32> to vector<3x64xf32>
    %545 = vector.shape_cast %539 : vector<3x64xf32> to vector<1x3x1x64xf32>
    tpu.vector_store %arg7[%c0_515, %c0_516, %c15_517, %c64_518], %545 {strides = array<i32>} : memref<1x3x16x128xf32, #tpu.memory_space<vmem>>, vector<1x3x1x64xf32>,
    %546 = arith.addf %513, %533 : vector<3x64xf32>
    %547 = arith.addf %546, %539 : vector<3x64xf32>
    %548 = arith.mulf %533, %533 : vector<3x64xf32>
    %549 = arith.addf %517, %548 : vector<3x64xf32>
    %550 = arith.mulf %539, %539 : vector<3x64xf32>
    %551 = arith.addf %549, %550 : vector<3x64xf32>
    %cst_519 = arith.constant dense<0.000000e+00> : vector<3xf32>
    %552 = vector.multi_reduction <add>, %547, %cst_519 [1] : vector<3x64xf32> to vector<3xf32>
    %553 = vector.shape_cast %552 : vector<3xf32> to vector<3x1xf32>
    %cst_520 = arith.constant dense<0.000000e+00> : vector<3xf32>
    %554 = vector.multi_reduction <add>, %551, %cst_520 [1] : vector<3x64xf32> to vector<3xf32>
    %555 = vector.shape_cast %554 : vector<3xf32> to vector<3x1xf32>
    %556 = tpu.concatenate %553, %555 in 1 : vector<3x1xf32>, vector<3x1xf32> -> vector<3x2xf32>
    %c0_521 = arith.constant 0 : index
    %c0_522 = arith.constant 0 : index
    %c0_523 = arith.constant 0 : index
    %c0_524 = arith.constant 0 : index
    %557 = vector.load %arg8[%c0_521, %c0_522, %c0_523, %c0_524] : memref<1x1x3x2xf32, #tpu.memory_space<vmem>>, vector<1x1x3x2xf32>
    %558 = vector.shape_cast %557 : vector<1x1x3x2xf32> to vector<3x2xf32>
    %559 = vector.shape_cast %556 : vector<3x2xf32> to vector<1x1x3x2xf32>
    tpu.vector_store %arg8[%c0_521, %c0_522, %c0_523, %c0_524], %559 {strides = array<i32>} : memref<1x1x3x2xf32, #tpu.memory_space<vmem>>, vector<1x1x3x2xf32>,
    return
  }
  func.func @transform_0(%arg0: i32, %arg1: i32) -> (i32, i32, i32, i32, i32) {
    %c0_i32 = arith.constant 0 : i32
    %c0_i32_0 = arith.constant 0 : i32
    %c0_i32_1 = arith.constant 0 : i32
    %c0_i32_2 = arith.constant 0 : i32
    return %arg0, %arg1, %c0_i32, %c0_i32_0, %c0_i32_1 : i32, i32, i32, i32, i32
  }
  func.func @transform_1(%arg0: i32, %arg1: i32) -> (i32, i32) {
    %c0_i32 = arith.constant 0 : i32
    %c0_i32_0 = arith.constant 0 : i32
    %c0_i32_1 = arith.constant 0 : i32
    return %c0_i32, %c0_i32_0 : i32, i32
  }
  func.func @transform_2(%arg0: i32, %arg1: i32) -> (i32, i32) {
    %c0_i32 = arith.constant 0 : i32
    %c0_i32_0 = arith.constant 0 : i32
    %c0_i32_1 = arith.constant 0 : i32
    return %c0_i32, %c0_i32_0 : i32, i32
  }
  func.func @transform_3(%arg0: i32, %arg1: i32) -> (i32, i32) {
    %c0_i32 = arith.constant 0 : i32
    %c0_i32_0 = arith.constant 0 : i32
    %c0_i32_1 = arith.constant 0 : i32
    return %c0_i32, %c0_i32_0 : i32, i32
  }
  func.func @transform_4(%arg0: i32, %arg1: i32) -> (i32, i32) {
    %c0_i32 = arith.constant 0 : i32
    %c0_i32_0 = arith.constant 0 : i32
    %c0_i32_1 = arith.constant 0 : i32
    return %c0_i32, %c0_i32_0 : i32, i32
  }
  func.func @transform_5(%arg0: i32, %arg1: i32) -> (i32, i32, i32, i32) {
    %c0_i32 = arith.constant 0 : i32
    %c0_i32_0 = arith.constant 0 : i32
    %c0_i32_1 = arith.constant 0 : i32
    return %arg0, %c0_i32, %arg1, %c0_i32_0 : i32, i32, i32, i32
  }
  func.func @transform_6(%arg0: i32, %arg1: i32) -> (i32, i32, i32, i32) {
    %c0_i32 = arith.constant 0 : i32
    %c0_i32_0 = arith.constant 0 : i32
    %c0_i32_1 = arith.constant 0 : i32
    return %arg0, %arg1, %c0_i32, %c0_i32_0 : i32, i32, i32, i32
  }
}

</mosaic_0001>

<bundles_post_ra>
// kernel: decoder_block.5
= control target key start
LH: loop header
LB: loop body
LE: loop exit
PB: predicated region body
PF: predicated region fallthrough
CT: control target
= control target key end

     0   :  { %s492_s12 = smov 0   ;;  %s494_s13 = smov 0   ;;  %s556_s0 = inlined_call_operand.vmem [shape: f32[2,8,1024], index: 0, kind: input, shape index: {}, may-alias: {0,3}]   ;;  %s557_s1 = inlined_call_operand.vmem [shape: f32[8,1], index: 1, kind: input, shape index: {}]   ;;  %s558_s2 = inlined_call_operand.vmem [shape: f32[8,1], index: 2, kind: input, shape index: {}]   ;;  %s559_s3 = inlined_call_operand.vmem [shape: f32[2,8,1024], index: 3, kind: output, shape index: {}, may-alias: {0,3}]  }
   0x1   :  { %s496_s14 = smov 0   ;;  %s498_s15 = smov 0  }
   0x2   :  { %s500_s16 = smov 0  }
   0x3 LB: > { %s22_s17 = sadd.s32 1, %s461_s14  ;;  %s25_s18 = sadd.s32 1, %s465_s15  ;;  %s469_s16 = sphi %s500_s16, %s13_s16   ;;  %s465_s15 = sphi %s498_s15, %s563_s15   ;;  %s461_s14 = sphi %s496_s14, %s562_s14   ;;  %s457_s13 = sphi %s494_s13, %s561_s13   ;;  %s453_s12 = sphi %s492_s12, %s560_s12  }
   0x4   : > { %p23_p0 = scmp.ge.s32.totalorder %s22_s17, 2  ;;  %p360_p1 = scmp.ge.s32.totalorder %s469_s16, 1 }
   0x5   : > { %p158_p2 = scmp.lt.s32.totalorder %s469_s16, 5 }
   0x6   : > { %s565_s17 = smov (%p23_p0, %s22_s17), 0  ;;  %s567_s18 = smov (!%p23_p0, %s25_s18), %s465_s15 }
   0x7   : > { %p159_p3 = pnand %p360_p1, %p158_p2  ;;  %p27_p4 = scmp.ge.s32.totalorder %s567_s18, 2 }
   0x8   : > { %v214_v0 = vld [vmem:[%s557_s1] sm:$0xff] (!%p159_p3)  ;;  %v471_v1 = vmov (!%p159_p3), 0   ;;  %s361_s23 = sshll.u32 (!%p159_p3), %s453_s12, 2  ;;  %p191_p5 = scmp.lt.s32.totalorder (!%p159_p3), %s457_s13, 1 }
   0x9   : > { %s569_s18 = smov (%p27_p4, %s567_s18), 0  ;;  %162 = sbr.rel (%p159_p3) target bundleno = 177 (0xb1), region = 32 }
   0xa   : > { %414 = vset.pattern.permute.xlu0 (!%p159_p3), %v471_v1  ;;  %v224_v2 = vld [vmem:[%s558_s2] sm:$0xff] (!%p159_p3)  ;;  %p193_p6 = scmp.lt.s32.totalorder (!%p159_p3), %s361_s23, 7 }
   0xb   : > { %217 = vperm.xlu0 (!%p159_p3), %414, %v214_v0  }
   0xf   : > { %227 = vperm.xlu0 (!%p159_p3), %414, %v224_v2  }
  0x10   : > { %s571_s13 = smov (!%p191_p5, %s457_s13), 1  ;;  %s573_s23 = smov (!%p193_p6, %s361_s23), 7 }
  0x11   : > { %s362_s24 = sshll.u32 %s571_s13, 3 }
  0x12   : > { %s528_s25 = sadd.s32 %s362_s24, %s573_s23 }
  0x13   : > { %s363_s26 = sshll.u32 %s528_s25, 3 }
  0x14   : > { %s198_s29 = scalar_lea.vmem %s556_s0, %s363_s26  ;;  %s208_s5 = scalar_lea.vmem %s559_s3, %s363_s26 }
  0x15   : > { %v210_v3 = vld [vmem:[%s198_s29] sm:$0xff]  ;;  %v211_v5 = vld [vmem:[%s198_s29 + $0x8] sm:$0xff]  ;;  %v212_v6 = vld [vmem:[%s198_s29 + $0x10] sm:$0xff] }
  0x16   : > { %v213_v7 = vld [vmem:[%s198_s29 + $0x18] sm:$0xff] }
  0x8a   : > { %v218_v4 = vpop.permute.xlu0 %217 }
  0x8b   : > { %v220_v8 = vmul.f32 %v218_v4, %v210_v3  ;;  %v221_v9 = vmul.f32 %v218_v4, %v211_v5  ;;  %v222_v10 = vmul.f32 %v218_v4, %v212_v6  ;;  %v223_v11 = vmul.f32 %v218_v4, %v213_v7 }
  0x8e   : > { %v228_v12 = vpop.permute.xlu0 %227 }
  0x8f   : > { %v230_v13 = vadd.f32 %v228_v12, %v220_v8  ;;  %v231_v14 = vadd.f32 %v228_v12, %v221_v9  ;;  %v232_v15 = vadd.f32 %v228_v12, %v222_v10  ;;  %v233_v16 = vadd.f32 %v228_v12, %v223_v11 }
  0x91   : > { %v367_v17 = vmul.f32 -1.442695, %v230_v13  ;;  %v368_v18 = vmul.f32 -1.442695, %v231_v14  ;;  %v369_v19 = vmul.f32 -1.442695, %v232_v15 }
  0x92   : > { %v370_v20 = vmul.f32 -1.442695, %v233_v16 }
  0x93   : > { %415 = vpow2.f32 %v367_v17 }
  0x94   : > { %417 = vpow2.f32 %v368_v18 }
  0x95   : > { %419 = vpow2.f32 %v369_v19 }
  0x96   : > { %421 = vpow2.f32 %v370_v20 }
  0x9d   : > { %v416_v21 = vpop.eup %415 }
  0x9e   : > { %v418_v22 = vpop.eup %417  ;;  %v246_v23 = vadd.f32 1.0, %v416_v21 }
  0x9f   : > { %v420_v24 = vpop.eup %419  ;;  %v247_v25 = vadd.f32 1.0, %v418_v22 }
  0xa0   : > { %v422_v26 = vpop.eup %421  ;;  %v248_v27 = vadd.f32 1.0, %v420_v24  ;;  %423 = vrcp.f32 %v246_v23 }
  0xa1   : > { %v249_v28 = vadd.f32 1.0, %v422_v26  ;;  %425 = vrcp.f32 %v247_v25 }
  0xa2   : > { %427 = vrcp.f32 %v248_v27 }
  0xa3   : > { %429 = vrcp.f32 %v249_v28 }
  0xaa   : > { %v424_v29 = vpop.eup %423 }
  0xab   : > { %v426_v30 = vpop.eup %425  ;;  %v258_v31 = vmul.f32 %v424_v29, %v230_v13 }
  0xac   : > { %v428_v32 = vpop.eup %427  ;;  %v259_v33 = vmul.f32 %v426_v30, %v231_v14 }
  0xad   : > { %v430_v34 = vpop.eup %429  ;;  %v260_v35 = vmul.f32 %v428_v32, %v232_v15  ;;  %262 = vst [vmem:[%s208_s5] sm:$0xff] %v258_v31 }
  0xae   : > { %v261_v36 = vmul.f32 %v430_v34, %v233_v16  ;;  %263 = vst [vmem:[%s208_s5 + $0x8] sm:$0xff] %v259_v33 }
  0xaf   : > { %264 = vst [vmem:[%s208_s5 + $0x10] sm:$0xff] %v260_v35 }
  0xb0   : > { %265 = vst [vmem:[%s208_s5 + $0x18] sm:$0xff] %v261_v36 }
  0xb1 PF: > { %s13_s16 = sadd.s32 1, %s469_s16   ;;  %s560_s12 = smov %s461_s14 }
  0xb2   : > { %p10_p7 = scmp.ge.s32.totalorder %s13_s16, 6   ;;  %s561_s13 = smov %s465_s15 }
  0xb3   : > { %s562_s14 = smov %s565_s17  ;;  %s563_s15 = smov %s569_s18 }
  0xb4   :  { %12 = sbr.rel (!%p10_p7) target bundleno = 3 (0x3), region = 62 }

// kernel: decoder_block.7
= control target key start
LH: loop header
LB: loop body
LE: loop exit
PB: predicated region body
PF: predicated region fallthrough
CT: control target
= control target key end

     0   :  { %s572_s12 = smov 0   ;;  %s574_s13 = smov 0   ;;  %s636_s0 = inlined_call_operand.vmem [shape: f32[2,3,4096], index: 0, kind: input, shape index: {}, may-alias: {0,3}]   ;;  %s637_s1 = inlined_call_operand.vmem [shape: f32[3,1], index: 1, kind: input, shape index: {}]   ;;  %s638_s2 = inlined_call_operand.vmem [shape: f32[3,1], index: 2, kind: input, shape index: {}]   ;;  %s639_s3 = inlined_call_operand.vmem [shape: f32[2,3,4096], index: 3, kind: output, shape index: {}, may-alias: {0,3}]  }
   0x1   :  { %s576_s14 = smov 0   ;;  %s578_s15 = smov 0  }
   0x2   :  { %s580_s16 = smov 0  }
   0x3 LB: > { %s22_s17 = sadd.s32 1, %s540_s14  ;;  %s25_s18 = sadd.s32 1, %s544_s15  ;;  %s548_s16 = sphi %s580_s16, %s13_s16   ;;  %s544_s15 = sphi %s578_s15, %s643_s15   ;;  %s540_s14 = sphi %s576_s14, %s642_s14   ;;  %s536_s13 = sphi %s574_s13, %s641_s13   ;;  %s532_s12 = sphi %s572_s12, %s640_s12  }
   0x4   : > { %p23_p0 = scmp.ge.s32.totalorder %s22_s17, 2  ;;  %p418_p1 = scmp.ge.s32.totalorder %s548_s16, 1 }
   0x5   : > { %p158_p2 = scmp.lt.s32.totalorder %s548_s16, 5 }
   0x6   : > { %s645_s17 = smov (%p23_p0, %s22_s17), 0  ;;  %s647_s18 = smov (!%p23_p0, %s25_s18), %s544_s15 }
   0x7   : > { %p159_p3 = pnand %p418_p1, %p158_p2  ;;  %p27_p4 = scmp.ge.s32.totalorder %s647_s18, 2 }
   0x8   : > { %v218_v0 = vld [vmem:[%s637_s1] sm:$0x7] (!%p159_p3)  ;;  %v550_v1 = vmov (!%p159_p3), 0   ;;  %s419_s23 = sshll.u32 (!%p159_p3), %s532_s12, 4  ;;  %p191_p5 = scmp.lt.s32.totalorder (!%p159_p3), %s536_s13, 1  ;;  %v226_v5 = vlaneseq (!%p159_p3) }
   0x9   : > { %s649_s18 = smov (%p27_p4, %s647_s18), 0  ;;  %162 = sbr.rel (%p159_p3) target bundleno = 183 (0xb7), region = 32 }
   0xa   : > { %477 = vset.pattern.permute.xlu0 (!%p159_p3), %v550_v1  ;;  %v239_v2 = vld [vmem:[%s638_s2] sm:$0x7] (!%p159_p3)  ;;  %p193_p6 = scmp.lt.s32.totalorder (!%p159_p3), %s419_s23, 31  ;;  %v551_v3 = vmov (!%p159_p3), 839922192   ;;  %v227_v7 = vshrl.u32 (!%p159_p3), %v226_v5, 7 }
   0xb   : > { %221 = vperm.xlu0 (!%p159_p3), %477, %v218_v0   ;;  %v224_v4 = vunpack.c.l.s4 (!%p159_p3), %v551_v3 }
   0xd   : > { %v225_v6 = vunpack.c.0.s8 (!%p159_p3), %v224_v4 }
   0xf   : > { %242 = vperm.xlu0 (!%p159_p3), %477, %v239_v2   ;;  %v228_v8 = vsub.s32 (!%p159_p3), %v225_v6, %v227_v7 }
  0x10   : > { %s651_s13 = smov (!%p191_p5, %s536_s13), 1  ;;  %s653_s23 = smov (!%p193_p6, %s419_s23), 31 }
  0x11   : > { %s420_s24 = sshll.u32 %s651_s13, 5 }
  0x12   : > { %s608_s25 = sadd.s32 %s420_s24, %s653_s23 }
  0x13   : > { %s421_s26 = sshll.u32 %s608_s25, 2 }
  0x14   : > { %s198_s29 = scalar_lea.vmem %s636_s0, %s421_s26  ;;  %s208_s5 = scalar_lea.vmem %s639_s3, %s421_s26 }
  0x15   : > { %v210_v10 = vld [vmem:[%s198_s29] sm:$0x77]  ;;  %v211_v12 = vld [vmem:[%s198_s29 + $0x8] sm:$0x77]  ;;  %v212_v13 = vld [vmem:[%s198_s29 + $0x10] sm:$0x77] }
  0x16   : > { %v213_v14 = vld [vmem:[%s198_s29 + $0x18] sm:$0x77]  ;;  %v214_v15 = vld [vmem:[%s198_s29 + $0x20] sm:$0x77]  ;;  %v215_v16 = vld [vmem:[%s198_s29 + $0x28] sm:$0x77] }
  0x17   : > { %v216_v17 = vld [vmem:[%s198_s29 + $0x30] sm:$0x77]  ;;  %v217_v20 = vld [vmem:[%s198_s29 + $0x38] sm:$0x77] }
  0x8a   : > { %v222_v9 = vpop.permute.xlu0 %221 }
  0x8b   : > { %v229_v11 = vrot.slane %v222_v9, %v228_v8 }
  0x8d   : > { %v231_v18 = vmul.f32 %v229_v11, %v210_v10  ;;  %v232_v21 = vmul.f32 %v229_v11, %v211_v12  ;;  %v233_v22 = vmul.f32 %v229_v11, %v212_v13  ;;  %v234_v23 = vmul.f32 %v229_v11, %v213_v14 }
  0x8e   : > { %v243_v19 = vpop.permute.xlu0 %242  ;;  %v235_v25 = vmul.f32 %v229_v11, %v214_v15  ;;  %v236_v26 = vmul.f32 %v229_v11, %v215_v16  ;;  %v237_v27 = vmul.f32 %v229_v11, %v216_v17  ;;  %v238_v32 = vmul.f32 %v229_v11, %v217_v20 }
  0x8f   : > { %v250_v24 = vrot.slane %v243_v19, %v228_v8 }
  0x91   : > { %v252_v28 = vadd.f32 %v250_v24, %v231_v18  ;;  %v253_v29 = vadd.f32 %v250_v24, %v232_v21  ;;  %v254_v30 = vadd.f32 %v250_v24, %v233_v22  ;;  %v255_v31 = vadd.f32 %v250_v24, %v234_v23 }
  0x92   : > { %v256_v33 = vadd.f32 %v250_v24, %v235_v25  ;;  %v257_v34 = vadd.f32 %v250_v24, %v236_v26  ;;  %v258_v35 = vadd.f32 %v250_v24, %v237_v27  ;;  %v259_v39 = vadd.f32 %v250_v24, %v238_v32 }
  0x93   : > { %v425_v36 = vmul.f32 -1.442695, %v252_v28  ;;  %v426_v37 = vmul.f32 -1.442695, %v253_v29  ;;  %v427_v38 = vmul.f32 -1.442695, %v254_v30 }
  0x94   : > { %v428_v40 = vmul.f32 -1.442695, %v255_v31  ;;  %v429_v41 = vmul.f32 -1.442695, %v256_v33  ;;  %v430_v42 = vmul.f32 -1.442695, %v257_v34 }
  0x95   : > { %478 = vpow2.f32 %v425_v36  ;;  %v431_v43 = vmul.f32 -1.442695, %v258_v35  ;;  %v432_v44 = vmul.f32 -1.442695, %v259_v39 }
  0x96   : > { %480 = vpow2.f32 %v426_v37 }
  0x97   : > { %482 = vpow2.f32 %v427_v38 }
  0x98   : > { %484 = vpow2.f32 %v428_v40 }
  0x99   : > { %486 = vpow2.f32 %v429_v41 }
  0x9a   : > { %488 = vpow2.f32 %v430_v42 }
  0x9b   : > { %490 = vpow2.f32 %v431_v43 }
  0x9c   : > { %492 = vpow2.f32 %v432_v44 }
  0x9f   : > { %v479_v45 = vpop.eup %478 }
  0xa0   : > { %v481_v46 = vpop.eup %480  ;;  %v284_v47 = vadd.f32 1.0, %v479_v45 }
  0xa1   : > { %v483_v48 = vpop.eup %482  ;;  %v285_v49 = vadd.f32 1.0, %v481_v46 }
  0xa2   : > { %v485_v50 = vpop.eup %484  ;;  %v286_v51 = vadd.f32 1.0, %v483_v48  ;;  %494 = vrcp.f32 %v284_v47 }
  0xa3   : > { %v487_v52 = vpop.eup %486  ;;  %v287_v53 = vadd.f32 1.0, %v485_v50  ;;  %496 = vrcp.f32 %v285_v49 }
  0xa4   : > { %v489_v54 = vpop.eup %488  ;;  %v288_v55 = vadd.f32 1.0, %v487_v52  ;;  %498 = vrcp.f32 %v286_v51 }
  0xa5   : > { %v491_v56 = vpop.eup %490  ;;  %v289_v57 = vadd.f32 1.0, %v489_v54  ;;  %500 = vrcp.f32 %v287_v53 }
  0xa6   : > { %v493_v58 = vpop.eup %492  ;;  %v290_v59 = vadd.f32 1.0, %v491_v56  ;;  %502 = vrcp.f32 %v288_v55 }
  0xa7   : > { %v291_v60 = vadd.f32 1.0, %v493_v58  ;;  %504 = vrcp.f32 %v289_v57 }
  0xa8   : > { %506 = vrcp.f32 %v290_v59 }
  0xa9   : > { %508 = vrcp.f32 %v291_v60 }
  0xac   : > { %v495_v61 = vpop.eup %494 }
  0xad   : > { %v497_v62 = vpop.eup %496  ;;  %v308_v63 = vmul.f32 %v495_v61, %v252_v28 }
  0xae   : > { %v499_v0 = vpop.eup %498  ;;  %v309_v1 = vmul.f32 %v497_v62, %v253_v29 }
  0xaf   : > { %v501_v2 = vpop.eup %500  ;;  %v310_v3 = vmul.f32 %v499_v0, %v254_v30  ;;  %316 = vst [vmem:[%s208_s5] sm:$0x77] %v308_v63 }
  0xb0   : > { %v503_v4 = vpop.eup %502  ;;  %v311_v5 = vmul.f32 %v501_v2, %v255_v31  ;;  %317 = vst [vmem:[%s208_s5 + $0x8] sm:$0x77] %v309_v1 }
  0xb1   : > { %v505_v6 = vpop.eup %504  ;;  %v312_v7 = vmul.f32 %v503_v4, %v256_v33  ;;  %318 = vst [vmem:[%s208_s5 + $0x10] sm:$0x77] %v310_v3 }
  0xb2   : > { %v507_v8 = vpop.eup %506  ;;  %v313_v9 = vmul.f32 %v505_v6, %v257_v34  ;;  %319 = vst [vmem:[%s208_s5 + $0x18] sm:$0x77] %v311_v5 }
  0xb3   : > { %v509_v10 = vpop.eup %508  ;;  %v314_v11 = vmul.f32 %v507_v8, %v258_v35  ;;  %320 = vst [vmem:[%s208_s5 + $0x20] sm:$0x77] %v312_v7 }
  0xb4   : > { %v315_v12 = vmul.f32 %v509_v10, %v259_v39  ;;  %321 = vst [vmem:[%s208_s5 + $0x28] sm:$0x77] %v313_v9 }
  0xb5   : > { %322 = vst [vmem:[%s208_s5 + $0x30] sm:$0x77] %v314_v11 }
  0xb6   : > { %323 = vst [vmem:[%s208_s5 + $0x38] sm:$0x77] %v315_v12 }
  0xb7 PF: > { %s13_s16 = sadd.s32 1, %s548_s16   ;;  %s640_s12 = smov %s540_s14 }
  0xb8   : > { %p10_p7 = scmp.ge.s32.totalorder %s13_s16, 6   ;;  %s641_s13 = smov %s544_s15 }
  0xb9   : > { %s642_s14 = smov %s645_s17  ;;  %s643_s15 = smov %s649_s18 }
  0xba   :  { %12 = sbr.rel (!%p10_p7) target bundleno = 3 (0x3), region = 62 }

// kernel: decoder_block.4
= control target key start
LH: loop header
LB: loop body
LE: loop exit
PB: predicated region body
PF: predicated region fallthrough
CT: control target
= control target key end

     0   :  { %s6347_s21 = smov 0   ;;  %s6349_s22 = smov 0   ;;  %s7644_s0 = inlined_call_operand.vmem [shape: f32[2,2,4,9,17], index: 0, kind: input, shape index: {}]   ;;  %s7645_s1 = inlined_call_operand.vmem [shape: f32[32,16], index: 1, kind: input, shape index: {}]   ;;  %s7646_s2 = inlined_call_operand.vmem [shape: f32[16,32], index: 2, kind: input, shape index: {}]   ;;  %s7647_s3 = inlined_call_operand.vmem [shape: f32[16,32], index: 3, kind: input, shape index: {}]   ;;  %s7648_s4 = inlined_call_operand.vmem [shape: f32[8,1], index: 4, kind: input, shape index: {}]   ;;  %s7649_s5 = inlined_call_operand.vmem [shape: f32[2,8,16,64], index: 5, kind: output, shape index: {0}]   ;;  %s7650_s6 = inlined_call_operand.vmem [shape: f32[2,2,8,2], index: 6, kind: output, shape index: {1}]  }
   0x1   :  { %s6351_s23 = smov 0   ;;  %s6353_s24 = smov 0  }
   0x2   :  { %s6355_s25 = smov 0   ;;  %s6357_s26 = smov 0  }
   0x3   :  { %s6359_s27 = smov 0  }
   0x4 LB: > { %s26_s28 = sadd.s32 1, %s6295_s25  ;;  %s29_s29 = sadd.s32 1, %s6299_s26  ;;  %s6303_s27 = sphi %s6359_s27, %s17_s27   ;;  %s6299_s26 = sphi %s6357_s26, %s7657_s26   ;;  %s6295_s25 = sphi %s6355_s25, %s7656_s25   ;;  %s6291_s24 = sphi %s6353_s24, %s7655_s24   ;;  %s6287_s23 = sphi %s6351_s23, %s7654_s23   ;;  %s6283_s22 = sphi %s6349_s22, %s7653_s22   ;;  %s6279_s21 = sphi %s6347_s21, %s7652_s21  }
   0x5   : > { %p27_p0 = scmp.ge.s32.totalorder %s26_s28, 2  ;;  %s5469_s30 = sadd.s32 4294967295, %s6303_s27  }
   0x6   : > { %p160_p1 = scmp.ne.s32.totalorder %s6283_s22, %s6279_s21  ;;  %p161_p2 = scmp.eq.s32.totalorder %s5469_s30, 3 }
   0x7   : > { %s7659_s28 = smov (%p27_p0, %s26_s28), 0  ;;  %s7661_s29 = smov (!%p27_p0, %s29_s29), %s6299_s26 }
   0x8   : > { %s146_s7 = ssub.s32 %s6295_s25, %s7659_s28  ;;  %p31_p3 = scmp.ge.s32.totalorder %s7661_s29, 2 }
   0x9   : > { %p5473_p4 = scmp.ge.s32.totalorder %s6303_s27, 1  ;;  %p6393_p5 = por %p161_p2, %p160_p1 }
   0xa   : > { %p237_p6 = scmp.lt.s32.totalorder %s6303_s27, 5  ;;  %s7663_s29 = smov (%p31_p3, %s7661_s29), 0 }
   0xb   : > { %s145_s9 = ssub.s32 %s6299_s26, %s7663_s29  ;;  %s150_s11 = sadd.s32 1, %s6283_s22 }
   0xc   : > { %p238_p7 = pnand %p5473_p4, %p237_p6  ;;  %s147_s10 = sor.u32 %s146_s7, %s145_s9 }
   0xd   : > { %p148_p8 = scmp.eq.s32.totalorder %s147_s10, 0  ;;  %p278_p9 = scmp.lt.s32.totalorder (!%p238_p7), %s6291_s24, 1  ;;  %vm333_vm0 = vcmask (!%p238_p7), 1045509   ;;  %vm336_vm1 = vcmask (!%p238_p7), 1046534   ;;  %vm339_vm2 = vcmask (!%p238_p7), 1047559   ;;  %vm322_vm3 = vcmask (!%p238_p7), 1041409  }
   0xe   : > { %241 = sbr.rel (%p238_p7) target bundleno = 2316 (0x90c), region = 40  ;;  %p280_p10 = scmp.lt.s32.totalorder (!%p238_p7), %s6287_s23, 1  ;;  %vm325_vm4 = vcmask (!%p238_p7), 1042434   ;;  %vm328_vm5 = vcmask (!%p238_p7), 1043459   ;;  %v6436_v26 = vld [vmem:[%s7645_s1] sm:$0xff] (!%p238_p7)  ;;  %vm368_vm6 = vcmask (!%p238_p7), 130048  }
   0xf   : > { %s6404_s12 = scalar_select %p148_p8, %s6283_s22, %s150_s11  }
  0x10   : > { %5697 = vmatprep.mubr.msk.f32.mxu0 (!%p238_p7), %vm368_vm6, %v6436_v26  ;;  %s6305_s10 = smov (!%p238_p7), 127   ;;  %v301_v47 = vld [vmem:[%s7647_s3] sm:$0xff] (!%p238_p7)  ;;  %v302_v48 = vld [vmem:[%s7647_s3 + $0x8] sm:$0xff] (!%p238_p7)  ;;  %v6306_v59 = vmov (!%p238_p7), 0.0|0.0   ;;  %vm365_vm7 = vcmask (!%p238_p7), 1043456   ;;  %vm6307_vm8 = vmmov (!%p238_p7), 0  }
  0x11   : > { %v6468_v56 = vpack.c.bf16 (!%p238_p7), %v302_v48, %v301_v47  ;;  %6001 = vmatprep.subr.bf16.mxu1 (!%p238_p7), %v6306_v59  ;;  %s265_s7 = sand.u32 (!%p238_p7), 1, %s6279_s21   ;;  %vm818_vm9 = vcmask (!%p238_p7), 253952   ;;  %s6311_s9 = smov (!%p238_p7), 32   ;;  %vm933_vm10 = vcmask (!%p238_p7), 516352   ;;  %vm5267_vm11 = vcmask (!%p238_p7), 261120  }
  0x12   : > { %vm5274_vm12 = vcmask (!%p238_p7), 7168   ;;  %vm5276_vm13 = vcmask (!%p238_p7), 15360  }
  0x13   : > { %6003 = vmatpush3.bf16.msra.mxu1 (!%p238_p7), %v6468_v56 }
  0x14   : > { %6004 = vmatprep.subr.bf16.mxu1 (!%p238_p7), %v6306_v59 }
  0x15   : > { %s6409_s13 = scalar_select %p278_p9, %s6291_s24, 1 }
  0x16   : > { %s6412_s14 = scalar_select %p280_p10, %s6287_s23, 1 }
  0x17   : > { %s5476_s15 = sshll.u32 %s6409_s13, 4 }
  0x18   : > { %s5475_s16 = sshll.u32 %s6412_s14, 3 }
  0x19   : > { %s284_s17 = sadd.s32 %s5476_s15, %s5475_s16 }
  0x1a   : > { %s5477_s18 = sshll.u32 %s284_s17, 3 }
  0x1b   : > { %s6419_s30 = scalar_lea.vmem %s7644_s0, %s5477_s18 }
  0x1c   : > { %v309_v0 = vld [vmem:[%s6419_s30] sm:$0x1]  ;;  %v310_v1 = vld [vmem:[%s6419_s30 + $0x10] sm:$0x1]  ;;  %v313_v4 = vld [vmem:[%s6419_s30 + $0x1] sm:$0x1] }
  0x1d   : > { %v311_v2 = vld [vmem:[%s6419_s30 + $0x20] sm:$0x1]  ;;  %v312_v3 = vld [vmem:[%s6419_s30 + $0x30] sm:$0x1]  ;;  %v314_v5 = vld [vmem:[%s6419_s30 + $0x11] sm:$0x1] }
  0x1e   : > { %v315_v6 = vld [vmem:[%s6419_s30 + $0x21] sm:$0x1]  ;;  %v321_v7 = vrot.slane %v310_v1, 7  ;;  %v324_v8 = vrot.slane %v311_v2, 6  ;;  %v316_v9 = vld [vmem:[%s6419_s30 + $0x31] sm:$0x1] }
  0x1f   : > { %v327_v10 = vrot.slane %v312_v3, 5  ;;  %v331_v11 = vrot.slane %v309_v0, 4  ;;  %v332_v12 = vrot.slane %v310_v1, 3  ;;  %v335_v13 = vrot.slane %v311_v2, 2  ;;  %v948_v36 = vld [vmem:[%s6419_s30 + $0x1] sm:$0x1] }
  0x20   : > { %v338_v14 = vrot.slane %v312_v3, 1  ;;  %v348_v15 = vrot.slane %v314_v5, 7  ;;  %v350_v16 = vrot.slane %v315_v6, 6  ;;  %v352_v17 = vrot.slane %v316_v9, 5  ;;  %v949_v37 = vld [vmem:[%s6419_s30 + $0x11] sm:$0x1] }
  0x21   : > { %v334_v18 = vsel %vm333_vm0, %v332_v12, %v331_v11  ;;  %v355_v19 = vrot.slane %v313_v4, 4  ;;  %v356_v20 = vrot.slane %v314_v5, 3  ;;  %v358_v21 = vrot.slane %v315_v6, 2  ;;  %v950_v38 = vld [vmem:[%s6419_s30 + $0x21] sm:$0x1]  ;;  %v6483_v5 = vld [vmem:[%s7645_s1 + $0x8] sm:$0xff] }
  0x22   : > { %v337_v22 = vsel %vm336_vm1, %v335_v13, %v334_v18  ;;  %v360_v23 = vrot.slane %v316_v9, 1  ;;  %v323_v24 = vsel %vm322_vm3, %v321_v7, %v309_v0  ;;  %v349_v25 = vsel %vm322_vm3, %v348_v15, %v313_v4  ;;  %v6453_v39 = vld [vmem:[%s6419_s30 + $0x31] sm:$0x1]  ;;  %v952_v40 = vld [vmem:[%s6419_s30 + $0x2] sm:$0x1]  ;;  %v6498_v7 = vld [vmem:[%s7645_s1 + $0x18] sm:$0xff] }
  0x23   : > { %v340_v27 = vsel %vm339_vm2, %v338_v14, %v337_v22  ;;  %v357_v28 = vsel %vm333_vm0, %v356_v20, %v355_v19  ;;  %v326_v29 = vsel %vm325_vm4, %v324_v8, %v323_v24  ;;  %v351_v30 = vsel %vm325_vm4, %v350_v16, %v349_v25  ;;  %v953_v41 = vld [vmem:[%s6419_s30 + $0x12] sm:$0x1]  ;;  %v954_v42 = vld [vmem:[%s6419_s30 + $0x22] sm:$0x1]  ;;  %v4035_v48 = vld [vmem:[%s6419_s30 + $0x26] sm:$0x1] }
  0x24   : > { %v359_v31 = vsel %vm336_vm1, %v358_v21, %v357_v28  ;;  %v329_v32 = vsel %vm328_vm5, %v327_v10, %v326_v29  ;;  %v353_v33 = vsel %vm328_vm5, %v352_v17, %v351_v30  ;;  %v955_v43 = vld [vmem:[%s6419_s30 + $0x32] sm:$0x1]  ;;  %v967_v44 = vrot.slane %v948_v36, 4  ;;  %v6520_v28 = vld [vmem:[%s6419_s30 + $0x4] sm:$0x1] }
  0x25   : > { %v361_v34 = vsel %vm339_vm2, %v360_v23, %v359_v31  ;;  %v968_v45 = vrot.slane %v949_v37, 3  ;;  %v970_v46 = vrot.slane %v950_v38, 2  ;;  %v972_v49 = vrot.slane %v6453_v39, 1  ;;  %v6488_v6 = vld [vmem:[%s7645_s1 + $0x10] sm:$0xff]  ;;  %v6526_v30 = vld [vmem:[%s6419_s30 + $0x24] sm:$0x1] }
  0x26   : > { %v6188_v35 = vpack.i.bf16 %v361_v34, %v340_v27  ;;  %v988_v51 = vrot.slane %v952_v40, 4  ;;  %v989_v52 = vrot.slane %v953_v41, 3  ;;  %v991_v53 = vrot.slane %v954_v42, 2  ;;  %v6523_v29 = vld [vmem:[%s6419_s30 + $0x14] sm:$0x1] }
  0x27   : > { %v969_v50 = vsel %vm333_vm0, %v968_v45, %v967_v44  ;;  %v993_v55 = vrot.slane %v955_v43, 1  ;;  %v960_v8 = vrot.slane %v949_v37, 7  ;;  %v981_v9 = vrot.slane %v953_v41, 7  ;;  %v6529_v31 = vld [vmem:[%s6419_s30 + $0x34] sm:$0x1] }
  0x28   : > { %6189 = vrot.lane.b32.xlu0 %v6188_v35, %s6305_s10  ;;  %v971_v54 = vsel %vm336_vm1, %v970_v46, %v969_v50  ;;  %v990_v58 = vsel %vm333_vm0, %v989_v52, %v988_v51  ;;  %v962_v11 = vrot.slane %v950_v38, 6  ;;  %v983_v12 = vrot.slane %v954_v42, 6  ;;  %v6538_v34 = vld [vmem:[%s6419_s30 + $0x25] sm:$0x1]  ;;  %v6541_v35 = vld [vmem:[%s6419_s30 + $0x35] sm:$0x1] }
  0x29   : > { %v973_v57 = vsel %vm339_vm2, %v972_v49, %v971_v54  ;;  %v992_v60 = vsel %vm336_vm1, %v991_v53, %v990_v58  ;;  %v964_v13 = vrot.slane %v6453_v39, 5  ;;  %v985_v14 = vrot.slane %v955_v43, 5  ;;  %v4034_v45 = vld [vmem:[%s6419_s30 + $0x16] sm:$0x1]  ;;  %v4037_v52 = vld [vmem:[%s6419_s30 + $0x7] sm:$0x1] }
  0x2a   : > { %v994_v61 = vsel %vm339_vm2, %v993_v55, %v992_v60  ;;  %v961_v17 = vsel %vm322_vm3, %v960_v8, %v948_v36  ;;  %v982_v18 = vsel %vm322_vm3, %v981_v9, %v952_v40  ;;  %v6308_v21 = vmov 0.0   ;;  %v4033_v40 = vld [vmem:[%s6419_s30 + $0x6] sm:$0x1]  ;;  %v4036_v49 = vld [vmem:[%s6419_s30 + $0x36] sm:$0x1] }
  0x2b   : > { %v6193_v62 = vpack.i.bf16 %v994_v61, %v973_v57  ;;  %v963_v19 = vsel %vm325_vm4, %v962_v11, %v961_v17  ;;  %v984_v20 = vsel %vm325_vm4, %v983_v12, %v982_v18  ;;  %5707 = vmatprep.mubr.msk.f32.mxu1 %vm6307_vm8, %v6308_v21  ;;  %v2818_v36 = vrot.slane %v6520_v28, 4  ;;  %v4038_v54 = vld [vmem:[%s6419_s30 + $0x17] sm:$0x1]  ;;  %v4039_v55 = vld [vmem:[%s6419_s30 + $0x27] sm:$0x1] }
  0x2c   : > { %v965_v22 = vsel %vm328_vm5, %v964_v13, %v963_v19  ;;  %v986_v23 = vsel %vm328_vm5, %v985_v14, %v984_v20  ;;  %v2819_v37 = vrot.slane %v6523_v29, 3  ;;  %v2821_v38 = vrot.slane %v6526_v30, 2  ;;  %v4040_v60 = vld [vmem:[%s6419_s30 + $0x37] sm:$0x1]  ;;  %v6570_v9 = vld [vmem:[%s6419_s30 + $0x12] sm:$0x1] }
  0x2d   : > { %6194 = vrot.lane.b32.xlu0 %v6193_v62, %s6305_s10  ;;  %v2823_v39 = vrot.slane %v6529_v31, 1  ;;  %v2842_v44 = vrot.slane %v6538_v34, 2  ;;  %v2844_v47 = vrot.slane %v6541_v35, 1  ;;  %v4052_v57 = vrot.slane %v4033_v40, 4  ;;  %v6575_v12 = vld [vmem:[%s6419_s30 + $0x22] sm:$0x1] }
  0x2e   : > { %v2820_v41 = vsel %vm333_vm0, %v2819_v37, %v2818_v36  ;;  %v4053_v61 = vrot.slane %v4034_v45, 3  ;;  %v4055_v62 = vrot.slane %v4035_v48, 2  ;;  %v4076_v8 = vrot.slane %v4039_v55, 2  ;;  %v6578_v13 = vld [vmem:[%s6419_s30 + $0x32] sm:$0x1]  ;;  %v303_v45 = vld [vmem:[%s7648_s4] sm:$0xff] }
  0x2f   : > { %v2822_v46 = vsel %vm336_vm1, %v2821_v38, %v2820_v41  ;;  %v4078_v11 = vrot.slane %v4040_v60, 1  ;;  %v6583_v17 = vld [vmem:[%s6419_s30 + $0x3] sm:$0x1]  ;;  %v6587_v19 = vld [vmem:[%s6419_s30 + $0x13] sm:$0x1]  ;;  %v1587_v36 = vrot.slane %v6575_v12, 2 }
  0x30   : > { %v2824_v50 = vsel %vm339_vm2, %v2823_v39, %v2822_v46  ;;  %v6590_v20 = vld [vmem:[%s6419_s30 + $0x23] sm:$0x1]  ;;  %v1589_v37 = vrot.slane %v6578_v13, 1  ;;  %v1605_v41 = vrot.slane %v6583_v17, 4  ;;  %v1579_v60 = vrot.slane %v6575_v12, 6 }
  0x9a   : > { %v6190_v63 = vpop.permute.xlu0 %6189 }
  0x9b   : > { %v6192_v0 = vunpack.i.h.bf16 %v6190_v63  ;;  %v6191_v1 = vunpack.i.l.bf16 %v6190_v63  ;;  %v4057_v63 = vrot.slane %v4036_v49, 1 }
  0x9d   : > { %v366_v2 = vsel %vm365_vm7, %v329_v32, %v6191_v1  ;;  %v367_v3 = vsel %vm365_vm7, %v353_v33, %v6192_v0  ;;  %v6532_v32 = vld [vmem:[%s6419_s30 + $0x5] sm:$0x1]  ;;  %v6535_v33 = vld [vmem:[%s6419_s30 + $0x15] sm:$0x1]  ;;  %v6566_v1 = vld [vmem:[%s6419_s30 + $0x2] sm:$0x1] }
  0x9e   : > { %v5997_v4 = vpack.c.bf16 %v367_v3, %v366_v2  ;;  %v2839_v42 = vrot.slane %v6532_v32, 4  ;;  %v2840_v43 = vrot.slane %v6535_v33, 3  ;;  %v4054_v2 = vsel %vm333_vm0, %v4053_v61, %v4052_v57 }
  0x9f   : > { %v6195_v10 = vpop.permute.xlu0 %6194  ;;  %v4073_v3 = vrot.slane %v4037_v52, 4  ;;  %v300_v52 = vld [vmem:[%s7646_s2 + $0x8] sm:$0xff]  ;;  %v1581_v61 = vrot.slane %v6578_v13, 5 }
  0xa0   : > { %5998 = vmatprep.subr.bf16.mxu0 %v5997_v4  ;;  %v6197_v15 = vunpack.i.h.bf16 %v6195_v10  ;;  %v6196_v16 = vunpack.i.l.bf16 %v6195_v10  ;;  %v2841_v51 = vsel %vm333_vm0, %v2840_v43, %v2839_v42  ;;  %v4056_v10 = vsel %vm336_vm1, %v4055_v62, %v4054_v2  ;;  %v6656_v62 = vld [vmem:[%s6419_s30 + $0x3] sm:$0x1] }
  0xa1   : > { %6000 = vmatpush3.bf16.msra.mxu0 %v5997_v4  ;;  %v2843_v53 = vsel %vm336_vm1, %v2842_v44, %v2841_v51  ;;  %v4074_v4 = vrot.slane %v4038_v54, 3  ;;  %v4058_v14 = vsel %vm339_vm2, %v4057_v63, %v4056_v10  ;;  %v1606_v42 = vrot.slane %v6587_v19, 3  ;;  %v299_v51 = vld [vmem:[%s7646_s2] sm:$0xff]  ;;  %v6659_v63 = vld [vmem:[%s6419_s30 + $0x13] sm:$0x1] }
  0xa2   : > { %6007 = vmatprep.subr.bf16.mxu0 %v6306_v59  ;;  %v998_v24 = vsel %vm365_vm7, %v965_v22, %v6196_v16  ;;  %v999_v25 = vsel %vm365_vm7, %v986_v23, %v6197_v15  ;;  %v2845_v58 = vsel %vm339_vm2, %v2844_v47, %v2843_v53  ;;  %v6309_v16 = vmov 0   ;;  %v6665_v2 = vld [vmem:[%s6419_s30 + $0x23] sm:$0x1] }
  0xa3   : > { %v6516_v27 = vpack.c.bf16 %v999_v25, %v998_v24  ;;  %v6208_v0 = vpack.i.bf16 %v2845_v58, %v2824_v50  ;;  %v4075_v15 = vsel %vm333_vm0, %v4074_v4, %v4073_v3  ;;  %6228 = vset.pattern.permute.xlu0 %v6309_v16  ;;  %v1584_v22 = vrot.slane %v6566_v1, 4  ;;  %v6596_v25 = vld [vmem:[%s6419_s30 + $0x33] sm:$0x1]  ;;  %v6668_v3 = vld [vmem:[%s6419_s30 + $0x14] sm:$0x1] }
  0xa4   : > { %5698 = vmatmul.mubr.msk.f32.vlgmr.msra.gmra.mrb[0].mxu0 %vm368_vm6, %v6483_v5  ;;  %v4077_v18 = vsel %vm336_vm1, %v4076_v8, %v4075_v15  ;;  %v1585_v23 = vrot.slane %v6570_v9, 3  ;;  %v1608_v43 = vrot.slane %v6590_v20, 2  ;;  %v1610_v44 = vrot.slane %v6596_v25, 1  ;;  %v6671_v4 = vld [vmem:[%s6419_s30 + $0x24] sm:$0x1] }
  0xa5   : > { %5700 = vmatprep.mubr.msk.f32.mxu0 %vm368_vm6, %v6488_v6  ;;  %6009 = vmatpush3.bf16.msra.mxu0 %v6468_v56  ;;  %v4079_v24 = vsel %vm339_vm2, %v4078_v11, %v4077_v18  ;;  %v1607_v47 = vsel %vm333_vm0, %v1606_v42, %v1605_v41  ;;  %v6621_v53 = vpack.c.bf16 %v300_v52, %v299_v51  ;;  %v6674_v8 = vld [vmem:[%s6419_s30 + $0x33] sm:$0x1]  ;;  %v2201_v10 = vrot.slane %v6656_v62, 4  ;;  %v6702_v42 = vld [vmem:[%s6419_s30 + $0x35] sm:$0x1] }
  0xa6   : > { %6014 = vmatprep.subr.bf16.mxu0 %v6516_v27  ;;  %6209 = vrot.lane.b32.xlu0 %v6208_v0, %s6305_s10  ;;  %v6218_v38 = vpack.i.bf16 %v4079_v24, %v4058_v14  ;;  %v1586_v39 = vsel %vm333_vm0, %v1585_v23, %v1584_v22  ;;  %v1609_v48 = vsel %vm336_vm1, %v1608_v43, %v1607_v47  ;;  %v6662_v0 = vld [vmem:[%s6419_s30 + $0x4] sm:$0x1]  ;;  %v2202_v11 = vrot.slane %v6659_v63, 3  ;;  %v6705_v43 = vld [vmem:[%s6419_s30 + $0x6] sm:$0x1] }
  0xa7   : > { %v1588_v40 = vsel %vm336_vm1, %v1587_v36, %v1586_v39  ;;  %v1611_v49 = vsel %vm339_vm2, %v1610_v44, %v1609_v48  ;;  %v2204_v12 = vrot.slane %v6665_v2, 2  ;;  %v2206_v13 = vrot.slane %v6674_v8, 1  ;;  %v6697_v39 = vld [vmem:[%s6419_s30 + $0x25] sm:$0x1]  ;;  %v6710_v47 = vld [vmem:[%s6419_s30 + $0x16] sm:$0x1] }
  0xa8   : > { %5701 = vmatmul.mubr.msk.f32.gmra.mrb[2].mxu0 %vm368_vm6, %v6498_v7  ;;  %v1590_v46 = vsel %vm339_vm2, %v1589_v37, %v1588_v40  ;;  %v2222_v14 = vrot.slane %v6662_v0, 4  ;;  %v2223_v15 = vrot.slane %v6668_v3, 3  ;;  %v1598_v16 = vrot.slane %v6587_v19, 7  ;;  %v6691_v37 = vld [vmem:[%s6419_s30 + $0x5] sm:$0x1] }
  0xa9   : > { %5721 = vmatprep.mubr.msk.f32.mxu0 %vm6307_vm8, %v6308_v21  ;;  %v6198_v50 = vpack.i.bf16 %v1611_v49, %v1590_v46  ;;  %v2203_v18 = vsel %vm333_vm0, %v2202_v11, %v2201_v10  ;;  %v2225_v22 = vrot.slane %v6671_v4, 2  ;;  %v1600_v19 = vrot.slane %v6590_v20, 6  ;;  %v6713_v48 = vld [vmem:[%s6419_s30 + $0x26] sm:$0x1]  ;;  %v6719_v49 = vld [vmem:[%s6419_s30 + $0x36] sm:$0x1] }
  0xaa   : > { %6219 = vrot.lane.b32.xlu0 %v6218_v38, %s6305_s10  ;;  %v2205_v36 = vsel %vm336_vm1, %v2204_v12, %v2203_v18  ;;  %v6694_v38 = vld [vmem:[%s6419_s30 + $0x15] sm:$0x1]  ;;  %v1602_v40 = vrot.slane %v6596_v25, 5  ;;  %v2224_v46 = vsel %vm333_vm0, %v2223_v15, %v2222_v14  ;;  %v3438_v52 = vrot.slane %v6697_v39, 2  ;;  %v4650_v12 = vld [vmem:[%s6419_s30 + $0x7] sm:$0x1] }
  0xab   : > { %6199 = vrot.lane.b32.xlu1 %v6198_v50, %s6305_s10  ;;  %v2226_v25 = vsel %vm336_vm1, %v2225_v22, %v2224_v46  ;;  %v3435_v50 = vrot.slane %v6691_v37, 4  ;;  %v3436_v51 = vrot.slane %v6694_v38, 3  ;;  %v3459_v10 = vrot.slane %v6713_v48, 2  ;;  %v4651_v22 = vld [vmem:[%s6419_s30 + $0x17] sm:$0x1] }
  0xac   : > { %v3461_v11 = vrot.slane %v6719_v49, 1  ;;  %v1599_v18 = vsel %vm322_vm3, %v1598_v16, %v6583_v17 }
  0xad   : > { %v1601_v46 = vsel %vm325_vm4, %v1600_v19, %v1599_v18  ;;  %v4656_v19 = vld [vmem:[%s6419_s30 + $0x28] sm:$0x1] }
  0xae   : > { %306 = vperm.xlu0 %6228, %v303_v45   ;;  %v2207_v45 = vsel %vm339_vm2, %v2206_v13, %v2205_v36  ;;  %v1603_v17 = vsel %vm328_vm5, %v1602_v40, %v1601_v46 }
 0x11d   : > { %v6200_v24 = vpop.permute.xlu1 %6199 }
 0x11e   : > { %v6202_v41 = vunpack.i.h.bf16 %v6200_v24  ;;  %v6201_v44 = vunpack.i.l.bf16 %v6200_v24 }
 0x177   : > { %v5699_v54 = vpop.f32.mrb[0].mxu0 }
 0x178   : > { %v447_v55 = vpop.f32.mrb[1].mxu0  ;;  %5708 = vmatmul.mubr.msk.f32.vlgmr.msra.gmra.mrb[0].mxu1 %vm368_vm6, %v5699_v54 }
 0x179   : > { %6006 = vmatpush3.bf16.msra.mxu1 %v6621_v53  ;;  %5714 = vmatprep.mubr.msk.f32.mxu1 %vm6307_vm8, %v6308_v21 }
 0x17a   : > { %6010 = vmatprep.subr.bf16.mxu1 %v6306_v59 }
 0x17b   : > { %v5702_v57 = vpop.f32.mrb[2].mxu0 }
 0x17c   : > { %v457_v58 = vpop.f32.mrb[3].mxu0  ;;  %5715 = vmatmul.mubr.msk.f32.vlgmr.msra.gmra.mrb[2].mxu1 %vm368_vm6, %v447_v55  ;;  %5722 = vmatmul.mubr.msk.f32.vlgmr.msra.gmra.mrb[4].mxu0 %vm368_vm6, %v5702_v57  ;;  %v3440_v55 = vrot.slane %v6702_v42, 1  ;;  %v3456_v57 = vrot.slane %v6705_v43, 4 }
 0x17d   : > { %6016 = vmatpush3.bf16.msra.mxu0 %v6516_v27  ;;  %6012 = vmatpush3.bf16.msra.mxu1 %v6621_v53  ;;  %v1577_v27 = vrot.slane %v6570_v9, 7  ;;  %v6677_v9 = vld [vmem:[%s6419_s30 + $0x34] sm:$0x1] }
 0x17e   : > { %5728 = vmatprep.mubr.msk.f32.mxu1 %vm6307_vm8, %v6308_v21  ;;  %5735 = vmatprep.mubr.msk.f32.mxu0 %vm368_vm6, %v6436_v26  ;;  %v2227_v23 = vrot.slane %v6677_v9, 1 }
 0x17f   : > { %6023 = vmatprep.subr.bf16.mxu0 %v6306_v59  ;;  %6017 = vmatprep.subr.bf16.mxu1 %v6306_v59  ;;  %v1578_v20 = vsel %vm322_vm3, %v1577_v27, %v6566_v1  ;;  %v3457_v1 = vrot.slane %v6710_v47, 3  ;;  %v3437_v27 = vsel %vm333_vm0, %v3436_v51, %v3435_v50  ;;  %v1616_v50 = vsel %vm365_vm7, %v1603_v17, %v6202_v41  ;;  %v4653_v51 = vld [vmem:[%s6419_s30 + $0x37] sm:$0x1] }
 0x180   : > { %5729 = vmatmul.mubr.msk.f32.vlgmr.msra.gmra.mrb[4].mxu1 %vm368_vm6, %v457_v58  ;;  %5736 = vmatmul.mubr.msk.f32.vlgmr.msra.gmra.mrb[6].mxu0 %vm368_vm6, %v6483_v5  ;;  %v2228_v54 = vsel %vm339_vm2, %v2227_v23, %v2226_v25  ;;  %v3439_v13 = vsel %vm336_vm1, %v3438_v52, %v3437_v27  ;;  %v1580_v15 = vsel %vm325_vm4, %v1579_v60, %v1578_v20  ;;  %v4652_v23 = vld [vmem:[%s6419_s30 + $0x27] sm:$0x1]  ;;  %v4669_v20 = vrot.slane %v4650_v12, 4 }
 0x181   : > { %5738 = vmatprep.mubr.msk.f32.mxu0 %vm368_vm6, %v6488_v6  ;;  %6025 = vmatpush3.bf16.msra.mxu0 %v6468_v56  ;;  %v6203_v58 = vpack.i.bf16 %v2228_v54, %v2207_v45  ;;  %v3458_v14 = vsel %vm333_vm0, %v3457_v1, %v3456_v57  ;;  %v3441_v24 = vsel %vm339_vm2, %v3440_v55, %v3439_v13  ;;  %v4670_v52 = vrot.slane %v4651_v22, 3  ;;  %v4655_v57 = vld [vmem:[%s6419_s30 + $0x18] sm:$0x1]  ;;  %v6764_v22 = vpop.permute.xlu0 %6209 }
 0x182   : > { %6019 = vmatpush3.bf16.msra.mxu1 %v6468_v56  ;;  %5745 = vmatprep.mubr.msk.f32.mxu1 %vm6307_vm8, %v6308_v21  ;;  %v3460_v36 = vsel %vm336_vm1, %v3459_v10, %v3458_v14  ;;  %v1582_v45 = vsel %vm328_vm5, %v1581_v61, %v1580_v15  ;;  %v4672_v54 = vrot.slane %v4652_v23, 2  ;;  %v4654_v61 = vld [vmem:[%s6419_s30 + $0x8] sm:$0x1]  ;;  %v4657_v1 = vld [vmem:[%s6419_s30 + $0x38] sm:$0x1]  ;;  %v4674_v40 = vrot.slane %v4653_v51, 1 }
 0x183   : > { %6020 = vmatprep.subr.bf16.mxu1 %v6306_v59  ;;  %6204 = vrot.lane.b32.xlu1 %v6203_v58, %s6305_s10  ;;  %v3462_v60 = vsel %vm339_vm2, %v3461_v11, %v3460_v36  ;;  %v1615_v16 = vsel %vm365_vm7, %v1582_v45, %v6201_v44  ;;  %v4671_v58 = vsel %vm333_vm0, %v4670_v52, %v4669_v20  ;;  %v4690_v27 = vrot.slane %v4654_v61, 4 }
 0x184   : > { %5739 = vmatmul.mubr.msk.f32.gmra.mrb[8].mxu0 %vm368_vm6, %v6498_v7  ;;  %v6213_v25 = vpack.i.bf16 %v3462_v60, %v3441_v24  ;;  %v6750_v55 = vpack.c.bf16 %v1616_v50, %v1615_v16  ;;  %v4673_v44 = vsel %vm336_vm1, %v4672_v54, %v4671_v58  ;;  %v4691_v41 = vrot.slane %v4655_v57, 3 }
 0x185   : > { %5759 = vmatprep.mubr.msk.f32.mxu0 %vm6307_vm8, %v6308_v21  ;;  %v4693_v10 = vrot.slane %v4656_v19, 2  ;;  %v4695_v11 = vrot.slane %v4657_v1, 1  ;;  %v4675_v12 = vsel %vm339_vm2, %v4674_v40, %v4673_v44  ;;  %v6766_v23 = vpop.permute.xlu0 %6219  ;;  %v6310_v24 = vmov 1966171168  }
 0x186   : > { %6030 = vmatprep.subr.bf16.mxu0 %v6750_v55  ;;  %v4692_v13 = vsel %vm333_vm0, %v4691_v41, %v4690_v27  ;;  %v763_v36 = vunpack.c.l.s4 %v6310_v24  ;;  %v765_v45 = vlaneseq }
 0x187   : > { %6214 = vrot.lane.b32.xlu1 %v6213_v25, %s6305_s10  ;;  %v4694_v14 = vsel %vm336_vm1, %v4693_v10, %v4692_v13 }
 0x188   : > { %v4696_v15 = vsel %vm339_vm2, %v4695_v11, %v4694_v14  ;;  %v764_v17 = vunpack.c.0.s8 %v763_v36  ;;  %v766_v16 = vshrl.u32 %v765_v45, 7 }
 0x189   : > { %v6223_v18 = vpack.i.bf16 %v4696_v15, %v4675_v12  ;;  %v6768_v20 = vpop.permute.xlu0 %306 }
 0x18a   : > { %v6771_v61 = vsub.s32 %v764_v17, %v766_v16 }
 0x18b   : > { %6224 = vrot.lane.b32.xlu1 %v6223_v18, %s6305_s10  ;;  %s5474_s10 = sshll.u32 %s265_s7, 6 }
 0x18c   : > { %s6790_s21 = scalar_lea.vmem [#allocation2], %s5474_s10 }
 0x24b   : > { %v535_v46 = vpop.f32.mrb[0].mxu1 }
 0x24c   : > { %v5709_v60 = vpop.f32.mrb[1].mxu1 }
 0x24f   : > { %v608_v25 = vpop.f32.mrb[2].mxu1  ;;  %v682_v50 = vpop.f32.mrb[4].mxu0 }
 0x250   : > { %v609_v51 = vadd.f32 %v608_v25, %v535_v46  ;;  %v5716_v52 = vpop.f32.mrb[3].mxu1  ;;  %v5723_v54 = vpop.f32.mrb[5].mxu0  ;;  %v6788_v46 = vsub.s32 0, %v766_v16 }
 0x252   : > { %v612_v57 = vadd.f32 %v609_v51, %v6768_v20 }
 0x253   : > { %v755_v19 = vpop.f32.mrb[4].mxu1  ;;  %v5737_v1 = vpop.f32.mrb[6].mxu0 }
 0x254   : > { %v756_v58 = vadd.f32 %v755_v19, %v682_v50  ;;  %v5730_v40 = vpop.f32.mrb[5].mxu1  ;;  %v1066_v44 = vpop.f32.mrb[7].mxu0  ;;  %5746 = vmatmul.mubr.msk.f32.vlgmr.msra.gmra.mrb[6].mxu1 %vm368_vm6, %v5737_v1  ;;  %v768_v27 = vrot.slane %v612_v57, %v6771_v61  ;;  %v761_v41 = vcombine.high %v612_v57, %v612_v57  ;;  %v944_v13 = vmul.f32 %v612_v57, %v612_v57 }
 0x255   : > { %6022 = vmatpush3.bf16.msra.mxu1 %v6621_v53  ;;  %5752 = vmatprep.mubr.msk.f32.mxu1 %vm6307_vm8, %v6308_v21 }
 0x256   : > { %v759_v10 = vadd.f32 %v756_v58, %v6768_v20  ;;  %6026 = vmatprep.subr.bf16.mxu1 %v6306_v59  ;;  %v784_v11 = vrot.slane %v768_v27, %v6771_v61  ;;  %v776_v12 = vcombine.high %v768_v27, %v768_v27  ;;  %v775_v15 = vrot.slane %v761_v41, %v6771_v61 }
 0x257   : > { %v5740_v14 = vpop.f32.mrb[8].mxu0 }
 0x258   : > { %v6783_v18 = vadd.f32 %v759_v10, %v612_v57  ;;  %v946_v24 = vmul.f32 %v759_v10, %v759_v10  ;;  %v1076_v36 = vpop.f32.mrb[9].mxu0  ;;  %5753 = vmatmul.mubr.msk.f32.vlgmr.msra.gmra.mrb[8].mxu1 %vm368_vm6, %v1066_v44  ;;  %5760 = vmatmul.mubr.msk.f32.vlgmr.msra.gmra.mrb[10].mxu0 %vm368_vm6, %v5740_v14  ;;  %v835_v45 = vrot.slane %v759_v10, %v6771_v61 }
 0x259   : > { %819 = vst.msk [vmem:[%s6790_s21] sm:$0x1] %vm818_vm9, %v784_v11  ;;  %6032 = vmatpush3.bf16.msra.mxu0 %v6750_v55  ;;  %6028 = vmatpush3.bf16.msra.mxu1 %v6621_v53  ;;  %v828_v60 = vcombine.high %v759_v10, %v759_v10  ;;  %v806_v17 = vcombine.high %v784_v11, %v784_v11 }
 0x25a   : > { %v798_v25 = vrot.slane %v776_v12, %v6771_v61  ;;  %v6797_v50 = vadd.f32 %v946_v24, %v944_v13  ;;  %5766 = vmatprep.mubr.msk.f32.mxu1 %vm6307_vm8, %v6308_v21  ;;  %5773 = vmatprep.mubr.msk.f32.mxu0 %vm368_vm6, %v6436_v26  ;;  %v851_v16 = vrot.slane %v835_v45, %v6771_v61 }
 0x25b   : > { %v843_v51 = vcombine.high %v835_v45, %v835_v45  ;;  %v842_v55 = vrot.slane %v828_v60, %v6771_v61  ;;  %821 = vst.msk [vmem:[%s6790_s21 + $0x10] sm:$0x1] %vm818_vm9, %v806_v17  ;;  %v791_v52 = vrot.slane %v775_v15, %v6771_v61  ;;  %v777_v57 = vcombine.high %v775_v15, %v775_v15 }
 0x25c   : > { %820 = vst.msk [vmem:[%s6790_s21 + $0x8] sm:$0x1] %vm818_vm9, %v798_v25  ;;  %v808_v54 = vcombine.high %v798_v25, %v798_v25  ;;  %6039 = vmatprep.subr.bf16.mxu0 %v6306_v59  ;;  %5767 = vmatmul.mubr.msk.f32.vlgmr.msra.gmra.mrb[10].mxu1 %vm368_vm6, %v1076_v36  ;;  %v880_v19 = vrot.slane %v851_v16, %v6788_v46 }
 0x25d   : > { %5774 = vmatmul.mubr.msk.f32.vlgmr.msra.gmra.mrb[12].mxu0 %vm368_vm6, %v6483_v5  ;;  %v873_v1 = vcombine.high %v851_v16, %v851_v16  ;;  %v865_v58 = vrot.slane %v843_v51, %v6771_v61  ;;  %823 = vst.msk [vmem:[%s6790_s21 + $0x20] sm:$0x1] %vm818_vm9, %v791_v52  ;;  %v807_v40 = vcombine.high %v791_v52, %v791_v52  ;;  %v2194_v16 = vrot.slane %v6659_v63, 7 }
 0x25e   : > { %5776 = vmatprep.mubr.msk.f32.mxu0 %vm368_vm6, %v6488_v6  ;;  %822 = vst.msk [vmem:[%s6790_s21 + $0x18] sm:$0x1] %vm818_vm9, %v808_v54  ;;  %v805_v44 = vrot.slane %v777_v57, %v6771_v61  ;;  %909 = vrot.lane.b32.xlu1 %v880_v19, %s6311_s9  ;;  %v858_v41 = vrot.slane %v842_v55, %v6771_v61  ;;  %v2215_v51 = vrot.slane %v6668_v3, 7  ;;  %v2217_v52 = vrot.slane %v6671_v4, 6  ;;  %v6205_v19 = vpop.permute.xlu1 %6204 }
 0x25f   : > { %v888_v27 = vrot.slane %v873_v1, %v6788_v46  ;;  %6033 = vmatprep.subr.bf16.mxu1 %v6306_v59  ;;  %825 = vst.msk [vmem:[%s6790_s21 + $0x30] sm:$0x1] %vm818_vm9, %v807_v40  ;;  %6041 = vmatpush3.bf16.msra.mxu0 %v6468_v56  ;;  %v884_v11 = vrot.slane %v865_v58, %v6788_v46  ;;  %v2198_v54 = vrot.slane %v6674_v8, 5  ;;  %v2219_v57 = vrot.slane %v6677_v9, 5 }
 0x260   : > { %824 = vst.msk [vmem:[%s6790_s21 + $0x28] sm:$0x1] %vm818_vm9, %v805_v44  ;;  %v809_v10 = vcombine.high %v805_v44, %v805_v44  ;;  %v875_v12 = vcombine.high %v865_v58, %v865_v58  ;;  %v844_v13 = vcombine.high %v842_v55, %v842_v55  ;;  %6035 = vmatpush3.bf16.msra.mxu1 %v6468_v56  ;;  %v2196_v55 = vrot.slane %v6665_v2, 6 }
 0x261   : > { %913 = vrot.lane.b32.xlu0 %v888_v27, %s6311_s9  ;;  %5777 = vmatmul.mubr.msk.f32.gmra.mrb[14].mxu0 %vm368_vm6, %v6498_v7  ;;  %v896_v14 = vrot.slane %v858_v41, %v6788_v46  ;;  %v874_v15 = vcombine.high %v858_v41, %v858_v41  ;;  %v6207_v1 = vunpack.i.h.bf16 %v6205_v19  ;;  %v6206_v58 = vunpack.i.l.bf16 %v6205_v19 }
 0x262   : > { %826 = vst.msk [vmem:[%s6790_s21 + $0x38] sm:$0x1] %vm818_vm9, %v809_v10  ;;  %5783 = vmatprep.mubr.msk.f32.mxu1 %vm6307_vm8, %v6308_v21  ;;  %911 = vrot.lane.b32.xlu1 %v884_v11, %s6311_s9  ;;  %v892_v24 = vrot.slane %v875_v12, %v6788_v46  ;;  %v872_v36 = vrot.slane %v844_v13, %v6771_v61  ;;  %v6872_v27 = vpop.permute.xlu1 %6214 }
 0x263   : > { %6036 = vmatprep.subr.bf16.mxu1 %v6306_v59  ;;  %5797 = vmatprep.mubr.msk.f32.mxu0 %vm6307_vm8, %v6308_v21  ;;  %v904_v45 = vrot.slane %v874_v15, %v6788_v46  ;;  %v2195_v40 = vsel %vm322_vm3, %v2194_v16, %v6656_v62  ;;  %v2216_v63 = vsel %vm322_vm3, %v2215_v51, %v6662_v0 }
 0x264   : > { %v900_v60 = vrot.slane %v872_v36, %v6788_v46  ;;  %v876_v17 = vcombine.high %v872_v36, %v872_v36  ;;  %v2197_v3 = vsel %vm325_vm4, %v2196_v55, %v2195_v40  ;;  %v2218_v2 = vsel %vm325_vm4, %v2217_v52, %v2216_v63 }
 0x265   : > { %917 = vrot.lane.b32.xlu0 %v896_v14, %s6311_s9  ;;  %v2199_v4 = vsel %vm328_vm5, %v2198_v54, %v2197_v3  ;;  %v2220_v8 = vsel %vm328_vm5, %v2219_v57, %v2218_v2 }
 0x266   : > { %915 = vrot.lane.b32.xlu1 %v892_v24, %s6311_s9  ;;  %v908_v25 = vrot.slane %v876_v17, %v6788_v46  ;;  %v2232_v9 = vsel %vm365_vm7, %v2199_v4, %v6206_v58  ;;  %v2233_v44 = vsel %vm365_vm7, %v2220_v8, %v6207_v1  ;;  %v6874_v0 = vpop.permute.xlu1 %6224 }
 0x267   : > { %v6045_v62 = vpack.c.bf16 %v2233_v44, %v2232_v9 }
 0x269   : > { %921 = vrot.lane.b32.xlu0 %v904_v45, %s6311_s9  ;;  %6046 = vmatprep.subr.bf16.mxu0 %v6045_v62 }
 0x26a   : > { %919 = vrot.lane.b32.xlu1 %v900_v60, %s6311_s9 }
 0x26e   : > { %923 = vrot.lane.b32.xlu1 %v908_v25, %s6311_s9 }
 0x2d0   : > { %v910_v41 = vpop.permute.xlu1 %909 }
 0x2d1   : > { %934 = vst.msk [vmem:[%s6790_s21] sm:$0x1] %vm933_vm10, %v910_v41 }
 0x2d3   : > { %v914_v10 = vpop.permute.xlu0 %913 }
 0x2d4   : > { %936 = vst.msk [vmem:[%s6790_s21 + $0x10] sm:$0x1] %vm933_vm10, %v914_v10  ;;  %v912_v11 = vpop.permute.xlu1 %911 }
 0x2d5   : > { %935 = vst.msk [vmem:[%s6790_s21 + $0x8] sm:$0x1] %vm933_vm10, %v912_v11 }
 0x2d7   : > { %v918_v12 = vpop.permute.xlu0 %917 }
 0x2d8   : > { %938 = vst.msk [vmem:[%s6790_s21 + $0x20] sm:$0x1] %vm933_vm10, %v918_v12  ;;  %v916_v13 = vpop.permute.xlu1 %915 }
 0x2d9   : > { %937 = vst.msk [vmem:[%s6790_s21 + $0x18] sm:$0x1] %vm933_vm10, %v916_v13 }
 0x2db   : > { %v922_v14 = vpop.permute.xlu0 %921 }
 0x2dc   : > { %940 = vst.msk [vmem:[%s6790_s21 + $0x30] sm:$0x1] %vm933_vm10, %v922_v14  ;;  %v920_v15 = vpop.permute.xlu1 %919 }
 0x2dd   : > { %939 = vst.msk [vmem:[%s6790_s21 + $0x28] sm:$0x1] %vm933_vm10, %v920_v15 }
 0x2e0   : > { %v924_v24 = vpop.permute.xlu1 %923 }
 0x2e1   : > { %941 = vst.msk [vmem:[%s6790_s21 + $0x38] sm:$0x1] %vm933_vm10, %v924_v24 }
 0x327   : > { %v1154_v36 = vpop.f32.mrb[6].mxu1 }
 0x328   : > { %v5747_v45 = vpop.f32.mrb[7].mxu1 }
 0x32b   : > { %v1227_v60 = vpop.f32.mrb[8].mxu1  ;;  %v1301_v17 = vpop.f32.mrb[10].mxu0 }
 0x32c   : > { %v1228_v25 = vadd.f32 %v1227_v60, %v1154_v36  ;;  %v5754_v16 = vpop.f32.mrb[9].mxu1  ;;  %v5761_v51 = vpop.f32.mrb[11].mxu0 }
 0x32e   : > { %v1231_v55 = vadd.f32 %v1228_v25, %v6768_v20 }
 0x32f   : > { %v1374_v52 = vpop.f32.mrb[10].mxu1 }
 0x330   : > { %v5775_v54 = vpop.f32.mrb[12].mxu0  ;;  %v1380_v57 = vcombine.high %v1231_v55, %v1231_v55  ;;  %v1387_v19 = vrot.slane %v1231_v55, %v6771_v61  ;;  %v1559_v1 = vadd.f32 %v1231_v55, %v6783_v18  ;;  %v1561_v58 = vmul.f32 %v1231_v55, %v1231_v55  ;;  %v5768_v40 = vpop.f32.mrb[11].mxu1 }
 0x331   : > { %v1683_v63 = vpop.f32.mrb[13].mxu0  ;;  %5784 = vmatmul.mubr.msk.f32.vlgmr.msra.gmra.mrb[12].mxu1 %vm368_vm6, %v5775_v54  ;;  %v1375_v3 = vadd.f32 %v1374_v52, %v1301_v17 }
 0x332   : > { %6038 = vmatpush3.bf16.msra.mxu1 %v6621_v53  ;;  %5790 = vmatprep.mubr.msk.f32.mxu1 %vm6307_vm8, %v6308_v21  ;;  %v1394_v2 = vrot.slane %v1380_v57, %v6771_v61  ;;  %v1395_v4 = vcombine.high %v1387_v19, %v1387_v19  ;;  %v1562_v8 = vadd.f32 %v1561_v58, %v6797_v50 }
 0x333   : > { %6042 = vmatprep.subr.bf16.mxu1 %v6306_v59  ;;  %v1403_v18 = vrot.slane %v1387_v19, %v6771_v61  ;;  %v1378_v9 = vadd.f32 %v1375_v3, %v6768_v20 }
 0x334   : > { %v5778_v44 = vpop.f32.mrb[14].mxu0  ;;  %v1417_v10 = vrot.slane %v1395_v4, %v6771_v61  ;;  %v1410_v11 = vrot.slane %v1394_v2, %v6771_v61 }
 0x335   : > { %v1693_v41 = vpop.f32.mrb[15].mxu0  ;;  %5791 = vmatmul.mubr.msk.f32.vlgmr.msra.gmra.mrb[14].mxu1 %vm368_vm6, %v1683_v63  ;;  %5798 = vmatmul.mubr.msk.f32.vlgmr.msra.gmra.mrb[16].mxu0 %vm368_vm6, %v5778_v44  ;;  %1437 = vst.msk [vmem:[%s6790_s21 + $0x1] sm:$0x1] %vm818_vm9, %v1403_v18  ;;  %v1425_v50 = vcombine.high %v1403_v18, %v1403_v18  ;;  %v6910_v12 = vadd.f32 %v1559_v1, %v1378_v9  ;;  %v2832_v18 = vrot.slane %v6535_v33, 7  ;;  %v2834_v44 = vrot.slane %v6538_v34, 6 }
 0x336   : > { %v1563_v13 = vmul.f32 %v1378_v9, %v1378_v9  ;;  %6048 = vmatpush3.bf16.msra.mxu0 %v6045_v62  ;;  %6044 = vmatpush3.bf16.msra.mxu1 %v6621_v53  ;;  %v1453_v14 = vrot.slane %v1378_v9, %v6771_v61  ;;  %v1446_v15 = vcombine.high %v1378_v9, %v1378_v9  ;;  %v2813_v9 = vrot.slane %v6526_v30, 6 }
 0x337   : > { %5804 = vmatprep.mubr.msk.f32.mxu1 %vm6307_vm8, %v6308_v21  ;;  %5811 = vmatprep.mubr.msk.f32.mxu0 %vm368_vm6, %v6436_v26  ;;  %1438 = vst.msk [vmem:[%s6790_s21 + $0x9] sm:$0x1] %vm818_vm9, %v1417_v10  ;;  %1439 = vst.msk [vmem:[%s6790_s21 + $0x11] sm:$0x1] %vm818_vm9, %v1425_v50  ;;  %v1427_v24 = vcombine.high %v1417_v10, %v1417_v10  ;;  %v1396_v62 = vcombine.high %v1394_v2, %v1394_v2  ;;  %v2836_v10 = vrot.slane %v6541_v35, 5 }
 0x338   : > { %1441 = vst.msk [vmem:[%s6790_s21 + $0x21] sm:$0x1] %vm818_vm9, %v1410_v11  ;;  %v6924_v36 = vadd.f32 %v1563_v13, %v1562_v8  ;;  %v1469_v45 = vrot.slane %v1453_v14, %v6771_v61  ;;  %v1461_v60 = vcombine.high %v1453_v14, %v1453_v14  ;;  %v1426_v17 = vcombine.high %v1410_v11, %v1410_v11 }
 0x339   : > { %6055 = vmatprep.subr.bf16.mxu0 %v6306_v59  ;;  %5805 = vmatmul.mubr.msk.f32.vlgmr.msra.gmra.mrb[16].mxu1 %vm368_vm6, %v1693_v41  ;;  %v1460_v26 = vrot.slane %v1446_v15, %v6771_v61  ;;  %1440 = vst.msk [vmem:[%s6790_s21 + $0x19] sm:$0x1] %vm818_vm9, %v1427_v24  ;;  %v1424_v25 = vrot.slane %v1396_v62, %v6771_v61  ;;  %v2811_v8 = vrot.slane %v6523_v29, 7  ;;  %v2815_v41 = vrot.slane %v6529_v31, 5 }
 0x33a   : > { %5812 = vmatmul.mubr.msk.f32.vlgmr.msra.gmra.mrb[18].mxu0 %vm368_vm6, %v6483_v5  ;;  %v1498_v16 = vrot.slane %v1469_v45, %v6788_v46  ;;  %v1483_v51 = vrot.slane %v1461_v60, %v6771_v61  ;;  %v1491_v55 = vcombine.high %v1469_v45, %v1469_v45  ;;  %1443 = vst.msk [vmem:[%s6790_s21 + $0x31] sm:$0x1] %vm818_vm9, %v1426_v17  ;;  %v6212_v50 = vunpack.i.h.bf16 %v6764_v22 }
 0x33b   : > { %5814 = vmatprep.mubr.msk.f32.mxu0 %vm368_vm6, %v6488_v6  ;;  %6049 = vmatprep.subr.bf16.mxu1 %v6306_v59  ;;  %1442 = vst.msk [vmem:[%s6790_s21 + $0x29] sm:$0x1] %vm818_vm9, %v1424_v25  ;;  %v1428_v5 = vcombine.high %v1424_v25, %v1424_v25  ;;  %v1462_v6 = vcombine.high %v1460_v26, %v1460_v26  ;;  %v6211_v11 = vunpack.i.l.bf16 %v6764_v22 }
 0x33c   : > { %6057 = vmatpush3.bf16.msra.mxu0 %v6468_v56  ;;  %6051 = vmatpush3.bf16.msra.mxu1 %v6468_v56  ;;  %v1502_v52 = vrot.slane %v1483_v51, %v6788_v46  ;;  %v1493_v54 = vcombine.high %v1483_v51, %v1483_v51  ;;  %v1506_v57 = vrot.slane %v1491_v55, %v6788_v46 }
 0x33d   : > { %1527 = vrot.lane.b32.xlu0 %v1498_v16, %s6311_s9  ;;  %5821 = vmatprep.mubr.msk.f32.mxu1 %vm6307_vm8, %v6308_v21  ;;  %1444 = vst.msk [vmem:[%s6790_s21 + $0x39] sm:$0x1] %vm818_vm9, %v1428_v5  ;;  %v1476_v19 = vrot.slane %v1460_v26, %v6771_v61  ;;  %v1490_v58 = vrot.slane %v1462_v6, %v6771_v61 }
 0x33e   : > { %5815 = vmatmul.mubr.msk.f32.gmra.mrb[20].mxu0 %vm368_vm6, %v6498_v7  ;;  %6052 = vmatprep.subr.bf16.mxu1 %v6306_v59  ;;  %v1510_v1 = vrot.slane %v1493_v54, %v6788_v46  ;;  %v2812_v29 = vsel %vm322_vm3, %v2811_v8, %v6520_v28  ;;  %v2833_v33 = vsel %vm322_vm3, %v2832_v18, %v6532_v32 }
 0x33f   : > { %1529 = vrot.lane.b32.xlu1 %v1502_v52, %s6311_s9  ;;  %5835 = vmatprep.mubr.msk.f32.mxu0 %vm6307_vm8, %v6308_v21  ;;  %v1514_v7 = vrot.slane %v1476_v19, %v6788_v46  ;;  %v1492_v40 = vcombine.high %v1476_v19, %v1476_v19  ;;  %v1518_v63 = vrot.slane %v1490_v58, %v6788_v46 }
 0x340   : > { %v1494_v3 = vcombine.high %v1490_v58, %v1490_v58  ;;  %v2814_v30 = vsel %vm325_vm4, %v2813_v9, %v2812_v29  ;;  %v2835_v34 = vsel %vm325_vm4, %v2834_v44, %v2833_v33  ;;  %v7033_v33 = vld [vmem:[%s7645_s1] sm:$0xff] }
 0x341   : > { %1531 = vrot.lane.b32.xlu0 %v1506_v57, %s6311_s9  ;;  %v1522_v2 = vrot.slane %v1492_v40, %v6788_v46  ;;  %v2816_v31 = vsel %vm328_vm5, %v2815_v41, %v2814_v30  ;;  %v2837_v35 = vsel %vm328_vm5, %v2836_v10, %v2835_v34 }
 0x342   : > { %v1526_v4 = vrot.slane %v1494_v3, %v6788_v46  ;;  %v2849_v22 = vsel %vm365_vm7, %v2816_v31, %v6211_v11  ;;  %v2850_v13 = vsel %vm365_vm7, %v2837_v35, %v6212_v50 }
 0x343   : > { %1533 = vrot.lane.b32.xlu1 %v1510_v1, %s6311_s9  ;;  %v6061_v28 = vpack.c.bf16 %v2850_v13, %v2849_v22 }
 0x345   : > { %1535 = vrot.lane.b32.xlu0 %v1514_v7, %s6311_s9  ;;  %6062 = vmatprep.subr.bf16.mxu0 %v6061_v28 }
 0x347   : > { %1537 = vrot.lane.b32.xlu1 %v1518_v63, %s6311_s9 }
 0x349   : > { %1539 = vrot.lane.b32.xlu0 %v1522_v2, %s6311_s9 }
 0x34b   : > { %1541 = vrot.lane.b32.xlu1 %v1526_v4, %s6311_s9 }
 0x3af   : > { %v1528_v32 = vpop.permute.xlu0 %1527 }
 0x3b0   : > { %1551 = vst.msk [vmem:[%s6790_s21 + $0x1] sm:$0x1] %vm933_vm10, %v1528_v32  ;;  %v7051_v32 = vld [vmem:[%s7645_s1 + $0x8] sm:$0xff] }
 0x3b1   : > { %v1530_v14 = vpop.permute.xlu1 %1529 }
 0x3b2   : > { %1552 = vst.msk [vmem:[%s6790_s21 + $0x9] sm:$0x1] %vm933_vm10, %v1530_v14 }
 0x3b3   : > { %v1532_v15 = vpop.permute.xlu0 %1531 }
 0x3b4   : > { %1553 = vst.msk [vmem:[%s6790_s21 + $0x11] sm:$0x1] %vm933_vm10, %v1532_v15 }
 0x3b5   : > { %v1534_v24 = vpop.permute.xlu1 %1533 }
 0x3b6   : > { %1554 = vst.msk [vmem:[%s6790_s21 + $0x19] sm:$0x1] %vm933_vm10, %v1534_v24 }
 0x3b7   : > { %v1536_v62 = vpop.permute.xlu0 %1535 }
 0x3b8   : > { %1555 = vst.msk [vmem:[%s6790_s21 + $0x21] sm:$0x1] %vm933_vm10, %v1536_v62  ;;  %v7063_v62 = vld [vmem:[%s7645_s1 + $0x10] sm:$0xff] }
 0x3b9   : > { %v1538_v45 = vpop.permute.xlu1 %1537 }
 0x3ba   : > { %1556 = vst.msk [vmem:[%s6790_s21 + $0x29] sm:$0x1] %vm933_vm10, %v1538_v45 }
 0x3bb   : > { %v1540_v60 = vpop.permute.xlu0 %1539 }
 0x3bc   : > { %1557 = vst.msk [vmem:[%s6790_s21 + $0x31] sm:$0x1] %vm933_vm10, %v1540_v60 }
 0x3bd   : > { %v1542_v17 = vpop.permute.xlu1 %1541 }
 0x3be   : > { %1558 = vst.msk [vmem:[%s6790_s21 + $0x39] sm:$0x1] %vm933_vm10, %v1542_v17 }
 0x404   : > { %v1771_v26 = vpop.f32.mrb[12].mxu1 }
 0x405   : > { %v5785_v25 = vpop.f32.mrb[13].mxu1 }
 0x408   : > { %v1844_v16 = vpop.f32.mrb[14].mxu1  ;;  %v1918_v51 = vpop.f32.mrb[16].mxu0 }
 0x409   : > { %v1845_v55 = vadd.f32 %v1844_v16, %v1771_v26  ;;  %v5792_v5 = vpop.f32.mrb[15].mxu1  ;;  %v5799_v52 = vpop.f32.mrb[17].mxu0 }
 0x40b   : > { %v1848_v54 = vadd.f32 %v1845_v55, %v6768_v20 }
 0x40c   : > { %v1991_v6 = vpop.f32.mrb[16].mxu1 }
 0x40d   : > { %v5813_v57 = vpop.f32.mrb[18].mxu0  ;;  %v1997_v19 = vcombine.high %v1848_v54, %v1848_v54  ;;  %v2004_v1 = vrot.slane %v1848_v54, %v6771_v61  ;;  %v2176_v58 = vadd.f32 %v1848_v54, %v6910_v12  ;;  %v2178_v7 = vmul.f32 %v1848_v54, %v1848_v54  ;;  %v5806_v40 = vpop.f32.mrb[17].mxu1 }
 0x40e   : > { %v2300_v63 = vpop.f32.mrb[19].mxu0  ;;  %5822 = vmatmul.mubr.msk.f32.vlgmr.msra.gmra.mrb[18].mxu1 %vm368_vm6, %v5813_v57  ;;  %v1992_v3 = vadd.f32 %v1991_v6, %v1918_v51  ;;  %v7082_v51 = vld [vmem:[%s7645_s1 + $0x18] sm:$0xff]  ;;  %v3428_v40 = vrot.slane %v6694_v38, 7 }
 0x40f   : > { %6054 = vmatpush3.bf16.msra.mxu1 %v6621_v53  ;;  %5828 = vmatprep.mubr.msk.f32.mxu1 %vm6307_vm8, %v6308_v21  ;;  %v2011_v2 = vrot.slane %v1997_v19, %v6771_v61  ;;  %v2012_v4 = vcombine.high %v2004_v1, %v2004_v1  ;;  %v2179_v8 = vadd.f32 %v2178_v7, %v6924_v36 }
 0x410   : > { %6058 = vmatprep.subr.bf16.mxu1 %v6306_v59  ;;  %v2020_v12 = vrot.slane %v2004_v1, %v6771_v61  ;;  %v1995_v18 = vadd.f32 %v1992_v3, %v6768_v20  ;;  %v3430_v3 = vrot.slane %v6697_v39, 6  ;;  %v3429_v38 = vsel %vm322_vm3, %v3428_v40, %v6691_v37 }
 0x411   : > { %v5816_v9 = vpop.f32.mrb[20].mxu0  ;;  %v2034_v41 = vrot.slane %v2012_v4, %v6771_v61  ;;  %v2027_v10 = vrot.slane %v2011_v2, %v6771_v61  ;;  %v2013_v31 = vcombine.high %v2011_v2, %v2011_v2  ;;  %v3451_v2 = vrot.slane %v6713_v48, 6 }
 0x412   : > { %v2310_v44 = vpop.f32.mrb[21].mxu0  ;;  %5829 = vmatmul.mubr.msk.f32.vlgmr.msra.gmra.mrb[20].mxu1 %vm368_vm6, %v2300_v63  ;;  %5836 = vmatmul.mubr.msk.f32.vlgmr.msra.gmra.mrb[22].mxu0 %vm368_vm6, %v5816_v9  ;;  %2054 = vst.msk [vmem:[%s6790_s21 + $0x2] sm:$0x1] %vm818_vm9, %v2020_v12  ;;  %v2042_v36 = vcombine.high %v2020_v12, %v2020_v12  ;;  %v7024_v50 = vadd.f32 %v2176_v58, %v1995_v18  ;;  %v3449_v63 = vrot.slane %v6710_v47, 7  ;;  %v3432_v4 = vrot.slane %v6702_v42, 5 }
 0x413   : > { %v2180_v11 = vmul.f32 %v1995_v18, %v1995_v18  ;;  %6064 = vmatpush3.bf16.msra.mxu0 %v6061_v28  ;;  %6060 = vmatpush3.bf16.msra.mxu1 %v6621_v53  ;;  %v2070_v29 = vrot.slane %v1995_v18, %v6771_v61  ;;  %v2063_v30 = vcombine.high %v1995_v18, %v1995_v18  ;;  %v6217_v12 = vunpack.i.h.bf16 %v6872_v27 }
 0x414   : > { %5842 = vmatprep.mubr.msk.f32.mxu1 %vm6307_vm8, %v6308_v21  ;;  %5849 = vmatprep.mubr.msk.f32.mxu0 %vm368_vm6, %v7033_v33  ;;  %2055 = vst.msk [vmem:[%s6790_s21 + $0xa] sm:$0x1] %vm818_vm9, %v2034_v41  ;;  %2056 = vst.msk [vmem:[%s6790_s21 + $0x12] sm:$0x1] %vm818_vm9, %v2042_v36  ;;  %v2044_v34 = vcombine.high %v2034_v41, %v2034_v41  ;;  %v2043_v28 = vcombine.high %v2027_v10, %v2027_v10  ;;  %v6216_v18 = vunpack.i.l.bf16 %v6872_v27 }
 0x415   : > { %2058 = vst.msk [vmem:[%s6790_s21 + $0x22] sm:$0x1] %vm818_vm9, %v2027_v10  ;;  %v7043_v35 = vadd.f32 %v2180_v11, %v2179_v8  ;;  %v2086_v22 = vrot.slane %v2070_v29, %v6771_v61  ;;  %v2078_v13 = vcombine.high %v2070_v29, %v2070_v29  ;;  %6071 = vmatprep.subr.bf16.mxu0 %v6306_v59  ;;  %v3453_v8 = vrot.slane %v6719_v49, 5 }
 0x416   : > { %5843 = vmatmul.mubr.msk.f32.vlgmr.msra.gmra.mrb[22].mxu1 %vm368_vm6, %v2310_v44  ;;  %5850 = vmatmul.mubr.msk.f32.vlgmr.msra.gmra.mrb[24].mxu0 %vm368_vm6, %v7051_v32  ;;  %v2077_v14 = vrot.slane %v2063_v30, %v6771_v61  ;;  %2057 = vst.msk [vmem:[%s6790_s21 + $0x1a] sm:$0x1] %vm818_vm9, %v2044_v34  ;;  %v2041_v15 = vrot.slane %v2013_v31, %v6771_v61  ;;  %2060 = vst.msk [vmem:[%s6790_s21 + $0x32] sm:$0x1] %vm818_vm9, %v2043_v28 }
 0x417   : > { %v2115_v24 = vrot.slane %v2086_v22, %v6788_v46  ;;  %5852 = vmatprep.mubr.msk.f32.mxu0 %vm368_vm6, %v7063_v62  ;;  %v2100_v45 = vrot.slane %v2078_v13, %v6771_v61  ;;  %v2108_v60 = vcombine.high %v2086_v22, %v2086_v22  ;;  %6065 = vmatprep.subr.bf16.mxu1 %v6306_v59 }
 0x418   : > { %2059 = vst.msk [vmem:[%s6790_s21 + $0x2a] sm:$0x1] %vm818_vm9, %v2041_v15  ;;  %v2045_v17 = vcombine.high %v2041_v15, %v2041_v15  ;;  %6073 = vmatpush3.bf16.msra.mxu0 %v6468_v56  ;;  %6067 = vmatpush3.bf16.msra.mxu1 %v6468_v56  ;;  %v2079_v16 = vcombine.high %v2077_v14, %v2077_v14 }
 0x419   : > { %2144 = vrot.lane.b32.xlu0 %v2115_v24, %s6311_s9  ;;  %v2119_v26 = vrot.slane %v2100_v45, %v6788_v46  ;;  %v2110_v25 = vcombine.high %v2100_v45, %v2100_v45  ;;  %5859 = vmatprep.mubr.msk.f32.mxu1 %vm6307_vm8, %v6308_v21  ;;  %v2123_v55 = vrot.slane %v2108_v60, %v6788_v46 }
 0x41a   : > { %5853 = vmatmul.mubr.msk.f32.gmra.mrb[26].mxu0 %vm368_vm6, %v7082_v51  ;;  %2061 = vst.msk [vmem:[%s6790_s21 + $0x3a] sm:$0x1] %vm818_vm9, %v2045_v17  ;;  %6068 = vmatprep.subr.bf16.mxu1 %v6306_v59  ;;  %v2093_v5 = vrot.slane %v2077_v14, %v6771_v61  ;;  %v2107_v54 = vrot.slane %v2079_v16, %v6771_v61 }
 0x41b   : > { %2146 = vrot.lane.b32.xlu1 %v2119_v26, %s6311_s9  ;;  %5873 = vmatprep.mubr.msk.f32.mxu0 %vm6307_vm8, %v6308_v21  ;;  %v2127_v52 = vrot.slane %v2110_v25, %v6788_v46  ;;  %v3450_v47 = vsel %vm322_vm3, %v3449_v63, %v6705_v43  ;;  %v3431_v39 = vsel %vm325_vm4, %v3430_v3, %v3429_v38 }
 0x41c   : > { %v2131_v6 = vrot.slane %v2093_v5, %v6788_v46  ;;  %v2109_v57 = vcombine.high %v2093_v5, %v2093_v5  ;;  %v2135_v19 = vrot.slane %v2107_v54, %v6788_v46  ;;  %v2111_v1 = vcombine.high %v2107_v54, %v2107_v54 }
 0x41d   : > { %2148 = vrot.lane.b32.xlu0 %v2123_v55, %s6311_s9  ;;  %v3452_v48 = vsel %vm325_vm4, %v3451_v2, %v3450_v47  ;;  %v3433_v42 = vsel %vm328_vm5, %v3432_v4, %v3431_v39 }
 0x41e   : > { %v2139_v58 = vrot.slane %v2109_v57, %v6788_v46  ;;  %v2143_v7 = vrot.slane %v2111_v1, %v6788_v46  ;;  %v3454_v49 = vsel %vm328_vm5, %v3453_v8, %v3452_v48  ;;  %v3466_v27 = vsel %vm365_vm7, %v3433_v42, %v6216_v18 }
 0x41f   : > { %2150 = vrot.lane.b32.xlu1 %v2127_v52, %s6311_s9  ;;  %v3467_v9 = vsel %vm365_vm7, %v3454_v49, %v6217_v12 }
 0x420   : > { %v6077_v37 = vpack.c.bf16 %v3467_v9, %v3466_v27 }
 0x421   : > { %2152 = vrot.lane.b32.xlu0 %v2131_v6, %s6311_s9 }
 0x422   : > { %6078 = vmatprep.subr.bf16.mxu0 %v6077_v37 }
 0x423   : > { %2154 = vrot.lane.b32.xlu1 %v2135_v19, %s6311_s9 }
 0x425   : > { %2156 = vrot.lane.b32.xlu0 %v2139_v58, %s6311_s9 }
 0x427   : > { %2158 = vrot.lane.b32.xlu1 %v2143_v7, %s6311_s9 }
 0x48b   : > { %v2145_v43 = vpop.permute.xlu0 %2144 }
 0x48c   : > { %2168 = vst.msk [vmem:[%s6790_s21 + $0x2] sm:$0x1] %vm933_vm10, %v2145_v43 }
 0x48d   : > { %v2147_v44 = vpop.permute.xlu1 %2146 }
 0x48e   : > { %2169 = vst.msk [vmem:[%s6790_s21 + $0xa] sm:$0x1] %vm933_vm10, %v2147_v44 }
 0x48f   : > { %v2149_v41 = vpop.permute.xlu0 %2148 }
 0x490   : > { %2170 = vst.msk [vmem:[%s6790_s21 + $0x12] sm:$0x1] %vm933_vm10, %v2149_v41 }
 0x491   : > { %v2151_v36 = vpop.permute.xlu1 %2150 }
 0x492   : > { %2171 = vst.msk [vmem:[%s6790_s21 + $0x1a] sm:$0x1] %vm933_vm10, %v2151_v36 }
 0x493   : > { %v2153_v10 = vpop.permute.xlu0 %2152 }
 0x494   : > { %2172 = vst.msk [vmem:[%s6790_s21 + $0x22] sm:$0x1] %vm933_vm10, %v2153_v10 }
 0x495   : > { %v2155_v11 = vpop.permute.xlu1 %2154 }
 0x496   : > { %2173 = vst.msk [vmem:[%s6790_s21 + $0x2a] sm:$0x1] %vm933_vm10, %v2155_v11 }
 0x497   : > { %v2157_v29 = vpop.permute.xlu0 %2156 }
 0x498   : > { %2174 = vst.msk [vmem:[%s6790_s21 + $0x32] sm:$0x1] %vm933_vm10, %v2157_v29 }
 0x499   : > { %v2159_v30 = vpop.permute.xlu1 %2158 }
 0x49a   : > { %2175 = vst.msk [vmem:[%s6790_s21 + $0x3a] sm:$0x1] %vm933_vm10, %v2159_v30 }
 0x4e1   : > { %v2388_v34 = vpop.f32.mrb[18].mxu1 }
 0x4e2   : > { %v5823_v31 = vpop.f32.mrb[19].mxu1 }
 0x4e5   : > { %v2461_v22 = vpop.f32.mrb[20].mxu1  ;;  %v2535_v13 = vpop.f32.mrb[22].mxu0 }
 0x4e6   : > { %v2462_v28 = vadd.f32 %v2461_v22, %v2388_v34  ;;  %v5830_v14 = vpop.f32.mrb[21].mxu1  ;;  %v5837_v15 = vpop.f32.mrb[23].mxu0 }
 0x4e7   : > { %v6233_v14 = vld [vmem:[%s6419_s30 + $0x16] sm:$0x1] }
 0x4e8   : > { %v2465_v24 = vadd.f32 %v2462_v28, %v6768_v20  ;;  %v4045_v15 = vrot.slane %v6233_v14, 7 }
 0x4e9   : > { %v2608_v45 = vpop.f32.mrb[22].mxu1  ;;  %v5851_v60 = vpop.f32.mrb[24].mxu0 }
 0x4ea   : > { %v2614_v17 = vcombine.high %v2465_v24, %v2465_v24  ;;  %v2621_v26 = vrot.slane %v2465_v24, %v6771_v61  ;;  %v2793_v25 = vadd.f32 %v2465_v24, %v7024_v50  ;;  %v2795_v16 = vmul.f32 %v2465_v24, %v2465_v24  ;;  %v5844_v55 = vpop.f32.mrb[23].mxu1  ;;  %v2917_v5 = vpop.f32.mrb[25].mxu0  ;;  %5860 = vmatmul.mubr.msk.f32.vlgmr.msra.gmra.mrb[24].mxu1 %vm368_vm6, %v5851_v60  ;;  %v6234_v24 = vld [vmem:[%s6419_s30 + $0x17] sm:$0x1]  ;;  %v6235_v60 = vld [vmem:[%s6419_s30 + $0x26] sm:$0x1] }
 0x4eb   : > { %v2609_v52 = vadd.f32 %v2608_v45, %v2535_v13  ;;  %6070 = vmatpush3.bf16.msra.mxu1 %v6621_v53  ;;  %5866 = vmatprep.mubr.msk.f32.mxu1 %vm6307_vm8, %v6308_v21  ;;  %v4066_v45 = vrot.slane %v6234_v24, 7 }
 0x4ec   : > { %v2628_v54 = vrot.slane %v2614_v17, %v6771_v61  ;;  %v2629_v6 = vcombine.high %v2621_v26, %v2621_v26  ;;  %v2796_v57 = vadd.f32 %v2795_v16, %v7043_v35  ;;  %6074 = vmatprep.subr.bf16.mxu1 %v6306_v59  ;;  %v2637_v50 = vrot.slane %v2621_v26, %v6771_v61  ;;  %v6236_v26 = vld [vmem:[%s6419_s30 + $0x27] sm:$0x1]  ;;  %v6237_v16 = vld [vmem:[%s6419_s30 + $0x36] sm:$0x1] }
 0x4ed   : > { %v2612_v19 = vadd.f32 %v2609_v52, %v6768_v20  ;;  %v5854_v1 = vpop.f32.mrb[26].mxu0  ;;  %v4047_v17 = vrot.slane %v6235_v60, 6  ;;  %v4049_v55 = vrot.slane %v6237_v16, 5 }
 0x4ee   : > { %v2927_v58 = vpop.f32.mrb[27].mxu0  ;;  %5867 = vmatmul.mubr.msk.f32.vlgmr.msra.gmra.mrb[26].mxu1 %vm368_vm6, %v2917_v5  ;;  %5874 = vmatmul.mubr.msk.f32.vlgmr.msra.gmra.mrb[28].mxu0 %vm368_vm6, %v5854_v1  ;;  %2671 = vst.msk [vmem:[%s6790_s21 + $0x3] sm:$0x1] %vm818_vm9, %v2637_v50  ;;  %v2651_v7 = vrot.slane %v2629_v6, %v6771_v61  ;;  %v2659_v35 = vcombine.high %v2637_v50, %v2637_v50  ;;  %v6238_v5 = vld [vmem:[%s6419_s30 + $0x37] sm:$0x1]  ;;  %v6221_v6 = vunpack.i.l.bf16 %v6766_v23 }
 0x4ef   : > { %v2644_v40 = vrot.slane %v2628_v54, %v6771_v61  ;;  %v7158_v63 = vadd.f32 %v2793_v25, %v2612_v19  ;;  %v2797_v3 = vmul.f32 %v2612_v19, %v2612_v19  ;;  %6080 = vmatpush3.bf16.msra.mxu0 %v6077_v37  ;;  %6076 = vmatpush3.bf16.msra.mxu1 %v6621_v53  ;;  %v4068_v25 = vrot.slane %v6236_v26, 6 }
 0x4f0   : > { %v2687_v2 = vrot.slane %v2612_v19, %v6771_v61  ;;  %5880 = vmatprep.mubr.msk.f32.mxu1 %vm6307_vm8, %v6308_v21  ;;  %5887 = vmatprep.mubr.msk.f32.mxu0 %vm368_vm6, %v7033_v33  ;;  %v2680_v4 = vcombine.high %v2612_v19, %v2612_v19  ;;  %2672 = vst.msk [vmem:[%s6790_s21 + $0xb] sm:$0x1] %vm818_vm9, %v2651_v7  ;;  %2673 = vst.msk [vmem:[%s6790_s21 + $0x13] sm:$0x1] %vm818_vm9, %v2659_v35  ;;  %v4070_v52 = vrot.slane %v6238_v5, 5 }
 0x4f1   : > { %v2661_v8 = vcombine.high %v2651_v7, %v2651_v7  ;;  %2675 = vst.msk [vmem:[%s6790_s21 + $0x23] sm:$0x1] %vm818_vm9, %v2644_v40  ;;  %v2630_v12 = vcombine.high %v2628_v54, %v2628_v54  ;;  %v7172_v18 = vadd.f32 %v2797_v3, %v2796_v57  ;;  %v2660_v39 = vcombine.high %v2644_v40, %v2644_v40  ;;  %v6239_v57 = vld [vmem:[%s6419_s30 + $0x6] sm:$0x1]  ;;  %v6240_v19 = vld [vmem:[%s6419_s30 + $0x7] sm:$0x1] }
 0x4f2   : > { %v2703_v38 = vrot.slane %v2687_v2, %v6771_v61  ;;  %v2695_v47 = vcombine.high %v2687_v2, %v2687_v2  ;;  %6087 = vmatprep.subr.bf16.mxu0 %v6306_v59  ;;  %5881 = vmatmul.mubr.msk.f32.vlgmr.msra.gmra.mrb[28].mxu1 %vm368_vm6, %v2927_v58  ;;  %v2694_v48 = vrot.slane %v2680_v4, %v6771_v61  ;;  %v6222_v54 = vunpack.i.h.bf16 %v6766_v23 }
 0x4f3   : > { %5888 = vmatmul.mubr.msk.f32.vlgmr.msra.gmra.mrb[30].mxu0 %vm368_vm6, %v7051_v32  ;;  %2674 = vst.msk [vmem:[%s6790_s21 + $0x1b] sm:$0x1] %vm818_vm9, %v2661_v8  ;;  %v2658_v42 = vrot.slane %v2630_v12, %v6771_v61  ;;  %2677 = vst.msk [vmem:[%s6790_s21 + $0x33] sm:$0x1] %vm818_vm9, %v2660_v39  ;;  %6081 = vmatprep.subr.bf16.mxu1 %v6306_v59  ;;  %v4046_v50 = vsel %vm322_vm3, %v4045_v15, %v6239_v57 }
 0x4f4   : > { %v2732_v49 = vrot.slane %v2703_v38, %v6788_v46  ;;  %5890 = vmatprep.mubr.msk.f32.mxu0 %vm368_vm6, %v7063_v62  ;;  %v2717_v27 = vrot.slane %v2695_v47, %v6771_v61  ;;  %v2725_v9 = vcombine.high %v2703_v38, %v2703_v38  ;;  %6089 = vmatpush3.bf16.msra.mxu0 %v6468_v56 }
 0x4f5   : > { %2676 = vst.msk [vmem:[%s6790_s21 + $0x2b] sm:$0x1] %vm818_vm9, %v2658_v42  ;;  %v2662_v37 = vcombine.high %v2658_v42, %v2658_v42  ;;  %6083 = vmatpush3.bf16.msra.mxu1 %v6468_v56  ;;  %v2696_v41 = vcombine.high %v2694_v48, %v2694_v48  ;;  %5897 = vmatprep.mubr.msk.f32.mxu1 %vm6307_vm8, %v6308_v21 }
 0x4f6   : > { %2761 = vrot.lane.b32.xlu0 %v2732_v49, %s6311_s9  ;;  %v2736_v43 = vrot.slane %v2717_v27, %v6788_v46  ;;  %v2727_v44 = vcombine.high %v2717_v27, %v2717_v27  ;;  %6084 = vmatprep.subr.bf16.mxu1 %v6306_v59  ;;  %v2740_v36 = vrot.slane %v2725_v9, %v6788_v46 }
 0x4f7   : > { %5891 = vmatmul.mubr.msk.f32.gmra.mrb[32].mxu0 %vm368_vm6, %v7082_v51  ;;  %2678 = vst.msk [vmem:[%s6790_s21 + $0x3b] sm:$0x1] %vm818_vm9, %v2662_v37  ;;  %v2710_v10 = vrot.slane %v2694_v48, %v6771_v61  ;;  %v2724_v29 = vrot.slane %v2696_v41, %v6771_v61  ;;  %v4067_v1 = vsel %vm322_vm3, %v4066_v45, %v6240_v19 }
 0x4f8   : > { %2763 = vrot.lane.b32.xlu1 %v2736_v43, %s6311_s9  ;;  %5911 = vmatprep.mubr.msk.f32.mxu0 %vm6307_vm8, %v6308_v21  ;;  %v2744_v11 = vrot.slane %v2727_v44, %v6788_v46  ;;  %v4048_v58 = vsel %vm325_vm4, %v4047_v17, %v4046_v50  ;;  %v4069_v7 = vsel %vm325_vm4, %v4068_v25, %v4067_v1 }
 0x4f9   : > { %v2748_v30 = vrot.slane %v2710_v10, %v6788_v46  ;;  %v2726_v34 = vcombine.high %v2710_v10, %v2710_v10  ;;  %v2752_v31 = vrot.slane %v2724_v29, %v6788_v46  ;;  %v2728_v22 = vcombine.high %v2724_v29, %v2724_v29 }
 0x4fa   : > { %2765 = vrot.lane.b32.xlu0 %v2740_v36, %s6311_s9  ;;  %v4050_v35 = vsel %vm328_vm5, %v4049_v55, %v4048_v58  ;;  %v4071_v40 = vsel %vm328_vm5, %v4070_v52, %v4069_v7 }
 0x4fb   : > { %v2756_v13 = vrot.slane %v2726_v34, %v6788_v46  ;;  %v2760_v28 = vrot.slane %v2728_v22, %v6788_v46  ;;  %v4083_v23 = vsel %vm365_vm7, %v4050_v35, %v6221_v6  ;;  %v4084_v3 = vsel %vm365_vm7, %v4071_v40, %v6222_v54 }
 0x4fc   : > { %2767 = vrot.lane.b32.xlu1 %v2744_v11, %s6311_s9  ;;  %v6093_v2 = vpack.c.bf16 %v4084_v3, %v4083_v23 }
 0x4fe   : > { %2769 = vrot.lane.b32.xlu0 %v2748_v30, %s6311_s9  ;;  %6094 = vmatprep.subr.bf16.mxu0 %v6093_v2 }
 0x500   : > { %2771 = vrot.lane.b32.xlu1 %v2752_v31, %s6311_s9 }
 0x502   : > { %2773 = vrot.lane.b32.xlu0 %v2756_v13, %s6311_s9 }
 0x504   : > { %2775 = vrot.lane.b32.xlu1 %v2760_v28, %s6311_s9 }
 0x568   : > { %v2762_v4 = vpop.permute.xlu0 %2761 }
 0x569   : > { %2785 = vst.msk [vmem:[%s6790_s21 + $0x3] sm:$0x1] %vm933_vm10, %v2762_v4 }
 0x56a   : > { %v2764_v8 = vpop.permute.xlu1 %2763 }
 0x56b   : > { %2786 = vst.msk [vmem:[%s6790_s21 + $0xb] sm:$0x1] %vm933_vm10, %v2764_v8 }
 0x56c   : > { %v2766_v12 = vpop.permute.xlu0 %2765 }
 0x56d   : > { %2787 = vst.msk [vmem:[%s6790_s21 + $0x13] sm:$0x1] %vm933_vm10, %v2766_v12 }
 0x56e   : > { %v2768_v38 = vpop.permute.xlu1 %2767 }
 0x56f   : > { %2788 = vst.msk [vmem:[%s6790_s21 + $0x1b] sm:$0x1] %vm933_vm10, %v2768_v38 }
 0x570   : > { %v2770_v47 = vpop.permute.xlu0 %2769 }
 0x571   : > { %2789 = vst.msk [vmem:[%s6790_s21 + $0x23] sm:$0x1] %vm933_vm10, %v2770_v47 }
 0x572   : > { %v2772_v39 = vpop.permute.xlu1 %2771 }
 0x573   : > { %2790 = vst.msk [vmem:[%s6790_s21 + $0x2b] sm:$0x1] %vm933_vm10, %v2772_v39 }
 0x574   : > { %v2774_v48 = vpop.permute.xlu0 %2773 }
 0x575   : > { %2791 = vst.msk [vmem:[%s6790_s21 + $0x33] sm:$0x1] %vm933_vm10, %v2774_v48 }
 0x576   : > { %v2776_v42 = vpop.permute.xlu1 %2775 }
 0x577   : > { %2792 = vst.msk [vmem:[%s6790_s21 + $0x3b] sm:$0x1] %vm933_vm10, %v2776_v42 }
 0x5bd   : > { %v3005_v49 = vpop.f32.mrb[24].mxu1 }
 0x5be   : > { %v5861_v27 = vpop.f32.mrb[25].mxu1 }
 0x5c1   : > { %v3078_v9 = vpop.f32.mrb[26].mxu1  ;;  %v3152_v37 = vpop.f32.mrb[28].mxu0 }
 0x5c2   : > { %v3079_v43 = vadd.f32 %v3078_v9, %v3005_v49  ;;  %v5868_v44 = vpop.f32.mrb[27].mxu1  ;;  %v5875_v41 = vpop.f32.mrb[29].mxu0 }
 0x5c3   : > { %v6242_v41 = vld [vmem:[%s6419_s30 + $0x18] sm:$0x1] }
 0x5c4   : > { %v3082_v36 = vadd.f32 %v3079_v43, %v6768_v20  ;;  %v6241_v43 = vld [vmem:[%s6419_s30 + $0x17] sm:$0x1] }
 0x5c5   : > { %v3225_v10 = vpop.f32.mrb[28].mxu1  ;;  %v4662_v44 = vrot.slane %v6241_v43, 7 }
 0x5c6   : > { %v5889_v11 = vpop.f32.mrb[30].mxu0  ;;  %v3231_v29 = vcombine.high %v3082_v36, %v3082_v36  ;;  %v3238_v30 = vrot.slane %v3082_v36, %v6771_v61  ;;  %v3410_v34 = vadd.f32 %v3082_v36, %v7158_v63  ;;  %v3412_v31 = vmul.f32 %v3082_v36, %v3082_v36  ;;  %v5882_v22 = vpop.f32.mrb[29].mxu1 }
 0x5c7   : > { %v3534_v13 = vpop.f32.mrb[31].mxu0  ;;  %5898 = vmatmul.mubr.msk.f32.vlgmr.msra.gmra.mrb[30].mxu1 %vm368_vm6, %v5889_v11  ;;  %v3226_v28 = vadd.f32 %v3225_v10, %v3152_v37  ;;  %v4683_v36 = vrot.slane %v6242_v41, 7  ;;  %v6243_v10 = vld [vmem:[%s6419_s30 + $0x27] sm:$0x1]  ;;  %v6246_v22 = vld [vmem:[%s6419_s30 + $0x38] sm:$0x1] }
 0x5c8   : > { %6086 = vmatpush3.bf16.msra.mxu1 %v6621_v53  ;;  %5904 = vmatprep.mubr.msk.f32.mxu1 %vm6307_vm8, %v6308_v21  ;;  %v3245_v14 = vrot.slane %v3231_v29, %v6771_v61  ;;  %v3246_v15 = vcombine.high %v3238_v30, %v3238_v30  ;;  %v3413_v24 = vadd.f32 %v3412_v31, %v7172_v18  ;;  %v4664_v11 = vrot.slane %v6243_v10, 6  ;;  %v6244_v29 = vld [vmem:[%s6419_s30 + $0x28] sm:$0x1] }
 0x5c9   : > { %6090 = vmatprep.subr.bf16.mxu1 %v6306_v59  ;;  %v3254_v63 = vrot.slane %v3238_v30, %v6771_v61  ;;  %v3229_v45 = vadd.f32 %v3226_v28, %v6768_v20  ;;  %v4685_v30 = vrot.slane %v6244_v29, 6  ;;  %v6227_v28 = vunpack.i.h.bf16 %v6874_v0 }
 0x5ca   : > { %v5892_v60 = vpop.f32.mrb[32].mxu0  ;;  %v3268_v26 = vrot.slane %v3246_v15, %v6771_v61  ;;  %v3261_v25 = vrot.slane %v3245_v14, %v6771_v61  ;;  %v3247_v6 = vcombine.high %v3245_v14, %v3245_v14  ;;  %v6226_v14 = vunpack.i.l.bf16 %v6874_v0  ;;  %v6247_v15 = vld [vmem:[%s6419_s30 + $0x7] sm:$0x1] }
 0x5cb   : > { %v3544_v17 = vpop.f32.mrb[33].mxu0  ;;  %5905 = vmatmul.mubr.msk.f32.vlgmr.msra.gmra.mrb[32].mxu1 %vm368_vm6, %v3534_v13  ;;  %5912 = vmatmul.mubr.msk.f32.vlgmr.msra.gmra.mrb[34].mxu0 %vm368_vm6, %v5892_v60  ;;  %3288 = vst.msk [vmem:[%s6790_s21 + $0x4] sm:$0x1] %vm818_vm9, %v3254_v63  ;;  %v3276_v18 = vcombine.high %v3254_v63, %v3254_v63  ;;  %v7272_v16 = vadd.f32 %v3410_v34, %v3229_v45  ;;  %v6245_v34 = vld [vmem:[%s6419_s30 + $0x37] sm:$0x1]  ;;  %v4687_v13 = vrot.slane %v6246_v22, 5 }
 0x5cc   : > { %v3414_v55 = vmul.f32 %v3229_v45, %v3229_v45  ;;  %6096 = vmatpush3.bf16.msra.mxu0 %v6093_v2  ;;  %6092 = vmatpush3.bf16.msra.mxu1 %v6621_v53  ;;  %v3304_v5 = vrot.slane %v3229_v45, %v6771_v61  ;;  %v3297_v52 = vcombine.high %v3229_v45, %v3229_v45  ;;  %v4666_v31 = vrot.slane %v6245_v34, 5  ;;  %v6248_v63 = vld [vmem:[%s6419_s30 + $0x8] sm:$0x1]  ;;  %s5478_s30 = sshll.u32 %s6409_s13, 1  ;;  %s5545_s13 = sshll.u32 (%p6393_p5), %s6291_s24, 4 }
 0x5cd   : > { %5918 = vmatprep.mubr.msk.f32.mxu1 %vm6307_vm8, %v6308_v21  ;;  %5925 = vmatprep.mubr.msk.f32.mxu0 %vm368_vm6, %v7033_v33  ;;  %3289 = vst.msk [vmem:[%s6790_s21 + $0xc] sm:$0x1] %vm818_vm9, %v3268_v26  ;;  %3290 = vst.msk [vmem:[%s6790_s21 + $0x14] sm:$0x1] %vm818_vm9, %v3276_v18  ;;  %v3278_v54 = vcombine.high %v3268_v26, %v3268_v26  ;;  %v3277_v1 = vcombine.high %v3261_v25, %v3261_v25  ;;  %s292_s10 = sadd.s32 %s5478_s30, %s6412_s14  ;;  %s5294_s14 = sadd.s32 (%p6393_p5), %s6287_s23, %s5545_s13 }
 0x5ce   : > { %3292 = vst.msk [vmem:[%s6790_s21 + $0x24] sm:$0x1] %vm818_vm9, %v3261_v25  ;;  %v7286_v57 = vadd.f32 %v3414_v55, %v3413_v24  ;;  %v3320_v50 = vrot.slane %v3304_v5, %v6771_v61  ;;  %v3312_v19 = vcombine.high %v3304_v5, %v3304_v5  ;;  %6103 = vmatprep.subr.bf16.mxu0 %v6306_v59  ;;  %s5479_s11 = sshll.u32 %s292_s10, 3  ;;  %s5546_s8 = sshll.u32 (%p6393_p5), %s5294_s14, 3 }
 0x5cf   : > { %5919 = vmatmul.mubr.msk.f32.vlgmr.msra.gmra.mrb[34].mxu1 %vm368_vm6, %v3544_v17  ;;  %5926 = vmatmul.mubr.msk.f32.vlgmr.msra.gmra.mrb[36].mxu0 %vm368_vm6, %v7051_v32  ;;  %v3311_v58 = vrot.slane %v3297_v52, %v6771_v61  ;;  %3291 = vst.msk [vmem:[%s6790_s21 + $0x1c] sm:$0x1] %vm818_vm9, %v3278_v54  ;;  %v3275_v7 = vrot.slane %v3247_v6, %v6771_v61  ;;  %3294 = vst.msk [vmem:[%s6790_s21 + $0x34] sm:$0x1] %vm818_vm9, %v3277_v1  ;;  %s294_s17 = scalar_lea.vmem %s7650_s6, %s5479_s11  ;;  %s5296_s19 = scalar_lea.vmem (%p6393_p5), %s7649_s5, %s5546_s8 }
 0x5d0   : > { %v3349_v35 = vrot.slane %v3320_v50, %v6788_v46  ;;  %5928 = vmatprep.mubr.msk.f32.mxu0 %vm368_vm6, %v7063_v62  ;;  %v3334_v40 = vrot.slane %v3312_v19, %v6771_v61  ;;  %v3342_v23 = vcombine.high %v3320_v50, %v3320_v50  ;;  %6097 = vmatprep.subr.bf16.mxu1 %v6306_v59 }
 0x5d1   : > { %3293 = vst.msk [vmem:[%s6790_s21 + $0x2c] sm:$0x1] %vm818_vm9, %v3275_v7  ;;  %v3279_v3 = vcombine.high %v3275_v7, %v3275_v7  ;;  %6105 = vmatpush3.bf16.msra.mxu0 %v6468_v56  ;;  %6099 = vmatpush3.bf16.msra.mxu1 %v6468_v56  ;;  %v3313_v8 = vcombine.high %v3311_v58, %v3311_v58 }
 0x5d2   : > { %3378 = vrot.lane.b32.xlu0 %v3349_v35, %s6311_s9  ;;  %v3353_v2 = vrot.slane %v3334_v40, %v6788_v46  ;;  %v3344_v4 = vcombine.high %v3334_v40, %v3334_v40  ;;  %5935 = vmatprep.mubr.msk.f32.mxu1 %vm6307_vm8, %v6308_v21  ;;  %v3357_v12 = vrot.slane %v3342_v23, %v6788_v46 }
 0x5d3   : > { %5929 = vmatmul.mubr.msk.f32.gmra.mrb[38].mxu0 %vm368_vm6, %v7082_v51  ;;  %3295 = vst.msk [vmem:[%s6790_s21 + $0x3c] sm:$0x1] %vm818_vm9, %v3279_v3  ;;  %6100 = vmatprep.subr.bf16.mxu1 %v6306_v59  ;;  %v3327_v38 = vrot.slane %v3311_v58, %v6771_v61  ;;  %v3341_v39 = vrot.slane %v3313_v8, %v6771_v61 }
 0x5d4   : > { %3380 = vrot.lane.b32.xlu1 %v3353_v2, %s6311_s9  ;;  %5949 = vmatprep.mubr.msk.f32.mxu0 %vm6307_vm8, %v6308_v21  ;;  %v3361_v47 = vrot.slane %v3344_v4, %v6788_v46  ;;  %v4663_v24 = vsel %vm322_vm3, %v4662_v44, %v6247_v15  ;;  %v4684_v45 = vsel %vm322_vm3, %v4683_v36, %v6248_v63 }
 0x5d5   : > { %v3365_v48 = vrot.slane %v3327_v38, %v6788_v46  ;;  %v3343_v42 = vcombine.high %v3327_v38, %v3327_v38  ;;  %v3369_v49 = vrot.slane %v3341_v39, %v6788_v46  ;;  %v3345_v27 = vcombine.high %v3341_v39, %v3341_v39 }
 0x5d6   : > { %3382 = vrot.lane.b32.xlu0 %v3357_v12, %s6311_s9  ;;  %v4665_v60 = vsel %vm325_vm4, %v4664_v11, %v4663_v24  ;;  %v4686_v17 = vsel %vm325_vm4, %v4685_v30, %v4684_v45 }
 0x5d7   : > { %v3373_v9 = vrot.slane %v3343_v42, %v6788_v46  ;;  %v3377_v37 = vrot.slane %v3345_v27, %v6788_v46  ;;  %v4667_v26 = vsel %vm328_vm5, %v4666_v31, %v4665_v60  ;;  %v4688_v18 = vsel %vm328_vm5, %v4687_v13, %v4686_v17 }
 0x5d8   : > { %3384 = vrot.lane.b32.xlu1 %v3361_v47, %s6311_s9  ;;  %v4700_v0 = vsel %vm365_vm7, %v4667_v26, %v6226_v14  ;;  %v4701_v25 = vsel %vm365_vm7, %v4688_v18, %v6227_v28 }
 0x5d9   : > { %v6109_v55 = vpack.c.bf16 %v4701_v25, %v4700_v0 }
 0x5da   : > { %3386 = vrot.lane.b32.xlu0 %v3365_v48, %s6311_s9 }
 0x5db   : > { %6110 = vmatprep.subr.bf16.mxu0 %v6109_v55 }
 0x5dc   : > { %3388 = vrot.lane.b32.xlu1 %v3369_v49, %s6311_s9 }
 0x5de   : > { %3390 = vrot.lane.b32.xlu0 %v3373_v9, %s6311_s9 }
 0x5e0   : > { %3392 = vrot.lane.b32.xlu1 %v3377_v37, %s6311_s9 }
 0x644   : > { %v3379_v5 = vpop.permute.xlu0 %3378 }
 0x645   : > { %3402 = vst.msk [vmem:[%s6790_s21 + $0x4] sm:$0x1] %vm933_vm10, %v3379_v5 }
 0x646   : > { %v3381_v52 = vpop.permute.xlu1 %3380 }
 0x647   : > { %3403 = vst.msk [vmem:[%s6790_s21 + $0xc] sm:$0x1] %vm933_vm10, %v3381_v52 }
 0x648   : > { %v3383_v54 = vpop.permute.xlu0 %3382 }
 0x649   : > { %3404 = vst.msk [vmem:[%s6790_s21 + $0x14] sm:$0x1] %vm933_vm10, %v3383_v54 }
 0x64a   : > { %v3385_v6 = vpop.permute.xlu1 %3384 }
 0x64b   : > { %3405 = vst.msk [vmem:[%s6790_s21 + $0x1c] sm:$0x1] %vm933_vm10, %v3385_v6 }
 0x64c   : > { %v3387_v50 = vpop.permute.xlu0 %3386 }
 0x64d   : > { %3406 = vst.msk [vmem:[%s6790_s21 + $0x24] sm:$0x1] %vm933_vm10, %v3387_v50 }
 0x64e   : > { %v3389_v19 = vpop.permute.xlu1 %3388 }
 0x64f   : > { %3407 = vst.msk [vmem:[%s6790_s21 + $0x2c] sm:$0x1] %vm933_vm10, %v3389_v19 }
 0x650   : > { %v3391_v1 = vpop.permute.xlu0 %3390 }
 0x651   : > { %3408 = vst.msk [vmem:[%s6790_s21 + $0x34] sm:$0x1] %vm933_vm10, %v3391_v1 }
 0x652   : > { %v3393_v58 = vpop.permute.xlu1 %3392 }
 0x653   : > { %3409 = vst.msk [vmem:[%s6790_s21 + $0x3c] sm:$0x1] %vm933_vm10, %v3393_v58 }
 0x69a   : > { %v3622_v7 = vpop.f32.mrb[30].mxu1 }
 0x69b   : > { %v5899_v35 = vpop.f32.mrb[31].mxu1 }
 0x69e   : > { %v3695_v40 = vpop.f32.mrb[32].mxu1  ;;  %v3769_v23 = vpop.f32.mrb[34].mxu0 }
 0x69f   : > { %v3696_v3 = vadd.f32 %v3695_v40, %v3622_v7  ;;  %v5906_v2 = vpop.f32.mrb[33].mxu1  ;;  %v5913_v4 = vpop.f32.mrb[35].mxu0 }
 0x6a1   : > { %v3699_v8 = vadd.f32 %v3696_v3, %v6768_v20 }
 0x6a2   : > { %v3842_v12 = vpop.f32.mrb[34].mxu1  ;;  %v5927_v38 = vpop.f32.mrb[36].mxu0 }
 0x6a3   : > { %v3848_v47 = vcombine.high %v3699_v8, %v3699_v8  ;;  %v3855_v39 = vrot.slane %v3699_v8, %v6771_v61  ;;  %v4027_v48 = vadd.f32 %v3699_v8, %v7272_v16  ;;  %v4029_v42 = vmul.f32 %v3699_v8, %v3699_v8  ;;  %v5920_v49 = vpop.f32.mrb[35].mxu1  ;;  %v4151_v27 = vpop.f32.mrb[37].mxu0  ;;  %5936 = vmatmul.mubr.msk.f32.vlgmr.msra.gmra.mrb[36].mxu1 %vm368_vm6, %v5927_v38 }
 0x6a4   : > { %v3843_v9 = vadd.f32 %v3842_v12, %v3769_v23  ;;  %6102 = vmatpush3.bf16.msra.mxu1 %v6621_v53  ;;  %5942 = vmatprep.mubr.msk.f32.mxu1 %vm6307_vm8, %v6308_v21 }
 0x6a5   : > { %v3862_v37 = vrot.slane %v3848_v47, %v6771_v61  ;;  %v3863_v43 = vcombine.high %v3855_v39, %v3855_v39  ;;  %6106 = vmatprep.subr.bf16.mxu1 %v6306_v59  ;;  %v3871_v44 = vrot.slane %v3855_v39, %v6771_v61  ;;  %v4030_v16 = vadd.f32 %v4029_v42, %v7286_v57 }
 0x6a6   : > { %v3846_v41 = vadd.f32 %v3843_v9, %v6768_v20  ;;  %v5930_v36 = vpop.f32.mrb[38].mxu0 }
 0x6a7   : > { %v4161_v10 = vpop.f32.mrb[39].mxu0  ;;  %5943 = vmatmul.mubr.msk.f32.vlgmr.msra.gmra.mrb[38].mxu1 %vm368_vm6, %v4151_v27  ;;  %5950 = vmatmul.mubr.msk.f32.vlgmr.msra.gmra.mrb[40].mxu0 %vm368_vm6, %v5930_v36  ;;  %3905 = vst.msk [vmem:[%s6790_s21 + $0x5] sm:$0x1] %vm818_vm9, %v3871_v44  ;;  %v3885_v11 = vrot.slane %v3863_v43, %v6771_v61  ;;  %v3893_v29 = vcombine.high %v3871_v44, %v3871_v44 }
 0x6a8   : > { %v3878_v30 = vrot.slane %v3862_v37, %v6771_v61  ;;  %v4031_v34 = vmul.f32 %v3846_v41, %v3846_v41  ;;  %6112 = vmatpush3.bf16.msra.mxu0 %v6109_v55  ;;  %6108 = vmatpush3.bf16.msra.mxu1 %v6621_v53  ;;  %v3921_v57 = vrot.slane %v3846_v41, %v6771_v61 }
 0x6a9   : > { %v3914_v31 = vcombine.high %v3846_v41, %v3846_v41  ;;  %5956 = vmatprep.mubr.msk.f32.mxu1 %vm6307_vm8, %v6308_v21  ;;  %5963 = vmatprep.mubr.msk.f32.mxu0 %vm368_vm6, %v7033_v33  ;;  %3906 = vst.msk [vmem:[%s6790_s21 + $0xd] sm:$0x1] %vm818_vm9, %v3885_v11  ;;  %3907 = vst.msk [vmem:[%s6790_s21 + $0x15] sm:$0x1] %vm818_vm9, %v3893_v29  ;;  %v3895_v22 = vcombine.high %v3885_v11, %v3885_v11 }
 0x6aa   : > { %3909 = vst.msk [vmem:[%s6790_s21 + $0x25] sm:$0x1] %vm818_vm9, %v3878_v30  ;;  %v3864_v13 = vcombine.high %v3862_v37, %v3862_v37  ;;  %v3894_v28 = vcombine.high %v3878_v30, %v3878_v30  ;;  %v3937_v14 = vrot.slane %v3921_v57, %v6771_v61  ;;  %v3929_v15 = vcombine.high %v3921_v57, %v3921_v57 }
 0x6ab   : > { %v3928_v24 = vrot.slane %v3914_v31, %v6771_v61  ;;  %6113 = vmatprep.subr.bf16.mxu1 %v6306_v59  ;;  %6119 = vmatprep.subr.bf16.mxu0 %v6306_v59  ;;  %3908 = vst.msk [vmem:[%s6790_s21 + $0x1d] sm:$0x1] %vm818_vm9, %v3895_v22  ;;  %v7410_v63 = vadd.f32 %v4027_v48, %v3846_v41 }
 0x6ac   : > { %5957 = vmatmul.mubr.msk.f32.vlgmr.msra.gmra.mrb[40].mxu1 %vm368_vm6, %v4161_v10  ;;  %5964 = vmatmul.mubr.msk.f32.vlgmr.msra.gmra.mrb[42].mxu0 %vm368_vm6, %v7051_v32  ;;  %v3892_v33 = vrot.slane %v3864_v13, %v6771_v61  ;;  %3911 = vst.msk [vmem:[%s6790_s21 + $0x35] sm:$0x1] %vm818_vm9, %v3894_v28  ;;  %v7412_v45 = vadd.f32 %v4031_v34, %v4030_v16 }
 0x6ad   : > { %v3966_v60 = vrot.slane %v3937_v14, %v6788_v46  ;;  %v3951_v17 = vrot.slane %v3929_v15, %v6771_v61  ;;  %5966 = vmatprep.mubr.msk.f32.mxu0 %vm368_vm6, %v7063_v62  ;;  %v3959_v26 = vcombine.high %v3937_v14, %v3937_v14  ;;  %6115 = vmatpush3.bf16.msra.mxu1 %v6468_v56 }
 0x6ae   : > { %3910 = vst.msk [vmem:[%s6790_s21 + $0x2d] sm:$0x1] %vm818_vm9, %v3892_v33  ;;  %v3896_v32 = vcombine.high %v3892_v33, %v3892_v33  ;;  %5973 = vmatprep.mubr.msk.f32.mxu1 %vm6307_vm8, %v6308_v21  ;;  %v3930_v25 = vcombine.high %v3928_v24, %v3928_v24  ;;  %6116 = vmatprep.subr.bf16.mxu1 %v6306_v59 }
 0x6af   : > { %3995 = vrot.lane.b32.xlu0 %v3966_v60, %s6311_s9  ;;  %v3970_v18 = vrot.slane %v3951_v17, %v6788_v46  ;;  %v3961_v0 = vcombine.high %v3951_v17, %v3951_v17  ;;  %v3974_v62 = vrot.slane %v3959_v26, %v6788_v46  ;;  %v3944_v55 = vrot.slane %v3928_v24, %v6771_v61 }
 0x6b0   : > { %5967 = vmatmul.mubr.msk.f32.gmra.mrb[44].mxu0 %vm368_vm6, %v7082_v51  ;;  %3912 = vst.msk [vmem:[%s6790_s21 + $0x3d] sm:$0x1] %vm818_vm9, %v3896_v32  ;;  %v3958_v5 = vrot.slane %v3930_v25, %v6771_v61 }
 0x6b1   : > { %3997 = vrot.lane.b32.xlu1 %v3970_v18, %s6311_s9  ;;  %6121 = vmatpush3.bf16.msra.mxu0 %v6468_v56  ;;  %v3978_v51 = vrot.slane %v3961_v0, %v6788_v46  ;;  %v3982_v52 = vrot.slane %v3944_v55, %v6788_v46  ;;  %v3960_v54 = vcombine.high %v3944_v55, %v3944_v55 }
 0x6b2   : > { %5987 = vmatprep.mubr.msk.f32.mxu0 %vm6307_vm8, %v6308_v21  ;;  %v3986_v56 = vrot.slane %v3958_v5, %v6788_v46  ;;  %v3962_v6 = vcombine.high %v3958_v5, %v3958_v5 }
 0x6b3   : > { %3999 = vrot.lane.b32.xlu0 %v3974_v62, %s6311_s9  ;;  %v3990_v50 = vrot.slane %v3960_v54, %v6788_v46 }
 0x6b4   : > { %v3994_v19 = vrot.slane %v3962_v6, %v6788_v46 }
 0x6b5   : > { %4001 = vrot.lane.b32.xlu1 %v3978_v51, %s6311_s9 }
 0x6b7   : > { %4003 = vrot.lane.b32.xlu0 %v3982_v52, %s6311_s9 }
 0x6b9   : > { %4005 = vrot.lane.b32.xlu1 %v3986_v56, %s6311_s9 }
 0x6bb   : > { %4007 = vrot.lane.b32.xlu0 %v3990_v50, %s6311_s9 }
 0x6bd   : > { %4009 = vrot.lane.b32.xlu1 %v3994_v19, %s6311_s9 }
 0x721   : > { %v3996_v1 = vpop.permute.xlu0 %3995 }
 0x722   : > { %4019 = vst.msk [vmem:[%s6790_s21 + $0x5] sm:$0x1] %vm933_vm10, %v3996_v1 }
 0x723   : > { %v3998_v58 = vpop.permute.xlu1 %3997 }
 0x724   : > { %4020 = vst.msk [vmem:[%s6790_s21 + $0xd] sm:$0x1] %vm933_vm10, %v3998_v58 }
 0x725   : > { %v4000_v7 = vpop.permute.xlu0 %3999 }
 0x726   : > { %4021 = vst.msk [vmem:[%s6790_s21 + $0x15] sm:$0x1] %vm933_vm10, %v4000_v7 }
 0x727   : > { %v4002_v35 = vpop.permute.xlu1 %4001 }
 0x728   : > { %4022 = vst.msk [vmem:[%s6790_s21 + $0x1d] sm:$0x1] %vm933_vm10, %v4002_v35 }
 0x729   : > { %v4004_v40 = vpop.permute.xlu0 %4003 }
 0x72a   : > { %4023 = vst.msk [vmem:[%s6790_s21 + $0x25] sm:$0x1] %vm933_vm10, %v4004_v40 }
 0x72b   : > { %v4006_v23 = vpop.permute.xlu1 %4005 }
 0x72c   : > { %4024 = vst.msk [vmem:[%s6790_s21 + $0x2d] sm:$0x1] %vm933_vm10, %v4006_v23 }
 0x72d   : > { %v4008_v3 = vpop.permute.xlu0 %4007 }
 0x72e   : > { %4025 = vst.msk [vmem:[%s6790_s21 + $0x35] sm:$0x1] %vm933_vm10, %v4008_v3 }
 0x72f   : > { %v4010_v2 = vpop.permute.xlu1 %4009 }
 0x730   : > { %4026 = vst.msk [vmem:[%s6790_s21 + $0x3d] sm:$0x1] %vm933_vm10, %v4010_v2 }
 0x776   : > { %v4239_v4 = vpop.f32.mrb[36].mxu1 }
 0x777   : > { %v5937_v8 = vpop.f32.mrb[37].mxu1 }
 0x77a   : > { %v4312_v12 = vpop.f32.mrb[38].mxu1  ;;  %v4386_v38 = vpop.f32.mrb[40].mxu0 }
 0x77b   : > { %v4313_v47 = vadd.f32 %v4312_v12, %v4239_v4  ;;  %v5944_v39 = vpop.f32.mrb[39].mxu1  ;;  %v5951_v48 = vpop.f32.mrb[41].mxu0 }
 0x77d   : > { %v4316_v42 = vadd.f32 %v4313_v47, %v6768_v20 }
 0x77f   : > { %v4459_v49 = vpop.f32.mrb[40].mxu1  ;;  %v5965_v27 = vpop.f32.mrb[42].mxu0  ;;  %v4465_v9 = vcombine.high %v4316_v42, %v4316_v42  ;;  %v4472_v37 = vrot.slane %v4316_v42, %v6771_v61  ;;  %v4644_v41 = vadd.f32 %v4316_v42, %v7410_v63  ;;  %v4646_v36 = vmul.f32 %v4316_v42, %v4316_v42 }
 0x780   : > { %v4460_v43 = vadd.f32 %v4459_v49, %v4386_v38  ;;  %v5958_v44 = vpop.f32.mrb[41].mxu1  ;;  %v4768_v16 = vpop.f32.mrb[43].mxu0  ;;  %5974 = vmatmul.mubr.msk.f32.vlgmr.msra.gmra.mrb[42].mxu1 %vm368_vm6, %v5965_v27 }
 0x781   : > { %6118 = vmatpush3.bf16.msra.mxu1 %v6621_v53  ;;  %5980 = vmatprep.mubr.msk.f32.mxu1 %vm6307_vm8, %v6308_v21  ;;  %v4479_v10 = vrot.slane %v4465_v9, %v6771_v61  ;;  %v4480_v11 = vcombine.high %v4472_v37, %v4472_v37  ;;  %v4488_v30 = vrot.slane %v4472_v37, %v6771_v61 }
 0x782   : > { %v4463_v29 = vadd.f32 %v4460_v43, %v6768_v20  ;;  %6122 = vmatprep.subr.bf16.mxu1 %v6306_v59  ;;  %v4647_v57 = vadd.f32 %v4646_v36, %v7412_v45 }
 0x783   : > { %v5968_v34 = vpop.f32.mrb[44].mxu0  ;;  %4522 = vst.msk [vmem:[%s6790_s21 + $0x6] sm:$0x1] %vm818_vm9, %v4488_v30  ;;  %v4502_v59 = vrot.slane %v4480_v11, %v6771_v61  ;;  %v4510_v28 = vcombine.high %v4488_v30, %v4488_v30  ;;  %v4495_v14 = vrot.slane %v4479_v10, %v6771_v61  ;;  %v4481_v15 = vcombine.high %v4479_v10, %v4479_v10 }
 0x784   : > { %5981 = vmatmul.mubr.msk.f32.vlgmr.msra.gmra.mrb[44].mxu1 %vm368_vm6, %v4768_v16  ;;  %v4778_v31 = vpop.f32.mrb[45].mxu0  ;;  %5988 = vmatmul.mubr.msk.f32.vlgmr.msra.gmra.mrb[46].mxu0 %vm368_vm6, %v5968_v34  ;;  %v4538_v22 = vrot.slane %v4463_v29, %v6771_v61  ;;  %v4531_v13 = vcombine.high %v4463_v29, %v4463_v29  ;;  %v4645_v60 = vadd.f32 %v4644_v41, %v4463_v29 }
 0x785   : > { %6124 = vmatpush3.bf16.msra.mxu1 %v6621_v53  ;;  %5994 = vmatprep.mubr.msk.f32.mxu1 %vm6307_vm8, %v6308_v21  ;;  %4523 = vst.msk [vmem:[%s6790_s21 + $0xe] sm:$0x1] %vm818_vm9, %v4502_v59  ;;  %v4512_v45 = vcombine.high %v4502_v59, %v4502_v59  ;;  %4524 = vst.msk [vmem:[%s6790_s21 + $0x16] sm:$0x1] %vm818_vm9, %v4510_v28  ;;  %v4509_v21 = vrot.slane %v4481_v15, %v6771_v61 }
 0x786   : > { %v4554_v24 = vrot.slane %v4538_v22, %v6771_v61  ;;  %v4546_v33 = vcombine.high %v4538_v22, %v4538_v22  ;;  %v4545_v63 = vrot.slane %v4531_v13, %v6771_v61  ;;  %4526 = vst.msk [vmem:[%s6790_s21 + $0x26] sm:$0x1] %vm818_vm9, %v4495_v14  ;;  %v4511_v53 = vcombine.high %v4495_v14, %v4495_v14 }
 0x787   : > { %v4648_v17 = vmul.f32 %v4463_v29, %v4463_v29  ;;  %4525 = vst.msk [vmem:[%s6790_s21 + $0x1e] sm:$0x1] %vm818_vm9, %v4512_v45  ;;  %4527 = vst.msk [vmem:[%s6790_s21 + $0x2e] sm:$0x1] %vm818_vm9, %v4509_v21  ;;  %v4513_v0 = vcombine.high %v4509_v21, %v4509_v21 }
 0x788   : > { %5995 = vmatmul.mubr.msk.f32.vlgmr.msra.gmra.mrb[46].mxu1 %vm368_vm6, %v4778_v31  ;;  %v4583_v26 = vrot.slane %v4554_v24, %v6788_v46  ;;  %v4568_v32 = vrot.slane %v4546_v33, %v6771_v61  ;;  %v4576_v18 = vcombine.high %v4554_v24, %v4554_v24  ;;  %4528 = vst.msk [vmem:[%s6790_s21 + $0x36] sm:$0x1] %vm818_vm9, %v4511_v53 }
 0x789   : > { %v4649_v25 = vadd.f32 %v4648_v17, %v4647_v57  ;;  %v4547_v51 = vcombine.high %v4545_v63, %v4545_v63  ;;  %4529 = vst.msk [vmem:[%s6790_s21 + $0x3e] sm:$0x1] %vm818_vm9, %v4513_v0  ;;  %v4561_v52 = vrot.slane %v4545_v63, %v6771_v61 }
 0x78a   : > { %4612 = vrot.lane.b32.xlu0 %v4583_v26, %s6311_s9  ;;  %v4587_v62 = vrot.slane %v4568_v32, %v6788_v46  ;;  %v4578_v55 = vcombine.high %v4568_v32, %v4568_v32  ;;  %v4591_v5 = vrot.slane %v4576_v18, %v6788_v46 }
 0x78b   : > { %v4575_v56 = vrot.slane %v4547_v51, %v6771_v61  ;;  %v4599_v6 = vrot.slane %v4561_v52, %v6788_v46  ;;  %v4577_v50 = vcombine.high %v4561_v52, %v4561_v52 }
 0x78c   : > { %4614 = vrot.lane.b32.xlu1 %v4587_v62, %s6311_s9  ;;  %v4595_v54 = vrot.slane %v4578_v55, %v6788_v46 }
 0x78d   : > { %v4603_v19 = vrot.slane %v4575_v56, %v6788_v46  ;;  %v4579_v1 = vcombine.high %v4575_v56, %v4575_v56  ;;  %v4607_v58 = vrot.slane %v4577_v50, %v6788_v46 }
 0x78e   : > { %4616 = vrot.lane.b32.xlu0 %v4591_v5, %s6311_s9 }
 0x78f   : > { %v4611_v7 = vrot.slane %v4579_v1, %v6788_v46 }
 0x790   : > { %4618 = vrot.lane.b32.xlu1 %v4595_v54, %s6311_s9 }
 0x792   : > { %4620 = vrot.lane.b32.xlu0 %v4599_v6, %s6311_s9 }
 0x794   : > { %4622 = vrot.lane.b32.xlu1 %v4603_v19, %s6311_s9 }
 0x796   : > { %4624 = vrot.lane.b32.xlu0 %v4607_v58, %s6311_s9 }
 0x798   : > { %4626 = vrot.lane.b32.xlu1 %v4611_v7, %s6311_s9 }
 0x7fc   : > { %v4613_v35 = vpop.permute.xlu0 %4612 }
 0x7fd   : > { %4636 = vst.msk [vmem:[%s6790_s21 + $0x6] sm:$0x1] %vm933_vm10, %v4613_v35 }
 0x7fe   : > { %v4615_v40 = vpop.permute.xlu1 %4614 }
 0x7ff   : > { %4637 = vst.msk [vmem:[%s6790_s21 + $0xe] sm:$0x1] %vm933_vm10, %v4615_v40 }
 0x800   : > { %v4617_v23 = vpop.permute.xlu0 %4616 }
 0x801   : > { %4638 = vst.msk [vmem:[%s6790_s21 + $0x16] sm:$0x1] %vm933_vm10, %v4617_v23 }
 0x802   : > { %v4619_v3 = vpop.permute.xlu1 %4618 }
 0x803   : > { %4639 = vst.msk [vmem:[%s6790_s21 + $0x1e] sm:$0x1] %vm933_vm10, %v4619_v3 }
 0x804   : > { %v4621_v2 = vpop.permute.xlu0 %4620 }
 0x805   : > { %4640 = vst.msk [vmem:[%s6790_s21 + $0x26] sm:$0x1] %vm933_vm10, %v4621_v2 }
 0x806   : > { %v4623_v4 = vpop.permute.xlu1 %4622 }
 0x807   : > { %4641 = vst.msk [vmem:[%s6790_s21 + $0x2e] sm:$0x1] %vm933_vm10, %v4623_v4 }
 0x808   : > { %v4625_v8 = vpop.permute.xlu0 %4624 }
 0x809   : > { %4642 = vst.msk [vmem:[%s6790_s21 + $0x36] sm:$0x1] %vm933_vm10, %v4625_v8 }
 0x80a   : > { %v4627_v12 = vpop.permute.xlu1 %4626 }
 0x80b   : > { %4643 = vst.msk [vmem:[%s6790_s21 + $0x3e] sm:$0x1] %vm933_vm10, %v4627_v12 }
 0x853   : > { %v4856_v38 = vpop.f32.mrb[42].mxu1 }
 0x854   : > { %v5975_v47 = vpop.f32.mrb[43].mxu1 }
 0x857   : > { %v4929_v39 = vpop.f32.mrb[44].mxu1  ;;  %v5003_v48 = vpop.f32.mrb[46].mxu0 }
 0x858   : > { %v4930_v42 = vadd.f32 %v4929_v39, %v4856_v38  ;;  %v5982_v49 = vpop.f32.mrb[45].mxu1  ;;  %v5989_v27 = vpop.f32.mrb[47].mxu0 }
 0x85a   : > { %v4933_v9 = vadd.f32 %v4930_v42, %v6768_v20 }
 0x85b   : > { %v5076_v37 = vpop.f32.mrb[46].mxu1 }
 0x85c   : > { %v5082_v43 = vcombine.high %v4933_v9, %v4933_v9  ;;  %v5089_v44 = vrot.slane %v4933_v9, %v6771_v61  ;;  %v5077_v16 = vadd.f32 %v5076_v37, %v5003_v48  ;;  %v5996_v41 = vpop.f32.mrb[47].mxu1  ;;  %v5261_v36 = vadd.f32 %v4933_v9, %v4645_v60 }
 0x85d   : > { %v5263_v10 = vmul.f32 %v4933_v9, %v4933_v9 }
 0x85e   : > { %v5096_v11 = vrot.slane %v5082_v43, %v6771_v61  ;;  %v5097_v29 = vcombine.high %v5089_v44, %v5089_v44  ;;  %v5080_v30 = vadd.f32 %v5077_v16, %v6768_v20  ;;  %v5105_v34 = vrot.slane %v5089_v44, %v6771_v61 }
 0x85f   : > { %v5264_v57 = vadd.f32 %v5263_v10, %v4649_v25 }
 0x860   : > { %v5262_v31 = vadd.f32 %v5261_v36, %v5080_v30  ;;  %v5265_v22 = vmul.f32 %v5080_v30, %v5080_v30  ;;  %5139 = vst.msk [vmem:[%s6790_s21 + $0x7] sm:$0x1] %vm818_vm9, %v5105_v34  ;;  %v5119_v13 = vrot.slane %v5097_v29, %v6771_v61  ;;  %v5127_v59 = vcombine.high %v5105_v34, %v5105_v34 }
 0x861   : > { %v5112_v28 = vrot.slane %v5096_v11, %v6771_v61  ;;  %v5098_v14 = vcombine.high %v5096_v11, %v5096_v11  ;;  %v5155_v53 = vrot.slane %v5080_v30, %v6771_v61  ;;  %v5148_v60 = vcombine.high %v5080_v30, %v5080_v30 }
 0x862   : > { %v5268_v20 = vsel %vm5267_vm11, %v5262_v31, 0.0  ;;  %v5266_v15 = vadd.f32 %v5265_v22, %v5264_v57  ;;  %5140 = vst.msk [vmem:[%s6790_s21 + $0xf] sm:$0x1] %vm818_vm9, %v5119_v13  ;;  %5141 = vst.msk [vmem:[%s6790_s21 + $0x17] sm:$0x1] %vm818_vm9, %v5127_v59  ;;  %v5129_v24 = vcombine.high %v5119_v13, %v5119_v13 }
 0x863   : > { %5269 = vadd.xlane.f32.xlu0 %v5268_v20  ;;  %5143 = vst.msk [vmem:[%s6790_s21 + $0x27] sm:$0x1] %vm818_vm9, %v5112_v28  ;;  %v5126_v33 = vrot.slane %v5098_v14, %v6771_v61  ;;  %v5128_v63 = vcombine.high %v5112_v28, %v5112_v28  ;;  %v5163_v17 = vcombine.high %v5155_v53, %v5155_v53 }
 0x864   : > { %v5271_v45 = vsel %vm5267_vm11, %v5266_v15, 0.0  ;;  %5142 = vst.msk [vmem:[%s6790_s21 + $0x1f] sm:$0x1] %vm818_vm9, %v5129_v24  ;;  %v5162_v32 = vrot.slane %v5148_v60, %v6771_v61  ;;  %v5171_v18 = vrot.slane %v5155_v53, %v6771_v61 }
 0x865   : > { %5272 = vadd.xlane.f32.xlu1 %v5271_v45  ;;  %5144 = vst.msk [vmem:[%s6790_s21 + $0x2f] sm:$0x1] %vm818_vm9, %v5126_v33  ;;  %5145 = vst.msk [vmem:[%s6790_s21 + $0x37] sm:$0x1] %vm818_vm9, %v5128_v63  ;;  %v5130_v21 = vcombine.high %v5126_v33, %v5126_v33  ;;  %v5185_v26 = vrot.slane %v5163_v17, %v6771_v61 }
 0x866   : > { %v5164_v62 = vcombine.high %v5162_v32, %v5162_v32  ;;  %v5200_v55 = vrot.slane %v5171_v18, %v6788_v46  ;;  %v5193_v51 = vcombine.high %v5171_v18, %v5171_v18  ;;  %v5178_v56 = vrot.slane %v5162_v32, %v6771_v61 }
 0x867   : > { %5146 = vst.msk [vmem:[%s6790_s21 + $0x3f] sm:$0x1] %vm818_vm9, %v5130_v21  ;;  %v5204_v0 = vrot.slane %v5185_v26, %v6788_v46  ;;  %v5195_v25 = vcombine.high %v5185_v26, %v5185_v26 }
 0x868   : > { %v5192_v52 = vrot.slane %v5164_v62, %v6771_v61  ;;  %v5208_v54 = vrot.slane %v5193_v51, %v6788_v46  ;;  %v5216_v19 = vrot.slane %v5178_v56, %v6788_v46  ;;  %v5194_v1 = vcombine.high %v5178_v56, %v5178_v56 }
 0x869   : > { %v5212_v5 = vrot.slane %v5195_v25, %v6788_v46 }
 0x86a   : > { %v5220_v6 = vrot.slane %v5192_v52, %v6788_v46  ;;  %v5196_v50 = vcombine.high %v5192_v52, %v5192_v52  ;;  %v5224_v61 = vrot.slane %v5194_v1, %v6788_v46 }
 0x86c   : > { %v5228_v58 = vrot.slane %v5196_v50, %v6788_v46 }
 0x876   : > { %5231 = vrot.lane.b32.xlu1 %v5204_v0, %s6311_s9 }
 0x879   : > { %5229 = vrot.lane.b32.xlu0 %v5200_v55, %s6311_s9 }
 0x87a   : > { %5235 = vrot.lane.b32.xlu1 %v5212_v5, %s6311_s9 }
 0x87d   : > { %5233 = vrot.lane.b32.xlu0 %v5208_v54, %s6311_s9 }
 0x87e   : > { %5239 = vrot.lane.b32.xlu1 %v5220_v6, %s6311_s9 }
 0x881   : > { %5237 = vrot.lane.b32.xlu0 %v5216_v19, %s6311_s9 }
 0x882   : > { %5243 = vrot.lane.b32.xlu1 %v5228_v58, %s6311_s9 }
 0x885   : > { %5241 = vrot.lane.b32.xlu0 %v5224_v61, %s6311_s9 }
 0x8f0   : > { %v5270_v7 = vpop.xlane.xlu0 %5269 }
 0x8f2   : > { %v5273_v35 = vpop.xlane.xlu1 %5272 }
 0x8f3   : > { %v5275_v40 = vsel %vm5274_vm12, %v5270_v7, %v5273_v35 }
 0x8f4   : > { %5277 = vst.msk [vmem:[%s294_s17] sm:$0xff] %vm5276_vm13, %v5275_v40  ;;  %v5230_v46 = vpop.permute.xlu0 %5229 }
 0x8f5   : > { %5253 = vst.msk [vmem:[%s6790_s21 + $0x7] sm:$0x1] %vm933_vm10, %v5230_v46 }
 0x8f6   : > { %v5232_v23 = vpop.permute.xlu1 %5231 }
 0x8f7   : > { %5254 = vst.msk [vmem:[%s6790_s21 + $0xf] sm:$0x1] %vm933_vm10, %v5232_v23 }
 0x8f8   : > { %v5234_v3 = vpop.permute.xlu0 %5233 }
 0x8f9   : > { %5255 = vst.msk [vmem:[%s6790_s21 + $0x17] sm:$0x1] %vm933_vm10, %v5234_v3 }
 0x8fa   : > { %v5236_v2 = vpop.permute.xlu1 %5235 }
 0x8fb   : > { %5256 = vst.msk [vmem:[%s6790_s21 + $0x1f] sm:$0x1] %vm933_vm10, %v5236_v2 }
 0x8fc   : > { %v5238_v4 = vpop.permute.xlu0 %5237  ;;  %v5338_v47 = vld [vmem:[%s6790_s21] sm:$0xff] (%p6393_p5) }
 0x8fd   : > { %5257 = vst.msk [vmem:[%s6790_s21 + $0x27] sm:$0x1] %vm933_vm10, %v5238_v4  ;;  %5292 = sbr.rel (!%p6393_p5) target bundleno = 2316 (0x90c), region = 44  ;;  %5339 = vst [vmem:[%s5296_s19] sm:$0xff] (%p6393_p5), %v5338_v47 }
 0x8fe   : > { %v5240_v8 = vpop.permute.xlu1 %5239  ;;  %v5340_v39 = vld [vmem:[%s6790_s21 + $0x8] sm:$0xff] (%p6393_p5) }
 0x8ff   : > { %5258 = vst.msk [vmem:[%s6790_s21 + $0x2f] sm:$0x1] %vm933_vm10, %v5240_v8  ;;  %5341 = vst [vmem:[%s5296_s19 + $0x10] sm:$0xff] (%p6393_p5), %v5340_v39 }
 0x900   : > { %v5242_v12 = vpop.permute.xlu0 %5241  ;;  %v5342_v48 = vld [vmem:[%s6790_s21 + $0x10] sm:$0xff] (%p6393_p5) }
 0x901   : > { %5259 = vst.msk [vmem:[%s6790_s21 + $0x37] sm:$0x1] %vm933_vm10, %v5242_v12  ;;  %5343 = vst [vmem:[%s5296_s19 + $0x20] sm:$0xff] (%p6393_p5), %v5342_v48 }
 0x902   : > { %v5244_v38 = vpop.permute.xlu1 %5243  ;;  %v5344_v42 = vld [vmem:[%s6790_s21 + $0x18] sm:$0xff] (%p6393_p5) }
 0x903   : > { %5260 = vst.msk [vmem:[%s6790_s21 + $0x3f] sm:$0x1] %vm933_vm10, %v5244_v38  ;;  %5345 = vst [vmem:[%s5296_s19 + $0x30] sm:$0xff] (%p6393_p5), %v5344_v42 }
 0x904   : > { %v5346_v49 = vld [vmem:[%s6790_s21 + $0x20] sm:$0xff] }
 0x905   : > { %5347 = vst [vmem:[%s5296_s19 + $0x40] sm:$0xff] %v5346_v49 }
 0x906   : > { %v5348_v27 = vld [vmem:[%s6790_s21 + $0x28] sm:$0xff] }
 0x907   : > { %5349 = vst [vmem:[%s5296_s19 + $0x50] sm:$0xff] %v5348_v27 }
 0x908   : > { %v5350_v9 = vld [vmem:[%s6790_s21 + $0x30] sm:$0xff] }
 0x909   : > { %5351 = vst [vmem:[%s5296_s19 + $0x60] sm:$0xff] %v5350_v9 }
 0x90a   : > { %v5352_v37 = vld [vmem:[%s6790_s21 + $0x38] sm:$0xff] }
 0x90b   : > { %5353 = vst [vmem:[%s5296_s19 + $0x70] sm:$0xff] %v5352_v37 }
 0x90c PF: > { %s17_s27 = sadd.s32 1, %s6303_s27   ;;  %s7652_s21 = smov %s6283_s22 }
 0x90d   : > { %p14_p11 = scmp.ge.s32.totalorder %s17_s27, 6   ;;  %s7653_s22 = smov %s6404_s12 }
 0x90e   : > { %s7654_s23 = smov %s6295_s25  ;;  %s7655_s24 = smov %s6299_s26 }
 0x90f   : > { %s7656_s25 = smov %s7659_s28  ;;  %s7657_s26 = smov %s7663_s29 }
 0x910   :  { %16 = sbr.rel (!%p14_p11) target bundleno = 4 (0x4), region = 120 }

// kernel: decoder_block.6
= control target key start
LH: loop header
LB: loop body
LE: loop exit
PB: predicated region body
PF: predicated region fallthrough
CT: control target
= control target key end

     0   :  { %s10997_s21 = smov 0   ;;  %s10999_s22 = smov 0   ;;  %s12929_s0 = inlined_call_operand.vmem [shape: f32[2,2,8,17,33], index: 0, kind: input, shape index: {}]   ;;  %s12930_s1 = inlined_call_operand.vmem [shape: f32[12,32], index: 1, kind: input, shape index: {}]   ;;  %s12931_s2 = inlined_call_operand.vmem [shape: f32[32,64], index: 2, kind: input, shape index: {}]   ;;  %s12932_s3 = inlined_call_operand.vmem [shape: f32[32,64], index: 3, kind: input, shape index: {}]   ;;  %s12933_s4 = inlined_call_operand.vmem [shape: f32[3,1], index: 4, kind: input, shape index: {}]   ;;  %s12934_s5 = inlined_call_operand.vmem [shape: f32[2,3,32,128], index: 5, kind: output, shape index: {0}]   ;;  %s12935_s6 = inlined_call_operand.vmem [shape: f32[2,2,3,2], index: 6, kind: output, shape index: {1}]  }
   0x1   :  { %s11001_s23 = smov 0   ;;  %s11003_s24 = smov 0  }
   0x2   :  { %s11005_s25 = smov 0   ;;  %s11007_s26 = smov 0  }
   0x3   :  { %s11009_s27 = smov 0  }
   0x4 LB: > { %s26_s28 = sadd.s32 1, %s10945_s25  ;;  %s29_s29 = sadd.s32 1, %s10949_s26  ;;  %s10953_s27 = sphi %s11009_s27, %s17_s27   ;;  %s10949_s26 = sphi %s11007_s26, %s12988_s26   ;;  %s10945_s25 = sphi %s11005_s25, %s12987_s25   ;;  %s10941_s24 = sphi %s11003_s24, %s12986_s24   ;;  %s10937_s23 = sphi %s11001_s23, %s12985_s23   ;;  %s10933_s22 = sphi %s10999_s22, %s12984_s22   ;;  %s10929_s21 = sphi %s10997_s21, %s12983_s21  }
   0x5   : > { %p27_p0 = scmp.ge.s32.totalorder %s26_s28, 2  ;;  %s8909_s30 = sadd.s32 4294967295, %s10953_s27  }
   0x6   : > { %p160_p1 = scmp.ne.s32.totalorder %s10933_s22, %s10929_s21  ;;  %p161_p2 = scmp.eq.s32.totalorder %s8909_s30, 3 }
   0x7   : > { %s12990_s28 = smov (%p27_p0, %s26_s28), 0  ;;  %s12992_s29 = smov (!%p27_p0, %s29_s29), %s10949_s26 }
   0x8   : > { %s146_s7 = ssub.s32 %s10945_s25, %s12990_s28  ;;  %p31_p3 = scmp.ge.s32.totalorder %s12992_s29, 2 }
   0x9   : > { %p8913_p4 = scmp.ge.s32.totalorder %s10953_s27, 1  ;;  %p11043_p5 = por %p161_p2, %p160_p1 }
   0xa   : > { %p237_p6 = scmp.lt.s32.totalorder %s10953_s27, 5  ;;  %s12994_s29 = smov (%p31_p3, %s12992_s29), 0 }
   0xb   : > { %s145_s9 = ssub.s32 %s10949_s26, %s12994_s29  ;;  %s150_s11 = sadd.s32 1, %s10933_s22 }
   0xc   : > { %p238_p7 = pnand %p8913_p4, %p237_p6  ;;  %s147_s10 = sor.u32 %s146_s7, %s145_s9 }
   0xd   : > { %p148_p8 = scmp.eq.s32.totalorder %s147_s10, 0 }
   0xe   : > { %241 = sbr.rel (%p238_p7) target bundleno = 4235 (0x108b), region = 40 }
   0xf   : > { %s11054_s12 = scalar_select %p148_p8, %s10933_s22, %s150_s11  }
  0x15   : > { %p278_p9 = scmp.lt.s32.totalorder %s10941_s24, 1  ;;  %p280_p10 = scmp.lt.s32.totalorder %s10937_s23, 1  ;;  %vm337_vm0 = vcmask 1041409   ;;  %vm340_vm1 = vcmask 1042434   ;;  %vm343_vm2 = vcmask 1043459   ;;  %vm346_vm3 = vcmask 1044484  }
  0x16   : > { %vm349_vm4 = vcmask 1045509   ;;  %vm352_vm5 = vcmask 1046534   ;;  %vm355_vm6 = vcmask 1047559   ;;  %v296_v32 = vld [vmem:[%s12930_s1] sm:$0xff]  ;;  %vm387_vm7 = vcmask 261120   ;;  %s10955_s10 = smov 127  }
  0x17   : > { %s11059_s13 = scalar_select %p278_p9, %s10941_s24, 1  ;;  %9441 = vmatprep.mubr.msk.f32.mxu0 %vm387_vm7, %v296_v32  ;;  %vm10957_vm8 = vmmov 0   ;;  %vm690_vm9 = vcmask 1041408   ;;  %vm794_vm10 = vcmask 516096   ;;  %vm843_vm11 = vcmask 1040896  }
  0x18   : > { %s11062_s14 = scalar_select %p280_p10, %s10937_s23, 1  ;;  %vm8713_vm12 = vcmask 518144   ;;  %vm8720_vm13 = vcmask 7168   ;;  %vm8722_vm14 = vcmask 10240  }
  0x19   : > { %s10827_s15 = smul.u32 48, %s11059_s13  ;;  %s10961_s20 = smov 64  }
  0x1a   : > { %s10826_s16 = smul.u32 24, %s11062_s14 }
  0x1c   : > { %s284_s17 = sadd.s32 %s10827_s15, %s10826_s16 }
  0x1d   : > { %s8914_s18 = sshll.u32 %s284_s17, 3 }
  0x1e   : > { %s11069_s30 = scalar_lea.vmem %s12929_s0, %s8914_s18 }
  0x1f   : > { %v312_v0 = vld [vmem:[%s11069_s30] sm:$0x1]  ;;  %v313_v1 = vld [vmem:[%s11069_s30 + $0x18] sm:$0x1]  ;;  %v314_v2 = vld [vmem:[%s11069_s30 + $0x30] sm:$0x1] }
  0x20   : > { %v315_v3 = vld [vmem:[%s11069_s30 + $0x48] sm:$0x1]  ;;  %v316_v4 = vld [vmem:[%s11069_s30 + $0x60] sm:$0x1]  ;;  %v317_v5 = vld [vmem:[%s11069_s30 + $0x78] sm:$0x1] }
  0x21   : > { %v318_v6 = vld [vmem:[%s11069_s30 + $0x90] sm:$0x1]  ;;  %v319_v7 = vld [vmem:[%s11069_s30 + $0xa8] sm:$0x1]  ;;  %v336_v8 = vrot.slane %v313_v1, 7  ;;  %v339_v9 = vrot.slane %v314_v2, 6 }
  0x22   : > { %v342_v10 = vrot.slane %v315_v3, 5  ;;  %v345_v11 = vrot.slane %v316_v4, 4  ;;  %v348_v12 = vrot.slane %v317_v5, 3  ;;  %v320_v13 = vld [vmem:[%s11069_s30 + $0x1] sm:$0x1]  ;;  %v351_v15 = vrot.slane %v318_v6, 2 }
  0x23   : > { %v338_v14 = vsel %vm337_vm0, %v336_v8, %v312_v0  ;;  %v354_v16 = vrot.slane %v319_v7, 1  ;;  %v321_v17 = vld [vmem:[%s11069_s30 + $0x19] sm:$0x1]  ;;  %v322_v18 = vld [vmem:[%s11069_s30 + $0x31] sm:$0x1] }
  0x24   : > { %v341_v19 = vsel %vm340_vm1, %v339_v9, %v338_v14  ;;  %v323_v20 = vld [vmem:[%s11069_s30 + $0x49] sm:$0x1]  ;;  %v324_v21 = vld [vmem:[%s11069_s30 + $0x61] sm:$0x1]  ;;  %v325_v22 = vld [vmem:[%s11069_s30 + $0x79] sm:$0x1] }
  0x25   : > { %v344_v23 = vsel %vm343_vm2, %v342_v10, %v341_v19  ;;  %v326_v24 = vld [vmem:[%s11069_s30 + $0x91] sm:$0x1]  ;;  %v327_v25 = vld [vmem:[%s11069_s30 + $0xa9] sm:$0x1]  ;;  %v369_v26 = vrot.slane %v321_v17, 7  ;;  %v371_v27 = vrot.slane %v322_v18, 6 }
  0x26   : > { %v347_v28 = vsel %vm346_vm3, %v345_v11, %v344_v23  ;;  %v373_v29 = vrot.slane %v323_v20, 5  ;;  %v375_v30 = vrot.slane %v324_v21, 4  ;;  %v377_v31 = vrot.slane %v325_v22, 3  ;;  %v853_v37 = vld [vmem:[%s11069_s30 + $0x1] sm:$0x1] }
  0x27   : > { %v350_v33 = vsel %vm349_vm4, %v348_v12, %v347_v28  ;;  %v370_v34 = vsel %vm337_vm0, %v369_v26, %v320_v13  ;;  %v379_v35 = vrot.slane %v326_v24, 2  ;;  %v381_v36 = vrot.slane %v327_v25, 1  ;;  %v854_v38 = vld [vmem:[%s11069_s30 + $0x19] sm:$0x1]  ;;  %v855_v41 = vld [vmem:[%s11069_s30 + $0x31] sm:$0x1] }
  0x28   : > { %v353_v39 = vsel %vm352_vm5, %v351_v15, %v350_v33  ;;  %v372_v40 = vsel %vm340_vm1, %v371_v27, %v370_v34  ;;  %v856_v42 = vld [vmem:[%s11069_s30 + $0x49] sm:$0x1]  ;;  %v877_v43 = vrot.slane %v854_v38, 7  ;;  %v857_v46 = vld [vmem:[%s11069_s30 + $0x61] sm:$0x1]  ;;  %v879_v52 = vrot.slane %v855_v41, 6 }
  0x29   : > { %v356_v44 = vsel %vm355_vm6, %v354_v16, %v353_v39  ;;  %v374_v45 = vsel %vm343_vm2, %v373_v29, %v372_v40  ;;  %v858_v47 = vld [vmem:[%s11069_s30 + $0x79] sm:$0x1]  ;;  %v859_v48 = vld [vmem:[%s11069_s30 + $0x91] sm:$0x1]  ;;  %v860_v50 = vld [vmem:[%s11069_s30 + $0xa9] sm:$0x1] }
  0x2a   : > { %358 = vrot.lane.b32.xlu0 %v356_v44, %s10955_s10  ;;  %v376_v49 = vsel %vm346_vm3, %v375_v30, %v374_v45  ;;  %v878_v51 = vsel %vm337_vm0, %v877_v43, %v853_v37  ;;  %v881_v53 = vrot.slane %v856_v42, 5  ;;  %v861_v54 = vld [vmem:[%s11069_s30 + $0x2] sm:$0x1]  ;;  %v883_v56 = vrot.slane %v857_v46, 4  ;;  %v862_v59 = vld [vmem:[%s11069_s30 + $0x1a] sm:$0x1] }
  0x2b   : > { %v378_v55 = vsel %vm349_vm4, %v377_v31, %v376_v49  ;;  %v885_v57 = vrot.slane %v858_v47, 3  ;;  %v887_v58 = vrot.slane %v859_v48, 2  ;;  %v880_v61 = vsel %vm340_vm1, %v879_v52, %v878_v51  ;;  %v863_v63 = vld [vmem:[%s11069_s30 + $0x32] sm:$0x1]  ;;  %v864_v0 = vld [vmem:[%s11069_s30 + $0x4a] sm:$0x1] }
  0x2c   : > { %v380_v60 = vsel %vm352_vm5, %v379_v35, %v378_v55  ;;  %v889_v62 = vrot.slane %v860_v50, 1  ;;  %v903_v1 = vrot.slane %v862_v59, 7  ;;  %v882_v3 = vsel %vm343_vm2, %v881_v53, %v880_v61  ;;  %v865_v4 = vld [vmem:[%s11069_s30 + $0x62] sm:$0x1]  ;;  %v866_v5 = vld [vmem:[%s11069_s30 + $0x7a] sm:$0x1] }
  0x2d   : > { %v382_v2 = vsel %vm355_vm6, %v381_v36, %v380_v60  ;;  %v867_v6 = vld [vmem:[%s11069_s30 + $0x92] sm:$0x1]  ;;  %v884_v7 = vsel %vm346_vm3, %v883_v56, %v882_v3  ;;  %v868_v8 = vld [vmem:[%s11069_s30 + $0xaa] sm:$0x1]  ;;  %v905_v10 = vrot.slane %v863_v63, 6  ;;  %v907_v11 = vrot.slane %v864_v0, 5 }
  0x2e   : > { %384 = vrot.lane.b32.xlu0 %v382_v2, %s10955_s10  ;;  %v904_v9 = vsel %vm337_vm0, %v903_v1, %v861_v54  ;;  %v302_v12 = vld [vmem:[%s12932_s3] sm:$0xff]  ;;  %v886_v13 = vsel %vm349_vm4, %v885_v57, %v884_v7  ;;  %v909_v14 = vrot.slane %v865_v4, 4  ;;  %v911_v15 = vrot.slane %v866_v5, 3  ;;  %v303_v16 = vld [vmem:[%s12932_s3 + $0x8] sm:$0xff]  ;;  %v300_v37 = vld [vmem:[%s12931_s2 + $0x10] sm:$0xff] }
  0x2f   : > { %v888_v17 = vsel %vm352_vm5, %v887_v58, %v886_v13  ;;  %v906_v18 = vsel %vm340_vm1, %v905_v10, %v904_v9  ;;  %v913_v19 = vrot.slane %v867_v6, 2  ;;  %v915_v22 = vrot.slane %v868_v8, 1  ;;  %v298_v33 = vld [vmem:[%s12931_s2] sm:$0xff]  ;;  %v299_v34 = vld [vmem:[%s12931_s2 + $0x8] sm:$0xff]  ;;  %v301_v38 = vld [vmem:[%s12931_s2 + $0x18] sm:$0xff] }
  0x30   : > { %v11138_v20 = vsel %vm355_vm6, %v889_v62, %v888_v17  ;;  %v908_v21 = vsel %vm343_vm2, %v907_v11, %v906_v18  ;;  %v12938_v23 = vmov 0.0|0.0   ;;  %v11142_v24 = vpack.c.bf16 %v303_v16, %v302_v12  ;;  %v297_v35 = vld [vmem:[%s12930_s1 + $0x8] sm:$0xf]  ;;  %v304_v40 = vld [vmem:[%s12932_s3 + $0x10] sm:$0xff]  ;;  %v305_v41 = vld [vmem:[%s12932_s3 + $0x18] sm:$0xff] }
  0x31   : > { %10321 = vmatprep.subr.bf16.mxu1 %v12938_v23  ;;  %892 = vrot.lane.b32.xlu1 %v11138_v20, %s10955_s10  ;;  %v910_v25 = vsel %vm346_vm3, %v909_v14, %v908_v21  ;;  %v11165_v36 = vpack.c.bf16 %v299_v34, %v298_v33  ;;  %v11176_v39 = vpack.c.bf16 %v301_v38, %v300_v37  ;;  %v12936_v43 = vmov 0.0   ;;  %v1378_v45 = vld [vmem:[%s11069_s30 + $0x1a] sm:$0x1]  ;;  %v1379_v46 = vld [vmem:[%s11069_s30 + $0x32] sm:$0x1] }
  0x32   : > { %v912_v26 = vsel %vm349_vm4, %v911_v15, %v910_v25  ;;  %10323 = vmatpush3.bf16.msra.mxu1 %v11142_v24  ;;  %v11187_v42 = vpack.c.bf16 %v305_v41, %v304_v40  ;;  %9452 = vmatprep.mubr.msk.f32.mxu1 %vm10957_vm8, %v12936_v43  ;;  %v1380_v47 = vld [vmem:[%s11069_s30 + $0x4a] sm:$0x1]  ;;  %v1381_v48 = vld [vmem:[%s11069_s30 + $0x62] sm:$0x1]  ;;  %v1382_v49 = vld [vmem:[%s11069_s30 + $0x7a] sm:$0x1] }
  0x33   : > { %v914_v27 = vsel %vm352_vm5, %v913_v19, %v912_v26  ;;  %10324 = vmatprep.subr.bf16.mxu1 %v12938_v23  ;;  %v1383_v50 = vld [vmem:[%s11069_s30 + $0x92] sm:$0x1]  ;;  %v1384_v51 = vld [vmem:[%s11069_s30 + $0xaa] sm:$0x1]  ;;  %v1401_v52 = vrot.slane %v1378_v45, 7  ;;  %v1403_v53 = vrot.slane %v1379_v46, 6 }
  0x34   : > { %v11152_v28 = vsel %vm355_vm6, %v915_v22, %v914_v27  ;;  %v1405_v54 = vrot.slane %v1380_v47, 5  ;;  %v1407_v55 = vrot.slane %v1381_v48, 4  ;;  %v1409_v56 = vrot.slane %v1382_v49, 3  ;;  %v1901_v58 = vld [vmem:[%s11069_s30 + $0x3] sm:$0x1] }
  0x35   : > { %918 = vrot.lane.b32.xlu1 %v11152_v28, %s10955_s10  ;;  %v1411_v57 = vrot.slane %v1383_v50, 2  ;;  %v1413_v60 = vrot.slane %v1384_v51, 1  ;;  %v1902_v61 = vld [vmem:[%s11069_s30 + $0x1b] sm:$0x1]  ;;  %v1903_v62 = vld [vmem:[%s11069_s30 + $0x33] sm:$0x1] }
  0x36   : > { %10326 = vmatpush3.bf16.msra.mxu1 %v11187_v42  ;;  %v1904_v0 = vld [vmem:[%s11069_s30 + $0x4b] sm:$0x1]  ;;  %v1905_v1 = vld [vmem:[%s11069_s30 + $0x63] sm:$0x1]  ;;  %v10959_v3 = vmov 0   ;;  %v1925_v7 = vrot.slane %v1902_v61, 7 }
  0x37   : > { %10333 = vmatprep.subr.bf16.mxu1 %v12938_v23  ;;  %10892 = vset.pattern.permute.xlu0 %v10959_v3  ;;  %v1907_v5 = vld [vmem:[%s11069_s30 + $0x93] sm:$0x1]  ;;  %v1908_v6 = vld [vmem:[%s11069_s30 + $0xab] sm:$0x1]  ;;  %v1927_v8 = vrot.slane %v1903_v62, 6  ;;  %v1929_v10 = vrot.slane %v1904_v0, 5 }
  0x38   : > { %v1931_v11 = vrot.slane %v1905_v1, 4  ;;  %v2425_v13 = vld [vmem:[%s11069_s30 + $0x4] sm:$0x1]  ;;  %v1926_v15 = vsel %vm337_vm0, %v1925_v7, %v1901_v58  ;;  %v1935_v16 = vrot.slane %v1907_v5, 2  ;;  %v1937_v17 = vrot.slane %v1908_v6, 1 }
  0x39   : > { %v2426_v18 = vld [vmem:[%s11069_s30 + $0x1c] sm:$0x1]  ;;  %v2427_v19 = vld [vmem:[%s11069_s30 + $0x34] sm:$0x1]  ;;  %v1928_v22 = vsel %vm340_vm1, %v1927_v8, %v1926_v15  ;;  %v2428_v25 = vld [vmem:[%s11069_s30 + $0x4c] sm:$0x1] }
  0x3a   : > { %v2429_v26 = vld [vmem:[%s11069_s30 + $0x64] sm:$0x1]  ;;  %v2430_v27 = vld [vmem:[%s11069_s30 + $0x7c] sm:$0x1]  ;;  %v2449_v33 = vrot.slane %v2426_v18, 7  ;;  %v2451_v34 = vrot.slane %v2427_v19, 6 }
  0x3b   : > { %v2453_v37 = vrot.slane %v2428_v25, 5  ;;  %v2455_v38 = vrot.slane %v2429_v26, 4  ;;  %v2457_v40 = vrot.slane %v2430_v27, 3  ;;  %v2949_v41 = vld [vmem:[%s11069_s30 + $0x5] sm:$0x1] }
  0x3c   : > { %v2450_v45 = vsel %vm337_vm0, %v2449_v33, %v2425_v13  ;;  %v2950_v48 = vld [vmem:[%s11069_s30 + $0x1d] sm:$0x1]  ;;  %v2951_v49 = vld [vmem:[%s11069_s30 + $0x35] sm:$0x1]  ;;  %v2956_v58 = vld [vmem:[%s11069_s30 + $0xad] sm:$0x1] }
  0x3d   : > { %v2452_v51 = vsel %vm340_vm1, %v2451_v34, %v2450_v45  ;;  %v3473_v1 = vld [vmem:[%s11069_s30 + $0x6] sm:$0x1]  ;;  %v2985_v5 = vrot.slane %v2956_v58, 1  ;;  %v3474_v6 = vld [vmem:[%s11069_s30 + $0x1e] sm:$0x1] }
  0x3e   : > { %v3475_v7 = vld [vmem:[%s11069_s30 + $0x36] sm:$0x1]  ;;  %v3997_v26 = vld [vmem:[%s11069_s30 + $0x7] sm:$0x1]  ;;  %v3998_v33 = vld [vmem:[%s11069_s30 + $0x1f] sm:$0x1] }
  0x3f   : > { %v3479_v15 = vld [vmem:[%s11069_s30 + $0x96] sm:$0x1]  ;;  %v3499_v18 = vrot.slane %v3475_v7, 6  ;;  %v3999_v34 = vld [vmem:[%s11069_s30 + $0x37] sm:$0x1] }
  0x9c   : > { %v359_v29 = vpop.permute.xlu0 %358 }
  0x9d   : > { %v10313_v30 = vpack.c.bf16 %v359_v29, %v356_v44  ;;  %v1377_v44 = vld [vmem:[%s11069_s30 + $0x2] sm:$0x1] }
  0x9e   : > { %v1402_v59 = vsel %vm337_vm0, %v1401_v52, %v1377_v44  ;;  %v2952_v52 = vld [vmem:[%s11069_s30 + $0x4d] sm:$0x1] }
  0x9f   : > { %10314 = vmatprep.subr.bf16.mxu0 %v10313_v30  ;;  %v1404_v63 = vsel %vm340_vm1, %v1403_v53, %v1402_v59  ;;  %v2953_v53 = vld [vmem:[%s11069_s30 + $0x65] sm:$0x1]  ;;  %v2973_v59 = vrot.slane %v2950_v48, 7  ;;  %v2977_v62 = vrot.slane %v2952_v52, 5  ;;  %v4021_v48 = vrot.slane %v3998_v33, 7 }
  0xa0   : > { %10316 = vmatpush3.bf16.msra.mxu0 %v10313_v30  ;;  %v385_v31 = vpop.permute.xlu0 %384  ;;  %v1406_v4 = vsel %vm343_vm2, %v1405_v54, %v1404_v63  ;;  %v1930_v30 = vsel %vm343_vm2, %v1929_v10, %v1928_v22  ;;  %v2954_v54 = vld [vmem:[%s11069_s30 + $0x7d] sm:$0x1]  ;;  %v2979_v63 = vrot.slane %v2953_v53, 4  ;;  %v3476_v10 = vld [vmem:[%s11069_s30 + $0x4e] sm:$0x1] }
  0xa1   : > { %v10317_v32 = vpack.c.bf16 %v385_v31, %v382_v2  ;;  %v1906_v2 = vld [vmem:[%s11069_s30 + $0x7b] sm:$0x1]  ;;  %v1408_v9 = vsel %vm346_vm3, %v1407_v55, %v1406_v4  ;;  %v2431_v31 = vld [vmem:[%s11069_s30 + $0x94] sm:$0x1]  ;;  %v2981_v0 = vrot.slane %v2954_v54, 3  ;;  %v2974_v3 = vsel %vm337_vm0, %v2973_v59, %v2949_v41 }
  0xa2   : > { %v1933_v12 = vrot.slane %v1906_v2, 3  ;;  %v1410_v14 = vsel %vm349_vm4, %v1409_v56, %v1408_v9  ;;  %v2459_v46 = vrot.slane %v2431_v31, 2  ;;  %v2454_v56 = vsel %vm343_vm2, %v2453_v37, %v2452_v51  ;;  %v4002_v41 = vld [vmem:[%s11069_s30 + $0x7f] sm:$0x1]  ;;  %v4521_v54 = vld [vmem:[%s11069_s30 + $0x8] sm:$0x1] }
  0xa3   : > { %10318 = vmatprep.subr.bf16.mxu0 %v10317_v32  ;;  %v1412_v21 = vsel %vm352_vm5, %v1411_v57, %v1410_v14  ;;  %v2955_v57 = vld [vmem:[%s11069_s30 + $0x95] sm:$0x1]  ;;  %v2456_v61 = vsel %vm346_vm3, %v2455_v38, %v2454_v56  ;;  %v3507_v31 = vrot.slane %v3479_v15, 2  ;;  %v4000_v38 = vld [vmem:[%s11069_s30 + $0x4f] sm:$0x1]  ;;  %v4029_v53 = vrot.slane %v4002_v41, 3 }
  0xa4   : > { %10320 = vmatpush3.bf16.msra.mxu0 %v10317_v32  ;;  %v11226_v29 = vsel %vm355_vm6, %v1413_v60, %v1412_v21  ;;  %v2432_v32 = vld [vmem:[%s11069_s30 + $0xac] sm:$0x1]  ;;  %v2975_v60 = vrot.slane %v2951_v49, 6  ;;  %v2458_v2 = vsel %vm349_vm4, %v2457_v40, %v2456_v61  ;;  %v2983_v4 = vrot.slane %v2955_v57, 2  ;;  %v4001_v40 = vld [vmem:[%s11069_s30 + $0x67] sm:$0x1] }
  0xa5   : > { %10327 = vmatprep.subr.bf16.mxu0 %v12938_v23  ;;  %1416 = vrot.lane.b32.xlu0 %v11226_v29, %s10955_s10  ;;  %v2461_v47 = vrot.slane %v2432_v32, 1  ;;  %v2460_v8 = vsel %vm352_vm5, %v2459_v46, %v2458_v2  ;;  %v3501_v21 = vrot.slane %v3476_v10, 5  ;;  %v4003_v46 = vld [vmem:[%s11069_s30 + $0x97] sm:$0x1]  ;;  %v4023_v49 = vrot.slane %v3999_v34, 6 }
  0xa6   : > { %v2976_v9 = vsel %vm340_vm1, %v2975_v60, %v2974_v3  ;;  %v4025_v51 = vrot.slane %v4000_v38, 5  ;;  %v4027_v52 = vrot.slane %v4001_v40, 4  ;;  %v4022_v57 = vsel %vm337_vm0, %v4021_v48, %v3997_v26  ;;  %v4522_v60 = vld [vmem:[%s11069_s30 + $0x20] sm:$0x1]  ;;  %v4523_v61 = vld [vmem:[%s11069_s30 + $0x38] sm:$0x1] }
  0xa7   : > { %9442 = vmatmul.mubr.msk.f32.vlgmr.msra.gmra.mrb[0].mxu0 %vm387_vm7, %v297_v35  ;;  %v1932_v35 = vsel %vm346_vm3, %v1931_v11, %v1930_v30  ;;  %v3477_v11 = vld [vmem:[%s11069_s30 + $0x66] sm:$0x1]  ;;  %v11264_v13 = vsel %vm355_vm6, %v2461_v47, %v2460_v8  ;;  %v2978_v14 = vsel %vm343_vm2, %v2977_v62, %v2976_v9  ;;  %v4004_v47 = vld [vmem:[%s11069_s30 + $0xaf] sm:$0x1]  ;;  %v4031_v58 = vrot.slane %v4003_v46, 2 }
  0xa8   : > { %10329 = vmatpush3.bf16.msra.mxu0 %v11165_v36  ;;  %9463 = vmatprep.mubr.msk.f32.mxu0 %vm10957_vm8, %v12936_v43  ;;  %v1934_v44 = vsel %vm349_vm4, %v1933_v12, %v1932_v35  ;;  %v3478_v12 = vld [vmem:[%s11069_s30 + $0x7e] sm:$0x1]  ;;  %v2980_v19 = vsel %vm346_vm3, %v2979_v63, %v2978_v14  ;;  %v3503_v22 = vrot.slane %v3477_v11, 4  ;;  %v4033_v59 = vrot.slane %v4004_v47, 1  ;;  %v4526_v2 = vld [vmem:[%s11069_s30 + $0x80] sm:$0x1] }
  0xa9   : > { %10330 = vmatprep.subr.bf16.mxu0 %v12938_v23  ;;  %v1936_v50 = vsel %vm352_vm5, %v1935_v16, %v1934_v44  ;;  %v3480_v16 = vld [vmem:[%s11069_s30 + $0xae] sm:$0x1]  ;;  %v3505_v25 = vrot.slane %v3478_v12, 3  ;;  %v2982_v27 = vsel %vm349_vm4, %v2981_v0, %v2980_v19  ;;  %v4024_v63 = vsel %vm340_vm1, %v4023_v49, %v4022_v57  ;;  %v4524_v0 = vld [vmem:[%s11069_s30 + $0x50] sm:$0x1] }
  0xaa   : > { %v11245_v55 = vsel %vm355_vm6, %v1937_v17, %v1936_v50  ;;  %v3497_v17 = vrot.slane %v3474_v6, 7  ;;  %v3509_v32 = vrot.slane %v3480_v16, 1  ;;  %v2984_v35 = vsel %vm352_vm5, %v2983_v4, %v2982_v27  ;;  %v4528_v6 = vld [vmem:[%s11069_s30 + $0xb0] sm:$0x1]  ;;  %v5045_v14 = vld [vmem:[%s11069_s30 + $0x9] sm:$0x1] }
  0xab   : > { %1940 = vrot.lane.b32.xlu0 %v11245_v55, %s10955_s10  ;;  %v11283_v44 = vsel %vm355_vm6, %v2985_v5, %v2984_v35  ;;  %v4026_v4 = vsel %vm343_vm2, %v4025_v51, %v4024_v63  ;;  %v4527_v5 = vld [vmem:[%s11069_s30 + $0x98] sm:$0x1]  ;;  %v4545_v7 = vrot.slane %v4522_v60, 7  ;;  %v4547_v8 = vrot.slane %v4523_v61, 6  ;;  %v5046_v19 = vld [vmem:[%s11069_s30 + $0x21] sm:$0x1] }
  0xac   : > { %10332 = vmatpush3.bf16.msra.mxu0 %v11176_v39  ;;  %v3498_v30 = vsel %vm337_vm0, %v3497_v17, %v3473_v1  ;;  %v4525_v1 = vld [vmem:[%s11069_s30 + $0x68] sm:$0x1]  ;;  %v4028_v9 = vsel %vm346_vm3, %v4027_v52, %v4026_v4  ;;  %v4549_v10 = vrot.slane %v4524_v0, 5  ;;  %v4553_v12 = vrot.slane %v4526_v2, 3  ;;  %v5048_v26 = vld [vmem:[%s11069_s30 + $0x51] sm:$0x1] }
  0xad   : > { %10339 = vmatprep.subr.bf16.mxu0 %v12938_v23  ;;  %v3500_v37 = vsel %vm340_vm1, %v3499_v18, %v3498_v30  ;;  %v4551_v11 = vrot.slane %v4525_v1, 4  ;;  %v4030_v15 = vsel %vm349_vm4, %v4029_v53, %v4028_v9  ;;  %v4546_v16 = vsel %vm337_vm0, %v4545_v7, %v4521_v54  ;;  %v5049_v27 = vld [vmem:[%s11069_s30 + $0x69] sm:$0x1]  ;;  %v5050_v30 = vld [vmem:[%s11069_s30 + $0x81] sm:$0x1] }
  0xae   : > { %v3502_v45 = vsel %vm343_vm2, %v3501_v21, %v3500_v37  ;;  %v4555_v17 = vrot.slane %v4527_v5, 2  ;;  %v4557_v18 = vrot.slane %v4528_v6, 1  ;;  %v5047_v21 = vld [vmem:[%s11069_s30 + $0x39] sm:$0x1]  ;;  %v5052_v34 = vld [vmem:[%s11069_s30 + $0xb1] sm:$0x1] }
  0xaf   : > { %2464 = vrot.lane.b32.xlu0 %v11264_v13, %s10955_s10  ;;  %v3504_v50 = vsel %vm346_vm3, %v3503_v22, %v3502_v45  ;;  %v4032_v22 = vsel %vm352_vm5, %v4031_v58, %v4030_v15  ;;  %v5051_v33 = vld [vmem:[%s11069_s30 + $0x99] sm:$0x1]  ;;  %v5069_v35 = vrot.slane %v5046_v19, 7  ;;  %v5071_v37 = vrot.slane %v5047_v21, 6  ;;  %v5569_v46 = vld [vmem:[%s11069_s30 + $0xa] sm:$0x1] }
  0xb0   : > { %v3506_v56 = vsel %vm349_vm4, %v3505_v25, %v3504_v50  ;;  %v4548_v25 = vsel %vm340_vm1, %v4547_v8, %v4546_v16  ;;  %v5073_v40 = vrot.slane %v5048_v26, 5  ;;  %v5075_v41 = vrot.slane %v5049_v27, 4  ;;  %v5570_v51 = vld [vmem:[%s11069_s30 + $0x22] sm:$0x1]  ;;  %v5571_v52 = vld [vmem:[%s11069_s30 + $0x3a] sm:$0x1] }
  0xb1   : > { %v3508_v62 = vsel %vm352_vm5, %v3507_v31, %v3506_v56  ;;  %v11321_v31 = vsel %vm355_vm6, %v4033_v59, %v4032_v22  ;;  %v5077_v45 = vrot.slane %v5050_v30, 3  ;;  %v5070_v48 = vsel %vm337_vm0, %v5069_v35, %v5045_v14  ;;  %v5572_v56 = vld [vmem:[%s11069_s30 + $0x52] sm:$0x1]  ;;  %v5573_v57 = vld [vmem:[%s11069_s30 + $0x6a] sm:$0x1] }
  0xb2   : > { %v11302_v3 = vsel %vm355_vm6, %v3509_v32, %v3508_v62  ;;  %v4550_v32 = vsel %vm343_vm2, %v4549_v10, %v4548_v25  ;;  %v5079_v49 = vrot.slane %v5051_v33, 2  ;;  %v5081_v50 = vrot.slane %v5052_v34, 1  ;;  %v5574_v58 = vld [vmem:[%s11069_s30 + $0x82] sm:$0x1]  ;;  %v5575_v61 = vld [vmem:[%s11069_s30 + $0x9a] sm:$0x1] }
  0xb3   : > { %2988 = vrot.lane.b32.xlu0 %v11283_v44, %s10955_s10  ;;  %v4552_v38 = vsel %vm346_vm3, %v4551_v11, %v4550_v32  ;;  %v5072_v54 = vsel %vm340_vm1, %v5071_v37, %v5070_v48  ;;  %v5576_v62 = vld [vmem:[%s11069_s30 + $0xb2] sm:$0x1]  ;;  %v5593_v63 = vrot.slane %v5570_v51, 7  ;;  %v5595_v0 = vrot.slane %v5571_v52, 6  ;;  %v6093_v6 = vld [vmem:[%s11069_s30 + $0xb] sm:$0x1] }
  0xb4   : > { %v4554_v47 = vsel %vm349_vm4, %v4553_v12, %v4552_v38  ;;  %v5074_v60 = vsel %vm343_vm2, %v5073_v40, %v5072_v54  ;;  %v5597_v2 = vrot.slane %v5572_v56, 5  ;;  %v5599_v4 = vrot.slane %v5573_v57, 4  ;;  %v6094_v11 = vld [vmem:[%s11069_s30 + $0x23] sm:$0x1]  ;;  %v6095_v12 = vld [vmem:[%s11069_s30 + $0x3b] sm:$0x1] }
  0xb5   : > { %v4556_v53 = vsel %vm352_vm5, %v4555_v17, %v4554_v47  ;;  %v5076_v1 = vsel %vm346_vm3, %v5075_v41, %v5074_v60  ;;  %v5601_v5 = vrot.slane %v5574_v58, 3  ;;  %v5594_v8 = vsel %vm337_vm0, %v5593_v63, %v5569_v46  ;;  %v6096_v16 = vld [vmem:[%s11069_s30 + $0x53] sm:$0x1]  ;;  %v6097_v17 = vld [vmem:[%s11069_s30 + $0x6b] sm:$0x1] }
  0xb6   : > { %v11340_v59 = vsel %vm355_vm6, %v4557_v18, %v4556_v53  ;;  %v5078_v7 = vsel %vm349_vm4, %v5077_v45, %v5076_v1  ;;  %v5603_v9 = vrot.slane %v5575_v61, 2  ;;  %v5605_v10 = vrot.slane %v5576_v62, 1  ;;  %v6098_v18 = vld [vmem:[%s11069_s30 + $0x83] sm:$0x1]  ;;  %v6099_v22 = vld [vmem:[%s11069_s30 + $0x9b] sm:$0x1] }
  0xb7   : > { %3512 = vrot.lane.b32.xlu0 %v11302_v3, %s10955_s10  ;;  %v5080_v14 = vsel %vm352_vm5, %v5079_v49, %v5078_v7  ;;  %v5596_v15 = vsel %vm340_vm1, %v5595_v0, %v5594_v8  ;;  %v6100_v25 = vld [vmem:[%s11069_s30 + $0xb3] sm:$0x1]  ;;  %v6117_v26 = vrot.slane %v6094_v11, 7  ;;  %v6119_v27 = vrot.slane %v6095_v12, 6  ;;  %v6617_v35 = vld [vmem:[%s11069_s30 + $0xc] sm:$0x1] }
  0xb8   : > { %v11359_v19 = vsel %vm355_vm6, %v5081_v50, %v5080_v14  ;;  %v5598_v21 = vsel %vm343_vm2, %v5597_v2, %v5596_v15  ;;  %v6121_v32 = vrot.slane %v6096_v16, 5  ;;  %v6123_v33 = vrot.slane %v6097_v17, 4  ;;  %v6618_v45 = vld [vmem:[%s11069_s30 + $0x24] sm:$0x1]  ;;  %v6619_v46 = vld [vmem:[%s11069_s30 + $0x3c] sm:$0x1] }
  0xb9   : > { %v5600_v30 = vsel %vm346_vm3, %v5599_v4, %v5598_v21  ;;  %v6125_v34 = vrot.slane %v6098_v18, 3  ;;  %v6118_v38 = vsel %vm337_vm0, %v6117_v26, %v6093_v6  ;;  %v6127_v40 = vrot.slane %v6099_v22, 2  ;;  %v6620_v49 = vld [vmem:[%s11069_s30 + $0x54] sm:$0x1]  ;;  %v6621_v50 = vld [vmem:[%s11069_s30 + $0x6c] sm:$0x1] }
  0xba   : > { %v5602_v37 = vsel %vm349_vm4, %v5601_v5, %v5600_v30  ;;  %v6129_v41 = vrot.slane %v6100_v25, 1  ;;  %v6120_v48 = vsel %vm340_vm1, %v6119_v27, %v6118_v38  ;;  %v6622_v51 = vld [vmem:[%s11069_s30 + $0x84] sm:$0x1]  ;;  %v6623_v54 = vld [vmem:[%s11069_s30 + $0x9c] sm:$0x1]  ;;  %v6641_v57 = vrot.slane %v6618_v45, 7 }
  0xbb   : > { %4036 = vrot.lane.b32.xlu0 %v11321_v31, %s10955_s10  ;;  %v5604_v47 = vsel %vm352_vm5, %v5603_v9, %v5602_v37  ;;  %v6122_v53 = vsel %vm343_vm2, %v6121_v32, %v6120_v48  ;;  %v6624_v56 = vld [vmem:[%s11069_s30 + $0xb4] sm:$0x1]  ;;  %v6643_v58 = vrot.slane %v6619_v46, 6  ;;  %v6645_v61 = vrot.slane %v6620_v49, 5  ;;  %v7141_v0 = vld [vmem:[%s11069_s30 + $0xd] sm:$0x1] }
  0xbc   : > { %v11378_v52 = vsel %vm355_vm6, %v5605_v10, %v5604_v47  ;;  %v6124_v60 = vsel %vm346_vm3, %v6123_v33, %v6122_v53  ;;  %v6647_v62 = vrot.slane %v6621_v50, 4  ;;  %v6649_v63 = vrot.slane %v6622_v51, 3  ;;  %v7142_v6 = vld [vmem:[%s11069_s30 + $0x25] sm:$0x1]  ;;  %v7143_v7 = vld [vmem:[%s11069_s30 + $0x3d] sm:$0x1] }
  0xbd   : > { %v6126_v1 = vsel %vm349_vm4, %v6125_v34, %v6124_v60  ;;  %v6642_v2 = vsel %vm337_vm0, %v6641_v57, %v6617_v35  ;;  %v6651_v4 = vrot.slane %v6623_v54, 2  ;;  %v6653_v5 = vrot.slane %v6624_v56, 1  ;;  %v7144_v10 = vld [vmem:[%s11069_s30 + $0x55] sm:$0x1]  ;;  %v7145_v11 = vld [vmem:[%s11069_s30 + $0x6d] sm:$0x1] }
  0xbe   : > { %v6128_v8 = vsel %vm352_vm5, %v6127_v40, %v6126_v1  ;;  %v6644_v9 = vsel %vm340_vm1, %v6643_v58, %v6642_v2  ;;  %v7146_v12 = vld [vmem:[%s11069_s30 + $0x85] sm:$0x1]  ;;  %v7147_v16 = vld [vmem:[%s11069_s30 + $0x9d] sm:$0x1]  ;;  %v7148_v17 = vld [vmem:[%s11069_s30 + $0xb5] sm:$0x1] }
  0xbf   : > { %4560 = vrot.lane.b32.xlu0 %v11340_v59, %s10955_s10  ;;  %v11397_v14 = vsel %vm355_vm6, %v6129_v41, %v6128_v8  ;;  %v6646_v15 = vsel %vm343_vm2, %v6645_v61, %v6644_v9  ;;  %v7165_v18 = vrot.slane %v7142_v6, 7  ;;  %v7167_v21 = vrot.slane %v7143_v7, 6  ;;  %v7665_v30 = vld [vmem:[%s11069_s30 + $0xe] sm:$0x1]  ;;  %v7666_v37 = vld [vmem:[%s11069_s30 + $0x26] sm:$0x1] }
  0xc0   : > { %v6648_v22 = vsel %vm346_vm3, %v6647_v62, %v6646_v15  ;;  %v7169_v25 = vrot.slane %v7144_v10, 5  ;;  %v7171_v26 = vrot.slane %v7145_v11, 4  ;;  %v7173_v27 = vrot.slane %v7146_v12, 3  ;;  %v7667_v38 = vld [vmem:[%s11069_s30 + $0x3e] sm:$0x1] }
  0xc1   : > { %v6650_v32 = vsel %vm349_vm4, %v6649_v63, %v6648_v22  ;;  %v7166_v33 = vsel %vm337_vm0, %v7165_v18, %v7141_v0  ;;  %v7175_v34 = vrot.slane %v7147_v16, 2  ;;  %v7177_v35 = vrot.slane %v7148_v17, 1  ;;  %v7668_v45 = vld [vmem:[%s11069_s30 + $0x56] sm:$0x1]  ;;  %v7669_v46 = vld [vmem:[%s11069_s30 + $0x6e] sm:$0x1] }
  0xc2   : > { %v6652_v40 = vsel %vm352_vm5, %v6651_v4, %v6650_v32  ;;  %v7168_v41 = vsel %vm340_vm1, %v7167_v21, %v7166_v33  ;;  %v7670_v47 = vld [vmem:[%s11069_s30 + $0x86] sm:$0x1]  ;;  %v7671_v50 = vld [vmem:[%s11069_s30 + $0x9e] sm:$0x1]  ;;  %v7672_v51 = vld [vmem:[%s11069_s30 + $0xb6] sm:$0x1] }
  0xc3   : > { %5084 = vrot.lane.b32.xlu0 %v11359_v19, %s10955_s10  ;;  %v11416_v48 = vsel %vm355_vm6, %v6653_v5, %v6652_v40  ;;  %v7170_v49 = vsel %vm343_vm2, %v7169_v25, %v7168_v41  ;;  %v7689_v53 = vrot.slane %v7666_v37, 7  ;;  %v7691_v54 = vrot.slane %v7667_v38, 6  ;;  %v8189_v61 = vld [vmem:[%s11069_s30 + $0xf] sm:$0x1]  ;;  %v8190_v2 = vld [vmem:[%s11069_s30 + $0x27] sm:$0x1] }
  0xc4   : > { %12949 = vst [vmem:[#allocation3_spill] sm:$0xff] %v11416_v48  ;;  %v7172_v56 = vsel %vm346_vm3, %v7171_v26, %v7170_v49  ;;  %v7693_v57 = vrot.slane %v7668_v45, 5  ;;  %v7695_v58 = vrot.slane %v7669_v46, 4  ;;  %v7697_v60 = vrot.slane %v7670_v47, 3  ;;  %v8191_v4 = vld [vmem:[%s11069_s30 + $0x3f] sm:$0x1] }
  0xc5   : > { %v7174_v62 = vsel %vm349_vm4, %v7173_v27, %v7172_v56  ;;  %v7690_v63 = vsel %vm337_vm0, %v7689_v53, %v7665_v30  ;;  %v7699_v0 = vrot.slane %v7671_v50, 2  ;;  %v7701_v1 = vrot.slane %v7672_v51, 1  ;;  %v8192_v7 = vld [vmem:[%s11069_s30 + $0x57] sm:$0x1]  ;;  %v8193_v8 = vld [vmem:[%s11069_s30 + $0x6f] sm:$0x1] }
  0xc6   : > { %v7176_v5 = vsel %vm352_vm5, %v7175_v34, %v7174_v62  ;;  %v7692_v6 = vsel %vm340_vm1, %v7691_v54, %v7690_v63  ;;  %v8194_v9 = vld [vmem:[%s11069_s30 + $0x87] sm:$0x1]  ;;  %v8195_v12 = vld [vmem:[%s11069_s30 + $0x9f] sm:$0x1]  ;;  %v8196_v15 = vld [vmem:[%s11069_s30 + $0xb7] sm:$0x1] }
  0xc7   : > { %5608 = vrot.lane.b32.xlu0 %v11378_v52, %s10955_s10  ;;  %v11435_v10 = vsel %vm355_vm6, %v7177_v35, %v7176_v5  ;;  %v7694_v11 = vsel %vm343_vm2, %v7693_v57, %v7692_v6  ;;  %v8213_v16 = vrot.slane %v8190_v2, 7  ;;  %v8215_v17 = vrot.slane %v8191_v4, 6  ;;  %v1385_v33 = vld [vmem:[%s11069_s30 + $0x3] sm:$0x1]  ;;  %v1386_v34 = vld [vmem:[%s11069_s30 + $0x1b] sm:$0x1] }
  0xc8   : > { %12950 = vst [vmem:[#allocation4_spill] sm:$0xff] %v11435_v10  ;;  %v7696_v18 = vsel %vm346_vm3, %v7695_v58, %v7694_v11  ;;  %v8217_v21 = vrot.slane %v8192_v7, 5  ;;  %v8219_v22 = vrot.slane %v8193_v8, 4  ;;  %v8221_v25 = vrot.slane %v8194_v9, 3  ;;  %v1387_v38 = vld [vmem:[%s11069_s30 + $0x33] sm:$0x1] }
  0xc9   : > { %v7698_v26 = vsel %vm349_vm4, %v7697_v60, %v7696_v18  ;;  %v8214_v27 = vsel %vm337_vm0, %v8213_v16, %v8189_v61  ;;  %v8223_v30 = vrot.slane %v8195_v12, 2  ;;  %v8225_v32 = vrot.slane %v8196_v15, 1  ;;  %v1388_v40 = vld [vmem:[%s11069_s30 + $0x4b] sm:$0x1]  ;;  %v1389_v41 = vld [vmem:[%s11069_s30 + $0x63] sm:$0x1] }
  0xca   : > { %v7700_v35 = vsel %vm352_vm5, %v7699_v0, %v7698_v26  ;;  %v8216_v37 = vsel %vm340_vm1, %v8215_v17, %v8214_v27  ;;  %v1390_v47 = vld [vmem:[%s11069_s30 + $0x7b] sm:$0x1]  ;;  %v1391_v49 = vld [vmem:[%s11069_s30 + $0x93] sm:$0x1]  ;;  %v1392_v50 = vld [vmem:[%s11069_s30 + $0xab] sm:$0x1] }
  0xcb   : > { %6132 = vrot.lane.b32.xlu0 %v11397_v14, %s10955_s10  ;;  %v11453_v45 = vsel %vm355_vm6, %v7701_v1, %v7700_v35  ;;  %v8218_v46 = vsel %vm343_vm2, %v8217_v21, %v8216_v37  ;;  %v1427_v53 = vrot.slane %v1386_v34, 7  ;;  %v1429_v54 = vrot.slane %v1387_v38, 6  ;;  %v1909_v57 = vld [vmem:[%s11069_s30 + $0x4] sm:$0x1]  ;;  %v1910_v63 = vld [vmem:[%s11069_s30 + $0x1c] sm:$0x1] }
  0xcc   : > { %12951 = vst [vmem:[#allocation5_spill] sm:$0xff] %v11453_v45  ;;  %v8220_v51 = vsel %vm346_vm3, %v8219_v22, %v8218_v46  ;;  %v1431_v56 = vrot.slane %v1388_v40, 5  ;;  %v1433_v60 = vrot.slane %v1389_v41, 4  ;;  %v1435_v61 = vrot.slane %v1390_v47, 3  ;;  %v1911_v4 = vld [vmem:[%s11069_s30 + $0x34] sm:$0x1] }
  0xcd   : > { %v8222_v58 = vsel %vm349_vm4, %v8221_v25, %v8220_v51  ;;  %v1437_v62 = vrot.slane %v1391_v49, 2  ;;  %v1428_v1 = vsel %vm337_vm0, %v1427_v53, %v1385_v33  ;;  %v1439_v2 = vrot.slane %v1392_v50, 1  ;;  %v1912_v5 = vld [vmem:[%s11069_s30 + $0x4c] sm:$0x1]  ;;  %v306_v8 = vld [vmem:[%s12933_s4] sm:$0x7] }
  0xce   : > { %v8224_v0 = vsel %vm352_vm5, %v8223_v30, %v8222_v58  ;;  %v1951_v6 = vrot.slane %v1910_v63, 7  ;;  %v1430_v9 = vsel %vm340_vm1, %v1429_v54, %v1428_v1  ;;  %v1913_v11 = vld [vmem:[%s11069_s30 + $0x64] sm:$0x1]  ;;  %v1914_v12 = vld [vmem:[%s11069_s30 + $0x7c] sm:$0x1]  ;;  %v1953_v21 = vrot.slane %v1911_v4, 6 }
  0xcf   : > { %6656 = vrot.lane.b32.xlu0 %v11416_v48, %s10955_s10  ;;  %v11470_v7 = vsel %vm355_vm6, %v8225_v32, %v8224_v0  ;;  %v1915_v15 = vld [vmem:[%s11069_s30 + $0x94] sm:$0x1]  ;;  %v1432_v16 = vsel %vm343_vm2, %v1431_v56, %v1430_v9  ;;  %v1916_v17 = vld [vmem:[%s11069_s30 + $0xac] sm:$0x1]  ;;  %v1955_v22 = vrot.slane %v1912_v5, 5  ;;  %v1957_v27 = vrot.slane %v1913_v11, 4 }
  0xd0   : > { %12952 = vst [vmem:[#allocation6_spill] sm:$0xff] %v11470_v7  ;;  %v1952_v18 = vsel %vm337_vm0, %v1951_v6, %v1909_v57  ;;  %v2433_v25 = vld [vmem:[%s11069_s30 + $0x5] sm:$0x1]  ;;  %v1434_v26 = vsel %vm346_vm3, %v1433_v60, %v1432_v16  ;;  %v1959_v30 = vrot.slane %v1914_v12, 3  ;;  %v1961_v32 = vrot.slane %v1915_v15, 2 }
  0xd1   : > { %v2434_v33 = vld [vmem:[%s11069_s30 + $0x1d] sm:$0x1]  ;;  %v1436_v34 = vsel %vm349_vm4, %v1435_v61, %v1434_v26  ;;  %v1954_v35 = vsel %vm340_vm1, %v1953_v21, %v1952_v18  ;;  %v1963_v37 = vrot.slane %v1916_v17, 1  ;;  %v2435_v38 = vld [vmem:[%s11069_s30 + $0x35] sm:$0x1] }
  0xd2   : > { %v2436_v40 = vld [vmem:[%s11069_s30 + $0x4d] sm:$0x1]  ;;  %v2475_v41 = vrot.slane %v2434_v33, 7  ;;  %v1438_v46 = vsel %vm352_vm5, %v1437_v62, %v1436_v34  ;;  %v1956_v47 = vsel %vm343_vm2, %v1955_v22, %v1954_v35  ;;  %v2437_v49 = vld [vmem:[%s11069_s30 + $0x65] sm:$0x1]  ;;  %v2477_v58 = vrot.slane %v2435_v38, 6 }
  0xd3   : > { %7180 = vrot.lane.b32.xlu0 %v11435_v10, %s10955_s10  ;;  %v2438_v50 = vld [vmem:[%s11069_s30 + $0x7d] sm:$0x1]  ;;  %v2439_v51 = vld [vmem:[%s11069_s30 + $0x95] sm:$0x1]  ;;  %v11497_v53 = vsel %vm355_vm6, %v1439_v2, %v1438_v46  ;;  %v1958_v54 = vsel %vm346_vm3, %v1957_v27, %v1956_v47  ;;  %v2440_v56 = vld [vmem:[%s11069_s30 + $0xad] sm:$0x1] }
  0xd4   : > { %v2476_v57 = vsel %vm337_vm0, %v2475_v41, %v2433_v25  ;;  %1442 = vrot.lane.b32.xlu1 %v11497_v53, %s10955_s10  ;;  %v1960_v60 = vsel %vm349_vm4, %v1959_v30, %v1958_v54  ;;  %v2479_v61 = vrot.slane %v2436_v40, 5  ;;  %v2481_v62 = vrot.slane %v2437_v49, 4  ;;  %v2957_v0 = vld [vmem:[%s11069_s30 + $0x6] sm:$0x1]  ;;  %v2958_v1 = vld [vmem:[%s11069_s30 + $0x1e] sm:$0x1] }
  0xd5   : > { %v2483_v63 = vrot.slane %v2438_v50, 3  ;;  %v1962_v2 = vsel %vm352_vm5, %v1961_v32, %v1960_v60  ;;  %v2478_v4 = vsel %vm340_vm1, %v2477_v58, %v2476_v57  ;;  %v2485_v5 = vrot.slane %v2439_v51, 2  ;;  %v2960_v9 = vld [vmem:[%s11069_s30 + $0x4e] sm:$0x1]  ;;  %v2961_v15 = vld [vmem:[%s11069_s30 + $0x66] sm:$0x1] }
  0xd6   : > { %v2487_v6 = vrot.slane %v2440_v56, 1  ;;  %v11512_v11 = vsel %vm355_vm6, %v1963_v37, %v1962_v2  ;;  %v2480_v12 = vsel %vm343_vm2, %v2479_v61, %v2478_v4  ;;  %v2962_v16 = vld [vmem:[%s11069_s30 + $0x7e] sm:$0x1]  ;;  %v2963_v17 = vld [vmem:[%s11069_s30 + $0x96] sm:$0x1]  ;;  %v2999_v22 = vrot.slane %v2958_v1, 7 }
  0xd7   : > { %7704 = vrot.lane.b32.xlu0 %v11453_v45, %s10955_s10  ;;  %v2482_v18 = vsel %vm346_vm3, %v2481_v62, %v2480_v12  ;;  %v2964_v21 = vld [vmem:[%s11069_s30 + $0xae] sm:$0x1]  ;;  %v3003_v26 = vrot.slane %v2960_v9, 5  ;;  %v3005_v30 = vrot.slane %v2961_v15, 4  ;;  %v3007_v32 = vrot.slane %v2962_v16, 3 }
  0xd8   : > { %1966 = vrot.lane.b32.xlu1 %v11512_v11, %s10955_s10  ;;  %v2484_v27 = vsel %vm349_vm4, %v2483_v63, %v2482_v18  ;;  %v3481_v33 = vld [vmem:[%s11069_s30 + $0x7] sm:$0x1]  ;;  %v3000_v35 = vsel %vm337_vm0, %v2999_v22, %v2957_v0  ;;  %v3009_v37 = vrot.slane %v2963_v17, 2  ;;  %v3011_v38 = vrot.slane %v2964_v21, 1  ;;  %v3482_v40 = vld [vmem:[%s11069_s30 + $0x1f] sm:$0x1] }
  0xd9   : > { %v2486_v34 = vsel %vm352_vm5, %v2485_v5, %v2484_v27  ;;  %v3483_v41 = vld [vmem:[%s11069_s30 + $0x37] sm:$0x1]  ;;  %v3484_v49 = vld [vmem:[%s11069_s30 + $0x4f] sm:$0x1]  ;;  %v3485_v50 = vld [vmem:[%s11069_s30 + $0x67] sm:$0x1] }
  0xda   : > { %v11529_v46 = vsel %vm355_vm6, %v2487_v6, %v2486_v34  ;;  %v3486_v51 = vld [vmem:[%s11069_s30 + $0x7f] sm:$0x1]  ;;  %v3487_v56 = vld [vmem:[%s11069_s30 + $0x97] sm:$0x1]  ;;  %v3488_v57 = vld [vmem:[%s11069_s30 + $0xaf] sm:$0x1] }
  0xdb   : > { %8228 = vrot.lane.b32.xlu0 %v11470_v7, %s10955_s10  ;;  %v3523_v58 = vrot.slane %v3482_v40, 7  ;;  %v3525_v60 = vrot.slane %v3483_v41, 6  ;;  %v3527_v62 = vrot.slane %v3484_v49, 5  ;;  %v3529_v63 = vrot.slane %v3485_v50, 4  ;;  %v4005_v1 = vld [vmem:[%s11069_s30 + $0x8] sm:$0x1] }
  0xdc   : > { %2490 = vrot.lane.b32.xlu1 %v11529_v46, %s10955_s10  ;;  %v3531_v0 = vrot.slane %v3486_v51, 3  ;;  %v3533_v5 = vrot.slane %v3487_v56, 2  ;;  %v3535_v6 = vrot.slane %v3488_v57, 1  ;;  %v4007_v9 = vld [vmem:[%s11069_s30 + $0x38] sm:$0x1] }
  0xdd   : > { %v3524_v4 = vsel %vm337_vm0, %v3523_v58, %v3481_v33  ;;  %v4008_v16 = vld [vmem:[%s11069_s30 + $0x50] sm:$0x1]  ;;  %v4009_v17 = vld [vmem:[%s11069_s30 + $0x68] sm:$0x1]  ;;  %v4010_v18 = vld [vmem:[%s11069_s30 + $0x80] sm:$0x1] }
  0xde   : > { %v3526_v15 = vsel %vm340_vm1, %v3525_v60, %v3524_v4  ;;  %v4051_v33 = vrot.slane %v4008_v16, 5  ;;  %v4053_v34 = vrot.slane %v4009_v17, 4  ;;  %v4530_v49 = vld [vmem:[%s11069_s30 + $0x21] sm:$0x1]  ;;  %v4531_v50 = vld [vmem:[%s11069_s30 + $0x39] sm:$0x1] }
  0xdf   : > { %309 = vperm.xlu0 %10892, %v306_v8   ;;  %v2959_v8 = vld [vmem:[%s11069_s30 + $0x36] sm:$0x1]  ;;  %v3528_v22 = vsel %vm343_vm2, %v3527_v62, %v3526_v15  ;;  %v4532_v56 = vld [vmem:[%s11069_s30 + $0x51] sm:$0x1]  ;;  %v4533_v57 = vld [vmem:[%s11069_s30 + $0x69] sm:$0x1] }
  0xe0   : > { %v3001_v25 = vrot.slane %v2959_v8, 6  ;;  %v4006_v8 = vld [vmem:[%s11069_s30 + $0x20] sm:$0x1]  ;;  %v4534_v58 = vld [vmem:[%s11069_s30 + $0x81] sm:$0x1]  ;;  %v4575_v4 = vrot.slane %v4532_v56, 5 }
  0xe1   : > { %v4047_v27 = vrot.slane %v4006_v8, 7  ;;  %v4535_v62 = vld [vmem:[%s11069_s30 + $0x99] sm:$0x1]  ;;  %v5053_v8 = vld [vmem:[%s11069_s30 + $0xa] sm:$0x1] }
  0xe2   : > { %v3002_v47 = vsel %vm340_vm1, %v3001_v25, %v3000_v35  ;;  %v4011_v25 = vld [vmem:[%s11069_s30 + $0x98] sm:$0x1]  ;;  %v4055_v35 = vrot.slane %v4010_v18, 3  ;;  %v4581_v15 = vrot.slane %v4535_v62, 2  ;;  %v5054_v17 = vld [vmem:[%s11069_s30 + $0x22] sm:$0x1] }
  0xe3   : > { %v3004_v54 = vsel %vm343_vm2, %v3003_v26, %v3002_v47  ;;  %v4012_v26 = vld [vmem:[%s11069_s30 + $0xb0] sm:$0x1]  ;;  %v4048_v40 = vsel %vm337_vm0, %v4047_v27, %v4005_v1  ;;  %v4057_v41 = vrot.slane %v4011_v25, 2  ;;  %v4573_v1 = vrot.slane %v4531_v50, 6  ;;  %v5055_v18 = vld [vmem:[%s11069_s30 + $0x3a] sm:$0x1] }
  0xe4   : > { %v3006_v61 = vsel %vm346_vm3, %v3005_v30, %v3004_v54  ;;  %v4049_v30 = vrot.slane %v4007_v9, 6  ;;  %v4059_v47 = vrot.slane %v4012_v26, 1  ;;  %v5056_v26 = vld [vmem:[%s11069_s30 + $0x52] sm:$0x1]  ;;  %v5057_v27 = vld [vmem:[%s11069_s30 + $0x6a] sm:$0x1] }
  0xe5   : > { %v3008_v2 = vsel %vm349_vm4, %v3007_v32, %v3006_v61  ;;  %v3530_v32 = vsel %vm346_vm3, %v3529_v63, %v3528_v22  ;;  %v4536_v63 = vld [vmem:[%s11069_s30 + $0xb1] sm:$0x1]  ;;  %v5577_v50 = vld [vmem:[%s11069_s30 + $0xb] sm:$0x1] }
  0xe6   : > { %v3010_v12 = vsel %vm352_vm5, %v3009_v37, %v3008_v2  ;;  %v4529_v37 = vld [vmem:[%s11069_s30 + $0x9] sm:$0x1]  ;;  %v4050_v54 = vsel %vm340_vm1, %v4049_v30, %v4048_v40  ;;  %v4583_v16 = vrot.slane %v4536_v63, 1  ;;  %v5058_v30 = vld [vmem:[%s11069_s30 + $0x82] sm:$0x1] }
  0xe7   : > { %v11552_v21 = vsel %vm355_vm6, %v3011_v38, %v3010_v12  ;;  %v3532_v38 = vsel %vm349_vm4, %v3531_v0, %v3530_v32  ;;  %v4052_v61 = vsel %vm343_vm2, %v4051_v33, %v4050_v54  ;;  %v4571_v0 = vrot.slane %v4530_v49, 7 }
  0xe8   : > { %3014 = vrot.lane.b32.xlu1 %v11552_v21, %s10955_s10  ;;  %v3534_v51 = vsel %vm352_vm5, %v3533_v5, %v3532_v38  ;;  %v4054_v2 = vsel %vm346_vm3, %v4053_v34, %v4052_v61  ;;  %v4577_v5 = vrot.slane %v4533_v57, 4  ;;  %v5059_v34 = vld [vmem:[%s11069_s30 + $0x9a] sm:$0x1]  ;;  %v5097_v38 = vrot.slane %v5055_v18, 6  ;;  %v5579_v61 = vld [vmem:[%s11069_s30 + $0x3b] sm:$0x1] }
  0xe9   : > { %v11571_v60 = vsel %vm355_vm6, %v3535_v6, %v3534_v51  ;;  %v4579_v6 = vrot.slane %v4534_v58, 3  ;;  %v4056_v9 = vsel %vm349_vm4, %v4055_v35, %v4054_v2  ;;  %v4572_v12 = vsel %vm337_vm0, %v4571_v0, %v4529_v37  ;;  %v5060_v35 = vld [vmem:[%s11069_s30 + $0xb2] sm:$0x1]  ;;  %v5578_v58 = vld [vmem:[%s11069_s30 + $0x23] sm:$0x1] }
  0xea   : > { %v4058_v22 = vsel %vm352_vm5, %v4057_v41, %v4056_v9  ;;  %v4574_v25 = vsel %vm340_vm1, %v4573_v1, %v4572_v12  ;;  %v5095_v37 = vrot.slane %v5054_v17, 7  ;;  %v5099_v41 = vrot.slane %v5056_v26, 5  ;;  %v5580_v0 = vld [vmem:[%s11069_s30 + $0x53] sm:$0x1]  ;;  %v5581_v1 = vld [vmem:[%s11069_s30 + $0x6b] sm:$0x1] }
  0xeb   : > { %v11590_v32 = vsel %vm355_vm6, %v4059_v47, %v4058_v22  ;;  %v4576_v33 = vsel %vm343_vm2, %v4575_v4, %v4574_v25  ;;  %v5101_v49 = vrot.slane %v5057_v27, 4  ;;  %v5103_v47 = vrot.slane %v5058_v30, 3  ;;  %v5582_v2 = vld [vmem:[%s11069_s30 + $0x83] sm:$0x1]  ;;  %v6101_v22 = vld [vmem:[%s11069_s30 + $0xc] sm:$0x1] }
  0xec   : > { %3538 = vrot.lane.b32.xlu1 %v11571_v60, %s10955_s10  ;;  %v4578_v40 = vsel %vm346_vm3, %v4577_v5, %v4576_v33  ;;  %v5096_v54 = vsel %vm337_vm0, %v5095_v37, %v5053_v8  ;;  %v5105_v56 = vrot.slane %v5059_v34, 2  ;;  %v5107_v57 = vrot.slane %v5060_v35, 1  ;;  %v5584_v8 = vld [vmem:[%s11069_s30 + $0xb3] sm:$0x1]  ;;  %v6102_v33 = vld [vmem:[%s11069_s30 + $0x24] sm:$0x1] }
  0xed   : > { %v4580_v51 = vsel %vm349_vm4, %v4579_v6, %v4578_v40  ;;  %v5098_v63 = vsel %vm340_vm1, %v5097_v38, %v5096_v54  ;;  %v5583_v6 = vld [vmem:[%s11069_s30 + $0x9b] sm:$0x1]  ;;  %v5619_v9 = vrot.slane %v5578_v58, 7  ;;  %v5621_v12 = vrot.slane %v5579_v61, 6  ;;  %v6103_v34 = vld [vmem:[%s11069_s30 + $0x3c] sm:$0x1] }
  0xee   : > { %v4582_v62 = vsel %vm352_vm5, %v4581_v15, %v4580_v51  ;;  %v5100_v5 = vsel %vm343_vm2, %v5099_v41, %v5098_v63  ;;  %v5623_v17 = vrot.slane %v5580_v0, 5  ;;  %v5625_v18 = vrot.slane %v5581_v1, 4  ;;  %v6104_v38 = vld [vmem:[%s11069_s30 + $0x54] sm:$0x1]  ;;  %v6105_v40 = vld [vmem:[%s11069_s30 + $0x6c] sm:$0x1] }
  0xef   : > { %v11609_v4 = vsel %vm355_vm6, %v4583_v16, %v4582_v62  ;;  %v5102_v15 = vsel %vm346_vm3, %v5101_v49, %v5100_v5  ;;  %v5627_v16 = vrot.slane %v5582_v2, 3  ;;  %v5620_v26 = vsel %vm337_vm0, %v5619_v9, %v5577_v50  ;;  %v6106_v41 = vld [vmem:[%s11069_s30 + $0x84] sm:$0x1]  ;;  %v6108_v61 = vld [vmem:[%s11069_s30 + $0xb4] sm:$0x1] }
  0xf0   : > { %4062 = vrot.lane.b32.xlu1 %v11590_v32, %s10955_s10  ;;  %v5104_v25 = vsel %vm349_vm4, %v5103_v47, %v5102_v15  ;;  %v5629_v27 = vrot.slane %v5583_v6, 2  ;;  %v5631_v30 = vrot.slane %v5584_v8, 1  ;;  %v5622_v37 = vsel %vm340_vm1, %v5621_v12, %v5620_v26  ;;  %v6107_v47 = vld [vmem:[%s11069_s30 + $0x9c] sm:$0x1]  ;;  %v893_v26 = vpop.permute.xlu1 %892 }
  0xf1   : > { %v5106_v35 = vsel %vm352_vm5, %v5105_v56, %v5104_v25  ;;  %v5624_v51 = vsel %vm343_vm2, %v5623_v17, %v5622_v37  ;;  %v6143_v54 = vrot.slane %v6102_v33, 7  ;;  %v6145_v50 = vrot.slane %v6103_v34, 6 }
  0xf2   : > { %v11628_v49 = vsel %vm355_vm6, %v5107_v57, %v5106_v35  ;;  %v5626_v58 = vsel %vm346_vm3, %v5625_v18, %v5624_v51  ;;  %v6147_v56 = vrot.slane %v6104_v38, 5  ;;  %v6149_v62 = vrot.slane %v6105_v40, 4  ;;  %v6626_v40 = vld [vmem:[%s11069_s30 + $0x25] sm:$0x1] }
  0xf3   : > { %v5628_v63 = vsel %vm349_vm4, %v5627_v16, %v5626_v58  ;;  %v6144_v0 = vsel %vm337_vm0, %v6143_v54, %v6101_v22  ;;  %v6151_v1 = vrot.slane %v6106_v41, 3  ;;  %v6153_v5 = vrot.slane %v6107_v47, 2  ;;  %v6627_v41 = vld [vmem:[%s11069_s30 + $0x3d] sm:$0x1]  ;;  %v6625_v47 = vld [vmem:[%s11069_s30 + $0xd] sm:$0x1] }
  0xf4   : > { %4586 = vrot.lane.b32.xlu1 %v11609_v4, %s10955_s10  ;;  %v5630_v57 = vsel %vm352_vm5, %v5629_v27, %v5628_v63  ;;  %v6146_v2 = vsel %vm340_vm1, %v6145_v50, %v6144_v0  ;;  %v6155_v9 = vrot.slane %v6108_v61, 1  ;;  %v10345_v34 = vpack.c.bf16 %v893_v26, %v11138_v20  ;;  %v919_v35 = vpop.permute.xlu1 %918  ;;  %v11679_v20 = vld [vmem:[%s12930_s1] sm:$0xff]  ;;  %v6628_v54 = vld [vmem:[%s11069_s30 + $0x55] sm:$0x1]  ;;  %v6629_v58 = vld [vmem:[%s11069_s30 + $0x6d] sm:$0x1] }
  0xf5   : > { %v11641_v6 = vsel %vm355_vm6, %v5631_v30, %v5630_v57  ;;  %v6148_v8 = vsel %vm343_vm2, %v6147_v56, %v6146_v2  ;;  %v10349_v38 = vpack.c.bf16 %v919_v35, %v11152_v28  ;;  %v11689_v28 = vld [vmem:[%s12930_s1 + $0x8] sm:$0xf]  ;;  %v6667_v51 = vrot.slane %v6626_v40, 7  ;;  %v6631_v57 = vld [vmem:[%s11069_s30 + $0x9d] sm:$0x1] }
  0xf6   : > { %v6150_v12 = vsel %vm346_vm3, %v6149_v62, %v6148_v8  ;;  %v6669_v50 = vrot.slane %v6627_v41, 6  ;;  %v6671_v56 = vrot.slane %v6628_v54, 5  ;;  %v6630_v62 = vld [vmem:[%s11069_s30 + $0x85] sm:$0x1]  ;;  %v6673_v0 = vrot.slane %v6629_v58, 4 }
  0xf7   : > { %v6152_v15 = vsel %vm349_vm4, %v6151_v1, %v6150_v12  ;;  %v6668_v61 = vsel %vm337_vm0, %v6667_v51, %v6625_v47  ;;  %v7150_v1 = vld [vmem:[%s11069_s30 + $0x26] sm:$0x1]  ;;  %v7151_v8 = vld [vmem:[%s11069_s30 + $0x3e] sm:$0x1]  ;;  %v6632_v12 = vld [vmem:[%s11069_s30 + $0xb5] sm:$0x1] }
  0xf8   : > { %5110 = vrot.lane.b32.xlu1 %v11628_v49, %s10955_s10  ;;  %v6154_v17 = vsel %vm352_vm5, %v6153_v5, %v6152_v15  ;;  %v6670_v63 = vsel %vm340_vm1, %v6669_v50, %v6668_v61  ;;  %v6675_v5 = vrot.slane %v6630_v62, 3  ;;  %v6679_v26 = vrot.slane %v6632_v12, 1  ;;  %v7154_v35 = vld [vmem:[%s11069_s30 + $0x86] sm:$0x1]  ;;  %v7674_v41 = vld [vmem:[%s11069_s30 + $0x27] sm:$0x1] }
  0xf9   : > { %v11650_v18 = vsel %vm355_vm6, %v6155_v9, %v6154_v17  ;;  %v6672_v2 = vsel %vm343_vm2, %v6671_v56, %v6670_v63  ;;  %v7191_v9 = vrot.slane %v7150_v1, 7  ;;  %v6677_v17 = vrot.slane %v6631_v57, 2  ;;  %v7155_v47 = vld [vmem:[%s11069_s30 + $0x9e] sm:$0x1]  ;;  %v7156_v50 = vld [vmem:[%s11069_s30 + $0xb6] sm:$0x1] }
  0xfa   : > { %v6674_v15 = vsel %vm346_vm3, %v6673_v0, %v6672_v2  ;;  %v7199_v54 = vrot.slane %v7154_v35, 3  ;;  %v7201_v61 = vrot.slane %v7155_v47, 2  ;;  %v7673_v56 = vld [vmem:[%s11069_s30 + $0xf] sm:$0x1]  ;;  %v7715_v62 = vrot.slane %v7674_v41, 7 }
  0xfb   : > { %v7203_v0 = vrot.slane %v7156_v50, 1  ;;  %v7675_v1 = vld [vmem:[%s11069_s30 + $0x3f] sm:$0x1]  ;;  %v7676_v57 = vld [vmem:[%s11069_s30 + $0x57] sm:$0x1] }
  0xfc   : > { %5634 = vrot.lane.b32.xlu1 %v11641_v6, %s10955_s10  ;;  %v7717_v12 = vrot.slane %v7675_v1, 6  ;;  %v8200_v47 = vld [vmem:[%s11069_s30 + $0x58] sm:$0x1]  ;;  %v8202_v50 = vld [vmem:[%s11069_s30 + $0x88] sm:$0x1] }
  0xfd   : > { %v8204_v1 = vld [vmem:[%s11069_s30 + $0xb8] sm:$0x1] }
 0x100   : > { %6158 = vrot.lane.b32.xlu1 %v11650_v18, %s10955_s10 }
 0x17a   : > { %v9443_v16 = vpop.f32.mrb[0].mxu0 }
 0x17b   : > { %v692_v22 = vrot.slane %v9443_v16, 6  ;;  %v460_v25 = vpop.f32.mrb[1].mxu0  ;;  %v617_v37 = vrot.slane %v9443_v16, 1  ;;  %v7149_v16 = vld [vmem:[%s11069_s30 + $0xe] sm:$0x1] }
 0x17c   : > { %v470_v27 = vrot.slane %v460_v25, 3  ;;  %v691_v30 = vrot.slane %v460_v25, 6  ;;  %9464 = vmatmul.mubr.msk.f32.vlgmr.msra.gmra.mrb[2].mxu0 %vm387_vm7, %v460_v25  ;;  %v6676_v25 = vsel %vm349_vm4, %v6675_v5, %v6674_v15  ;;  %v7677_v5 = vld [vmem:[%s11069_s30 + $0x6f] sm:$0x1] }
 0x17d   : > { %10341 = vmatpush3.bf16.msra.mxu0 %v11165_v36  ;;  %9485 = vmatprep.mubr.msk.f32.mxu0 %vm10957_vm8, %v12936_v43 }
 0x17e   : > { %9453 = vmatmul.mubr.msk.f32.vlgmr.msra.gmra.mrb[0].mxu1 %vm387_vm7, %v470_v27  ;;  %10342 = vmatprep.subr.bf16.mxu0 %v12938_v23  ;;  %v693_v33 = vsel %vm690_vm9, %v691_v30, %v692_v22  ;;  %v7193_v22 = vrot.slane %v7151_v8, 6  ;;  %v7152_v27 = vld [vmem:[%s11069_s30 + $0x56] sm:$0x1]  ;;  %v7153_v30 = vld [vmem:[%s11069_s30 + $0x6e] sm:$0x1] }
 0x17f   : > { %10335 = vmatpush3.bf16.msra.mxu1 %v11142_v24  ;;  %9474 = vmatprep.mubr.msk.f32.mxu1 %vm10957_vm8, %v12936_v43  ;;  %v7197_v40 = vrot.slane %v7153_v30, 4  ;;  %v7678_v8 = vld [vmem:[%s11069_s30 + $0x87] sm:$0x1] }
 0x180   : > { %10336 = vmatprep.subr.bf16.mxu1 %v12938_v23 }
 0x181   : > { %10344 = vmatpush3.bf16.msra.mxu0 %v11176_v39 }
 0x182   : > { %10353 = vmatprep.subr.bf16.mxu0 %v12938_v23 }
 0x183   : > { %10338 = vmatpush3.bf16.msra.mxu1 %v11187_v42 }
 0x184   : > { %9486 = vmatmul.mubr.msk.f32.vlgmr.msra.gmra.mrb[4].mxu0 %vm387_vm7, %v693_v33  ;;  %10346 = vmatprep.subr.bf16.mxu1 %v10345_v34  ;;  %v7192_v33 = vsel %vm337_vm0, %v7191_v9, %v7149_v16  ;;  %v7716_v9 = vsel %vm337_vm0, %v7715_v62, %v7673_v56  ;;  %v7719_v16 = vrot.slane %v7676_v57, 5 }
 0x185   : > { %10355 = vmatpush3.bf16.msra.mxu0 %v11142_v24  ;;  %9507 = vmatprep.mubr.msk.f32.mxu0 %vm10957_vm8, %v12936_v43  ;;  %v7718_v30 = vsel %vm340_vm1, %v7717_v12, %v7716_v9 }
 0x186   : > { %9475 = vmatmul.mubr.msk.f32.vlgmr.msra.gmra.mrb[2].mxu1 %vm387_vm7, %v617_v37  ;;  %10356 = vmatprep.subr.bf16.mxu0 %v12938_v23  ;;  %v7194_v37 = vsel %vm340_vm1, %v7193_v22, %v7192_v33  ;;  %v7721_v22 = vrot.slane %v7677_v5, 4  ;;  %v7720_v35 = vsel %vm343_vm2, %v7719_v16, %v7718_v30  ;;  %v11775_v30 = vpop.permute.xlu0 %1416 }
 0x187   : > { %10348 = vmatpush3.bf16.msra.mxu1 %v10345_v34  ;;  %9496 = vmatprep.mubr.msk.f32.mxu1 %vm387_vm7, %v11679_v20  ;;  %v6678_v34 = vsel %vm352_vm5, %v6677_v17, %v6676_v25  ;;  %v7679_v17 = vld [vmem:[%s11069_s30 + $0x9f] sm:$0x1]  ;;  %v7723_v25 = vrot.slane %v7678_v8, 3  ;;  %v8247_v8 = vrot.slane %v8202_v50, 3 }
 0x188   : > { %10350 = vmatprep.subr.bf16.mxu1 %v10349_v38  ;;  %v11723_v51 = vsel %vm355_vm6, %v6679_v26, %v6678_v34  ;;  %v7725_v33 = vrot.slane %v7679_v17, 2  ;;  %v8197_v34 = vld [vmem:[%s11069_s30 + $0x10] sm:$0x1]  ;;  %v7722_v41 = vsel %vm346_vm3, %v7721_v22, %v7720_v35  ;;  %v8251_v17 = vrot.slane %v8204_v1, 1 }
 0x189   : > { %10358 = vmatpush3.bf16.msra.mxu0 %v11187_v42  ;;  %12953 = vst [vmem:[#allocation7_spill] sm:$0xff] %v11723_v51  ;;  %6682 = vrot.lane.b32.xlu1 %v11723_v51, %s10955_s10 }
 0x18a   : > { %10365 = vmatprep.subr.bf16.mxu0 %v12938_v23 }
 0x18b   : > { %10352 = vmatpush3.bf16.msra.mxu1 %v10349_v38  ;;  %v7195_v38 = vrot.slane %v7152_v27, 5  ;;  %v7680_v27 = vld [vmem:[%s11069_s30 + $0xb7] sm:$0x1] }
 0x18c   : > { %10359 = vmatprep.subr.bf16.mxu1 %v12938_v23 }
 0x18d   : > { %v7196_v58 = vsel %vm343_vm2, %v7195_v38, %v7194_v37  ;;  %v7727_v37 = vrot.slane %v7680_v27, 1  ;;  %v8198_v38 = vld [vmem:[%s11069_s30 + $0x28] sm:$0x1] }
 0x18e   : > { %9497 = vmatmul.mubr.msk.f32.vlgmr.msra.gmra.mrb[4].mxu1 %vm387_vm7, %v11689_v28  ;;  %v7198_v63 = vsel %vm346_vm3, %v7197_v40, %v7196_v58  ;;  %v8199_v40 = vld [vmem:[%s11069_s30 + $0x40] sm:$0x1]  ;;  %v7724_v58 = vsel %vm349_vm4, %v7723_v25, %v7722_v41  ;;  %v8239_v56 = vrot.slane %v8198_v38, 7 }
 0x18f   : > { %10361 = vmatpush3.bf16.msra.mxu1 %v11165_v36  ;;  %9518 = vmatprep.mubr.msk.f32.mxu1 %vm10957_vm8, %v12936_v43  ;;  %v7200_v2 = vsel %vm349_vm4, %v7199_v54, %v7198_v63  ;;  %v8201_v54 = vld [vmem:[%s11069_s30 + $0x70] sm:$0x1]  ;;  %v8241_v62 = vrot.slane %v8199_v40, 6  ;;  %v8243_v63 = vrot.slane %v8200_v47, 5 }
 0x190   : > { %10362 = vmatprep.subr.bf16.mxu1 %v12938_v23  ;;  %v7202_v15 = vsel %vm352_vm5, %v7201_v61, %v7200_v2  ;;  %v8203_v61 = vld [vmem:[%s11069_s30 + $0xa0] sm:$0x1]  ;;  %v8245_v57 = vrot.slane %v8201_v54, 4  ;;  %v8240_v5 = vsel %vm337_vm0, %v8239_v56, %v8197_v34  ;;  %v10960_v56 = vmov 1966171168   ;;  %s265_s30 = sand.u32 1, %s10929_s21  }
 0x191   : > { %v11741_v26 = vsel %vm355_vm6, %v7203_v0, %v7202_v15  ;;  %v7726_v0 = vsel %vm352_vm5, %v7725_v33, %v7724_v58  ;;  %v8242_v9 = vsel %vm340_vm1, %v8241_v62, %v8240_v5  ;;  %v8249_v12 = vrot.slane %v8203_v61, 2  ;;  %v11777_v33 = vpop.permute.xlu0 %1940 }
 0x192   : > { %12954 = vst [vmem:[#allocation8_spill] sm:$0xff] %v11741_v26  ;;  %7206 = vrot.lane.b32.xlu1 %v11741_v26, %s10955_s10  ;;  %v11760_v2 = vsel %vm355_vm6, %v7727_v37, %v7726_v0  ;;  %v8244_v15 = vsel %vm343_vm2, %v8243_v63, %v8242_v9  ;;  %v769_v62 = vunpack.c.l.s4 %v10960_v56  ;;  %v771_v63 = vlaneseq }
 0x193   : > { %10364 = vmatpush3.bf16.msra.mxu1 %v11176_v39  ;;  %12955 = vst [vmem:[#allocation9_spill] sm:$0xff] %v11760_v2  ;;  %v8246_v16 = vsel %vm346_vm3, %v8245_v57, %v8244_v15 }
 0x194   : > { %10371 = vmatprep.subr.bf16.mxu1 %v12938_v23  ;;  %v8248_v22 = vsel %vm349_vm4, %v8247_v8, %v8246_v16  ;;  %v770_v1 = vunpack.c.0.s8 %v769_v62  ;;  %v772_v57 = vshrl.u32 %v771_v63, 7 }
 0x195   : > { %v8250_v25 = vsel %vm352_vm5, %v8249_v12, %v8248_v22  ;;  %v11779_v34 = vpop.permute.xlu0 %2464 }
 0x196   : > { %7730 = vrot.lane.b32.xlu1 %v11760_v2, %s10955_s10  ;;  %v11771_v27 = vsel %vm355_vm6, %v8251_v17, %v8250_v25  ;;  %v11806_v16 = vsub.s32 %v770_v1, %v772_v57 }
 0x197   : > { %12956 = vst [vmem:[#allocation10_spill] sm:$0xff] %v11771_v27 }
 0x199   : > { %v11781_v35 = vpop.permute.xlu0 %2988 }
 0x19a   : > { %8254 = vrot.lane.b32.xlu1 %v11771_v27, %s10955_s10  ;;  %s10825_s10 = smul.u32 48, %s265_s30  ;;  %s8915_s30 = sshll.u32 %s11059_s13, 1 }
 0x19b   : > { %s9013_s13 = sshll.u32 (%p11043_p5), %s10937_s23, 1 }
 0x19c   : > { %s11811_s21 = scalar_lea.vmem [#allocation2], %s10825_s10  ;;  %s293_s10 = sadd.s32 %s8915_s30, %s11062_s14 }
 0x19d   : > { %v11783_v37 = vpop.permute.xlu0 %3512  ;;  %s8916_s7 = sshll.u32 %s293_s10, 2  ;;  %s10828_s14 = smul.u32 (%p11043_p5), 12, %s10941_s24 }
 0x19e   : > { %s295_s15 = scalar_lea.vmem %s12935_s6, %s8916_s7 }
 0x1a1   : > { %v11785_v38 = vpop.permute.xlu0 %4036 }
 0x1a5   : > { %v11787_v40 = vpop.permute.xlu0 %4560 }
 0x1a9   : > { %v11789_v41 = vpop.permute.xlu0 %5084 }
 0x1ad   : > { %v11791_v47 = vpop.permute.xlu0 %5608 }
 0x1b1   : > { %v11793_v54 = vpop.permute.xlu0 %6132 }
 0x1b5   : > { %v11795_v50 = vpop.permute.xlu0 %6656 }
 0x1b6   : > { %12957 = vst [vmem:[#allocation11_spill] sm:$0xff] %v11795_v50 }
 0x1b9   : > { %v11797_v58 = vpop.permute.xlu0 %7180 }
 0x1ba   : > { %12958 = vst [vmem:[#allocation12_spill] sm:$0xff] %v11797_v58 }
 0x1bd   : > { %v11799_v61 = vpop.permute.xlu0 %7704 }
 0x1be   : > { %12959 = vst [vmem:[#allocation13_spill] sm:$0xff] %v11799_v61 }
 0x1c1   : > { %v11801_v0 = vpop.permute.xlu0 %8228 }
 0x1c2   : > { %12960 = vst [vmem:[#allocation14_spill] sm:$0xff] %v11801_v0 }
 0x1c5   : > { %v11804_v12 = vpop.permute.xlu0 %309 }
 0x24f   : > { %v611_v5 = vpop.f32.mrb[2].mxu0 }
 0x250   : > { %v9465_v8 = vpop.f32.mrb[3].mxu0 }
 0x251   : > { %v539_v9 = vpop.f32.mrb[0].mxu1 }
 0x252   : > { %v612_v15 = vadd.f32 %v611_v5, %v539_v9  ;;  %v9454_v17 = vpop.f32.mrb[1].mxu1 }
 0x254   : > { %v615_v22 = vadd.f32 %v612_v15, %v11804_v12 }
 0x256   : > { %v774_v25 = vrot.slane %v615_v22, %v11806_v16  ;;  %v849_v17 = vmul.f32 %v615_v22, %v615_v22 }
 0x257   : > { %v762_v56 = vpop.f32.mrb[4].mxu0 }
 0x258   : > { %v9487_v43 = vpop.f32.mrb[5].mxu0  ;;  %v782_v62 = vrot.slane %v774_v25, %v11806_v16  ;;  %v775_v63 = vcombine.high %v774_v25, %v774_v25 }
 0x259   : > { %v686_v8 = vpop.f32.mrb[2].mxu1  ;;  %v11821_v43 = vsub.s32 0, %v772_v57 }
 0x25a   : > { %v763_v23 = vadd.f32 %v762_v56, %v686_v8  ;;  %v9476_v27 = vpop.f32.mrb[3].mxu1  ;;  %795 = vst.msk [vmem:[%s11811_s21] sm:$0x1] %vm794_vm10, %v782_v62  ;;  %v790_v1 = vcombine.high %v782_v62, %v782_v62  ;;  %v789_v5 = vrot.slane %v775_v63, %v11806_v16 }
 0x25c   : > { %v766_v9 = vadd.f32 %v763_v23, %v11804_v12  ;;  %797 = vst.msk [vmem:[%s11811_s21 + $0x20] sm:$0x1] %vm794_vm10, %v790_v1  ;;  %796 = vst.msk [vmem:[%s11811_s21 + $0x10] sm:$0x1] %vm794_vm10, %v789_v5 }
 0x25e   : > { %v805_v27 = vrot.slane %v766_v9, %v11806_v16  ;;  %v11824_v15 = vadd.f32 %v766_v9, %v615_v22  ;;  %v851_v25 = vmul.f32 %v766_v9, %v766_v9  ;;  %v12961_v9 = vmov 0.0|0.0  }
 0x260   : > { %v11826_v56 = vadd.f32 %v851_v25, %v849_v17  ;;  %v813_v62 = vrot.slane %v805_v27, %v11806_v16  ;;  %v806_v8 = vcombine.high %v805_v27, %v805_v27  ;;  %v10377_v25 = vpack.c.bf16 %v11775_v30, %v11226_v29 }
 0x261   : > { %v9498_v63 = vpop.f32.mrb[4].mxu1 }
 0x262   : > { %v1218_v0 = vrot.slane %v9498_v63, 6  ;;  %v987_v23 = vpop.f32.mrb[5].mxu1  ;;  %v825_v1 = vrot.slane %v813_v62, %v11821_v43  ;;  %v821_v7 = vcombine.high %v813_v62, %v813_v62  ;;  %v820_v2 = vrot.slane %v806_v8, %v11806_v16 }
 0x263   : > { %v997_v5 = vrot.slane %v987_v23, 3  ;;  %v1217_v57 = vrot.slane %v987_v23, 6  ;;  %9519 = vmatmul.mubr.msk.f32.vlgmr.msra.gmra.mrb[6].mxu1 %vm387_vm7, %v987_v23  ;;  %v12962_v62 = vmov 0.0  }
 0x264   : > { %10373 = vmatpush3.bf16.msra.mxu1 %v11165_v36  ;;  %834 = vrot.lane.b32.xlu1 %v825_v1, %s10961_s20  ;;  %v833_v22 = vrot.slane %v821_v7, %v11821_v43  ;;  %v829_v17 = vrot.slane %v820_v2, %v11821_v43  ;;  %v1443_v7 = vpop.permute.xlu1 %1442  ;;  %v1144_v2 = vrot.slane %v9498_v63, 1 }
 0x265   : > { %9508 = vmatmul.mubr.msk.f32.vlgmr.msra.gmra.mrb[6].mxu0 %vm387_vm7, %v997_v5  ;;  %10374 = vmatprep.subr.bf16.mxu1 %v12961_v9  ;;  %v1219_v27 = vsel %vm690_vm9, %v1217_v57, %v1218_v0  ;;  %v10381_v29 = vpack.c.bf16 %v1443_v7, %v11497_v53 }
 0x266   : > { %10367 = vmatpush3.bf16.msra.mxu0 %v11142_v24  ;;  %838 = vrot.lane.b32.xlu0 %v833_v22, %s10961_s20 }
 0x267   : > { %10368 = vmatprep.subr.bf16.mxu0 %v12961_v9  ;;  %9540 = vmatprep.mubr.msk.f32.mxu1 %vm10957_vm8, %v12962_v62 }
 0x268   : > { %10376 = vmatpush3.bf16.msra.mxu1 %v11176_v39  ;;  %836 = vrot.lane.b32.xlu1 %v829_v17, %s10961_s20  ;;  %v11872_v53 = vpop.permute.xlu1 %1966 }
 0x269   : > { %9529 = vmatprep.mubr.msk.f32.mxu0 %vm10957_vm8, %v12962_v62  ;;  %10385 = vmatprep.subr.bf16.mxu1 %v12961_v9 }
 0x26a   : > { %10370 = vmatpush3.bf16.msra.mxu0 %v11187_v42 }
 0x26b   : > { %9541 = vmatmul.mubr.msk.f32.vlgmr.msra.gmra.mrb[8].mxu1 %vm387_vm7, %v1219_v27  ;;  %10378 = vmatprep.subr.bf16.mxu0 %v10377_v25 }
 0x26c   : > { %10387 = vmatpush3.bf16.msra.mxu1 %v11142_v24  ;;  %9562 = vmatprep.mubr.msk.f32.mxu1 %vm10957_vm8, %v12962_v62  ;;  %v11874_v30 = vpop.permute.xlu1 %2490 }
 0x26d   : > { %9530 = vmatmul.mubr.msk.f32.vlgmr.msra.gmra.mrb[8].mxu0 %vm387_vm7, %v1144_v2  ;;  %10388 = vmatprep.subr.bf16.mxu1 %v12961_v9 }
 0x26e   : > { %10380 = vmatpush3.bf16.msra.mxu0 %v10377_v25  ;;  %9551 = vmatprep.mubr.msk.f32.mxu0 %vm387_vm7, %v11679_v20 }
 0x26f   : > { %10382 = vmatprep.subr.bf16.mxu0 %v10381_v29 }
 0x270   : > { %10390 = vmatpush3.bf16.msra.mxu1 %v11187_v42  ;;  %v11876_v0 = vpop.permute.xlu1 %3014 }
 0x271   : > { %10397 = vmatprep.subr.bf16.mxu1 %v12961_v9 }
 0x272   : > { %10384 = vmatpush3.bf16.msra.mxu0 %v10381_v29 }
 0x273   : > { %10391 = vmatprep.subr.bf16.mxu0 %v12961_v9 }
 0x274   : > { %v11878_v8 = vpop.permute.xlu1 %3538 }
 0x275   : > { %9552 = vmatmul.mubr.msk.f32.vlgmr.msra.gmra.mrb[10].mxu0 %vm387_vm7, %v11689_v28 }
 0x276   : > { %10393 = vmatpush3.bf16.msra.mxu0 %v11165_v36  ;;  %9573 = vmatprep.mubr.msk.f32.mxu0 %vm10957_vm8, %v12962_v62 }
 0x277   : > { %10394 = vmatprep.subr.bf16.mxu0 %v12961_v9 }
 0x278   : > { %v11880_v63 = vpop.permute.xlu1 %4062 }
 0x27a   : > { %10396 = vmatpush3.bf16.msra.mxu0 %v11176_v39 }
 0x27b   : > { %10403 = vmatprep.subr.bf16.mxu0 %v12961_v9 }
 0x27c   : > { %v11882_v23 = vpop.permute.xlu1 %4586 }
 0x280   : > { %v11884_v1 = vpop.permute.xlu1 %5110 }
 0x284   : > { %v11886_v5 = vpop.permute.xlu1 %5634 }
 0x288   : > { %v11888_v57 = vpop.permute.xlu1 %6158 }
 0x28c   : > { %v11890_v22 = vpop.permute.xlu1 %6682 }
 0x28d   : > { %12963 = vst [vmem:[#allocation15_spill] sm:$0xff] %v11890_v22 }
 0x290   : > { %v11892_v27 = vpop.permute.xlu1 %7206 }
 0x291   : > { %12964 = vst [vmem:[#allocation16_spill] sm:$0xff] %v11892_v27 }
 0x294   : > { %v11894_v17 = vpop.permute.xlu1 %7730 }
 0x295   : > { %12965 = vst [vmem:[#allocation17_spill] sm:$0xff] %v11894_v17 }
 0x298   : > { %v11896_v25 = vpop.permute.xlu1 %8254 }
 0x299   : > { %12966 = vst [vmem:[#allocation18_spill] sm:$0xff] %v11896_v25 }
 0x2d6   : > { %v835_v7 = vpop.permute.xlu1 %834 }
 0x2d7   : > { %844 = vst.msk [vmem:[%s11811_s21] sm:$0x1] %vm843_vm11, %v835_v7 }
 0x2d8   : > { %v839_v2 = vpop.permute.xlu0 %838 }
 0x2d9   : > { %846 = vst.msk [vmem:[%s11811_s21 + $0x20] sm:$0x1] %vm843_vm11, %v839_v2 }
 0x2da   : > { %v837_v29 = vpop.permute.xlu1 %836 }
 0x2db   : > { %845 = vst.msk [vmem:[%s11811_s21 + $0x10] sm:$0x1] %vm843_vm11, %v837_v29 }
 0x336   : > { %v1138_v61 = vpop.f32.mrb[6].mxu1 }
 0x337   : > { %v9520_v45 = vpop.f32.mrb[7].mxu1 }
 0x338   : > { %v1066_v26 = vpop.f32.mrb[6].mxu0 }
 0x339   : > { %v1139_v58 = vadd.f32 %v1138_v61, %v1066_v26  ;;  %v9509_v27 = vpop.f32.mrb[7].mxu0 }
 0x33b   : > { %v1142_v17 = vadd.f32 %v1139_v58, %v11804_v12 }
 0x33d   : > { %v1300_v25 = vrot.slane %v1142_v17, %v11806_v16  ;;  %v1371_v7 = vadd.f32 %v1142_v17, %v11824_v15  ;;  %v1373_v10 = vmul.f32 %v1142_v17, %v1142_v17 }
 0x33e   : > { %v1288_v22 = vpop.f32.mrb[8].mxu1 }
 0x33f   : > { %v1301_v2 = vcombine.high %v1300_v25, %v1300_v25  ;;  %v1308_v51 = vrot.slane %v1300_v25, %v11806_v16  ;;  %v1374_v29 = vadd.f32 %v1373_v10, %v11826_v56  ;;  %v9542_v45 = vpop.f32.mrb[9].mxu1 }
 0x340   : > { %v1213_v50 = vpop.f32.mrb[8].mxu0 }
 0x341   : > { %v1315_v26 = vrot.slane %v1301_v2, %v11806_v16  ;;  %v1316_v61 = vcombine.high %v1308_v51, %v1308_v51  ;;  %1320 = vst.msk [vmem:[%s11811_s21 + $0x1] sm:$0x1] %vm794_vm10, %v1308_v51  ;;  %v1289_v58 = vadd.f32 %v1288_v22, %v1213_v50  ;;  %v9531_v27 = vpop.f32.mrb[9].mxu0 }
 0x343   : > { %1321 = vst.msk [vmem:[%s11811_s21 + $0x11] sm:$0x1] %vm794_vm10, %v1315_v26  ;;  %1322 = vst.msk [vmem:[%s11811_s21 + $0x21] sm:$0x1] %vm794_vm10, %v1316_v61  ;;  %v1292_v15 = vadd.f32 %v1289_v58, %v11804_v12 }
 0x345   : > { %v1330_v17 = vrot.slane %v1292_v15, %v11806_v16  ;;  %v11918_v25 = vadd.f32 %v1371_v7, %v1292_v15  ;;  %v1375_v10 = vmul.f32 %v1292_v15, %v1292_v15 }
 0x347   : > { %v11920_v56 = vadd.f32 %v1375_v10, %v1374_v29  ;;  %v1338_v2 = vrot.slane %v1330_v17, %v11806_v16  ;;  %v1331_v45 = vcombine.high %v1330_v17, %v1330_v17  ;;  %v10409_v17 = vpack.c.bf16 %v11777_v33, %v11245_v55 }
 0x348   : > { %v9553_v48 = vpop.f32.mrb[10].mxu0  ;;  %v10413_v10 = vpack.c.bf16 %v11872_v53, %v11512_v11 }
 0x349   : > { %v1742_v51 = vrot.slane %v9553_v48, 6  ;;  %v1511_v50 = vpop.f32.mrb[11].mxu0  ;;  %v1350_v22 = vrot.slane %v1338_v2, %v11821_v43  ;;  %v1345_v26 = vrot.slane %v1331_v45, %v11806_v16  ;;  %v1346_v58 = vcombine.high %v1338_v2, %v1338_v2 }
 0x34a   : > { %v1521_v61 = vrot.slane %v1511_v50, 3  ;;  %v1741_v27 = vrot.slane %v1511_v50, 6  ;;  %9574 = vmatmul.mubr.msk.f32.vlgmr.msra.gmra.mrb[12].mxu0 %vm387_vm7, %v1511_v50  ;;  %v1668_v55 = vrot.slane %v9553_v48, 1 }
 0x34b   : > { %10405 = vmatpush3.bf16.msra.mxu0 %v11165_v36  ;;  %1359 = vrot.lane.b32.xlu1 %v1350_v22, %s10961_s20  ;;  %v1354_v7 = vrot.slane %v1345_v26, %v11821_v43  ;;  %v1358_v15 = vrot.slane %v1346_v58, %v11821_v43 }
 0x34c   : > { %9563 = vmatmul.mubr.msk.f32.vlgmr.msra.gmra.mrb[10].mxu1 %vm387_vm7, %v1521_v61  ;;  %10406 = vmatprep.subr.bf16.mxu0 %v12961_v9  ;;  %v1743_v29 = vsel %vm690_vm9, %v1741_v27, %v1742_v51 }
 0x34d   : > { %10399 = vmatpush3.bf16.msra.mxu1 %v11142_v24  ;;  %1361 = vrot.lane.b32.xlu0 %v1354_v7, %s10961_s20 }
 0x34e   : > { %10400 = vmatprep.subr.bf16.mxu1 %v12961_v9  ;;  %9595 = vmatprep.mubr.msk.f32.mxu0 %vm10957_vm8, %v12962_v62 }
 0x34f   : > { %10408 = vmatpush3.bf16.msra.mxu0 %v11176_v39  ;;  %1363 = vrot.lane.b32.xlu1 %v1358_v15, %s10961_s20 }
 0x350   : > { %9584 = vmatprep.mubr.msk.f32.mxu1 %vm10957_vm8, %v12962_v62  ;;  %10417 = vmatprep.subr.bf16.mxu0 %v12961_v9 }
 0x351   : > { %10402 = vmatpush3.bf16.msra.mxu1 %v11187_v42 }
 0x352   : > { %9596 = vmatmul.mubr.msk.f32.vlgmr.msra.gmra.mrb[14].mxu0 %vm387_vm7, %v1743_v29  ;;  %10410 = vmatprep.subr.bf16.mxu1 %v10409_v17 }
 0x353   : > { %10419 = vmatpush3.bf16.msra.mxu0 %v11142_v24  ;;  %9617 = vmatprep.mubr.msk.f32.mxu0 %vm10957_vm8, %v12962_v62 }
 0x354   : > { %9585 = vmatmul.mubr.msk.f32.vlgmr.msra.gmra.mrb[12].mxu1 %vm387_vm7, %v1668_v55  ;;  %10420 = vmatprep.subr.bf16.mxu0 %v12961_v9 }
 0x355   : > { %10412 = vmatpush3.bf16.msra.mxu1 %v10409_v17  ;;  %9606 = vmatprep.mubr.msk.f32.mxu1 %vm387_vm7, %v11679_v20 }
 0x356   : > { %10414 = vmatprep.subr.bf16.mxu1 %v10413_v10 }
 0x357   : > { %10422 = vmatpush3.bf16.msra.mxu0 %v11187_v42 }
 0x358   : > { %10429 = vmatprep.subr.bf16.mxu0 %v12961_v9 }
 0x359   : > { %10416 = vmatpush3.bf16.msra.mxu1 %v10413_v10 }
 0x35a   : > { %10423 = vmatprep.subr.bf16.mxu1 %v12961_v9 }
 0x35c   : > { %9607 = vmatmul.mubr.msk.f32.vlgmr.msra.gmra.mrb[14].mxu1 %vm387_vm7, %v11689_v28 }
 0x35d   : > { %10425 = vmatpush3.bf16.msra.mxu1 %v11165_v36  ;;  %9628 = vmatprep.mubr.msk.f32.mxu1 %vm10957_vm8, %v12962_v62 }
 0x35e   : > { %10426 = vmatprep.subr.bf16.mxu1 %v12961_v9 }
 0x361   : > { %10428 = vmatpush3.bf16.msra.mxu1 %v11176_v39 }
 0x362   : > { %10435 = vmatprep.subr.bf16.mxu1 %v12961_v9 }
 0x3bd   : > { %v1360_v48 = vpop.permute.xlu1 %1359 }
 0x3be   : > { %1368 = vst.msk [vmem:[%s11811_s21 + $0x1] sm:$0x1] %vm843_vm11, %v1360_v48 }
 0x3bf   : > { %v1362_v11 = vpop.permute.xlu0 %1361 }
 0x3c0   : > { %1369 = vst.msk [vmem:[%s11811_s21 + $0x11] sm:$0x1] %vm843_vm11, %v1362_v11 }
 0x3c1   : > { %v1364_v33 = vpop.permute.xlu1 %1363 }
 0x3c2   : > { %1370 = vst.msk [vmem:[%s11811_s21 + $0x21] sm:$0x1] %vm843_vm11, %v1364_v33 }
 0x41d   : > { %v1662_v53 = vpop.f32.mrb[12].mxu0 }
 0x41e   : > { %v9575_v2 = vpop.f32.mrb[13].mxu0 }
 0x41f   : > { %v1590_v45 = vpop.f32.mrb[10].mxu1 }
 0x420   : > { %v1663_v51 = vadd.f32 %v1662_v53, %v1590_v45  ;;  %v9564_v50 = vpop.f32.mrb[11].mxu1 }
 0x422   : > { %v1666_v22 = vadd.f32 %v1663_v51, %v11804_v12 }
 0x424   : > { %v1824_v26 = vrot.slane %v1666_v22, %v11806_v16  ;;  %v1895_v61 = vadd.f32 %v1666_v22, %v11918_v25  ;;  %v1897_v27 = vmul.f32 %v1666_v22, %v1666_v22 }
 0x425   : > { %v1812_v58 = vpop.f32.mrb[14].mxu0 }
 0x426   : > { %v1825_v7 = vcombine.high %v1824_v26, %v1824_v26  ;;  %v1832_v29 = vrot.slane %v1824_v26, %v11806_v16  ;;  %v1898_v15 = vadd.f32 %v1897_v27, %v11920_v56  ;;  %v9597_v17 = vpop.f32.mrb[15].mxu0 }
 0x427   : > { %v1737_v10 = vpop.f32.mrb[12].mxu1 }
 0x428   : > { %v1839_v55 = vrot.slane %v1825_v7, %v11806_v16  ;;  %v1840_v48 = vcombine.high %v1832_v29, %v1832_v29  ;;  %1844 = vst.msk [vmem:[%s11811_s21 + $0x2] sm:$0x1] %vm794_vm10, %v1832_v29  ;;  %v1813_v11 = vadd.f32 %v1812_v58, %v1737_v10  ;;  %v9586_v33 = vpop.f32.mrb[13].mxu1 }
 0x42a   : > { %1845 = vst.msk [vmem:[%s11811_s21 + $0x12] sm:$0x1] %vm794_vm10, %v1839_v55  ;;  %1846 = vst.msk [vmem:[%s11811_s21 + $0x22] sm:$0x1] %vm794_vm10, %v1840_v48  ;;  %v1816_v25 = vadd.f32 %v1813_v11, %v11804_v12  ;;  %v10441_v48 = vpack.c.bf16 %v11779_v34, %v11264_v13  ;;  %v10445_v11 = vpack.c.bf16 %v11874_v30, %v11529_v46 }
 0x42c   : > { %v1854_v53 = vrot.slane %v1816_v25, %v11806_v16  ;;  %v11987_v2 = vadd.f32 %v1895_v61, %v1816_v25  ;;  %v1899_v56 = vmul.f32 %v1816_v25, %v1816_v25 }
 0x42e   : > { %v11989_v45 = vadd.f32 %v1899_v56, %v1898_v15  ;;  %v1862_v51 = vrot.slane %v1854_v53, %v11806_v16  ;;  %v1855_v50 = vcombine.high %v1854_v53, %v1854_v53 }
 0x42f   : > { %v9608_v22 = vpop.f32.mrb[14].mxu1 }
 0x430   : > { %v2266_v26 = vrot.slane %v9608_v22, 6  ;;  %v2035_v27 = vpop.f32.mrb[15].mxu1  ;;  %v1874_v58 = vrot.slane %v1862_v51, %v11821_v43  ;;  %v1869_v7 = vrot.slane %v1855_v50, %v11806_v16  ;;  %v1870_v10 = vcombine.high %v1862_v51, %v1862_v51 }
 0x431   : > { %v2045_v29 = vrot.slane %v2035_v27, 3  ;;  %v2265_v17 = vrot.slane %v2035_v27, 6  ;;  %9629 = vmatmul.mubr.msk.f32.vlgmr.msra.gmra.mrb[16].mxu1 %vm387_vm7, %v2035_v27  ;;  %v2192_v13 = vrot.slane %v9608_v22, 1 }
 0x432   : > { %10437 = vmatpush3.bf16.msra.mxu1 %v11165_v36  ;;  %1883 = vrot.lane.b32.xlu0 %v1874_v58, %s10961_s20  ;;  %v1878_v61 = vrot.slane %v1869_v7, %v11821_v43  ;;  %v1882_v55 = vrot.slane %v1870_v10, %v11821_v43 }
 0x433   : > { %9618 = vmatmul.mubr.msk.f32.vlgmr.msra.gmra.mrb[16].mxu0 %vm387_vm7, %v2045_v29  ;;  %10438 = vmatprep.subr.bf16.mxu1 %v12961_v9  ;;  %v2267_v15 = vsel %vm690_vm9, %v2265_v17, %v2266_v26 }
 0x434   : > { %10431 = vmatpush3.bf16.msra.mxu0 %v11142_v24  ;;  %1885 = vrot.lane.b32.xlu1 %v1878_v61, %s10961_s20 }
 0x435   : > { %10432 = vmatprep.subr.bf16.mxu0 %v12961_v9  ;;  %9650 = vmatprep.mubr.msk.f32.mxu1 %vm10957_vm8, %v12962_v62 }
 0x436   : > { %10440 = vmatpush3.bf16.msra.mxu1 %v11176_v39  ;;  %1887 = vrot.lane.b32.xlu0 %v1882_v55, %s10961_s20 }
 0x437   : > { %9639 = vmatprep.mubr.msk.f32.mxu0 %vm10957_vm8, %v12962_v62  ;;  %10449 = vmatprep.subr.bf16.mxu1 %v12961_v9 }
 0x438   : > { %10434 = vmatpush3.bf16.msra.mxu0 %v11187_v42 }
 0x439   : > { %9651 = vmatmul.mubr.msk.f32.vlgmr.msra.gmra.mrb[18].mxu1 %vm387_vm7, %v2267_v15  ;;  %10442 = vmatprep.subr.bf16.mxu0 %v10441_v48 }
 0x43a   : > { %10451 = vmatpush3.bf16.msra.mxu1 %v11142_v24  ;;  %9672 = vmatprep.mubr.msk.f32.mxu1 %vm10957_vm8, %v12962_v62 }
 0x43b   : > { %9640 = vmatmul.mubr.msk.f32.vlgmr.msra.gmra.mrb[18].mxu0 %vm387_vm7, %v2192_v13  ;;  %10452 = vmatprep.subr.bf16.mxu1 %v12961_v9 }
 0x43c   : > { %10444 = vmatpush3.bf16.msra.mxu0 %v10441_v48  ;;  %9661 = vmatprep.mubr.msk.f32.mxu0 %vm387_vm7, %v11679_v20 }
 0x43d   : > { %10446 = vmatprep.subr.bf16.mxu0 %v10445_v11 }
 0x43e   : > { %10454 = vmatpush3.bf16.msra.mxu1 %v11187_v42 }
 0x43f   : > { %10461 = vmatprep.subr.bf16.mxu1 %v12961_v9 }
 0x440   : > { %10448 = vmatpush3.bf16.msra.mxu0 %v10445_v11 }
 0x441   : > { %10455 = vmatprep.subr.bf16.mxu0 %v12961_v9 }
 0x443   : > { %9662 = vmatmul.mubr.msk.f32.vlgmr.msra.gmra.mrb[20].mxu0 %vm387_vm7, %v11689_v28 }
 0x444   : > { %10457 = vmatpush3.bf16.msra.mxu0 %v11165_v36  ;;  %9683 = vmatprep.mubr.msk.f32.mxu0 %vm10957_vm8, %v12962_v62 }
 0x445   : > { %10458 = vmatprep.subr.bf16.mxu0 %v12961_v9 }
 0x448   : > { %10460 = vmatpush3.bf16.msra.mxu0 %v11176_v39 }
 0x449   : > { %10467 = vmatprep.subr.bf16.mxu0 %v12961_v9 }
 0x4a4   : > { %v1884_v46 = vpop.permute.xlu0 %1883 }
 0x4a5   : > { %1892 = vst.msk [vmem:[%s11811_s21 + $0x2] sm:$0x1] %vm843_vm11, %v1884_v46 }
 0x4a6   : > { %v1886_v34 = vpop.permute.xlu1 %1885 }
 0x4a7   : > { %1893 = vst.msk [vmem:[%s11811_s21 + $0x12] sm:$0x1] %vm843_vm11, %v1886_v34 }
 0x4a8   : > { %v1888_v30 = vpop.permute.xlu0 %1887 }
 0x4a9   : > { %1894 = vst.msk [vmem:[%s11811_s21 + $0x22] sm:$0x1] %vm843_vm11, %v1888_v30 }
 0x504   : > { %v2186_v33 = vpop.f32.mrb[16].mxu1 }
 0x505   : > { %v9630_v25 = vpop.f32.mrb[17].mxu1 }
 0x506   : > { %v2114_v53 = vpop.f32.mrb[16].mxu0 }
 0x507   : > { %v2187_v56 = vadd.f32 %v2186_v33, %v2114_v53  ;;  %v9619_v51 = vpop.f32.mrb[17].mxu0 }
 0x509   : > { %v2190_v50 = vadd.f32 %v2187_v56, %v11804_v12 }
 0x50b   : > { %v2348_v22 = vrot.slane %v2190_v50, %v11806_v16  ;;  %v2419_v26 = vadd.f32 %v2190_v50, %v11987_v2  ;;  %v2421_v27 = vmul.f32 %v2190_v50, %v2190_v50 }
 0x50c   : > { %v2336_v58 = vpop.f32.mrb[18].mxu1 }
 0x50d   : > { %v2349_v7 = vcombine.high %v2348_v22, %v2348_v22  ;;  %v2356_v29 = vrot.slane %v2348_v22, %v11806_v16  ;;  %v2422_v17 = vadd.f32 %v2421_v27, %v11989_v45  ;;  %v9652_v10 = vpop.f32.mrb[19].mxu1 }
 0x50e   : > { %v2261_v61 = vpop.f32.mrb[18].mxu0  ;;  %v10477_v10 = vpack.c.bf16 %v11876_v0, %v11552_v21 }
 0x50f   : > { %v2363_v15 = vrot.slane %v2349_v7, %v11806_v16  ;;  %v2364_v55 = vcombine.high %v2356_v29, %v2356_v29  ;;  %2368 = vst.msk [vmem:[%s11811_s21 + $0x3] sm:$0x1] %vm794_vm10, %v2356_v29  ;;  %v2337_v48 = vadd.f32 %v2336_v58, %v2261_v61  ;;  %v9641_v11 = vpop.f32.mrb[19].mxu0 }
 0x511   : > { %2369 = vst.msk [vmem:[%s11811_s21 + $0x13] sm:$0x1] %vm794_vm10, %v2363_v15  ;;  %2370 = vst.msk [vmem:[%s11811_s21 + $0x23] sm:$0x1] %vm794_vm10, %v2364_v55  ;;  %v2340_v2 = vadd.f32 %v2337_v48, %v11804_v12 }
 0x513   : > { %v2378_v13 = vrot.slane %v2340_v2, %v11806_v16  ;;  %v12056_v46 = vadd.f32 %v2419_v26, %v2340_v2  ;;  %v2423_v45 = vmul.f32 %v2340_v2, %v2340_v2 }
 0x515   : > { %v12058_v34 = vadd.f32 %v2423_v45, %v2422_v17  ;;  %v2386_v30 = vrot.slane %v2378_v13, %v11806_v16  ;;  %v2379_v33 = vcombine.high %v2378_v13, %v2378_v13  ;;  %v10473_v17 = vpack.c.bf16 %v11781_v35, %v11283_v44 }
 0x516   : > { %v9663_v25 = vpop.f32.mrb[20].mxu0 }
 0x517   : > { %v2790_v53 = vrot.slane %v9663_v25, 6  ;;  %v2559_v56 = vpop.f32.mrb[21].mxu0  ;;  %v2398_v51 = vrot.slane %v2386_v30, %v11821_v43  ;;  %v2393_v50 = vrot.slane %v2379_v33, %v11806_v16  ;;  %v2394_v58 = vcombine.high %v2386_v30, %v2386_v30 }
 0x518   : > { %v2569_v22 = vrot.slane %v2559_v56, 3  ;;  %v2789_v27 = vrot.slane %v2559_v56, 6  ;;  %9684 = vmatmul.mubr.msk.f32.vlgmr.msra.gmra.mrb[22].mxu0 %vm387_vm7, %v2559_v56  ;;  %v2716_v44 = vrot.slane %v9663_v25, 1 }
 0x519   : > { %10469 = vmatpush3.bf16.msra.mxu0 %v11165_v36  ;;  %2407 = vrot.lane.b32.xlu1 %v2398_v51, %s10961_s20  ;;  %v2402_v26 = vrot.slane %v2393_v50, %v11821_v43  ;;  %v2406_v29 = vrot.slane %v2394_v58, %v11821_v43 }
 0x51a   : > { %9673 = vmatmul.mubr.msk.f32.vlgmr.msra.gmra.mrb[20].mxu1 %vm387_vm7, %v2569_v22  ;;  %10470 = vmatprep.subr.bf16.mxu0 %v12961_v9  ;;  %v2791_v7 = vsel %vm690_vm9, %v2789_v27, %v2790_v53 }
 0x51b   : > { %10463 = vmatpush3.bf16.msra.mxu1 %v11142_v24  ;;  %2409 = vrot.lane.b32.xlu0 %v2402_v26, %s10961_s20 }
 0x51c   : > { %10464 = vmatprep.subr.bf16.mxu1 %v12961_v9  ;;  %9705 = vmatprep.mubr.msk.f32.mxu0 %vm10957_vm8, %v12962_v62 }
 0x51d   : > { %10472 = vmatpush3.bf16.msra.mxu0 %v11176_v39  ;;  %2411 = vrot.lane.b32.xlu1 %v2406_v29, %s10961_s20 }
 0x51e   : > { %9694 = vmatprep.mubr.msk.f32.mxu1 %vm10957_vm8, %v12962_v62  ;;  %10481 = vmatprep.subr.bf16.mxu0 %v12961_v9 }
 0x51f   : > { %10466 = vmatpush3.bf16.msra.mxu1 %v11187_v42 }
 0x520   : > { %9706 = vmatmul.mubr.msk.f32.vlgmr.msra.gmra.mrb[24].mxu0 %vm387_vm7, %v2791_v7  ;;  %10474 = vmatprep.subr.bf16.mxu1 %v10473_v17 }
 0x521   : > { %10483 = vmatpush3.bf16.msra.mxu0 %v11142_v24  ;;  %9727 = vmatprep.mubr.msk.f32.mxu0 %vm10957_vm8, %v12962_v62 }
 0x522   : > { %9695 = vmatmul.mubr.msk.f32.vlgmr.msra.gmra.mrb[22].mxu1 %vm387_vm7, %v2716_v44  ;;  %10484 = vmatprep.subr.bf16.mxu0 %v12961_v9 }
 0x523   : > { %10476 = vmatpush3.bf16.msra.mxu1 %v10473_v17  ;;  %9716 = vmatprep.mubr.msk.f32.mxu1 %vm387_vm7, %v11679_v20 }
 0x524   : > { %10478 = vmatprep.subr.bf16.mxu1 %v10477_v10 }
 0x525   : > { %10486 = vmatpush3.bf16.msra.mxu0 %v11187_v42 }
 0x526   : > { %10493 = vmatprep.subr.bf16.mxu0 %v12961_v9 }
 0x527   : > { %10480 = vmatpush3.bf16.msra.mxu1 %v10477_v10 }
 0x528   : > { %10487 = vmatprep.subr.bf16.mxu1 %v12961_v9 }
 0x52a   : > { %9717 = vmatmul.mubr.msk.f32.vlgmr.msra.gmra.mrb[24].mxu1 %vm387_vm7, %v11689_v28 }
 0x52b   : > { %10489 = vmatpush3.bf16.msra.mxu1 %v11165_v36  ;;  %9738 = vmatprep.mubr.msk.f32.mxu1 %vm10957_vm8, %v12962_v62 }
 0x52c   : > { %10490 = vmatprep.subr.bf16.mxu1 %v12961_v9 }
 0x52f   : > { %10492 = vmatpush3.bf16.msra.mxu1 %v11176_v39 }
 0x530   : > { %10499 = vmatprep.subr.bf16.mxu1 %v12961_v9 }
 0x58b   : > { %v2408_v21 = vpop.permute.xlu1 %2407 }
 0x58c   : > { %2416 = vst.msk [vmem:[%s11811_s21 + $0x3] sm:$0x1] %vm843_vm11, %v2408_v21 }
 0x58d   : > { %v2410_v20 = vpop.permute.xlu0 %2409 }
 0x58e   : > { %2417 = vst.msk [vmem:[%s11811_s21 + $0x13] sm:$0x1] %vm843_vm11, %v2410_v20 }
 0x58f   : > { %v2412_v35 = vpop.permute.xlu1 %2411 }
 0x590   : > { %2418 = vst.msk [vmem:[%s11811_s21 + $0x23] sm:$0x1] %vm843_vm11, %v2412_v35 }
 0x5eb   : > { %v2710_v28 = vpop.f32.mrb[22].mxu0 }
 0x5ec   : > { %v9685_v0 = vpop.f32.mrb[23].mxu0 }
 0x5ed   : > { %v2638_v61 = vpop.f32.mrb[20].mxu1 }
 0x5ee   : > { %v2711_v15 = vadd.f32 %v2710_v28, %v2638_v61  ;;  %v9674_v55 = vpop.f32.mrb[21].mxu1 }
 0x5f0   : > { %v2714_v48 = vadd.f32 %v2711_v15, %v11804_v12 }
 0x5f2   : > { %v2872_v11 = vrot.slane %v2714_v48, %v11806_v16  ;;  %v2943_v2 = vadd.f32 %v2714_v48, %v12056_v46  ;;  %v2945_v13 = vmul.f32 %v2714_v48, %v2714_v48 }
 0x5f3   : > { %v2860_v45 = vpop.f32.mrb[24].mxu0 }
 0x5f4   : > { %v2873_v30 = vcombine.high %v2872_v11, %v2872_v11  ;;  %v2880_v33 = vrot.slane %v2872_v11, %v11806_v16  ;;  %v2946_v25 = vadd.f32 %v2945_v13, %v12058_v34  ;;  %v9707_v53 = vpop.f32.mrb[25].mxu0  ;;  %v10505_v11 = vpack.c.bf16 %v11783_v37, %v11302_v3  ;;  %v12164_v37 = vld [vmem:[%s12930_s1] sm:$0xff] }
 0x5f5   : > { %v2785_v56 = vpop.f32.mrb[22].mxu1 }
 0x5f6   : > { %v2887_v51 = vrot.slane %v2873_v30, %v11806_v16  ;;  %v2888_v50 = vcombine.high %v2880_v33, %v2880_v33  ;;  %2892 = vst.msk [vmem:[%s11811_s21 + $0x4] sm:$0x1] %vm794_vm10, %v2880_v33  ;;  %v2861_v22 = vadd.f32 %v2860_v45, %v2785_v56  ;;  %v9696_v27 = vpop.f32.mrb[23].mxu1 }
 0x5f8   : > { %2893 = vst.msk [vmem:[%s11811_s21 + $0x14] sm:$0x1] %vm794_vm10, %v2887_v51  ;;  %2894 = vst.msk [vmem:[%s11811_s21 + $0x24] sm:$0x1] %vm794_vm10, %v2888_v50  ;;  %v2864_v46 = vadd.f32 %v2861_v22, %v11804_v12 }
 0x5fa   : > { %v2902_v58 = vrot.slane %v2864_v46, %v11806_v16  ;;  %v12125_v26 = vadd.f32 %v2943_v2, %v2864_v46  ;;  %v2947_v34 = vmul.f32 %v2864_v46, %v2864_v46  ;;  %v10509_v2 = vpack.c.bf16 %v11878_v8, %v11571_v60  ;;  %v12174_v60 = vld [vmem:[%s12930_s1 + $0x8] sm:$0xf] }
 0x5fc   : > { %v12127_v7 = vadd.f32 %v2947_v34, %v2946_v25  ;;  %v2910_v29 = vrot.slane %v2902_v58, %v11806_v16  ;;  %v2903_v17 = vcombine.high %v2902_v58, %v2902_v58 }
 0x5fd   : > { %v9718_v10 = vpop.f32.mrb[24].mxu1 }
 0x5fe   : > { %v3314_v44 = vrot.slane %v9718_v10, 6  ;;  %v3083_v21 = vpop.f32.mrb[25].mxu1  ;;  %v2922_v20 = vrot.slane %v2910_v29, %v11821_v43  ;;  %v2917_v35 = vrot.slane %v2903_v17, %v11806_v16  ;;  %v2918_v61 = vcombine.high %v2910_v29, %v2910_v29 }
 0x5ff   : > { %v3093_v28 = vrot.slane %v3083_v21, 3  ;;  %v3313_v0 = vrot.slane %v3083_v21, 6  ;;  %9739 = vmatmul.mubr.msk.f32.vlgmr.msra.gmra.mrb[26].mxu1 %vm387_vm7, %v3083_v21  ;;  %v3240_v3 = vrot.slane %v9718_v10, 1 }
 0x600   : > { %10501 = vmatpush3.bf16.msra.mxu1 %v11165_v36  ;;  %2931 = vrot.lane.b32.xlu0 %v2922_v20, %s10961_s20  ;;  %v2926_v15 = vrot.slane %v2917_v35, %v11821_v43  ;;  %v2930_v48 = vrot.slane %v2918_v61, %v11821_v43 }
 0x601   : > { %9728 = vmatmul.mubr.msk.f32.vlgmr.msra.gmra.mrb[26].mxu0 %vm387_vm7, %v3093_v28  ;;  %10502 = vmatprep.subr.bf16.mxu1 %v12961_v9  ;;  %v3315_v55 = vsel %vm690_vm9, %v3313_v0, %v3314_v44 }
 0x602   : > { %10495 = vmatpush3.bf16.msra.mxu0 %v11142_v24  ;;  %2933 = vrot.lane.b32.xlu1 %v2926_v15, %s10961_s20 }
 0x603   : > { %10496 = vmatprep.subr.bf16.mxu0 %v12961_v9  ;;  %9760 = vmatprep.mubr.msk.f32.mxu1 %vm10957_vm8, %v12962_v62 }
 0x604   : > { %10504 = vmatpush3.bf16.msra.mxu1 %v11176_v39  ;;  %2935 = vrot.lane.b32.xlu0 %v2930_v48, %s10961_s20 }
 0x605   : > { %9749 = vmatprep.mubr.msk.f32.mxu0 %vm10957_vm8, %v12962_v62  ;;  %10513 = vmatprep.subr.bf16.mxu1 %v12961_v9 }
 0x606   : > { %10498 = vmatpush3.bf16.msra.mxu0 %v11187_v42 }
 0x607   : > { %9761 = vmatmul.mubr.msk.f32.vlgmr.msra.gmra.mrb[28].mxu1 %vm387_vm7, %v3315_v55  ;;  %10506 = vmatprep.subr.bf16.mxu0 %v10505_v11 }
 0x608   : > { %10515 = vmatpush3.bf16.msra.mxu1 %v11142_v24  ;;  %9782 = vmatprep.mubr.msk.f32.mxu1 %vm10957_vm8, %v12962_v62 }
 0x609   : > { %9750 = vmatmul.mubr.msk.f32.vlgmr.msra.gmra.mrb[28].mxu0 %vm387_vm7, %v3240_v3  ;;  %10516 = vmatprep.subr.bf16.mxu1 %v12961_v9 }
 0x60a   : > { %10508 = vmatpush3.bf16.msra.mxu0 %v10505_v11  ;;  %9771 = vmatprep.mubr.msk.f32.mxu0 %vm387_vm7, %v12164_v37 }
 0x60b   : > { %10510 = vmatprep.subr.bf16.mxu0 %v10509_v2 }
 0x60c   : > { %10518 = vmatpush3.bf16.msra.mxu1 %v11187_v42 }
 0x60d   : > { %10525 = vmatprep.subr.bf16.mxu1 %v12961_v9 }
 0x60e   : > { %10512 = vmatpush3.bf16.msra.mxu0 %v10509_v2 }
 0x60f   : > { %10519 = vmatprep.subr.bf16.mxu0 %v12961_v9 }
 0x611   : > { %9772 = vmatmul.mubr.msk.f32.vlgmr.msra.gmra.mrb[30].mxu0 %vm387_vm7, %v12174_v60 }
 0x612   : > { %10521 = vmatpush3.bf16.msra.mxu0 %v11165_v36  ;;  %9793 = vmatprep.mubr.msk.f32.mxu0 %vm10957_vm8, %v12962_v62 }
 0x613   : > { %10522 = vmatprep.subr.bf16.mxu0 %v12961_v9 }
 0x616   : > { %10524 = vmatpush3.bf16.msra.mxu0 %v11176_v39 }
 0x617   : > { %10531 = vmatprep.subr.bf16.mxu0 %v12961_v9 }
 0x672   : > { %v2932_v8 = vpop.permute.xlu0 %2931 }
 0x673   : > { %2940 = vst.msk [vmem:[%s11811_s21 + $0x4] sm:$0x1] %vm843_vm11, %v2932_v8 }
 0x674   : > { %v2934_v13 = vpop.permute.xlu1 %2933 }
 0x675   : > { %2941 = vst.msk [vmem:[%s11811_s21 + $0x14] sm:$0x1] %vm843_vm11, %v2934_v13 }
 0x676   : > { %v2936_v45 = vpop.permute.xlu0 %2935 }
 0x677   : > { %2942 = vst.msk [vmem:[%s11811_s21 + $0x24] sm:$0x1] %vm843_vm11, %v2936_v45 }
 0x6d2   : > { %v3234_v30 = vpop.f32.mrb[26].mxu1 }
 0x6d3   : > { %v9740_v33 = vpop.f32.mrb[27].mxu1 }
 0x6d4   : > { %v3162_v25 = vpop.f32.mrb[26].mxu0 }
 0x6d5   : > { %v3235_v53 = vadd.f32 %v3234_v30, %v3162_v25  ;;  %v9729_v56 = vpop.f32.mrb[27].mxu0 }
 0x6d6   : > { %v10537_v56 = vpack.c.bf16 %v11785_v38, %v11321_v31 }
 0x6d7   : > { %v3238_v51 = vadd.f32 %v3235_v53, %v11804_v12 }
 0x6d9   : > { %v3396_v50 = vrot.slane %v3238_v51, %v11806_v16  ;;  %v3467_v22 = vadd.f32 %v3238_v51, %v12125_v26  ;;  %v3469_v27 = vmul.f32 %v3238_v51, %v3238_v51  ;;  %v10541_v51 = vpack.c.bf16 %v11880_v63, %v11590_v32 }
 0x6da   : > { %v3384_v46 = vpop.f32.mrb[28].mxu1 }
 0x6db   : > { %v3397_v58 = vcombine.high %v3396_v50, %v3396_v50  ;;  %v3404_v34 = vrot.slane %v3396_v50, %v11806_v16  ;;  %v3470_v29 = vadd.f32 %v3469_v27, %v12127_v7  ;;  %v9762_v17 = vpop.f32.mrb[29].mxu1 }
 0x6dc   : > { %v3309_v10 = vpop.f32.mrb[28].mxu0 }
 0x6dd   : > { %v3411_v44 = vrot.slane %v3397_v58, %v11806_v16  ;;  %v3412_v21 = vcombine.high %v3404_v34, %v3404_v34  ;;  %3416 = vst.msk [vmem:[%s11811_s21 + $0x5] sm:$0x1] %vm794_vm10, %v3404_v34  ;;  %v3385_v20 = vadd.f32 %v3384_v46, %v3309_v10  ;;  %v9751_v35 = vpop.f32.mrb[29].mxu0 }
 0x6df   : > { %3417 = vst.msk [vmem:[%s11811_s21 + $0x15] sm:$0x1] %vm794_vm10, %v3411_v44  ;;  %3418 = vst.msk [vmem:[%s11811_s21 + $0x25] sm:$0x1] %vm794_vm10, %v3412_v21  ;;  %v3388_v26 = vadd.f32 %v3385_v20, %v11804_v12 }
 0x6e1   : > { %v3426_v28 = vrot.slane %v3388_v26, %v11806_v16  ;;  %v12204_v0 = vadd.f32 %v3467_v22, %v3388_v26  ;;  %v3471_v7 = vmul.f32 %v3388_v26, %v3388_v26 }
 0x6e3   : > { %v12206_v61 = vadd.f32 %v3471_v7, %v3470_v29  ;;  %v3434_v15 = vrot.slane %v3426_v28, %v11806_v16  ;;  %v3427_v55 = vcombine.high %v3426_v28, %v3426_v28 }
 0x6e4   : > { %v9773_v48 = vpop.f32.mrb[30].mxu0 }
 0x6e5   : > { %v3838_v11 = vrot.slane %v9773_v48, 6  ;;  %v3607_v2 = vpop.f32.mrb[31].mxu0  ;;  %v3446_v3 = vrot.slane %v3434_v15, %v11821_v43  ;;  %v3441_v8 = vrot.slane %v3427_v55, %v11806_v16  ;;  %v3442_v30 = vcombine.high %v3434_v15, %v3434_v15 }
 0x6e6   : > { %v3617_v13 = vrot.slane %v3607_v2, 3  ;;  %v3837_v45 = vrot.slane %v3607_v2, 6  ;;  %9794 = vmatmul.mubr.msk.f32.vlgmr.msra.gmra.mrb[32].mxu0 %vm387_vm7, %v3607_v2  ;;  %v3764_v31 = vrot.slane %v9773_v48, 1 }
 0x6e7   : > { %10533 = vmatpush3.bf16.msra.mxu0 %v11165_v36  ;;  %3455 = vrot.lane.b32.xlu1 %v3446_v3, %s10961_s20  ;;  %v3450_v33 = vrot.slane %v3441_v8, %v11821_v43  ;;  %v3454_v53 = vrot.slane %v3442_v30, %v11821_v43 }
 0x6e8   : > { %9783 = vmatmul.mubr.msk.f32.vlgmr.msra.gmra.mrb[30].mxu1 %vm387_vm7, %v3617_v13  ;;  %10534 = vmatprep.subr.bf16.mxu0 %v12961_v9  ;;  %v3839_v25 = vsel %vm690_vm9, %v3837_v45, %v3838_v11 }
 0x6e9   : > { %10527 = vmatpush3.bf16.msra.mxu1 %v11142_v24  ;;  %3457 = vrot.lane.b32.xlu0 %v3450_v33, %s10961_s20 }
 0x6ea   : > { %10528 = vmatprep.subr.bf16.mxu1 %v12961_v9  ;;  %9815 = vmatprep.mubr.msk.f32.mxu0 %vm10957_vm8, %v12962_v62 }
 0x6eb   : > { %10536 = vmatpush3.bf16.msra.mxu0 %v11176_v39  ;;  %3459 = vrot.lane.b32.xlu1 %v3454_v53, %s10961_s20 }
 0x6ec   : > { %9804 = vmatprep.mubr.msk.f32.mxu1 %vm10957_vm8, %v12962_v62  ;;  %10545 = vmatprep.subr.bf16.mxu0 %v12961_v9 }
 0x6ed   : > { %10530 = vmatpush3.bf16.msra.mxu1 %v11187_v42 }
 0x6ee   : > { %9816 = vmatmul.mubr.msk.f32.vlgmr.msra.gmra.mrb[34].mxu0 %vm387_vm7, %v3839_v25  ;;  %10538 = vmatprep.subr.bf16.mxu1 %v10537_v56 }
 0x6ef   : > { %10547 = vmatpush3.bf16.msra.mxu0 %v11142_v24  ;;  %9837 = vmatprep.mubr.msk.f32.mxu0 %vm10957_vm8, %v12962_v62 }
 0x6f0   : > { %9805 = vmatmul.mubr.msk.f32.vlgmr.msra.gmra.mrb[32].mxu1 %vm387_vm7, %v3764_v31  ;;  %10548 = vmatprep.subr.bf16.mxu0 %v12961_v9 }
 0x6f1   : > { %10540 = vmatpush3.bf16.msra.mxu1 %v10537_v56  ;;  %9826 = vmatprep.mubr.msk.f32.mxu1 %vm387_vm7, %v12164_v37 }
 0x6f2   : > { %10542 = vmatprep.subr.bf16.mxu1 %v10541_v51 }
 0x6f3   : > { %10550 = vmatpush3.bf16.msra.mxu0 %v11187_v42 }
 0x6f4   : > { %10557 = vmatprep.subr.bf16.mxu0 %v12961_v9 }
 0x6f5   : > { %10544 = vmatpush3.bf16.msra.mxu1 %v10541_v51 }
 0x6f6   : > { %10551 = vmatprep.subr.bf16.mxu1 %v12961_v9 }
 0x6f8   : > { %9827 = vmatmul.mubr.msk.f32.vlgmr.msra.gmra.mrb[34].mxu1 %vm387_vm7, %v12174_v60 }
 0x6f9   : > { %10553 = vmatpush3.bf16.msra.mxu1 %v11165_v36  ;;  %9848 = vmatprep.mubr.msk.f32.mxu1 %vm10957_vm8, %v12962_v62 }
 0x6fa   : > { %10554 = vmatprep.subr.bf16.mxu1 %v12961_v9 }
 0x6fd   : > { %10556 = vmatpush3.bf16.msra.mxu1 %v11176_v39 }
 0x6fe   : > { %10563 = vmatprep.subr.bf16.mxu1 %v12961_v9 }
 0x759   : > { %v3456_v32 = vpop.permute.xlu1 %3455 }
 0x75a   : > { %3464 = vst.msk [vmem:[%s11811_s21 + $0x5] sm:$0x1] %vm843_vm11, %v3456_v32 }
 0x75b   : > { %v3458_v38 = vpop.permute.xlu0 %3457 }
 0x75c   : > { %3465 = vst.msk [vmem:[%s11811_s21 + $0x15] sm:$0x1] %vm843_vm11, %v3458_v38 }
 0x75d   : > { %v3460_v63 = vpop.permute.xlu1 %3459 }
 0x75e   : > { %3466 = vst.msk [vmem:[%s11811_s21 + $0x25] sm:$0x1] %vm843_vm11, %v3460_v63 }
 0x7b9   : > { %v3758_v50 = vpop.f32.mrb[32].mxu0 }
 0x7ba   : > { %v9795_v22 = vpop.f32.mrb[33].mxu0 }
 0x7bb   : > { %v3686_v27 = vpop.f32.mrb[30].mxu1  ;;  %v10573_v22 = vpack.c.bf16 %v11882_v23, %v11609_v4 }
 0x7bc   : > { %v3759_v46 = vadd.f32 %v3758_v50, %v3686_v27  ;;  %v9784_v58 = vpop.f32.mrb[31].mxu1  ;;  %v10569_v50 = vpack.c.bf16 %v11787_v40, %v11340_v59 }
 0x7be   : > { %v3762_v34 = vadd.f32 %v3759_v46, %v11804_v12 }
 0x7c0   : > { %v3920_v29 = vrot.slane %v3762_v34, %v11806_v16  ;;  %v3991_v17 = vadd.f32 %v3762_v34, %v12204_v0  ;;  %v3993_v10 = vmul.f32 %v3762_v34, %v3762_v34 }
 0x7c1   : > { %v3908_v44 = vpop.f32.mrb[34].mxu0 }
 0x7c2   : > { %v3921_v21 = vcombine.high %v3920_v29, %v3920_v29  ;;  %v3928_v20 = vrot.slane %v3920_v29, %v11806_v16  ;;  %v3994_v35 = vadd.f32 %v3993_v10, %v12206_v61  ;;  %v9817_v26 = vpop.f32.mrb[35].mxu0 }
 0x7c3   : > { %v3833_v28 = vpop.f32.mrb[32].mxu1 }
 0x7c4   : > { %v3935_v7 = vrot.slane %v3921_v21, %v11806_v16  ;;  %v3936_v15 = vcombine.high %v3928_v20, %v3928_v20  ;;  %3940 = vst.msk [vmem:[%s11811_s21 + $0x6] sm:$0x1] %vm794_vm10, %v3928_v20  ;;  %v3909_v55 = vadd.f32 %v3908_v44, %v3833_v28  ;;  %v9806_v48 = vpop.f32.mrb[33].mxu1 }
 0x7c6   : > { %3941 = vst.msk [vmem:[%s11811_s21 + $0x16] sm:$0x1] %vm794_vm10, %v3935_v7  ;;  %3942 = vst.msk [vmem:[%s11811_s21 + $0x26] sm:$0x1] %vm794_vm10, %v3936_v15  ;;  %v3912_v0 = vadd.f32 %v3909_v55, %v11804_v12 }
 0x7c8   : > { %v3950_v11 = vrot.slane %v3912_v0, %v11806_v16  ;;  %v12273_v2 = vadd.f32 %v3991_v17, %v3912_v0  ;;  %v3995_v61 = vmul.f32 %v3912_v0, %v3912_v0 }
 0x7ca   : > { %v12275_v3 = vadd.f32 %v3995_v61, %v3994_v35  ;;  %v3958_v8 = vrot.slane %v3950_v11, %v11806_v16  ;;  %v3951_v13 = vcombine.high %v3950_v11, %v3950_v11 }
 0x7cb   : > { %v9828_v45 = vpop.f32.mrb[34].mxu1 }
 0x7cc   : > { %v4362_v30 = vrot.slane %v9828_v45, 6  ;;  %v4131_v33 = vpop.f32.mrb[35].mxu1  ;;  %v3970_v25 = vrot.slane %v3958_v8, %v11821_v43  ;;  %v3965_v53 = vrot.slane %v3951_v13, %v11806_v16  ;;  %v3966_v31 = vcombine.high %v3958_v8, %v3958_v8 }
 0x7cd   : > { %v4141_v56 = vrot.slane %v4131_v33, 3  ;;  %v4361_v51 = vrot.slane %v4131_v33, 6  ;;  %9849 = vmatmul.mubr.msk.f32.vlgmr.msra.gmra.mrb[36].mxu1 %vm387_vm7, %v4131_v33  ;;  %v4288_v59 = vrot.slane %v9828_v45, 1 }
 0x7ce   : > { %10565 = vmatpush3.bf16.msra.mxu1 %v11165_v36  ;;  %3979 = vrot.lane.b32.xlu0 %v3970_v25, %s10961_s20  ;;  %v3974_v32 = vrot.slane %v3965_v53, %v11821_v43  ;;  %v3978_v63 = vrot.slane %v3966_v31, %v11821_v43 }
 0x7cf   : > { %9838 = vmatmul.mubr.msk.f32.vlgmr.msra.gmra.mrb[36].mxu0 %vm387_vm7, %v4141_v56  ;;  %10566 = vmatprep.subr.bf16.mxu1 %v12961_v9  ;;  %v4363_v38 = vsel %vm690_vm9, %v4361_v51, %v4362_v30 }
 0x7d0   : > { %10559 = vmatpush3.bf16.msra.mxu0 %v11142_v24  ;;  %3981 = vrot.lane.b32.xlu1 %v3974_v32, %s10961_s20 }
 0x7d1   : > { %10560 = vmatprep.subr.bf16.mxu0 %v12961_v9  ;;  %9870 = vmatprep.mubr.msk.f32.mxu1 %vm10957_vm8, %v12962_v62 }
 0x7d2   : > { %10568 = vmatpush3.bf16.msra.mxu1 %v11176_v39  ;;  %3983 = vrot.lane.b32.xlu0 %v3978_v63, %s10961_s20 }
 0x7d3   : > { %9859 = vmatprep.mubr.msk.f32.mxu0 %vm10957_vm8, %v12962_v62  ;;  %10577 = vmatprep.subr.bf16.mxu1 %v12961_v9 }
 0x7d4   : > { %10562 = vmatpush3.bf16.msra.mxu0 %v11187_v42 }
 0x7d5   : > { %9871 = vmatmul.mubr.msk.f32.vlgmr.msra.gmra.mrb[38].mxu1 %vm387_vm7, %v4363_v38  ;;  %10570 = vmatprep.subr.bf16.mxu0 %v10569_v50 }
 0x7d6   : > { %10579 = vmatpush3.bf16.msra.mxu1 %v11142_v24  ;;  %9892 = vmatprep.mubr.msk.f32.mxu1 %vm10957_vm8, %v12962_v62 }
 0x7d7   : > { %9860 = vmatmul.mubr.msk.f32.vlgmr.msra.gmra.mrb[38].mxu0 %vm387_vm7, %v4288_v59  ;;  %10580 = vmatprep.subr.bf16.mxu1 %v12961_v9  ;;  %v10601_v59 = vpack.c.bf16 %v11789_v41, %v11359_v19 }
 0x7d8   : > { %10572 = vmatpush3.bf16.msra.mxu0 %v10569_v50  ;;  %9881 = vmatprep.mubr.msk.f32.mxu0 %vm387_vm7, %v12164_v37 }
 0x7d9   : > { %10574 = vmatprep.subr.bf16.mxu0 %v10573_v22 }
 0x7da   : > { %10582 = vmatpush3.bf16.msra.mxu1 %v11187_v42 }
 0x7db   : > { %10589 = vmatprep.subr.bf16.mxu1 %v12961_v9 }
 0x7dc   : > { %10576 = vmatpush3.bf16.msra.mxu0 %v10573_v22 }
 0x7dd   : > { %10583 = vmatprep.subr.bf16.mxu0 %v12961_v9 }
 0x7df   : > { %9882 = vmatmul.mubr.msk.f32.vlgmr.msra.gmra.mrb[40].mxu0 %vm387_vm7, %v12174_v60 }
 0x7e0   : > { %10585 = vmatpush3.bf16.msra.mxu0 %v11165_v36  ;;  %9903 = vmatprep.mubr.msk.f32.mxu0 %vm10957_vm8, %v12962_v62 }
 0x7e1   : > { %10586 = vmatprep.subr.bf16.mxu0 %v12961_v9 }
 0x7e4   : > { %10588 = vmatpush3.bf16.msra.mxu0 %v11176_v39 }
 0x7e5   : > { %10595 = vmatprep.subr.bf16.mxu0 %v12961_v9 }
 0x840   : > { %v3980_v4 = vpop.permute.xlu0 %3979 }
 0x841   : > { %3988 = vst.msk [vmem:[%s11811_s21 + $0x6] sm:$0x1] %vm843_vm11, %v3980_v4  ;;  %v10605_v4 = vpack.c.bf16 %v11884_v1, %v11628_v49 }
 0x842   : > { %v3982_v40 = vpop.permute.xlu1 %3981 }
 0x843   : > { %3989 = vst.msk [vmem:[%s11811_s21 + $0x16] sm:$0x1] %vm843_vm11, %v3982_v40 }
 0x844   : > { %v3984_v23 = vpop.permute.xlu0 %3983 }
 0x845   : > { %3990 = vst.msk [vmem:[%s11811_s21 + $0x26] sm:$0x1] %vm843_vm11, %v3984_v23 }
 0x8a0   : > { %v4282_v27 = vpop.f32.mrb[36].mxu1 }
 0x8a1   : > { %v9850_v46 = vpop.f32.mrb[37].mxu1 }
 0x8a2   : > { %v4210_v58 = vpop.f32.mrb[36].mxu0 }
 0x8a3   : > { %v4283_v34 = vadd.f32 %v4282_v27, %v4210_v58  ;;  %v9839_v29 = vpop.f32.mrb[37].mxu0 }
 0x8a5   : > { %v4286_v17 = vadd.f32 %v4283_v34, %v11804_v12 }
 0x8a7   : > { %v4444_v10 = vrot.slane %v4286_v17, %v11806_v16  ;;  %v4515_v44 = vadd.f32 %v4286_v17, %v12273_v2  ;;  %v4517_v21 = vmul.f32 %v4286_v17, %v4286_v17 }
 0x8a8   : > { %v4432_v20 = vpop.f32.mrb[38].mxu1 }
 0x8a9   : > { %v4445_v35 = vcombine.high %v4444_v10, %v4444_v10  ;;  %v4452_v26 = vrot.slane %v4444_v10, %v11806_v16  ;;  %v4518_v28 = vadd.f32 %v4517_v21, %v12275_v3  ;;  %v9872_v7 = vpop.f32.mrb[39].mxu1 }
 0x8aa   : > { %v4357_v15 = vpop.f32.mrb[38].mxu0 }
 0x8ab   : > { %v4459_v55 = vrot.slane %v4445_v35, %v11806_v16  ;;  %v4460_v48 = vcombine.high %v4452_v26, %v4452_v26  ;;  %4464 = vst.msk [vmem:[%s11811_s21 + $0x7] sm:$0x1] %vm794_vm10, %v4452_v26  ;;  %v4433_v0 = vadd.f32 %v4432_v20, %v4357_v15  ;;  %v9861_v11 = vpop.f32.mrb[39].mxu0 }
 0x8ad   : > { %4465 = vst.msk [vmem:[%s11811_s21 + $0x17] sm:$0x1] %vm794_vm10, %v4459_v55  ;;  %4466 = vst.msk [vmem:[%s11811_s21 + $0x27] sm:$0x1] %vm794_vm10, %v4460_v48  ;;  %v4436_v2 = vadd.f32 %v4433_v0, %v11804_v12 }
 0x8af   : > { %v4474_v61 = vrot.slane %v4436_v2, %v11806_v16  ;;  %v12342_v8 = vadd.f32 %v4515_v44, %v4436_v2  ;;  %v4519_v3 = vmul.f32 %v4436_v2, %v4436_v2 }
 0x8b1   : > { %v12344_v13 = vadd.f32 %v4519_v3, %v4518_v28  ;;  %v4482_v45 = vrot.slane %v4474_v61, %v11806_v16  ;;  %v4475_v30 = vcombine.high %v4474_v61, %v4474_v61 }
 0x8b2   : > { %v9883_v33 = vpop.f32.mrb[40].mxu0 }
 0x8b3   : > { %v4886_v25 = vrot.slane %v9883_v33, 6  ;;  %v4655_v53 = vpop.f32.mrb[41].mxu0  ;;  %v4494_v56 = vrot.slane %v4482_v45, %v11821_v43  ;;  %v4489_v51 = vrot.slane %v4475_v30, %v11806_v16  ;;  %v4490_v38 = vcombine.high %v4482_v45, %v4482_v45 }
 0x8b4   : > { %v4665_v31 = vrot.slane %v4655_v53, 3  ;;  %v4885_v32 = vrot.slane %v4655_v53, 6  ;;  %9904 = vmatmul.mubr.msk.f32.vlgmr.msra.gmra.mrb[42].mxu0 %vm387_vm7, %v4655_v53  ;;  %v4812_v19 = vrot.slane %v9883_v33, 1 }
 0x8b5   : > { %10597 = vmatpush3.bf16.msra.mxu0 %v11165_v36  ;;  %4503 = vrot.lane.b32.xlu1 %v4494_v56, %s10961_s20  ;;  %v4498_v63 = vrot.slane %v4489_v51, %v11821_v43  ;;  %v4502_v22 = vrot.slane %v4490_v38, %v11821_v43 }
 0x8b6   : > { %9893 = vmatmul.mubr.msk.f32.vlgmr.msra.gmra.mrb[40].mxu1 %vm387_vm7, %v4665_v31  ;;  %10598 = vmatprep.subr.bf16.mxu0 %v12961_v9  ;;  %v4887_v50 = vsel %vm690_vm9, %v4885_v32, %v4886_v25 }
 0x8b7   : > { %10591 = vmatpush3.bf16.msra.mxu1 %v11142_v24  ;;  %4505 = vrot.lane.b32.xlu0 %v4498_v63, %s10961_s20 }
 0x8b8   : > { %10592 = vmatprep.subr.bf16.mxu1 %v12961_v9  ;;  %9925 = vmatprep.mubr.msk.f32.mxu0 %vm10957_vm8, %v12962_v62 }
 0x8b9   : > { %10600 = vmatpush3.bf16.msra.mxu0 %v11176_v39  ;;  %4507 = vrot.lane.b32.xlu1 %v4502_v22, %s10961_s20  ;;  %v10637_v22 = vpack.c.bf16 %v11886_v5, %v11641_v6 }
 0x8ba   : > { %9914 = vmatprep.mubr.msk.f32.mxu1 %vm10957_vm8, %v12962_v62  ;;  %10609 = vmatprep.subr.bf16.mxu0 %v12961_v9 }
 0x8bb   : > { %10594 = vmatpush3.bf16.msra.mxu1 %v11187_v42 }
 0x8bc   : > { %9926 = vmatmul.mubr.msk.f32.vlgmr.msra.gmra.mrb[44].mxu0 %vm387_vm7, %v4887_v50  ;;  %10602 = vmatprep.subr.bf16.mxu1 %v10601_v59  ;;  %v10633_v50 = vpack.c.bf16 %v11791_v47, %v11378_v52 }
 0x8bd   : > { %10611 = vmatpush3.bf16.msra.mxu0 %v11142_v24  ;;  %9947 = vmatprep.mubr.msk.f32.mxu0 %vm10957_vm8, %v12962_v62 }
 0x8be   : > { %9915 = vmatmul.mubr.msk.f32.vlgmr.msra.gmra.mrb[42].mxu1 %vm387_vm7, %v4812_v19  ;;  %10612 = vmatprep.subr.bf16.mxu0 %v12961_v9 }
 0x8bf   : > { %10604 = vmatpush3.bf16.msra.mxu1 %v10601_v59  ;;  %9936 = vmatprep.mubr.msk.f32.mxu1 %vm387_vm7, %v12164_v37 }
 0x8c0   : > { %10606 = vmatprep.subr.bf16.mxu1 %v10605_v4 }
 0x8c1   : > { %10614 = vmatpush3.bf16.msra.mxu0 %v11187_v42 }
 0x8c2   : > { %10621 = vmatprep.subr.bf16.mxu0 %v12961_v9 }
 0x8c3   : > { %10608 = vmatpush3.bf16.msra.mxu1 %v10605_v4 }
 0x8c4   : > { %10615 = vmatprep.subr.bf16.mxu1 %v12961_v9 }
 0x8c6   : > { %9937 = vmatmul.mubr.msk.f32.vlgmr.msra.gmra.mrb[44].mxu1 %vm387_vm7, %v12174_v60 }
 0x8c7   : > { %10617 = vmatpush3.bf16.msra.mxu1 %v11165_v36  ;;  %9958 = vmatprep.mubr.msk.f32.mxu1 %vm10957_vm8, %v12962_v62 }
 0x8c8   : > { %10618 = vmatprep.subr.bf16.mxu1 %v12961_v9 }
 0x8cb   : > { %10620 = vmatpush3.bf16.msra.mxu1 %v11176_v39 }
 0x8cc   : > { %10627 = vmatprep.subr.bf16.mxu1 %v12961_v9 }
 0x927   : > { %v4504_v49 = vpop.permute.xlu1 %4503 }
 0x928   : > { %4512 = vst.msk [vmem:[%s11811_s21 + $0x7] sm:$0x1] %vm843_vm11, %v4504_v49 }
 0x929   : > { %v4506_v41 = vpop.permute.xlu0 %4505 }
 0x92a   : > { %4513 = vst.msk [vmem:[%s11811_s21 + $0x17] sm:$0x1] %vm843_vm11, %v4506_v41 }
 0x92b   : > { %v4508_v1 = vpop.permute.xlu1 %4507 }
 0x92c   : > { %4514 = vst.msk [vmem:[%s11811_s21 + $0x27] sm:$0x1] %vm843_vm11, %v4508_v1 }
 0x987   : > { %v4806_v40 = vpop.f32.mrb[42].mxu0 }
 0x988   : > { %v9905_v23 = vpop.f32.mrb[43].mxu0 }
 0x989   : > { %v4734_v27 = vpop.f32.mrb[40].mxu1 }
 0x98a   : > { %v4807_v46 = vadd.f32 %v4806_v40, %v4734_v27  ;;  %v9894_v58 = vpop.f32.mrb[41].mxu1 }
 0x98c   : > { %v4810_v34 = vadd.f32 %v4807_v46, %v11804_v12 }
 0x98e   : > { %v4968_v29 = vrot.slane %v4810_v34, %v11806_v16  ;;  %v5039_v17 = vadd.f32 %v4810_v34, %v12342_v8  ;;  %v5041_v10 = vmul.f32 %v4810_v34, %v4810_v34 }
 0x98f   : > { %v4956_v44 = vpop.f32.mrb[44].mxu0 }
 0x990   : > { %v4969_v21 = vcombine.high %v4968_v29, %v4968_v29  ;;  %v4976_v20 = vrot.slane %v4968_v29, %v11806_v16  ;;  %v5042_v35 = vadd.f32 %v5041_v10, %v12344_v13  ;;  %v9927_v26 = vpop.f32.mrb[45].mxu0 }
 0x991   : > { %v4881_v28 = vpop.f32.mrb[42].mxu1 }
 0x992   : > { %v4983_v7 = vrot.slane %v4969_v21, %v11806_v16  ;;  %v4984_v15 = vcombine.high %v4976_v20, %v4976_v20  ;;  %4988 = vst.msk [vmem:[%s11811_s21 + $0x8] sm:$0x1] %vm794_vm10, %v4976_v20  ;;  %v4957_v55 = vadd.f32 %v4956_v44, %v4881_v28  ;;  %v9916_v48 = vpop.f32.mrb[43].mxu1 }
 0x994   : > { %4989 = vst.msk [vmem:[%s11811_s21 + $0x18] sm:$0x1] %vm794_vm10, %v4983_v7  ;;  %4990 = vst.msk [vmem:[%s11811_s21 + $0x28] sm:$0x1] %vm794_vm10, %v4984_v15  ;;  %v4960_v0 = vadd.f32 %v4957_v55, %v11804_v12 }
 0x996   : > { %v4998_v11 = vrot.slane %v4960_v0, %v11806_v16  ;;  %v12411_v2 = vadd.f32 %v5039_v17, %v4960_v0  ;;  %v5043_v61 = vmul.f32 %v4960_v0, %v4960_v0 }
 0x998   : > { %v12413_v8 = vadd.f32 %v5043_v61, %v5042_v35  ;;  %v5006_v3 = vrot.slane %v4998_v11, %v11806_v16  ;;  %v4999_v13 = vcombine.high %v4998_v11, %v4998_v11 }
 0x999   : > { %v9938_v45 = vpop.f32.mrb[44].mxu1 }
 0x99a   : > { %v5410_v30 = vrot.slane %v9938_v45, 6  ;;  %v5179_v33 = vpop.f32.mrb[45].mxu1  ;;  %v5018_v25 = vrot.slane %v5006_v3, %v11821_v43  ;;  %v5013_v53 = vrot.slane %v4999_v13, %v11806_v16  ;;  %v5014_v31 = vcombine.high %v5006_v3, %v5006_v3 }
 0x99b   : > { %v5189_v56 = vrot.slane %v5179_v33, 3  ;;  %v5409_v51 = vrot.slane %v5179_v33, 6  ;;  %9959 = vmatmul.mubr.msk.f32.vlgmr.msra.gmra.mrb[46].mxu1 %vm387_vm7, %v5179_v33  ;;  %v5336_v52 = vrot.slane %v9938_v45, 1 }
 0x99c   : > { %10629 = vmatpush3.bf16.msra.mxu1 %v11165_v36  ;;  %5027 = vrot.lane.b32.xlu0 %v5018_v25, %s10961_s20  ;;  %v5022_v32 = vrot.slane %v5013_v53, %v11821_v43  ;;  %v5026_v63 = vrot.slane %v5014_v31, %v11821_v43 }
 0x99d   : > { %9948 = vmatmul.mubr.msk.f32.vlgmr.msra.gmra.mrb[46].mxu0 %vm387_vm7, %v5189_v56  ;;  %10630 = vmatprep.subr.bf16.mxu1 %v12961_v9  ;;  %v5411_v38 = vsel %vm690_vm9, %v5409_v51, %v5410_v30  ;;  %v10665_v56 = vpack.c.bf16 %v11793_v54, %v11397_v14  ;;  %v10669_v51 = vpack.c.bf16 %v11888_v57, %v11650_v18 }
 0x99e   : > { %10623 = vmatpush3.bf16.msra.mxu0 %v11142_v24  ;;  %5029 = vrot.lane.b32.xlu1 %v5022_v32, %s10961_s20 }
 0x99f   : > { %10624 = vmatprep.subr.bf16.mxu0 %v12961_v9  ;;  %9980 = vmatprep.mubr.msk.f32.mxu1 %vm10957_vm8, %v12962_v62 }
 0x9a0   : > { %10632 = vmatpush3.bf16.msra.mxu1 %v11176_v39  ;;  %5031 = vrot.lane.b32.xlu0 %v5026_v63, %s10961_s20 }
 0x9a1   : > { %9969 = vmatprep.mubr.msk.f32.mxu0 %vm10957_vm8, %v12962_v62  ;;  %10641 = vmatprep.subr.bf16.mxu1 %v12961_v9 }
 0x9a2   : > { %10626 = vmatpush3.bf16.msra.mxu0 %v11187_v42 }
 0x9a3   : > { %9981 = vmatmul.mubr.msk.f32.vlgmr.msra.gmra.mrb[48].mxu1 %vm387_vm7, %v5411_v38  ;;  %10634 = vmatprep.subr.bf16.mxu0 %v10633_v50 }
 0x9a4   : > { %10643 = vmatpush3.bf16.msra.mxu1 %v11142_v24  ;;  %10002 = vmatprep.mubr.msk.f32.mxu1 %vm10957_vm8, %v12962_v62 }
 0x9a5   : > { %9970 = vmatmul.mubr.msk.f32.vlgmr.msra.gmra.mrb[48].mxu0 %vm387_vm7, %v5336_v52  ;;  %10644 = vmatprep.subr.bf16.mxu1 %v12961_v9 }
 0x9a6   : > { %10636 = vmatpush3.bf16.msra.mxu0 %v10633_v50  ;;  %9991 = vmatprep.mubr.msk.f32.mxu0 %vm387_vm7, %v12164_v37 }
 0x9a7   : > { %10638 = vmatprep.subr.bf16.mxu0 %v10637_v22 }
 0x9a8   : > { %10646 = vmatpush3.bf16.msra.mxu1 %v11187_v42 }
 0x9a9   : > { %10653 = vmatprep.subr.bf16.mxu1 %v12961_v9 }
 0x9aa   : > { %10640 = vmatpush3.bf16.msra.mxu0 %v10637_v22 }
 0x9ab   : > { %10647 = vmatprep.subr.bf16.mxu0 %v12961_v9 }
 0x9ad   : > { %9992 = vmatmul.mubr.msk.f32.vlgmr.msra.gmra.mrb[50].mxu0 %vm387_vm7, %v12174_v60 }
 0x9ae   : > { %10649 = vmatpush3.bf16.msra.mxu0 %v11165_v36  ;;  %10013 = vmatprep.mubr.msk.f32.mxu0 %vm10957_vm8, %v12962_v62 }
 0x9af   : > { %10650 = vmatprep.subr.bf16.mxu0 %v12961_v9 }
 0x9b2   : > { %10652 = vmatpush3.bf16.msra.mxu0 %v11176_v39 }
 0x9b3   : > { %10659 = vmatprep.subr.bf16.mxu0 %v12961_v9 }
 0xa0e   : > { %v5028_v6 = vpop.permute.xlu0 %5027 }
 0xa0f   : > { %5036 = vst.msk [vmem:[%s11811_s21 + $0x8] sm:$0x1] %vm843_vm11, %v5028_v6 }
 0xa10   : > { %v5030_v47 = vpop.permute.xlu1 %5029 }
 0xa11   : > { %5037 = vst.msk [vmem:[%s11811_s21 + $0x18] sm:$0x1] %vm843_vm11, %v5030_v47 }
 0xa12   : > { %v5032_v5 = vpop.permute.xlu0 %5031 }
 0xa13   : > { %5038 = vst.msk [vmem:[%s11811_s21 + $0x28] sm:$0x1] %vm843_vm11, %v5032_v5 }
 0xa6e   : > { %v5330_v59 = vpop.f32.mrb[46].mxu1 }
 0xa6f   : > { %v9960_v4 = vpop.f32.mrb[47].mxu1 }
 0xa70   : > { %v5258_v19 = vpop.f32.mrb[46].mxu0 }
 0xa71   : > { %v5331_v49 = vadd.f32 %v5330_v59, %v5258_v19  ;;  %v9949_v41 = vpop.f32.mrb[47].mxu0 }
 0xa73   : > { %v5334_v1 = vadd.f32 %v5331_v49, %v11804_v12 }
 0xa75   : > { %v5492_v40 = vrot.slane %v5334_v1, %v11806_v16  ;;  %v5563_v23 = vadd.f32 %v5334_v1, %v12411_v2  ;;  %v5565_v27 = vmul.f32 %v5334_v1, %v5334_v1 }
 0xa76   : > { %v5480_v46 = vpop.f32.mrb[48].mxu1 }
 0xa77   : > { %v5493_v58 = vcombine.high %v5492_v40, %v5492_v40  ;;  %v5500_v34 = vrot.slane %v5492_v40, %v11806_v16  ;;  %v5566_v29 = vadd.f32 %v5565_v27, %v12413_v8  ;;  %v9982_v17 = vpop.f32.mrb[49].mxu1 }
 0xa78   : > { %v5405_v10 = vpop.f32.mrb[48].mxu0 }
 0xa79   : > { %v5507_v44 = vrot.slane %v5493_v58, %v11806_v16  ;;  %v5508_v21 = vcombine.high %v5500_v34, %v5500_v34  ;;  %5512 = vst.msk [vmem:[%s11811_s21 + $0x9] sm:$0x1] %vm794_vm10, %v5500_v34  ;;  %v5481_v20 = vadd.f32 %v5480_v46, %v5405_v10  ;;  %v9971_v35 = vpop.f32.mrb[49].mxu0 }
 0xa7b   : > { %5513 = vst.msk [vmem:[%s11811_s21 + $0x19] sm:$0x1] %vm794_vm10, %v5507_v44  ;;  %5514 = vst.msk [vmem:[%s11811_s21 + $0x29] sm:$0x1] %vm794_vm10, %v5508_v21  ;;  %v5484_v26 = vadd.f32 %v5481_v20, %v11804_v12 }
 0xa7d   : > { %v5522_v28 = vrot.slane %v5484_v26, %v11806_v16  ;;  %v12480_v7 = vadd.f32 %v5563_v23, %v5484_v26  ;;  %v5567_v15 = vmul.f32 %v5484_v26, %v5484_v26 }
 0xa7f   : > { %v12482_v55 = vadd.f32 %v5567_v15, %v5566_v29  ;;  %v5530_v48 = vrot.slane %v5522_v28, %v11806_v16  ;;  %v5523_v0 = vcombine.high %v5522_v28, %v5522_v28 }
 0xa80   : > { %v9993_v11 = vpop.f32.mrb[50].mxu0 }
 0xa81   : > { %v5934_v2 = vrot.slane %v9993_v11, 6  ;;  %v5703_v61 = vpop.f32.mrb[51].mxu0  ;;  %v5542_v8 = vrot.slane %v5530_v48, %v11821_v43  ;;  %v5537_v3 = vrot.slane %v5523_v0, %v11806_v16  ;;  %v5538_v30 = vcombine.high %v5530_v48, %v5530_v48 }
 0xa82   : > { %v5713_v13 = vrot.slane %v5703_v61, 3  ;;  %v5933_v45 = vrot.slane %v5703_v61, 6  ;;  %10014 = vmatmul.mubr.msk.f32.vlgmr.msra.gmra.mrb[52].mxu0 %vm387_vm7, %v5703_v61  ;;  %v5860_v14 = vrot.slane %v9993_v11, 1  ;;  %v12968_v61 = vld [vmem:[#allocation11_spill] sm:$0xff] }
 0xa83   : > { %10661 = vmatpush3.bf16.msra.mxu0 %v11165_v36  ;;  %5551 = vrot.lane.b32.xlu1 %v5542_v8, %s10961_s20  ;;  %v5546_v33 = vrot.slane %v5537_v3, %v11821_v43  ;;  %v5550_v53 = vrot.slane %v5538_v30, %v11821_v43  ;;  %v12969_v3 = vld [vmem:[#allocation7_spill] sm:$0xff] }
 0xa84   : > { %10003 = vmatmul.mubr.msk.f32.vlgmr.msra.gmra.mrb[50].mxu1 %vm387_vm7, %v5713_v13  ;;  %10662 = vmatprep.subr.bf16.mxu0 %v12961_v9  ;;  %v5935_v25 = vsel %vm690_vm9, %v5933_v45, %v5934_v2  ;;  %v12967_v2 = vld [vmem:[#allocation3_spill] sm:$0xff] }
 0xa85   : > { %10655 = vmatpush3.bf16.msra.mxu1 %v11142_v24  ;;  %5553 = vrot.lane.b32.xlu0 %v5546_v33, %s10961_s20  ;;  %v10697_v8 = vpack.c.bf16 %v12968_v61, %v12967_v2  ;;  %v12970_v13 = vld [vmem:[#allocation15_spill] sm:$0xff]  ;;  %v12667_v2 = vld [vmem:[%s12930_s1 + $0x8] sm:$0xf] }
 0xa86   : > { %10656 = vmatprep.subr.bf16.mxu1 %v12961_v9  ;;  %10035 = vmatprep.mubr.msk.f32.mxu0 %vm10957_vm8, %v12962_v62  ;;  %v10701_v45 = vpack.c.bf16 %v12970_v13, %v12969_v3 }
 0xa87   : > { %10664 = vmatpush3.bf16.msra.mxu0 %v11176_v39  ;;  %5555 = vrot.lane.b32.xlu1 %v5550_v53, %s10961_s20 }
 0xa88   : > { %10024 = vmatprep.mubr.msk.f32.mxu1 %vm10957_vm8, %v12962_v62  ;;  %10673 = vmatprep.subr.bf16.mxu0 %v12961_v9 }
 0xa89   : > { %10658 = vmatpush3.bf16.msra.mxu1 %v11187_v42 }
 0xa8a   : > { %10036 = vmatmul.mubr.msk.f32.vlgmr.msra.gmra.mrb[54].mxu0 %vm387_vm7, %v5935_v25  ;;  %10666 = vmatprep.subr.bf16.mxu1 %v10665_v56 }
 0xa8b   : > { %10675 = vmatpush3.bf16.msra.mxu0 %v11142_v24  ;;  %10057 = vmatprep.mubr.msk.f32.mxu0 %vm10957_vm8, %v12962_v62 }
 0xa8c   : > { %10025 = vmatmul.mubr.msk.f32.vlgmr.msra.gmra.mrb[52].mxu1 %vm387_vm7, %v5860_v14  ;;  %10676 = vmatprep.subr.bf16.mxu0 %v12961_v9 }
 0xa8d   : > { %10668 = vmatpush3.bf16.msra.mxu1 %v10665_v56  ;;  %10046 = vmatprep.mubr.msk.f32.mxu1 %vm387_vm7, %v12164_v37 }
 0xa8e   : > { %10670 = vmatprep.subr.bf16.mxu1 %v10669_v51 }
 0xa8f   : > { %10678 = vmatpush3.bf16.msra.mxu0 %v11187_v42 }
 0xa90   : > { %10685 = vmatprep.subr.bf16.mxu0 %v12961_v9 }
 0xa91   : > { %10672 = vmatpush3.bf16.msra.mxu1 %v10669_v51 }
 0xa92   : > { %10679 = vmatprep.subr.bf16.mxu1 %v12961_v9 }
 0xa94   : > { %10047 = vmatmul.mubr.msk.f32.vlgmr.msra.gmra.mrb[54].mxu1 %vm387_vm7, %v12174_v60 }
 0xa95   : > { %10681 = vmatpush3.bf16.msra.mxu1 %v11165_v36  ;;  %10068 = vmatprep.mubr.msk.f32.mxu1 %vm10957_vm8, %v12962_v62 }
 0xa96   : > { %10682 = vmatprep.subr.bf16.mxu1 %v12961_v9 }
 0xa99   : > { %10684 = vmatpush3.bf16.msra.mxu1 %v11176_v39 }
 0xa9a   : > { %10691 = vmatprep.subr.bf16.mxu1 %v12961_v9 }
 0xaf5   : > { %v5552_v18 = vpop.permute.xlu1 %5551 }
 0xaf6   : > { %5560 = vst.msk [vmem:[%s11811_s21 + $0x9] sm:$0x1] %vm843_vm11, %v5552_v18 }
 0xaf7   : > { %v5554_v54 = vpop.permute.xlu0 %5553 }
 0xaf8   : > { %5561 = vst.msk [vmem:[%s11811_s21 + $0x19] sm:$0x1] %vm843_vm11, %v5554_v54 }
 0xaf9   : > { %v5556_v57 = vpop.permute.xlu1 %5555 }
 0xafa   : > { %5562 = vst.msk [vmem:[%s11811_s21 + $0x29] sm:$0x1] %vm843_vm11, %v5556_v57 }
 0xb55   : > { %v5854_v31 = vpop.f32.mrb[52].mxu0 }
 0xb56   : > { %v10015_v32 = vpop.f32.mrb[53].mxu0 }
 0xb57   : > { %v5782_v38 = vpop.f32.mrb[50].mxu1 }
 0xb58   : > { %v5855_v63 = vadd.f32 %v5854_v31, %v5782_v38  ;;  %v10004_v50 = vpop.f32.mrb[51].mxu1 }
 0xb5a   : > { %v5858_v22 = vadd.f32 %v5855_v63, %v11804_v12 }
 0xb5c   : > { %v6016_v52 = vrot.slane %v5858_v22, %v11806_v16  ;;  %v6087_v6 = vadd.f32 %v5858_v22, %v12480_v7  ;;  %v6089_v47 = vmul.f32 %v5858_v22, %v5858_v22 }
 0xb5d   : > { %v6004_v5 = vpop.f32.mrb[54].mxu0 }
 0xb5e   : > { %v6017_v59 = vcombine.high %v6016_v52, %v6016_v52  ;;  %v6024_v4 = vrot.slane %v6016_v52, %v11806_v16  ;;  %v6090_v19 = vadd.f32 %v6089_v47, %v12482_v55  ;;  %v10037_v49 = vpop.f32.mrb[55].mxu0 }
 0xb5f   : > { %v5929_v41 = vpop.f32.mrb[52].mxu1 }
 0xb60   : > { %v6031_v1 = vrot.slane %v6017_v59, %v11806_v16  ;;  %v6032_v40 = vcombine.high %v6024_v4, %v6024_v4  ;;  %6036 = vst.msk [vmem:[%s11811_s21 + $0xa] sm:$0x1] %vm794_vm10, %v6024_v4  ;;  %v6005_v23 = vadd.f32 %v6004_v5, %v5929_v41  ;;  %v10026_v27 = vpop.f32.mrb[53].mxu1 }
 0xb62   : > { %6037 = vst.msk [vmem:[%s11811_s21 + $0x1a] sm:$0x1] %vm794_vm10, %v6031_v1  ;;  %6038 = vst.msk [vmem:[%s11811_s21 + $0x2a] sm:$0x1] %vm794_vm10, %v6032_v40  ;;  %v6008_v46 = vadd.f32 %v6005_v23, %v11804_v12 }
 0xb64   : > { %v6046_v58 = vrot.slane %v6008_v46, %v11806_v16  ;;  %v12549_v34 = vadd.f32 %v6087_v6, %v6008_v46  ;;  %v6091_v29 = vmul.f32 %v6008_v46, %v6008_v46 }
 0xb66   : > { %v12551_v17 = vadd.f32 %v6091_v29, %v6090_v19  ;;  %v6054_v10 = vrot.slane %v6046_v58, %v11806_v16  ;;  %v6047_v44 = vcombine.high %v6046_v58, %v6046_v58 }
 0xb67   : > { %v10048_v21 = vpop.f32.mrb[54].mxu1 }
 0xb68   : > { %v6458_v20 = vrot.slane %v10048_v21, 6  ;;  %v6227_v35 = vpop.f32.mrb[55].mxu1  ;;  %v6066_v26 = vrot.slane %v6054_v10, %v11821_v43  ;;  %v6061_v28 = vrot.slane %v6047_v44, %v11806_v16  ;;  %v6062_v55 = vcombine.high %v6054_v10, %v6054_v10 }
 0xb69   : > { %v6237_v7 = vrot.slane %v6227_v35, 3  ;;  %v6457_v15 = vrot.slane %v6227_v35, 6  ;;  %10069 = vmatmul.mubr.msk.f32.vlgmr.msra.gmra.mrb[56].mxu1 %vm387_vm7, %v6227_v35  ;;  %v6384_v30 = vrot.slane %v10048_v21, 1 }
 0xb6a   : > { %10693 = vmatpush3.bf16.msra.mxu1 %v11165_v36  ;;  %6075 = vrot.lane.b32.xlu0 %v6066_v26, %s10961_s20  ;;  %v6070_v48 = vrot.slane %v6061_v28, %v11821_v43  ;;  %v6074_v11 = vrot.slane %v6062_v55, %v11821_v43  ;;  %v12971_v26 = vld [vmem:[#allocation4_spill] sm:$0xff] }
 0xb6b   : > { %10058 = vmatmul.mubr.msk.f32.vlgmr.msra.gmra.mrb[56].mxu0 %vm387_vm7, %v6237_v7  ;;  %10694 = vmatprep.subr.bf16.mxu1 %v12961_v9  ;;  %v6459_v0 = vsel %vm690_vm9, %v6457_v15, %v6458_v20  ;;  %v12972_v28 = vld [vmem:[#allocation12_spill] sm:$0xff] }
 0xb6c   : > { %10687 = vmatpush3.bf16.msra.mxu0 %v11142_v24  ;;  %6077 = vrot.lane.b32.xlu1 %v6070_v48, %s10961_s20  ;;  %v10729_v7 = vpack.c.bf16 %v12972_v28, %v12971_v26  ;;  %v12973_v15 = vld [vmem:[#allocation8_spill] sm:$0xff] }
 0xb6d   : > { %10688 = vmatprep.subr.bf16.mxu0 %v12961_v9  ;;  %10090 = vmatprep.mubr.msk.f32.mxu1 %vm10957_vm8, %v12962_v62  ;;  %v12974_v55 = vld [vmem:[#allocation16_spill] sm:$0xff] }
 0xb6e   : > { %10696 = vmatpush3.bf16.msra.mxu1 %v11176_v39  ;;  %6079 = vrot.lane.b32.xlu0 %v6074_v11, %s10961_s20  ;;  %v10733_v48 = vpack.c.bf16 %v12974_v55, %v12973_v15  ;;  %v12657_v11 = vld [vmem:[%s12930_s1] sm:$0xff] }
 0xb6f   : > { %10079 = vmatprep.mubr.msk.f32.mxu0 %vm10957_vm8, %v12962_v62  ;;  %10705 = vmatprep.subr.bf16.mxu1 %v12961_v9 }
 0xb70   : > { %10690 = vmatpush3.bf16.msra.mxu0 %v11187_v42 }
 0xb71   : > { %10091 = vmatmul.mubr.msk.f32.vlgmr.msra.gmra.mrb[58].mxu1 %vm387_vm7, %v6459_v0  ;;  %10698 = vmatprep.subr.bf16.mxu0 %v10697_v8 }
 0xb72   : > { %10707 = vmatpush3.bf16.msra.mxu1 %v11142_v24  ;;  %10112 = vmatprep.mubr.msk.f32.mxu1 %vm10957_vm8, %v12962_v62 }
 0xb73   : > { %10080 = vmatmul.mubr.msk.f32.vlgmr.msra.gmra.mrb[58].mxu0 %vm387_vm7, %v6384_v30  ;;  %10708 = vmatprep.subr.bf16.mxu1 %v12961_v9 }
 0xb74   : > { %10700 = vmatpush3.bf16.msra.mxu0 %v10697_v8  ;;  %10101 = vmatprep.mubr.msk.f32.mxu0 %vm387_vm7, %v12164_v37 }
 0xb75   : > { %10702 = vmatprep.subr.bf16.mxu0 %v10701_v45 }
 0xb76   : > { %10710 = vmatpush3.bf16.msra.mxu1 %v11187_v42 }
 0xb77   : > { %10717 = vmatprep.subr.bf16.mxu1 %v12961_v9 }
 0xb78   : > { %10704 = vmatpush3.bf16.msra.mxu0 %v10701_v45 }
 0xb79   : > { %10711 = vmatprep.subr.bf16.mxu0 %v12961_v9 }
 0xb7b   : > { %10102 = vmatmul.mubr.msk.f32.vlgmr.msra.gmra.mrb[60].mxu0 %vm387_vm7, %v12174_v60 }
 0xb7c   : > { %10713 = vmatpush3.bf16.msra.mxu0 %v11165_v36  ;;  %10123 = vmatprep.mubr.msk.f32.mxu0 %vm10957_vm8, %v12962_v62 }
 0xb7d   : > { %10714 = vmatprep.subr.bf16.mxu0 %v12961_v9 }
 0xb80   : > { %10716 = vmatpush3.bf16.msra.mxu0 %v11176_v39 }
 0xb81   : > { %10723 = vmatprep.subr.bf16.mxu0 %v12961_v9 }
 0xbdc   : > { %v6076_v37 = vpop.permute.xlu0 %6075 }
 0xbdd   : > { %6084 = vst.msk [vmem:[%s11811_s21 + $0xa] sm:$0x1] %vm843_vm11, %v6076_v37 }
 0xbde   : > { %v6078_v33 = vpop.permute.xlu1 %6077 }
 0xbdf   : > { %6085 = vst.msk [vmem:[%s11811_s21 + $0x1a] sm:$0x1] %vm843_vm11, %v6078_v33 }
 0xbe0   : > { %v6080_v25 = vpop.permute.xlu0 %6079 }
 0xbe1   : > { %6086 = vst.msk [vmem:[%s11811_s21 + $0x2a] sm:$0x1] %vm843_vm11, %v6080_v25 }
 0xc3c   : > { %v6378_v60 = vpop.f32.mrb[56].mxu1 }
 0xc3d   : > { %v10070_v53 = vpop.f32.mrb[57].mxu1 }
 0xc3e   : > { %v6306_v56 = vpop.f32.mrb[56].mxu0 }
 0xc3f   : > { %v6379_v51 = vadd.f32 %v6378_v60, %v6306_v56  ;;  %v10059_v14 = vpop.f32.mrb[57].mxu0 }
 0xc41   : > { %v6382_v18 = vadd.f32 %v6379_v51, %v11804_v12 }
 0xc43   : > { %v6540_v54 = vrot.slane %v6382_v18, %v11806_v16  ;;  %v6611_v57 = vadd.f32 %v6382_v18, %v12549_v34  ;;  %v6613_v31 = vmul.f32 %v6382_v18, %v6382_v18 }
 0xc44   : > { %v6528_v32 = vpop.f32.mrb[58].mxu1 }
 0xc45   : > { %v6541_v38 = vcombine.high %v6540_v54, %v6540_v54  ;;  %v6548_v63 = vrot.slane %v6540_v54, %v11806_v16  ;;  %v6614_v50 = vadd.f32 %v6613_v31, %v12551_v17  ;;  %v10092_v22 = vpop.f32.mrb[59].mxu1 }
 0xc46   : > { %v6453_v52 = vpop.f32.mrb[58].mxu0 }
 0xc47   : > { %v6555_v6 = vrot.slane %v6541_v38, %v11806_v16  ;;  %v6556_v47 = vcombine.high %v6548_v63, %v6548_v63  ;;  %6560 = vst.msk [vmem:[%s11811_s21 + $0xb] sm:$0x1] %vm794_vm10, %v6548_v63  ;;  %v6529_v5 = vadd.f32 %v6528_v32, %v6453_v52  ;;  %v10081_v59 = vpop.f32.mrb[59].mxu0 }
 0xc49   : > { %6561 = vst.msk [vmem:[%s11811_s21 + $0x1b] sm:$0x1] %vm794_vm10, %v6555_v6  ;;  %6562 = vst.msk [vmem:[%s11811_s21 + $0x2b] sm:$0x1] %vm794_vm10, %v6556_v47  ;;  %v6532_v4 = vadd.f32 %v6529_v5, %v11804_v12 }
 0xc4b   : > { %v6570_v19 = vrot.slane %v6532_v4, %v11806_v16  ;;  %v12618_v49 = vadd.f32 %v6611_v57, %v6532_v4  ;;  %v6615_v41 = vmul.f32 %v6532_v4, %v6532_v4 }
 0xc4d   : > { %v12620_v1 = vadd.f32 %v6615_v41, %v6614_v50  ;;  %v6578_v40 = vrot.slane %v6570_v19, %v11806_v16  ;;  %v6571_v23 = vcombine.high %v6570_v19, %v6570_v19 }
 0xc4e   : > { %v10103_v27 = vpop.f32.mrb[60].mxu0 }
 0xc4f   : > { %v6982_v46 = vrot.slane %v10103_v27, 6  ;;  %v6751_v58 = vpop.f32.mrb[61].mxu0  ;;  %v6590_v34 = vrot.slane %v6578_v40, %v11821_v43  ;;  %v6585_v29 = vrot.slane %v6571_v23, %v11806_v16  ;;  %v6586_v44 = vcombine.high %v6578_v40, %v6578_v40 }
 0xc50   : > { %v6761_v17 = vrot.slane %v6751_v58, 3  ;;  %v6981_v10 = vrot.slane %v6751_v58, 6  ;;  %10124 = vmatmul.mubr.msk.f32.vlgmr.msra.gmra.mrb[62].mxu0 %vm387_vm7, %v6751_v58  ;;  %v6908_v0 = vrot.slane %v10103_v27, 1 }
 0xc51   : > { %10725 = vmatpush3.bf16.msra.mxu0 %v11165_v36  ;;  %6599 = vrot.lane.b32.xlu1 %v6590_v34, %s10961_s20  ;;  %v6594_v21 = vrot.slane %v6585_v29, %v11821_v43  ;;  %v6598_v35 = vrot.slane %v6586_v44, %v11821_v43 }
 0xc52   : > { %10113 = vmatmul.mubr.msk.f32.vlgmr.msra.gmra.mrb[60].mxu1 %vm387_vm7, %v6761_v17  ;;  %10726 = vmatprep.subr.bf16.mxu0 %v12961_v9  ;;  %v6983_v20 = vsel %vm690_vm9, %v6981_v10, %v6982_v46  ;;  %v12975_v17 = vld [vmem:[#allocation5_spill] sm:$0xff] }
 0xc53   : > { %10719 = vmatpush3.bf16.msra.mxu1 %v11142_v24  ;;  %6601 = vrot.lane.b32.xlu0 %v6594_v21, %s10961_s20  ;;  %v12976_v10 = vld [vmem:[#allocation13_spill] sm:$0xff] }
 0xc54   : > { %10720 = vmatprep.subr.bf16.mxu1 %v12961_v9  ;;  %10145 = vmatprep.mubr.msk.f32.mxu0 %vm10957_vm8, %v12962_v62  ;;  %v10761_v44 = vpack.c.bf16 %v12976_v10, %v12975_v17  ;;  %v12977_v21 = vld [vmem:[#allocation9_spill] sm:$0xff] }
 0xc55   : > { %10728 = vmatpush3.bf16.msra.mxu0 %v11176_v39  ;;  %6603 = vrot.lane.b32.xlu1 %v6598_v35, %s10961_s20 }
 0xc56   : > { %10134 = vmatprep.mubr.msk.f32.mxu1 %vm10957_vm8, %v12962_v62  ;;  %10737 = vmatprep.subr.bf16.mxu0 %v12961_v9 }
 0xc57   : > { %10722 = vmatpush3.bf16.msra.mxu1 %v11187_v42 }
 0xc58   : > { %10146 = vmatmul.mubr.msk.f32.vlgmr.msra.gmra.mrb[64].mxu0 %vm387_vm7, %v6983_v20  ;;  %10730 = vmatprep.subr.bf16.mxu1 %v10729_v7  ;;  %v12978_v20 = vld [vmem:[#allocation17_spill] sm:$0xff] }
 0xc59   : > { %10739 = vmatpush3.bf16.msra.mxu0 %v11142_v24  ;;  %10167 = vmatprep.mubr.msk.f32.mxu0 %vm10957_vm8, %v12962_v62  ;;  %v10765_v35 = vpack.c.bf16 %v12978_v20, %v12977_v21 }
 0xc5a   : > { %10135 = vmatmul.mubr.msk.f32.vlgmr.msra.gmra.mrb[62].mxu1 %vm387_vm7, %v6908_v0  ;;  %10740 = vmatprep.subr.bf16.mxu0 %v12961_v9 }
 0xc5b   : > { %10732 = vmatpush3.bf16.msra.mxu1 %v10729_v7  ;;  %10156 = vmatprep.mubr.msk.f32.mxu1 %vm387_vm7, %v12657_v11 }
 0xc5c   : > { %10734 = vmatprep.subr.bf16.mxu1 %v10733_v48 }
 0xc5d   : > { %10742 = vmatpush3.bf16.msra.mxu0 %v11187_v42 }
 0xc5e   : > { %10749 = vmatprep.subr.bf16.mxu0 %v12961_v9 }
 0xc5f   : > { %10736 = vmatpush3.bf16.msra.mxu1 %v10733_v48 }
 0xc60   : > { %10743 = vmatprep.subr.bf16.mxu1 %v12961_v9 }
 0xc62   : > { %10157 = vmatmul.mubr.msk.f32.vlgmr.msra.gmra.mrb[64].mxu1 %vm387_vm7, %v12667_v2 }
 0xc63   : > { %10745 = vmatpush3.bf16.msra.mxu1 %v11165_v36  ;;  %10178 = vmatprep.mubr.msk.f32.mxu1 %vm10957_vm8, %v12962_v62 }
 0xc64   : > { %10746 = vmatprep.subr.bf16.mxu1 %v12961_v9 }
 0xc67   : > { %10748 = vmatpush3.bf16.msra.mxu1 %v11176_v39 }
 0xc68   : > { %10755 = vmatprep.subr.bf16.mxu1 %v12961_v9 }
 0xcc3   : > { %v6600_v61 = vpop.permute.xlu1 %6599 }
 0xcc4   : > { %6608 = vst.msk [vmem:[%s11811_s21 + $0xb] sm:$0x1] %vm843_vm11, %v6600_v61 }
 0xcc5   : > { %v6602_v8 = vpop.permute.xlu0 %6601 }
 0xcc6   : > { %6609 = vst.msk [vmem:[%s11811_s21 + $0x1b] sm:$0x1] %vm843_vm11, %v6602_v8 }
 0xcc7   : > { %v6604_v3 = vpop.permute.xlu1 %6603 }
 0xcc8   : > { %6610 = vst.msk [vmem:[%s11811_s21 + $0x2b] sm:$0x1] %vm843_vm11, %v6604_v3 }
 0xd23   : > { %v6902_v13 = vpop.f32.mrb[62].mxu0 }
 0xd24   : > { %v10125_v45 = vpop.f32.mrb[63].mxu0 }
 0xd25   : > { %v6830_v30 = vpop.f32.mrb[60].mxu1 }
 0xd26   : > { %v6903_v37 = vadd.f32 %v6902_v13, %v6830_v30  ;;  %v10114_v33 = vpop.f32.mrb[61].mxu1 }
 0xd28   : > { %v6906_v25 = vadd.f32 %v6903_v37, %v11804_v12 }
 0xd2a   : > { %v7064_v60 = vrot.slane %v6906_v25, %v11806_v16  ;;  %v7135_v53 = vadd.f32 %v6906_v25, %v12618_v49  ;;  %v7137_v56 = vmul.f32 %v6906_v25, %v6906_v25 }
 0xd2b   : > { %v7052_v51 = vpop.f32.mrb[64].mxu0 }
 0xd2c   : > { %v7065_v14 = vcombine.high %v7064_v60, %v7064_v60  ;;  %v7072_v18 = vrot.slane %v7064_v60, %v11806_v16  ;;  %v7138_v54 = vadd.f32 %v7137_v56, %v12620_v1  ;;  %v10147_v57 = vpop.f32.mrb[65].mxu0 }
 0xd2d   : > { %v6977_v31 = vpop.f32.mrb[62].mxu1 }
 0xd2e   : > { %v7079_v32 = vrot.slane %v7065_v14, %v11806_v16  ;;  %v7080_v38 = vcombine.high %v7072_v18, %v7072_v18  ;;  %7084 = vst.msk [vmem:[%s11811_s21 + $0xc] sm:$0x1] %vm794_vm10, %v7072_v18  ;;  %v7053_v63 = vadd.f32 %v7052_v51, %v6977_v31  ;;  %v10136_v50 = vpop.f32.mrb[63].mxu1 }
 0xd30   : > { %7085 = vst.msk [vmem:[%s11811_s21 + $0x1c] sm:$0x1] %vm794_vm10, %v7079_v32  ;;  %7086 = vst.msk [vmem:[%s11811_s21 + $0x2c] sm:$0x1] %vm794_vm10, %v7080_v38  ;;  %v7056_v22 = vadd.f32 %v7053_v63, %v11804_v12 }
 0xd32   : > { %v7094_v52 = vrot.slane %v7056_v22, %v11806_v16  ;;  %v12697_v6 = vadd.f32 %v7135_v53, %v7056_v22  ;;  %v7139_v47 = vmul.f32 %v7056_v22, %v7056_v22 }
 0xd34   : > { %v12699_v5 = vadd.f32 %v7139_v47, %v7138_v54  ;;  %v7102_v59 = vrot.slane %v7094_v52, %v11806_v16  ;;  %v7095_v4 = vcombine.high %v7094_v52, %v7094_v52 }
 0xd35   : > { %v10158_v19 = vpop.f32.mrb[64].mxu1 }
 0xd36   : > { %v7506_v49 = vrot.slane %v10158_v19, 6  ;;  %v7275_v41 = vpop.f32.mrb[65].mxu1  ;;  %v7114_v1 = vrot.slane %v7102_v59, %v11821_v43  ;;  %v7109_v40 = vrot.slane %v7095_v4, %v11806_v16  ;;  %v7110_v46 = vcombine.high %v7102_v59, %v7102_v59 }
 0xd37   : > { %v7285_v23 = vrot.slane %v7275_v41, 3  ;;  %v7505_v27 = vrot.slane %v7275_v41, 6  ;;  %10179 = vmatmul.mubr.msk.f32.vlgmr.msra.gmra.mrb[66].mxu1 %vm387_vm7, %v7275_v41  ;;  %v7432_v26 = vrot.slane %v10158_v19, 1 }
 0xd38   : > { %10757 = vmatpush3.bf16.msra.mxu1 %v11165_v36  ;;  %7123 = vrot.lane.b32.xlu0 %v7114_v1, %s10961_s20  ;;  %v7118_v58 = vrot.slane %v7109_v40, %v11821_v43  ;;  %v7122_v29 = vrot.slane %v7110_v46, %v11821_v43 }
 0xd39   : > { %10168 = vmatmul.mubr.msk.f32.vlgmr.msra.gmra.mrb[66].mxu0 %vm387_vm7, %v7285_v23  ;;  %10758 = vmatprep.subr.bf16.mxu1 %v12961_v9  ;;  %v7507_v34 = vsel %vm690_vm9, %v7505_v27, %v7506_v49  ;;  %v12979_v23 = vld [vmem:[#allocation6_spill] sm:$0xff] }
 0xd3a   : > { %10751 = vmatpush3.bf16.msra.mxu0 %v11142_v24  ;;  %7125 = vrot.lane.b32.xlu1 %v7118_v58, %s10961_s20  ;;  %v12980_v27 = vld [vmem:[#allocation14_spill] sm:$0xff] }
 0xd3b   : > { %10752 = vmatprep.subr.bf16.mxu0 %v12961_v9  ;;  %10200 = vmatprep.mubr.msk.f32.mxu1 %vm10957_vm8, %v12962_v62  ;;  %v10793_v46 = vpack.c.bf16 %v12980_v27, %v12979_v23  ;;  %v12981_v58 = vld [vmem:[#allocation10_spill] sm:$0xff] }
 0xd3c   : > { %10760 = vmatpush3.bf16.msra.mxu1 %v11176_v39  ;;  %7127 = vrot.lane.b32.xlu0 %v7122_v29, %s10961_s20 }
 0xd3d   : > { %10189 = vmatprep.mubr.msk.f32.mxu0 %vm10957_vm8, %v12962_v62  ;;  %10769 = vmatprep.subr.bf16.mxu1 %v12961_v9 }
 0xd3e   : > { %10754 = vmatpush3.bf16.msra.mxu0 %v11187_v42 }
 0xd3f   : > { %10201 = vmatmul.mubr.msk.f32.vlgmr.msra.gmra.mrb[68].mxu1 %vm387_vm7, %v7507_v34  ;;  %10762 = vmatprep.subr.bf16.mxu0 %v10761_v44  ;;  %v12982_v34 = vld [vmem:[#allocation18_spill] sm:$0xff] }
 0xd40   : > { %10771 = vmatpush3.bf16.msra.mxu1 %v11142_v24  ;;  %10222 = vmatprep.mubr.msk.f32.mxu1 %vm10957_vm8, %v12962_v62  ;;  %v10797_v29 = vpack.c.bf16 %v12982_v34, %v12981_v58 }
 0xd41   : > { %10190 = vmatmul.mubr.msk.f32.vlgmr.msra.gmra.mrb[68].mxu0 %vm387_vm7, %v7432_v26  ;;  %10772 = vmatprep.subr.bf16.mxu1 %v12961_v9 }
 0xd42   : > { %10764 = vmatpush3.bf16.msra.mxu0 %v10761_v44  ;;  %10211 = vmatprep.mubr.msk.f32.mxu0 %vm387_vm7, %v12657_v11 }
 0xd43   : > { %10766 = vmatprep.subr.bf16.mxu0 %v10765_v35 }
 0xd44   : > { %10774 = vmatpush3.bf16.msra.mxu1 %v11187_v42 }
 0xd45   : > { %10781 = vmatprep.subr.bf16.mxu1 %v12961_v9 }
 0xd46   : > { %10768 = vmatpush3.bf16.msra.mxu0 %v10765_v35 }
 0xd47   : > { %10775 = vmatprep.subr.bf16.mxu0 %v12961_v9 }
 0xd49   : > { %10212 = vmatmul.mubr.msk.f32.vlgmr.msra.gmra.mrb[70].mxu0 %vm387_vm7, %v12667_v2 }
 0xd4a   : > { %10777 = vmatpush3.bf16.msra.mxu0 %v11165_v36  ;;  %10233 = vmatprep.mubr.msk.f32.mxu0 %vm10957_vm8, %v12962_v62 }
 0xd4b   : > { %10778 = vmatprep.subr.bf16.mxu0 %v12961_v9 }
 0xd4e   : > { %10780 = vmatpush3.bf16.msra.mxu0 %v11176_v39 }
 0xd4f   : > { %10787 = vmatprep.subr.bf16.mxu0 %v12961_v9 }
 0xdaa   : > { %v7124_v28 = vpop.permute.xlu0 %7123 }
 0xdab   : > { %7132 = vst.msk [vmem:[%s11811_s21 + $0xc] sm:$0x1] %vm843_vm11, %v7124_v28 }
 0xdac   : > { %v7126_v7 = vpop.permute.xlu1 %7125 }
 0xdad   : > { %7133 = vst.msk [vmem:[%s11811_s21 + $0x1c] sm:$0x1] %vm843_vm11, %v7126_v7 }
 0xdae   : > { %v7128_v15 = vpop.permute.xlu0 %7127 }
 0xdaf   : > { %7134 = vst.msk [vmem:[%s11811_s21 + $0x2c] sm:$0x1] %vm843_vm11, %v7128_v15 }
 0xe0a   : > { %v7426_v55 = vpop.f32.mrb[66].mxu1 }
 0xe0b   : > { %v10180_v48 = vpop.f32.mrb[67].mxu1 }
 0xe0c   : > { %v7354_v0 = vpop.f32.mrb[66].mxu0 }
 0xe0d   : > { %v7427_v61 = vadd.f32 %v7426_v55, %v7354_v0  ;;  %v10169_v8 = vpop.f32.mrb[67].mxu0 }
 0xe0f   : > { %v7430_v3 = vadd.f32 %v7427_v61, %v11804_v12 }
 0xe11   : > { %v7588_v13 = vrot.slane %v7430_v3, %v11806_v16  ;;  %v7659_v45 = vadd.f32 %v7430_v3, %v12697_v6  ;;  %v7661_v30 = vmul.f32 %v7430_v3, %v7430_v3 }
 0xe12   : > { %v7576_v37 = vpop.f32.mrb[68].mxu1 }
 0xe13   : > { %v7589_v33 = vcombine.high %v7588_v13, %v7588_v13  ;;  %v7596_v25 = vrot.slane %v7588_v13, %v11806_v16  ;;  %v7662_v60 = vadd.f32 %v7661_v30, %v12699_v5  ;;  %v10202_v53 = vpop.f32.mrb[69].mxu1 }
 0xe14   : > { %v7501_v56 = vpop.f32.mrb[68].mxu0 }
 0xe15   : > { %v7603_v51 = vrot.slane %v7589_v33, %v11806_v16  ;;  %v7604_v14 = vcombine.high %v7596_v25, %v7596_v25  ;;  %7608 = vst.msk [vmem:[%s11811_s21 + $0xd] sm:$0x1] %vm794_vm10, %v7596_v25  ;;  %v7577_v18 = vadd.f32 %v7576_v37, %v7501_v56  ;;  %v10191_v54 = vpop.f32.mrb[69].mxu0 }
 0xe17   : > { %7609 = vst.msk [vmem:[%s11811_s21 + $0x1d] sm:$0x1] %vm794_vm10, %v7603_v51  ;;  %7610 = vst.msk [vmem:[%s11811_s21 + $0x2d] sm:$0x1] %vm794_vm10, %v7604_v14  ;;  %v7580_v57 = vadd.f32 %v7577_v18, %v11804_v12 }
 0xe19   : > { %v7618_v31 = vrot.slane %v7580_v57, %v11806_v16  ;;  %v12766_v32 = vadd.f32 %v7659_v45, %v7580_v57  ;;  %v7663_v38 = vmul.f32 %v7580_v57, %v7580_v57 }
 0xe1b   : > { %v12768_v63 = vadd.f32 %v7663_v38, %v7662_v60  ;;  %v7626_v50 = vrot.slane %v7618_v31, %v11806_v16  ;;  %v7619_v22 = vcombine.high %v7618_v31, %v7618_v31 }
 0xe1c   : > { %v10213_v52 = vpop.f32.mrb[70].mxu0 }
 0xe1d   : > { %v8030_v6 = vrot.slane %v10213_v52, 6  ;;  %v7799_v47 = vpop.f32.mrb[71].mxu0  ;;  %v7638_v5 = vrot.slane %v7626_v50, %v11821_v43  ;;  %v7633_v59 = vrot.slane %v7619_v22, %v11806_v16  ;;  %v7634_v49 = vcombine.high %v7626_v50, %v7626_v50 }
 0xe1e   : > { %v7809_v4 = vrot.slane %v7799_v47, 3  ;;  %v8029_v19 = vrot.slane %v7799_v47, 6  ;;  %10234 = vmatmul.mubr.msk.f32.vlgmr.msra.gmra.mrb[72].mxu0 %vm387_vm7, %v7799_v47  ;;  %v7956_v17 = vrot.slane %v10213_v52, 1 }
 0xe1f   : > { %10789 = vmatpush3.bf16.msra.mxu0 %v11165_v36  ;;  %7647 = vrot.lane.b32.xlu1 %v7638_v5, %s10961_s20  ;;  %v7642_v41 = vrot.slane %v7633_v59, %v11821_v43  ;;  %v7646_v40 = vrot.slane %v7634_v49, %v11821_v43 }
 0xe20   : > { %10223 = vmatmul.mubr.msk.f32.vlgmr.msra.gmra.mrb[70].mxu1 %vm387_vm7, %v7809_v4  ;;  %10790 = vmatprep.subr.bf16.mxu0 %v12961_v9  ;;  %v8031_v1 = vsel %vm690_vm9, %v8029_v19, %v8030_v6 }
 0xe21   : > { %10783 = vmatpush3.bf16.msra.mxu1 %v11142_v24  ;;  %7649 = vrot.lane.b32.xlu0 %v7642_v41, %s10961_s20 }
 0xe22   : > { %10784 = vmatprep.subr.bf16.mxu1 %v12961_v9  ;;  %10255 = vmatprep.mubr.msk.f32.mxu0 %vm10957_vm8, %v12962_v62 }
 0xe23   : > { %10792 = vmatpush3.bf16.msra.mxu0 %v11176_v39  ;;  %7651 = vrot.lane.b32.xlu1 %v7646_v40, %s10961_s20 }
 0xe24   : > { %10244 = vmatprep.mubr.msk.f32.mxu1 %vm10957_vm8, %v12962_v62  ;;  %10801 = vmatprep.subr.bf16.mxu0 %v12961_v9 }
 0xe25   : > { %10786 = vmatpush3.bf16.msra.mxu1 %v11187_v42 }
 0xe26   : > { %10256 = vmatmul.mubr.msk.f32.vlgmr.msra.gmra.mrb[74].mxu0 %vm387_vm7, %v8031_v1  ;;  %10794 = vmatprep.subr.bf16.mxu1 %v10793_v46 }
 0xe27   : > { %10803 = vmatpush3.bf16.msra.mxu0 %v11142_v24  ;;  %10277 = vmatprep.mubr.msk.f32.mxu0 %vm10957_vm8, %v12962_v62 }
 0xe28   : > { %10245 = vmatmul.mubr.msk.f32.vlgmr.msra.gmra.mrb[72].mxu1 %vm387_vm7, %v7956_v17  ;;  %10804 = vmatprep.subr.bf16.mxu0 %v12961_v9 }
 0xe29   : > { %10796 = vmatpush3.bf16.msra.mxu1 %v10793_v46  ;;  %10266 = vmatprep.mubr.msk.f32.mxu1 %vm387_vm7, %v12657_v11 }
 0xe2a   : > { %10798 = vmatprep.subr.bf16.mxu1 %v10797_v29 }
 0xe2b   : > { %10806 = vmatpush3.bf16.msra.mxu0 %v11187_v42 }
 0xe2c   : > { %10813 = vmatprep.subr.bf16.mxu0 %v12961_v9 }
 0xe2d   : > { %10800 = vmatpush3.bf16.msra.mxu1 %v10797_v29 }
 0xe2e   : > { %10807 = vmatprep.subr.bf16.mxu1 %v12961_v9 }
 0xe30   : > { %10267 = vmatmul.mubr.msk.f32.vlgmr.msra.gmra.mrb[74].mxu1 %vm387_vm7, %v12667_v2 }
 0xe31   : > { %10809 = vmatpush3.bf16.msra.mxu1 %v11165_v36  ;;  %10288 = vmatprep.mubr.msk.f32.mxu1 %vm10957_vm8, %v12962_v62 }
 0xe32   : > { %10810 = vmatprep.subr.bf16.mxu1 %v12961_v9 }
 0xe35   : > { %10812 = vmatpush3.bf16.msra.mxu1 %v11176_v39 }
 0xe36   : > { %10819 = vmatprep.subr.bf16.mxu1 %v12961_v9 }
 0xe91   : > { %v7648_v11 = vpop.permute.xlu1 %7647 }
 0xe92   : > { %7656 = vst.msk [vmem:[%s11811_s21 + $0xd] sm:$0x1] %vm843_vm11, %v7648_v11 }
 0xe93   : > { %v7650_v10 = vpop.permute.xlu0 %7649 }
 0xe94   : > { %7657 = vst.msk [vmem:[%s11811_s21 + $0x1d] sm:$0x1] %vm843_vm11, %v7650_v10 }
 0xe95   : > { %v7652_v44 = vpop.permute.xlu1 %7651 }
 0xe96   : > { %7658 = vst.msk [vmem:[%s11811_s21 + $0x2d] sm:$0x1] %vm843_vm11, %v7652_v44 }
 0xef1   : > { %v7950_v2 = vpop.f32.mrb[72].mxu0 }
 0xef2   : > { %v10235_v21 = vpop.f32.mrb[73].mxu0 }
 0xef3   : > { %v7878_v20 = vpop.f32.mrb[70].mxu1 }
 0xef4   : > { %v7951_v35 = vadd.f32 %v7950_v2, %v7878_v20  ;;  %v10224_v26 = vpop.f32.mrb[71].mxu1 }
 0xef6   : > { %v7954_v28 = vadd.f32 %v7951_v35, %v11804_v12 }
 0xef8   : > { %v8112_v7 = vrot.slane %v7954_v28, %v11806_v16  ;;  %v8183_v15 = vadd.f32 %v7954_v28, %v12766_v32  ;;  %v8185_v55 = vmul.f32 %v7954_v28, %v7954_v28 }
 0xef9   : > { %v8100_v48 = vpop.f32.mrb[74].mxu0 }
 0xefa   : > { %v8113_v0 = vcombine.high %v8112_v7, %v8112_v7  ;;  %v8120_v61 = vrot.slane %v8112_v7, %v11806_v16  ;;  %v10257_v8 = vpop.f32.mrb[75].mxu0  ;;  %v8186_v3 = vadd.f32 %v8185_v55, %v12768_v63 }
 0xefb   : > { %v8025_v13 = vpop.f32.mrb[72].mxu1 }
 0xefc   : > { %v8127_v45 = vrot.slane %v8113_v0, %v11806_v16  ;;  %v8128_v30 = vcombine.high %v8120_v61, %v8120_v61  ;;  %8132 = vst.msk [vmem:[%s11811_s21 + $0xe] sm:$0x1] %vm794_vm10, %v8120_v61  ;;  %v8101_v37 = vadd.f32 %v8100_v48, %v8025_v13  ;;  %v10246_v33 = vpop.f32.mrb[73].mxu1 }
 0xefd   : > { %v8785_v33 = vld [vmem:[%s11811_s21 + $0x10] sm:$0xff] (%p11043_p5) }
 0xefe   : > { %8133 = vst.msk [vmem:[%s11811_s21 + $0x1e] sm:$0x1] %vm794_vm10, %v8127_v45  ;;  %8134 = vst.msk [vmem:[%s11811_s21 + $0x2e] sm:$0x1] %vm794_vm10, %v8128_v30  ;;  %v8104_v25 = vadd.f32 %v8101_v37, %v11804_v12  ;;  %v8781_v30 = vld [vmem:[%s11811_s21] sm:$0xff] (%p11043_p5) }
 0xf00   : > { %v8142_v60 = vrot.slane %v8104_v25, %v11806_v16  ;;  %v8187_v53 = vmul.f32 %v8104_v25, %v8104_v25  ;;  %v8184_v56 = vadd.f32 %v8183_v15, %v8104_v25 }
 0xf02   : > { %v8150_v51 = vrot.slane %v8142_v60, %v11806_v16  ;;  %v8143_v14 = vcombine.high %v8142_v60, %v8142_v60  ;;  %v8188_v18 = vadd.f32 %v8187_v53, %v8186_v3  ;;  %v8789_v60 = vld [vmem:[%s11811_s21 + $0x20] sm:$0xff] (%p11043_p5) }
 0xf03   : > { %v10268_v54 = vpop.f32.mrb[74].mxu1 }
 0xf04   : > { %v8554_v57 = vrot.slane %v10268_v54, 6  ;;  %v8323_v31 = vpop.f32.mrb[75].mxu1  ;;  %v8162_v32 = vrot.slane %v8150_v51, %v11821_v43  ;;  %v8157_v38 = vrot.slane %v8143_v14, %v11806_v16  ;;  %v8158_v22 = vcombine.high %v8150_v51, %v8150_v51 }
 0xf05   : > { %v8333_v63 = vrot.slane %v8323_v31, 3  ;;  %v8553_v50 = vrot.slane %v8323_v31, 6  ;;  %10289 = vmatmul.mubr.msk.f32.vlgmr.msra.gmra.mrb[76].mxu1 %vm387_vm7, %v8323_v31 }
 0xf06   : > { %10821 = vmatpush3.bf16.msra.mxu1 %v11165_v36  ;;  %8171 = vrot.lane.b32.xlu0 %v8162_v32, %s10961_s20  ;;  %v8166_v52 = vrot.slane %v8157_v38, %v11821_v43  ;;  %v8170_v47 = vrot.slane %v8158_v22, %v11821_v43 }
 0xf07   : > { %10278 = vmatmul.mubr.msk.f32.vlgmr.msra.gmra.mrb[76].mxu0 %vm387_vm7, %v8333_v63  ;;  %10822 = vmatprep.subr.bf16.mxu1 %v12961_v9  ;;  %v8555_v6 = vsel %vm690_vm9, %v8553_v50, %v8554_v57 }
 0xf08   : > { %10815 = vmatpush3.bf16.msra.mxu0 %v11142_v24  ;;  %8173 = vrot.lane.b32.xlu1 %v8166_v52, %s10961_s20  ;;  %v8480_v24 = vrot.slane %v10268_v54, 1 }
 0xf09   : > { %10816 = vmatprep.subr.bf16.mxu0 %v12961_v9  ;;  %10310 = vmatprep.mubr.msk.f32.mxu1 %vm10957_vm8, %v12962_v62 }
 0xf0a   : > { %10824 = vmatpush3.bf16.msra.mxu1 %v11176_v39  ;;  %8175 = vrot.lane.b32.xlu0 %v8170_v47, %s10961_s20 }
 0xf0b   : > { %10299 = vmatprep.mubr.msk.f32.mxu0 %vm10957_vm8, %v12962_v62 }
 0xf0c   : > { %10818 = vmatpush3.bf16.msra.mxu0 %v11187_v42 }
 0xf0d   : > { %10311 = vmatmul.mubr.msk.f32.vlgmr.msra.gmra.mrb[78].mxu1 %vm387_vm7, %v8555_v6 }
 0xf0f   : > { %10300 = vmatmul.mubr.msk.f32.vlgmr.msra.gmra.mrb[78].mxu0 %vm387_vm7, %v8480_v24 }
 0xf78   : > { %v8172_v36 = vpop.permute.xlu0 %8171 }
 0xf79   : > { %8180 = vst.msk [vmem:[%s11811_s21 + $0xe] sm:$0x1] %vm843_vm11, %v8172_v36 }
 0xf7a   : > { %v8174_v9 = vpop.permute.xlu1 %8173 }
 0xf7b   : > { %8181 = vst.msk [vmem:[%s11811_s21 + $0x1e] sm:$0x1] %vm843_vm11, %v8174_v9 }
 0xf7c   : > { %v8176_v5 = vpop.permute.xlu0 %8175 }
 0xf7d   : > { %8182 = vst.msk [vmem:[%s11811_s21 + $0x2e] sm:$0x1] %vm843_vm11, %v8176_v5 }
 0xfd8   : > { %v8474_v39 = vpop.f32.mrb[76].mxu1 }
 0xfd9   : > { %v10290_v59 = vpop.f32.mrb[77].mxu1 }
 0xfda   : > { %v8402_v62 = vpop.f32.mrb[76].mxu0 }
 0xfdb   : > { %v8475_v4 = vadd.f32 %v8474_v39, %v8402_v62  ;;  %v10279_v42 = vpop.f32.mrb[77].mxu0 }
 0xfdd   : > { %v8478_v19 = vadd.f32 %v8475_v4, %v11804_v12 }
 0xfdf   : > { %v8636_v49 = vrot.slane %v8478_v19, %v11806_v16  ;;  %v8707_v41 = vadd.f32 %v8478_v19, %v8184_v56  ;;  %v8709_v1 = vmul.f32 %v8478_v19, %v8478_v19 }
 0xfe0   : > { %v8624_v40 = vpop.f32.mrb[78].mxu1 }
 0xfe1   : > { %v8637_v23 = vcombine.high %v8636_v49, %v8636_v49  ;;  %v8644_v27 = vrot.slane %v8636_v49, %v11806_v16  ;;  %v10312_v46 = vpop.f32.mrb[79].mxu1  ;;  %v8710_v58 = vadd.f32 %v8709_v1, %v8188_v18 }
 0xfe2   : > { %v8549_v34 = vpop.f32.mrb[78].mxu0 }
 0xfe3   : > { %v8651_v29 = vrot.slane %v8637_v23, %v11806_v16  ;;  %v8652_v17 = vcombine.high %v8644_v27, %v8644_v27  ;;  %8656 = vst.msk [vmem:[%s11811_s21 + $0xf] sm:$0x1] %vm794_vm10, %v8644_v27  ;;  %v8625_v11 = vadd.f32 %v8624_v40, %v8549_v34  ;;  %v10301_v10 = vpop.f32.mrb[79].mxu0 }
 0xfe5   : > { %8657 = vst.msk [vmem:[%s11811_s21 + $0x1f] sm:$0x1] %vm794_vm10, %v8651_v29  ;;  %8658 = vst.msk [vmem:[%s11811_s21 + $0x2f] sm:$0x1] %vm794_vm10, %v8652_v17  ;;  %v8628_v44 = vadd.f32 %v8625_v11, %v11804_v12 }
 0xfe7   : > { %v8708_v2 = vadd.f32 %v8707_v41, %v8628_v44  ;;  %v8711_v21 = vmul.f32 %v8628_v44, %v8628_v44  ;;  %v8666_v28 = vrot.slane %v8628_v44, %v11806_v16 }
 0xfe9   : > { %v8714_v20 = vsel %vm8713_vm12, %v8708_v2, 0.0  ;;  %v8712_v35 = vadd.f32 %v8711_v21, %v8710_v58  ;;  %v8667_v7 = vcombine.high %v8666_v28, %v8666_v28  ;;  %v8674_v15 = vrot.slane %v8666_v28, %v11806_v16 }
 0xfea   : > { %8715 = vadd.xlane.f32.xlu0 %v8714_v20 }
 0xfeb   : > { %v8717_v26 = vsel %vm8713_vm12, %v8712_v35, 0.0  ;;  %v8681_v55 = vrot.slane %v8667_v7, %v11806_v16  ;;  %v8686_v48 = vrot.slane %v8674_v15, %v11821_v43  ;;  %v8682_v12 = vcombine.high %v8674_v15, %v8674_v15 }
 0xfec   : > { %8718 = vadd.xlane.f32.xlu1 %v8717_v26 }
 0xfed   : > { %v8690_v0 = vrot.slane %v8681_v55, %v11821_v43  ;;  %v8694_v61 = vrot.slane %v8682_v12, %v11821_v43 }
 0xffd   : > { %8695 = vrot.lane.b32.xlu1 %v8686_v48, %s10961_s20 }
0x1000   : > { %8697 = vrot.lane.b32.xlu0 %v8690_v0, %s10961_s20 }
0x1001   : > { %8699 = vrot.lane.b32.xlu1 %v8694_v61, %s10961_s20  ;;  %s8741_s20 = sadd.s32 (%p11043_p5), %s10828_s14, %s9013_s13 }
0x1002   : > { %s9014_s16 = sshll.u32 (%p11043_p5), %s8741_s20, 3 }
0x1003   : > { %s8743_s18 = scalar_lea.vmem (%p11043_p5), %s12934_s5, %s9014_s16 }
0x1004   : > { %8782 = vst [vmem:[%s8743_s18] sm:$0xff] (%p11043_p5), %v8781_v30  ;;  %8786 = vst [vmem:[%s8743_s18 + $0x20] sm:$0xff] (%p11043_p5), %v8785_v33 }
0x1005   : > { %8790 = vst [vmem:[%s8743_s18 + $0x40] sm:$0xff] (%p11043_p5), %v8789_v60 }
0x1077   : > { %v8716_v16 = vpop.xlane.xlu0 %8715 }
0x1079   : > { %v8719_v8 = vpop.xlane.xlu1 %8718 }
0x107a   : > { %v8721_v3 = vsel %vm8720_vm13, %v8716_v16, %v8719_v8 }
0x107b   : > { %8723 = vst.msk [vmem:[%s295_s15] sm:$0x7] %vm8722_vm14, %v8721_v3  ;;  %v8698_v43 = vpop.permute.xlu0 %8697 }
0x107c   : > { %8705 = vst.msk [vmem:[%s11811_s21 + $0x1f] sm:$0x1] %vm843_vm11, %v8698_v43  ;;  %8738 = sbr.rel (!%p11043_p5) target bundleno = 4235 (0x108b), region = 44 }
0x107d   : > { %v8696_v13 = vpop.permute.xlu1 %8695 }
0x107e   : > { %8704 = vst.msk [vmem:[%s11811_s21 + $0xf] sm:$0x1] %vm843_vm11, %v8696_v13 }
0x1081   : > { %v8700_v45 = vpop.permute.xlu1 %8699 }
0x1082   : > { %8706 = vst.msk [vmem:[%s11811_s21 + $0x2f] sm:$0x1] %vm843_vm11, %v8700_v45 }
0x1083   : > { %v8787_v25 = vld [vmem:[%s11811_s21 + $0x18] sm:$0xff] }
0x1084   : > { %8788 = vst [vmem:[%s8743_s18 + $0x28] sm:$0xff] %v8787_v25 }
0x1085   : > { %v8783_v37 = vld [vmem:[%s11811_s21 + $0x8] sm:$0xff] }
0x1086   : > { %8784 = vst [vmem:[%s8743_s18 + $0x8] sm:$0xff] %v8783_v37 }
0x1089   : > { %v8791_v53 = vld [vmem:[%s11811_s21 + $0x28] sm:$0xff] }
0x108a   : > { %8792 = vst [vmem:[%s8743_s18 + $0x48] sm:$0xff] %v8791_v53 }
0x108b PF: > { %s17_s27 = sadd.s32 1, %s10953_s27   ;;  %s12983_s21 = smov %s10933_s22 }
0x108c   : > { %p14_p11 = scmp.ge.s32.totalorder %s17_s27, 6   ;;  %s12984_s22 = smov %s11054_s12 }
0x108d   : > { %s12985_s23 = smov %s10945_s25  ;;  %s12986_s24 = smov %s10949_s26 }
0x108e   : > { %s12987_s25 = smov %s12990_s28  ;;  %s12988_s26 = smov %s12994_s29 }
0x108f   :  { %16 = sbr.rel (!%p14_p11) target bundleno = 4 (0x4), region = 120 }

</bundles_post_ra>
